<compile_context>
chip_gen: v6e
topology: v6e:2x2x1
jax: 0.10.0
libtpu: 0.0.40
codegen_flags: <defaults>
</compile_context>

<pallas_src>
import functools
import jax
import jax.numpy as jnp
from jax import lax
from jax.experimental import pallas as pl
from jax.experimental.pallas import tpu as pltpu


# ----------------------------------------------------------------------------
# Fused self-attention kernel: `rows` batch elements (all heads) per grid step.
# ----------------------------------------------------------------------------
def _self_attention_kernel(x_ref, wqkv_ref, bqkv_ref, wproj_ref, bproj_ref,
                           out_ref, scores_ref, merged_ref,
                           *, num_heads, head_dim, rows, seq, scale):
    embed_dim = num_heads * head_dim

    # (R, S, E) -> (R*S, E): contiguous merge of leading dims (free layout-wise)
    # so the projections present M = R*S rows to the MXU.
    x = x_ref[...].reshape(rows * seq, embed_dim)             # bf16

    # Fused QKV projection: single bf16 MXU matmul, f32 accumulation.
    qkv = jnp.dot(x, wqkv_ref[...], preferred_element_type=jnp.float32)
    qkv = qkv + bqkv_ref[...]                                 # (R*S, 3E) f32

    # Fold the softmax scale into q; cast q/k/v to bf16 immediately so the
    # f32 (R*S, 3E) slab does not stay live across the head loop.
    q = (qkv[:, :embed_dim] * scale).astype(jnp.bfloat16)
    k = qkv[:, embed_dim:2 * embed_dim].astype(jnp.bfloat16)
    v = qkv[:, 2 * embed_dim:].astype(jnp.bfloat16)

    for r in range(rows):                                     # static unroll
        r0 = r * seq
        for h in range(num_heads):                            # static unroll
            lo = h * head_dim
            hi = lo + head_dim
            qh = q[r0:r0 + seq, lo:hi]                        # (S, dh) bf16
            kh = k[r0:r0 + seq, lo:hi]
            vh = v[r0:r0 + seq, lo:hi]

            # scaled scores = (q * scale) @ k^T; transpose folded into the
            # dot_general contraction (no explicit k.T).
            s = lax.dot_general(qh, kh, (((1,), (1,)), ((), ())),
                                preferred_element_type=jnp.float32)  # (S, S)
            scores_ref[r, h] = s.astype(scores_ref.dtype)     # module returns them

            # softmax in f32; reciprocal on the EUP slot.
            p = jnp.exp(s - jnp.max(s, axis=-1, keepdims=True))
            denom = jnp.sum(p, axis=-1, keepdims=True)
            p = p * pl.reciprocal(denom, approx=True)

            av = jnp.dot(p.astype(jnp.bfloat16), vh,
                         preferred_element_type=jnp.float32)  # (S, dh) f32
            # Lane-dense merged scratch; static offsets, no vreg concat.
            merged_ref[r0:r0 + seq, lo:hi] = av

    # One dense (R*S, E) @ (E, E) output projection, fused in the same kernel.
    out = jnp.dot(merged_ref[...].astype(jnp.bfloat16), wproj_ref[...],
                  preferred_element_type=jnp.float32) + bproj_ref[...]
    out_ref[...] = out.reshape(rows, seq, embed_dim).astype(out_ref.dtype)


def self_attention_forward(x, params, num_heads, *, rows_per_step=None,
                           scores_dtype=jnp.bfloat16):
    B, S, E = x.shape
    assert E % num_heads == 0, "embed_dim must divide num_heads"
    assert E % 128 == 0 and S % 8 == 0, \
        "kernel assumes lane/sublane-aligned (S, E); pad inputs otherwise"
    head_dim = E // num_heads
    scale = float(head_dim) ** -0.5

    if rows_per_step is None:
        rows_per_step = 2 if B % 2 == 0 else 1                # M=2S for v6e/v7x MXU
    R = rows_per_step
    assert B % R == 0

    # x cast to bf16 in the wrapper: the kernel feeds it to the MXU in bf16
    # anyway, so DMA'ing f32 would double the input bytes for nothing.
    x_bf16 = x.astype(jnp.bfloat16)
    wqkv = params["qkv_w"].astype(jnp.bfloat16)               # (E, 3E)
    bqkv = params["qkv_b"].reshape(1, 3 * E).astype(jnp.float32)
    wproj = params["proj_w"].astype(jnp.bfloat16)             # (E, E)
    bproj = params["proj_b"].reshape(1, E).astype(jnp.float32)

    kernel = functools.partial(_self_attention_kernel, num_heads=num_heads,
                               head_dim=head_dim, rows=R, seq=S, scale=scale)

    out, scores = pl.pallas_call(
        kernel,
        grid=(B // R,),
        out_shape=(
            jax.ShapeDtypeStruct((B, S, E), jnp.float32),
            jax.ShapeDtypeStruct((B, num_heads, S, S), scores_dtype),
        ),
        in_specs=[
            pl.BlockSpec((R, S, E), lambda b: (b, 0, 0)),
            pl.BlockSpec((E, 3 * E), lambda b: (0, 0)),       # resident weights
            pl.BlockSpec((1, 3 * E), lambda b: (0, 0)),
            pl.BlockSpec((E, E), lambda b: (0, 0)),
            pl.BlockSpec((1, E), lambda b: (0, 0)),
        ],
        out_specs=(
            pl.BlockSpec((R, S, E), lambda b: (b, 0, 0)),
            pl.BlockSpec((R, num_heads, S, S), lambda b: (b, 0, 0, 0)),
        ),
        scratch_shapes=[pltpu.VMEM((R * S, E), jnp.float32)],
        compiler_params=pltpu.CompilerParams(
            dimension_semantics=("parallel",)),
    )(x_bf16, wqkv, bqkv, wproj, bproj)
    return out, scores


# ----------------------------------------------------------------------------
# Pure-JAX reference (mirrors the PyTorch forward) for a sanity check.
# ----------------------------------------------------------------------------
def self_attention_reference(x, params, num_heads):
    B, S, E = x.shape
    D = E // num_heads
    qkv = x @ params["qkv_w"] + params["qkv_b"]
    q, k, v = jnp.split(qkv, 3, axis=-1)

    def split_heads(t):
        return t.reshape(B, S, num_heads, D).transpose(0, 2, 1, 3)

    q, k, v = map(split_heads, (q, k, v))
    scores = jnp.einsum("bhsd,bhtd->bhst", q, k) * (D ** -0.5)
    w = jax.nn.softmax(scores, axis=-1)
    out = jnp.einsum("bhst,bhtd->bhsd", w, v)
    out = out.transpose(0, 2, 1, 3).reshape(B, S, E)
    out = out @ params["proj_w"] + params["proj_b"]
    return out, scores


if __name__ == "__main__":
    key = jax.random.PRNGKey(0)
    kx, k1, k2, k3, k4 = jax.random.split(key, 5)

    # B=4 -> grid=(2,) with 2 rows/step: M=256 projections AND >= 2 parallel
    # grid iterations (keeps both v7x TensorCores busy).
    B, S, E, H = 4, 128, 128, 4                               # head_dim = 32
    x = jax.random.normal(kx, (B, S, E), dtype=jnp.float32)
    params = {
        "qkv_w": jax.random.normal(k1, (E, 3 * E), jnp.float32) * 0.02,
        "qkv_b": jax.random.normal(k2, (3 * E,), jnp.float32) * 0.02,
        "proj_w": jax.random.normal(k3, (E, E), jnp.float32) * 0.02,
        "proj_b": jax.random.normal(k4, (E,), jnp.float32) * 0.02,
    }

    fwd = jax.jit(functools.partial(self_attention_forward, num_heads=H))
    out, scores = fwd(x, params)
    out = jax.block_until_ready(out)
    scores = jax.block_until_ready(scores)

    assert out.shape == (B, S, E), out.shape
    assert scores.shape == (B, H, S, S), scores.shape
    assert bool(jnp.all(jnp.isfinite(out)))
    assert bool(jnp.all(jnp.isfinite(scores.astype(jnp.float32))))

    # Loose tolerance: bf16 MXU operands / bf16 scores + approx reciprocal vs
    # f32 reference.
    ref_out, ref_scores = self_attention_reference(x, params, H)
    assert bool(jnp.allclose(scores.astype(jnp.float32), ref_scores,
                             rtol=0.1, atol=2e-2))
    assert bool(jnp.allclose(out, ref_out, rtol=0.1, atol=2e-2))

    print("KERNEL_OK")
</pallas_src>

<mosaic_0001>
module attributes {stable_mosaic.version = 11 : i64} {
  func.func @_self_attention_kernel(%arg0: i32, %arg1: memref<2x128x128xbf16, #tpu.memory_space<vmem>>, %arg2: memref<128x384xbf16, #tpu.memory_space<vmem>>, %arg3: memref<1x384xf32, #tpu.memory_space<vmem>>, %arg4: memref<128x128xbf16, #tpu.memory_space<vmem>>, %arg5: memref<1x128xf32, #tpu.memory_space<vmem>>, %arg6: memref<2x128x128xf32, #tpu.memory_space<vmem>>, %arg7: memref<2x4x128x128xbf16, #tpu.memory_space<vmem>>, %arg8: memref<256x128xf32, #tpu.memory_space<vmem>>) attributes {dimension_semantics = [#tpu.dimension_semantics<parallel>], iteration_bounds = array<i64: 2>, scalar_prefetch = 0 : i64, scratch_operands = 1 : i64, tpu.core_type = #tpu.core_type<tc>, window_params = [{transform_indices = @transform_0, window_bounds = array<i64: 2, 128, 128>}, {pipeline_mode = #tpu.pipeline_mode<synchronous>, transform_indices = @transform_1, window_bounds = array<i64: 128, 384>}, {pipeline_mode = #tpu.pipeline_mode<synchronous>, transform_indices = @transform_2, window_bounds = array<i64: 1, 384>}, {pipeline_mode = #tpu.pipeline_mode<synchronous>, transform_indices = @transform_3, window_bounds = array<i64: 128, 128>}, {pipeline_mode = #tpu.pipeline_mode<synchronous>, transform_indices = @transform_4, window_bounds = array<i64: 1, 128>}, {transform_indices = @transform_5, window_bounds = array<i64: 2, 128, 128>}, {transform_indices = @transform_6, window_bounds = array<i64: 2, 4, 128, 128>}]} {
    %c0 = arith.constant 0 : index
    %c0_0 = arith.constant 0 : index
    %c0_1 = arith.constant 0 : index
    %0 = vector.load %arg1[%c0, %c0_0, %c0_1] : memref<2x128x128xbf16, #tpu.memory_space<vmem>>, vector<2x128x128xbf16>
    %1 = vector.shape_cast %0 : vector<2x128x128xbf16> to vector<256x128xbf16>
    %c0_2 = arith.constant 0 : index
    %c0_3 = arith.constant 0 : index
    %2 = vector.load %arg2[%c0_2, %c0_3] : memref<128x384xbf16, #tpu.memory_space<vmem>>, vector<128x384xbf16>
    %cst = arith.constant dense<0.000000e+00> : vector<256x384xf32>
    %3 = tpu.matmul %1, %2, %cst {dimension_numbers = #tpu.dot_dimension_numbers<[1], [0], [0], [1], [0, 0, 1, 1], [], []>} : vector<256x128xbf16>, vector<128x384xbf16>, vector<256x384xf32> -> vector<256x384xf32>
    %c0_4 = arith.constant 0 : index
    %c0_5 = arith.constant 0 : index
    %4 = vector.load %arg3[%c0_4, %c0_5] : memref<1x384xf32, #tpu.memory_space<vmem>>, vector<1x384xf32>
    %5 = vector.broadcast %4 : vector<1x384xf32> to vector<256x384xf32>
    %6 = arith.addf %3, %5 : vector<256x384xf32>
    %7 = vector.extract_strided_slice %6 {offsets = [0, 0], sizes = [256, 128], strides = [1, 1]} : vector<256x384xf32> to vector<256x128xf32>
    %cst_6 = arith.constant 0.176776692 : f32
    %8 = vector.broadcast %cst_6 : f32 to vector<256x128xf32>
    %9 = arith.mulf %7, %8 : vector<256x128xf32>
    %10 = arith.truncf %9 : vector<256x128xf32> to vector<256x128xbf16>
    %11 = vector.extract_strided_slice %6 {offsets = [0, 128], sizes = [256, 128], strides = [1, 1]} : vector<256x384xf32> to vector<256x128xf32>
    %12 = arith.truncf %11 : vector<256x128xf32> to vector<256x128xbf16>
    %13 = vector.extract_strided_slice %6 {offsets = [0, 256], sizes = [256, 128], strides = [1, 1]} : vector<256x384xf32> to vector<256x128xf32>
    %14 = arith.truncf %13 : vector<256x128xf32> to vector<256x128xbf16>
    %15 = vector.extract_strided_slice %10 {offsets = [0, 0], sizes = [128, 32], strides = [1, 1]} : vector<256x128xbf16> to vector<128x32xbf16>
    %16 = vector.extract_strided_slice %12 {offsets = [0, 0], sizes = [128, 32], strides = [1, 1]} : vector<256x128xbf16> to vector<128x32xbf16>
    %17 = vector.extract_strided_slice %14 {offsets = [0, 0], sizes = [128, 32], strides = [1, 1]} : vector<256x128xbf16> to vector<128x32xbf16>
    %cst_7 = arith.constant dense<0.000000e+00> : vector<128x128xf32>
    %18 = tpu.matmul %15, %16, %cst_7 {dimension_numbers = #tpu.dot_dimension_numbers<[1], [1], [0], [0], [0, 0, 1, 0], [], []>} : vector<128x32xbf16>, vector<128x32xbf16>, vector<128x128xf32> -> vector<128x128xf32>
    %19 = arith.truncf %18 : vector<128x128xf32> to vector<128x128xbf16>
    %c0_8 = arith.constant 0 : index
    %c0_9 = arith.constant 0 : index
    %c0_10 = arith.constant 0 : index
    %c0_11 = arith.constant 0 : index
    %20 = vector.load %arg7[%c0_8, %c0_9, %c0_10, %c0_11] : memref<2x4x128x128xbf16, #tpu.memory_space<vmem>>, vector<1x1x128x128xbf16>
    %21 = vector.shape_cast %20 : vector<1x1x128x128xbf16> to vector<128x128xbf16>
    %22 = vector.shape_cast %19 : vector<128x128xbf16> to vector<1x1x128x128xbf16>
    tpu.vector_store %arg7[%c0_8, %c0_9, %c0_10, %c0_11], %22 {strides = array<i32>} : memref<2x4x128x128xbf16, #tpu.memory_space<vmem>>, vector<1x1x128x128xbf16>,
    %cst_12 = arith.constant dense<0xFF800000> : vector<128xf32>
    %23 = vector.multi_reduction <maximumf>, %18, %cst_12 [1] : vector<128x128xf32> to vector<128xf32>
    %24 = vector.shape_cast %23 : vector<128xf32> to vector<128x1xf32>
    %25 = vector.broadcast %24 : vector<128x1xf32> to vector<128x128xf32>
    %26 = arith.subf %18, %25 : vector<128x128xf32>
    %27 = math.exp %26 : vector<128x128xf32>
    %cst_13 = arith.constant dense<0.000000e+00> : vector<128xf32>
    %28 = vector.multi_reduction <add>, %27, %cst_13 [1] : vector<128x128xf32> to vector<128xf32>
    %29 = vector.shape_cast %28 : vector<128xf32> to vector<128x1xf32>
    %30 = tpu.reciprocal %29 {approx = true} : vector<128x1xf32> -> vector<128x1xf32>
    %31 = vector.broadcast %30 : vector<128x1xf32> to vector<128x128xf32>
    %32 = arith.mulf %27, %31 : vector<128x128xf32>
    %33 = arith.truncf %32 : vector<128x128xf32> to vector<128x128xbf16>
    %cst_14 = arith.constant dense<0.000000e+00> : vector<128x32xf32>
    %34 = tpu.matmul %33, %17, %cst_14 {dimension_numbers = #tpu.dot_dimension_numbers<[1], [0], [0], [1], [0, 0, 1, 1], [], []>} : vector<128x128xbf16>, vector<128x32xbf16>, vector<128x32xf32> -> vector<128x32xf32>
    %c0_15 = arith.constant 0 : index
    %c0_16 = arith.constant 0 : index
    %35 = vector.load %arg8[%c0_15, %c0_16] : memref<256x128xf32, #tpu.memory_space<vmem>>, vector<128x32xf32>
    tpu.vector_store %arg8[%c0_15, %c0_16], %34 {strides = array<i32>} : memref<256x128xf32, #tpu.memory_space<vmem>>, vector<128x32xf32>,
    %36 = vector.extract_strided_slice %10 {offsets = [0, 32], sizes = [128, 32], strides = [1, 1]} : vector<256x128xbf16> to vector<128x32xbf16>
    %37 = vector.extract_strided_slice %12 {offsets = [0, 32], sizes = [128, 32], strides = [1, 1]} : vector<256x128xbf16> to vector<128x32xbf16>
    %38 = vector.extract_strided_slice %14 {offsets = [0, 32], sizes = [128, 32], strides = [1, 1]} : vector<256x128xbf16> to vector<128x32xbf16>
    %cst_17 = arith.constant dense<0.000000e+00> : vector<128x128xf32>
    %39 = tpu.matmul %36, %37, %cst_17 {dimension_numbers = #tpu.dot_dimension_numbers<[1], [1], [0], [0], [0, 0, 1, 0], [], []>} : vector<128x32xbf16>, vector<128x32xbf16>, vector<128x128xf32> -> vector<128x128xf32>
    %40 = arith.truncf %39 : vector<128x128xf32> to vector<128x128xbf16>
    %c0_18 = arith.constant 0 : index
    %c1 = arith.constant 1 : index
    %c0_19 = arith.constant 0 : index
    %c0_20 = arith.constant 0 : index
    %41 = vector.load %arg7[%c0_18, %c1, %c0_19, %c0_20] : memref<2x4x128x128xbf16, #tpu.memory_space<vmem>>, vector<1x1x128x128xbf16>
    %42 = vector.shape_cast %41 : vector<1x1x128x128xbf16> to vector<128x128xbf16>
    %43 = vector.shape_cast %40 : vector<128x128xbf16> to vector<1x1x128x128xbf16>
    tpu.vector_store %arg7[%c0_18, %c1, %c0_19, %c0_20], %43 {strides = array<i32>} : memref<2x4x128x128xbf16, #tpu.memory_space<vmem>>, vector<1x1x128x128xbf16>,
    %cst_21 = arith.constant dense<0xFF800000> : vector<128xf32>
    %44 = vector.multi_reduction <maximumf>, %39, %cst_21 [1] : vector<128x128xf32> to vector<128xf32>
    %45 = vector.shape_cast %44 : vector<128xf32> to vector<128x1xf32>
    %46 = vector.broadcast %45 : vector<128x1xf32> to vector<128x128xf32>
    %47 = arith.subf %39, %46 : vector<128x128xf32>
    %48 = math.exp %47 : vector<128x128xf32>
    %cst_22 = arith.constant dense<0.000000e+00> : vector<128xf32>
    %49 = vector.multi_reduction <add>, %48, %cst_22 [1] : vector<128x128xf32> to vector<128xf32>
    %50 = vector.shape_cast %49 : vector<128xf32> to vector<128x1xf32>
    %51 = tpu.reciprocal %50 {approx = true} : vector<128x1xf32> -> vector<128x1xf32>
    %52 = vector.broadcast %51 : vector<128x1xf32> to vector<128x128xf32>
    %53 = arith.mulf %48, %52 : vector<128x128xf32>
    %54 = arith.truncf %53 : vector<128x128xf32> to vector<128x128xbf16>
    %cst_23 = arith.constant dense<0.000000e+00> : vector<128x32xf32>
    %55 = tpu.matmul %54, %38, %cst_23 {dimension_numbers = #tpu.dot_dimension_numbers<[1], [0], [0], [1], [0, 0, 1, 1], [], []>} : vector<128x128xbf16>, vector<128x32xbf16>, vector<128x32xf32> -> vector<128x32xf32>
    %c0_24 = arith.constant 0 : index
    %c32 = arith.constant 32 : index
    %56 = vector.load %arg8[%c0_24, %c32] : memref<256x128xf32, #tpu.memory_space<vmem>>, vector<128x32xf32>
    tpu.vector_store %arg8[%c0_24, %c32], %55 {strides = array<i32>} : memref<256x128xf32, #tpu.memory_space<vmem>>, vector<128x32xf32>,
    %57 = vector.extract_strided_slice %10 {offsets = [0, 64], sizes = [128, 32], strides = [1, 1]} : vector<256x128xbf16> to vector<128x32xbf16>
    %58 = vector.extract_strided_slice %12 {offsets = [0, 64], sizes = [128, 32], strides = [1, 1]} : vector<256x128xbf16> to vector<128x32xbf16>
    %59 = vector.extract_strided_slice %14 {offsets = [0, 64], sizes = [128, 32], strides = [1, 1]} : vector<256x128xbf16> to vector<128x32xbf16>
    %cst_25 = arith.constant dense<0.000000e+00> : vector<128x128xf32>
    %60 = tpu.matmul %57, %58, %cst_25 {dimension_numbers = #tpu.dot_dimension_numbers<[1], [1], [0], [0], [0, 0, 1, 0], [], []>} : vector<128x32xbf16>, vector<128x32xbf16>, vector<128x128xf32> -> vector<128x128xf32>
    %61 = arith.truncf %60 : vector<128x128xf32> to vector<128x128xbf16>
    %c0_26 = arith.constant 0 : index
    %c2 = arith.constant 2 : index
    %c0_27 = arith.constant 0 : index
    %c0_28 = arith.constant 0 : index
    %62 = vector.load %arg7[%c0_26, %c2, %c0_27, %c0_28] : memref<2x4x128x128xbf16, #tpu.memory_space<vmem>>, vector<1x1x128x128xbf16>
    %63 = vector.shape_cast %62 : vector<1x1x128x128xbf16> to vector<128x128xbf16>
    %64 = vector.shape_cast %61 : vector<128x128xbf16> to vector<1x1x128x128xbf16>
    tpu.vector_store %arg7[%c0_26, %c2, %c0_27, %c0_28], %64 {strides = array<i32>} : memref<2x4x128x128xbf16, #tpu.memory_space<vmem>>, vector<1x1x128x128xbf16>,
    %cst_29 = arith.constant dense<0xFF800000> : vector<128xf32>
    %65 = vector.multi_reduction <maximumf>, %60, %cst_29 [1] : vector<128x128xf32> to vector<128xf32>
    %66 = vector.shape_cast %65 : vector<128xf32> to vector<128x1xf32>
    %67 = vector.broadcast %66 : vector<128x1xf32> to vector<128x128xf32>
    %68 = arith.subf %60, %67 : vector<128x128xf32>
    %69 = math.exp %68 : vector<128x128xf32>
    %cst_30 = arith.constant dense<0.000000e+00> : vector<128xf32>
    %70 = vector.multi_reduction <add>, %69, %cst_30 [1] : vector<128x128xf32> to vector<128xf32>
    %71 = vector.shape_cast %70 : vector<128xf32> to vector<128x1xf32>
    %72 = tpu.reciprocal %71 {approx = true} : vector<128x1xf32> -> vector<128x1xf32>
    %73 = vector.broadcast %72 : vector<128x1xf32> to vector<128x128xf32>
    %74 = arith.mulf %69, %73 : vector<128x128xf32>
    %75 = arith.truncf %74 : vector<128x128xf32> to vector<128x128xbf16>
    %cst_31 = arith.constant dense<0.000000e+00> : vector<128x32xf32>
    %76 = tpu.matmul %75, %59, %cst_31 {dimension_numbers = #tpu.dot_dimension_numbers<[1], [0], [0], [1], [0, 0, 1, 1], [], []>} : vector<128x128xbf16>, vector<128x32xbf16>, vector<128x32xf32> -> vector<128x32xf32>
    %c0_32 = arith.constant 0 : index
    %c64 = arith.constant 64 : index
    %77 = vector.load %arg8[%c0_32, %c64] : memref<256x128xf32, #tpu.memory_space<vmem>>, vector<128x32xf32>
    tpu.vector_store %arg8[%c0_32, %c64], %76 {strides = array<i32>} : memref<256x128xf32, #tpu.memory_space<vmem>>, vector<128x32xf32>,
    %78 = vector.extract_strided_slice %10 {offsets = [0, 96], sizes = [128, 32], strides = [1, 1]} : vector<256x128xbf16> to vector<128x32xbf16>
    %79 = vector.extract_strided_slice %12 {offsets = [0, 96], sizes = [128, 32], strides = [1, 1]} : vector<256x128xbf16> to vector<128x32xbf16>
    %80 = vector.extract_strided_slice %14 {offsets = [0, 96], sizes = [128, 32], strides = [1, 1]} : vector<256x128xbf16> to vector<128x32xbf16>
    %cst_33 = arith.constant dense<0.000000e+00> : vector<128x128xf32>
    %81 = tpu.matmul %78, %79, %cst_33 {dimension_numbers = #tpu.dot_dimension_numbers<[1], [1], [0], [0], [0, 0, 1, 0], [], []>} : vector<128x32xbf16>, vector<128x32xbf16>, vector<128x128xf32> -> vector<128x128xf32>
    %82 = arith.truncf %81 : vector<128x128xf32> to vector<128x128xbf16>
    %c0_34 = arith.constant 0 : index
    %c3 = arith.constant 3 : index
    %c0_35 = arith.constant 0 : index
    %c0_36 = arith.constant 0 : index
    %83 = vector.load %arg7[%c0_34, %c3, %c0_35, %c0_36] : memref<2x4x128x128xbf16, #tpu.memory_space<vmem>>, vector<1x1x128x128xbf16>
    %84 = vector.shape_cast %83 : vector<1x1x128x128xbf16> to vector<128x128xbf16>
    %85 = vector.shape_cast %82 : vector<128x128xbf16> to vector<1x1x128x128xbf16>
    tpu.vector_store %arg7[%c0_34, %c3, %c0_35, %c0_36], %85 {strides = array<i32>} : memref<2x4x128x128xbf16, #tpu.memory_space<vmem>>, vector<1x1x128x128xbf16>,
    %cst_37 = arith.constant dense<0xFF800000> : vector<128xf32>
    %86 = vector.multi_reduction <maximumf>, %81, %cst_37 [1] : vector<128x128xf32> to vector<128xf32>
    %87 = vector.shape_cast %86 : vector<128xf32> to vector<128x1xf32>
    %88 = vector.broadcast %87 : vector<128x1xf32> to vector<128x128xf32>
    %89 = arith.subf %81, %88 : vector<128x128xf32>
    %90 = math.exp %89 : vector<128x128xf32>
    %cst_38 = arith.constant dense<0.000000e+00> : vector<128xf32>
    %91 = vector.multi_reduction <add>, %90, %cst_38 [1] : vector<128x128xf32> to vector<128xf32>
    %92 = vector.shape_cast %91 : vector<128xf32> to vector<128x1xf32>
    %93 = tpu.reciprocal %92 {approx = true} : vector<128x1xf32> -> vector<128x1xf32>
    %94 = vector.broadcast %93 : vector<128x1xf32> to vector<128x128xf32>
    %95 = arith.mulf %90, %94 : vector<128x128xf32>
    %96 = arith.truncf %95 : vector<128x128xf32> to vector<128x128xbf16>
    %cst_39 = arith.constant dense<0.000000e+00> : vector<128x32xf32>
    %97 = tpu.matmul %96, %80, %cst_39 {dimension_numbers = #tpu.dot_dimension_numbers<[1], [0], [0], [1], [0, 0, 1, 1], [], []>} : vector<128x128xbf16>, vector<128x32xbf16>, vector<128x32xf32> -> vector<128x32xf32>
    %c0_40 = arith.constant 0 : index
    %c96 = arith.constant 96 : index
    %98 = vector.load %arg8[%c0_40, %c96] : memref<256x128xf32, #tpu.memory_space<vmem>>, vector<128x32xf32>
    tpu.vector_store %arg8[%c0_40, %c96], %97 {strides = array<i32>} : memref<256x128xf32, #tpu.memory_space<vmem>>, vector<128x32xf32>,
    %99 = vector.extract_strided_slice %10 {offsets = [128, 0], sizes = [128, 32], strides = [1, 1]} : vector<256x128xbf16> to vector<128x32xbf16>
    %100 = vector.extract_strided_slice %12 {offsets = [128, 0], sizes = [128, 32], strides = [1, 1]} : vector<256x128xbf16> to vector<128x32xbf16>
    %101 = vector.extract_strided_slice %14 {offsets = [128, 0], sizes = [128, 32], strides = [1, 1]} : vector<256x128xbf16> to vector<128x32xbf16>
    %cst_41 = arith.constant dense<0.000000e+00> : vector<128x128xf32>
    %102 = tpu.matmul %99, %100, %cst_41 {dimension_numbers = #tpu.dot_dimension_numbers<[1], [1], [0], [0], [0, 0, 1, 0], [], []>} : vector<128x32xbf16>, vector<128x32xbf16>, vector<128x128xf32> -> vector<128x128xf32>
    %103 = arith.truncf %102 : vector<128x128xf32> to vector<128x128xbf16>
    %c1_42 = arith.constant 1 : index
    %c0_43 = arith.constant 0 : index
    %c0_44 = arith.constant 0 : index
    %c0_45 = arith.constant 0 : index
    %104 = vector.load %arg7[%c1_42, %c0_43, %c0_44, %c0_45] : memref<2x4x128x128xbf16, #tpu.memory_space<vmem>>, vector<1x1x128x128xbf16>
    %105 = vector.shape_cast %104 : vector<1x1x128x128xbf16> to vector<128x128xbf16>
    %106 = vector.shape_cast %103 : vector<128x128xbf16> to vector<1x1x128x128xbf16>
    tpu.vector_store %arg7[%c1_42, %c0_43, %c0_44, %c0_45], %106 {strides = array<i32>} : memref<2x4x128x128xbf16, #tpu.memory_space<vmem>>, vector<1x1x128x128xbf16>,
    %cst_46 = arith.constant dense<0xFF800000> : vector<128xf32>
    %107 = vector.multi_reduction <maximumf>, %102, %cst_46 [1] : vector<128x128xf32> to vector<128xf32>
    %108 = vector.shape_cast %107 : vector<128xf32> to vector<128x1xf32>
    %109 = vector.broadcast %108 : vector<128x1xf32> to vector<128x128xf32>
    %110 = arith.subf %102, %109 : vector<128x128xf32>
    %111 = math.exp %110 : vector<128x128xf32>
    %cst_47 = arith.constant dense<0.000000e+00> : vector<128xf32>
    %112 = vector.multi_reduction <add>, %111, %cst_47 [1] : vector<128x128xf32> to vector<128xf32>
    %113 = vector.shape_cast %112 : vector<128xf32> to vector<128x1xf32>
    %114 = tpu.reciprocal %113 {approx = true} : vector<128x1xf32> -> vector<128x1xf32>
    %115 = vector.broadcast %114 : vector<128x1xf32> to vector<128x128xf32>
    %116 = arith.mulf %111, %115 : vector<128x128xf32>
    %117 = arith.truncf %116 : vector<128x128xf32> to vector<128x128xbf16>
    %cst_48 = arith.constant dense<0.000000e+00> : vector<128x32xf32>
    %118 = tpu.matmul %117, %101, %cst_48 {dimension_numbers = #tpu.dot_dimension_numbers<[1], [0], [0], [1], [0, 0, 1, 1], [], []>} : vector<128x128xbf16>, vector<128x32xbf16>, vector<128x32xf32> -> vector<128x32xf32>
    %c128 = arith.constant 128 : index
    %c0_49 = arith.constant 0 : index
    %119 = vector.load %arg8[%c128, %c0_49] : memref<256x128xf32, #tpu.memory_space<vmem>>, vector<128x32xf32>
    tpu.vector_store %arg8[%c128, %c0_49], %118 {strides = array<i32>} : memref<256x128xf32, #tpu.memory_space<vmem>>, vector<128x32xf32>,
    %120 = vector.extract_strided_slice %10 {offsets = [128, 32], sizes = [128, 32], strides = [1, 1]} : vector<256x128xbf16> to vector<128x32xbf16>
    %121 = vector.extract_strided_slice %12 {offsets = [128, 32], sizes = [128, 32], strides = [1, 1]} : vector<256x128xbf16> to vector<128x32xbf16>
    %122 = vector.extract_strided_slice %14 {offsets = [128, 32], sizes = [128, 32], strides = [1, 1]} : vector<256x128xbf16> to vector<128x32xbf16>
    %cst_50 = arith.constant dense<0.000000e+00> : vector<128x128xf32>
    %123 = tpu.matmul %120, %121, %cst_50 {dimension_numbers = #tpu.dot_dimension_numbers<[1], [1], [0], [0], [0, 0, 1, 0], [], []>} : vector<128x32xbf16>, vector<128x32xbf16>, vector<128x128xf32> -> vector<128x128xf32>
    %124 = arith.truncf %123 : vector<128x128xf32> to vector<128x128xbf16>
    %c1_51 = arith.constant 1 : index
    %c1_52 = arith.constant 1 : index
    %c0_53 = arith.constant 0 : index
    %c0_54 = arith.constant 0 : index
    %125 = vector.load %arg7[%c1_51, %c1_52, %c0_53, %c0_54] : memref<2x4x128x128xbf16, #tpu.memory_space<vmem>>, vector<1x1x128x128xbf16>
    %126 = vector.shape_cast %125 : vector<1x1x128x128xbf16> to vector<128x128xbf16>
    %127 = vector.shape_cast %124 : vector<128x128xbf16> to vector<1x1x128x128xbf16>
    tpu.vector_store %arg7[%c1_51, %c1_52, %c0_53, %c0_54], %127 {strides = array<i32>} : memref<2x4x128x128xbf16, #tpu.memory_space<vmem>>, vector<1x1x128x128xbf16>,
    %cst_55 = arith.constant dense<0xFF800000> : vector<128xf32>
    %128 = vector.multi_reduction <maximumf>, %123, %cst_55 [1] : vector<128x128xf32> to vector<128xf32>
    %129 = vector.shape_cast %128 : vector<128xf32> to vector<128x1xf32>
    %130 = vector.broadcast %129 : vector<128x1xf32> to vector<128x128xf32>
    %131 = arith.subf %123, %130 : vector<128x128xf32>
    %132 = math.exp %131 : vector<128x128xf32>
    %cst_56 = arith.constant dense<0.000000e+00> : vector<128xf32>
    %133 = vector.multi_reduction <add>, %132, %cst_56 [1] : vector<128x128xf32> to vector<128xf32>
    %134 = vector.shape_cast %133 : vector<128xf32> to vector<128x1xf32>
    %135 = tpu.reciprocal %134 {approx = true} : vector<128x1xf32> -> vector<128x1xf32>
    %136 = vector.broadcast %135 : vector<128x1xf32> to vector<128x128xf32>
    %137 = arith.mulf %132, %136 : vector<128x128xf32>
    %138 = arith.truncf %137 : vector<128x128xf32> to vector<128x128xbf16>
    %cst_57 = arith.constant dense<0.000000e+00> : vector<128x32xf32>
    %139 = tpu.matmul %138, %122, %cst_57 {dimension_numbers = #tpu.dot_dimension_numbers<[1], [0], [0], [1], [0, 0, 1, 1], [], []>} : vector<128x128xbf16>, vector<128x32xbf16>, vector<128x32xf32> -> vector<128x32xf32>
    %c128_58 = arith.constant 128 : index
    %c32_59 = arith.constant 32 : index
    %140 = vector.load %arg8[%c128_58, %c32_59] : memref<256x128xf32, #tpu.memory_space<vmem>>, vector<128x32xf32>
    tpu.vector_store %arg8[%c128_58, %c32_59], %139 {strides = array<i32>} : memref<256x128xf32, #tpu.memory_space<vmem>>, vector<128x32xf32>,
    %141 = vector.extract_strided_slice %10 {offsets = [128, 64], sizes = [128, 32], strides = [1, 1]} : vector<256x128xbf16> to vector<128x32xbf16>
    %142 = vector.extract_strided_slice %12 {offsets = [128, 64], sizes = [128, 32], strides = [1, 1]} : vector<256x128xbf16> to vector<128x32xbf16>
    %143 = vector.extract_strided_slice %14 {offsets = [128, 64], sizes = [128, 32], strides = [1, 1]} : vector<256x128xbf16> to vector<128x32xbf16>
    %cst_60 = arith.constant dense<0.000000e+00> : vector<128x128xf32>
    %144 = tpu.matmul %141, %142, %cst_60 {dimension_numbers = #tpu.dot_dimension_numbers<[1], [1], [0], [0], [0, 0, 1, 0], [], []>} : vector<128x32xbf16>, vector<128x32xbf16>, vector<128x128xf32> -> vector<128x128xf32>
    %145 = arith.truncf %144 : vector<128x128xf32> to vector<128x128xbf16>
    %c1_61 = arith.constant 1 : index
    %c2_62 = arith.constant 2 : index
    %c0_63 = arith.constant 0 : index
    %c0_64 = arith.constant 0 : index
    %146 = vector.load %arg7[%c1_61, %c2_62, %c0_63, %c0_64] : memref<2x4x128x128xbf16, #tpu.memory_space<vmem>>, vector<1x1x128x128xbf16>
    %147 = vector.shape_cast %146 : vector<1x1x128x128xbf16> to vector<128x128xbf16>
    %148 = vector.shape_cast %145 : vector<128x128xbf16> to vector<1x1x128x128xbf16>
    tpu.vector_store %arg7[%c1_61, %c2_62, %c0_63, %c0_64], %148 {strides = array<i32>} : memref<2x4x128x128xbf16, #tpu.memory_space<vmem>>, vector<1x1x128x128xbf16>,
    %cst_65 = arith.constant dense<0xFF800000> : vector<128xf32>
    %149 = vector.multi_reduction <maximumf>, %144, %cst_65 [1] : vector<128x128xf32> to vector<128xf32>
    %150 = vector.shape_cast %149 : vector<128xf32> to vector<128x1xf32>
    %151 = vector.broadcast %150 : vector<128x1xf32> to vector<128x128xf32>
    %152 = arith.subf %144, %151 : vector<128x128xf32>
    %153 = math.exp %152 : vector<128x128xf32>
    %cst_66 = arith.constant dense<0.000000e+00> : vector<128xf32>
    %154 = vector.multi_reduction <add>, %153, %cst_66 [1] : vector<128x128xf32> to vector<128xf32>
    %155 = vector.shape_cast %154 : vector<128xf32> to vector<128x1xf32>
    %156 = tpu.reciprocal %155 {approx = true} : vector<128x1xf32> -> vector<128x1xf32>
    %157 = vector.broadcast %156 : vector<128x1xf32> to vector<128x128xf32>
    %158 = arith.mulf %153, %157 : vector<128x128xf32>
    %159 = arith.truncf %158 : vector<128x128xf32> to vector<128x128xbf16>
    %cst_67 = arith.constant dense<0.000000e+00> : vector<128x32xf32>
    %160 = tpu.matmul %159, %143, %cst_67 {dimension_numbers = #tpu.dot_dimension_numbers<[1], [0], [0], [1], [0, 0, 1, 1], [], []>} : vector<128x128xbf16>, vector<128x32xbf16>, vector<128x32xf32> -> vector<128x32xf32>
    %c128_68 = arith.constant 128 : index
    %c64_69 = arith.constant 64 : index
    %161 = vector.load %arg8[%c128_68, %c64_69] : memref<256x128xf32, #tpu.memory_space<vmem>>, vector<128x32xf32>
    tpu.vector_store %arg8[%c128_68, %c64_69], %160 {strides = array<i32>} : memref<256x128xf32, #tpu.memory_space<vmem>>, vector<128x32xf32>,
    %162 = vector.extract_strided_slice %10 {offsets = [128, 96], sizes = [128, 32], strides = [1, 1]} : vector<256x128xbf16> to vector<128x32xbf16>
    %163 = vector.extract_strided_slice %12 {offsets = [128, 96], sizes = [128, 32], strides = [1, 1]} : vector<256x128xbf16> to vector<128x32xbf16>
    %164 = vector.extract_strided_slice %14 {offsets = [128, 96], sizes = [128, 32], strides = [1, 1]} : vector<256x128xbf16> to vector<128x32xbf16>
    %cst_70 = arith.constant dense<0.000000e+00> : vector<128x128xf32>
    %165 = tpu.matmul %162, %163, %cst_70 {dimension_numbers = #tpu.dot_dimension_numbers<[1], [1], [0], [0], [0, 0, 1, 0], [], []>} : vector<128x32xbf16>, vector<128x32xbf16>, vector<128x128xf32> -> vector<128x128xf32>
    %166 = arith.truncf %165 : vector<128x128xf32> to vector<128x128xbf16>
    %c1_71 = arith.constant 1 : index
    %c3_72 = arith.constant 3 : index
    %c0_73 = arith.constant 0 : index
    %c0_74 = arith.constant 0 : index
    %167 = vector.load %arg7[%c1_71, %c3_72, %c0_73, %c0_74] : memref<2x4x128x128xbf16, #tpu.memory_space<vmem>>, vector<1x1x128x128xbf16>
    %168 = vector.shape_cast %167 : vector<1x1x128x128xbf16> to vector<128x128xbf16>
    %169 = vector.shape_cast %166 : vector<128x128xbf16> to vector<1x1x128x128xbf16>
    tpu.vector_store %arg7[%c1_71, %c3_72, %c0_73, %c0_74], %169 {strides = array<i32>} : memref<2x4x128x128xbf16, #tpu.memory_space<vmem>>, vector<1x1x128x128xbf16>,
    %cst_75 = arith.constant dense<0xFF800000> : vector<128xf32>
    %170 = vector.multi_reduction <maximumf>, %165, %cst_75 [1] : vector<128x128xf32> to vector<128xf32>
    %171 = vector.shape_cast %170 : vector<128xf32> to vector<128x1xf32>
    %172 = vector.broadcast %171 : vector<128x1xf32> to vector<128x128xf32>
    %173 = arith.subf %165, %172 : vector<128x128xf32>
    %174 = math.exp %173 : vector<128x128xf32>
    %cst_76 = arith.constant dense<0.000000e+00> : vector<128xf32>
    %175 = vector.multi_reduction <add>, %174, %cst_76 [1] : vector<128x128xf32> to vector<128xf32>
    %176 = vector.shape_cast %175 : vector<128xf32> to vector<128x1xf32>
    %177 = tpu.reciprocal %176 {approx = true} : vector<128x1xf32> -> vector<128x1xf32>
    %178 = vector.broadcast %177 : vector<128x1xf32> to vector<128x128xf32>
    %179 = arith.mulf %174, %178 : vector<128x128xf32>
    %180 = arith.truncf %179 : vector<128x128xf32> to vector<128x128xbf16>
    %cst_77 = arith.constant dense<0.000000e+00> : vector<128x32xf32>
    %181 = tpu.matmul %180, %164, %cst_77 {dimension_numbers = #tpu.dot_dimension_numbers<[1], [0], [0], [1], [0, 0, 1, 1], [], []>} : vector<128x128xbf16>, vector<128x32xbf16>, vector<128x32xf32> -> vector<128x32xf32>
    %c128_78 = arith.constant 128 : index
    %c96_79 = arith.constant 96 : index
    %182 = vector.load %arg8[%c128_78, %c96_79] : memref<256x128xf32, #tpu.memory_space<vmem>>, vector<128x32xf32>
    tpu.vector_store %arg8[%c128_78, %c96_79], %181 {strides = array<i32>} : memref<256x128xf32, #tpu.memory_space<vmem>>, vector<128x32xf32>,
    %c0_80 = arith.constant 0 : index
    %c0_81 = arith.constant 0 : index
    %183 = vector.load %arg8[%c0_80, %c0_81] : memref<256x128xf32, #tpu.memory_space<vmem>>, vector<256x128xf32>
    %184 = arith.truncf %183 : vector<256x128xf32> to vector<256x128xbf16>
    %c0_82 = arith.constant 0 : index
    %c0_83 = arith.constant 0 : index
    %185 = vector.load %arg4[%c0_82, %c0_83] : memref<128x128xbf16, #tpu.memory_space<vmem>>, vector<128x128xbf16>
    %cst_84 = arith.constant dense<0.000000e+00> : vector<256x128xf32>
    %186 = tpu.matmul %184, %185, %cst_84 {dimension_numbers = #tpu.dot_dimension_numbers<[1], [0], [0], [1], [0, 0, 1, 1], [], []>} : vector<256x128xbf16>, vector<128x128xbf16>, vector<256x128xf32> -> vector<256x128xf32>
    %c0_85 = arith.constant 0 : index
    %c0_86 = arith.constant 0 : index
    %187 = vector.load %arg5[%c0_85, %c0_86] : memref<1x128xf32, #tpu.memory_space<vmem>>, vector<1x128xf32>
    %188 = vector.broadcast %187 : vector<1x128xf32> to vector<256x128xf32>
    %189 = arith.addf %186, %188 : vector<256x128xf32>
    %190 = vector.shape_cast %189 : vector<256x128xf32> to vector<2x128x128xf32>
    %c0_87 = arith.constant 0 : index
    %c0_88 = arith.constant 0 : index
    %c0_89 = arith.constant 0 : index
    %191 = vector.load %arg6[%c0_87, %c0_88, %c0_89] : memref<2x128x128xf32, #tpu.memory_space<vmem>>, vector<2x128x128xf32>
    tpu.vector_store %arg6[%c0_87, %c0_88, %c0_89], %190 {strides = array<i32>} : memref<2x128x128xf32, #tpu.memory_space<vmem>>, vector<2x128x128xf32>,
    return
  }
  func.func @transform_0(%arg0: i32) -> (i32, i32, i32) {
    %c0_i32 = arith.constant 0 : i32
    %c0_i32_0 = arith.constant 0 : i32
    %c0_i32_1 = arith.constant 0 : i32
    return %arg0, %c0_i32, %c0_i32_0 : i32, i32, i32
  }
  func.func @transform_1(%arg0: i32) -> (i32, i32) {
    %c0_i32 = arith.constant 0 : i32
    %c0_i32_0 = arith.constant 0 : i32
    %c0_i32_1 = arith.constant 0 : i32
    return %c0_i32, %c0_i32_0 : i32, i32
  }
  func.func @transform_2(%arg0: i32) -> (i32, i32) {
    %c0_i32 = arith.constant 0 : i32
    %c0_i32_0 = arith.constant 0 : i32
    %c0_i32_1 = arith.constant 0 : i32
    return %c0_i32, %c0_i32_0 : i32, i32
  }
  func.func @transform_3(%arg0: i32) -> (i32, i32) {
    %c0_i32 = arith.constant 0 : i32
    %c0_i32_0 = arith.constant 0 : i32
    %c0_i32_1 = arith.constant 0 : i32
    return %c0_i32, %c0_i32_0 : i32, i32
  }
  func.func @transform_4(%arg0: i32) -> (i32, i32) {
    %c0_i32 = arith.constant 0 : i32
    %c0_i32_0 = arith.constant 0 : i32
    %c0_i32_1 = arith.constant 0 : i32
    return %c0_i32, %c0_i32_0 : i32, i32
  }
  func.func @transform_5(%arg0: i32) -> (i32, i32, i32) {
    %c0_i32 = arith.constant 0 : i32
    %c0_i32_0 = arith.constant 0 : i32
    %c0_i32_1 = arith.constant 0 : i32
    return %arg0, %c0_i32, %c0_i32_0 : i32, i32, i32
  }
  func.func @transform_6(%arg0: i32) -> (i32, i32, i32, i32) {
    %c0_i32 = arith.constant 0 : i32
    %c0_i32_0 = arith.constant 0 : i32
    %c0_i32_1 = arith.constant 0 : i32
    %c0_i32_2 = arith.constant 0 : i32
    return %arg0, %c0_i32, %c0_i32_0, %c0_i32_1 : i32, i32, i32, i32
  }
}

</mosaic_0001>

<bundles_post_ra>
// kernel: self_attention_forward.1
= control target key start
LH: loop header
LB: loop body
LE: loop exit
PB: predicated region body
PF: predicated region fallthrough
CT: control target
= control target key end

     0   :  { %12 = vsyncpa [#allocation4], 0  ;;  %s11786_s0 = inlined_call_operand.vmem [shape: bf16[4,128,128], index: 0, kind: input, shape index: {}]   ;;  %s11787_s1 = inlined_call_operand.vmem [shape: bf16[128,384], index: 1, kind: input, shape index: {}]   ;;  %s11788_s2 = inlined_call_operand.vmem [shape: f32[1,384], index: 2, kind: input, shape index: {}]   ;;  %s11789_s3 = inlined_call_operand.vmem [shape: bf16[128,128], index: 3, kind: input, shape index: {}]   ;;  %s11790_s4 = inlined_call_operand.vmem [shape: f32[1,128], index: 4, kind: input, shape index: {}]   ;;  %s11791_s5 = inlined_call_operand.hbm [shape: f32[4,128,128], index: 5, kind: output, shape index: {0}]   ;;  %s11792_s6 = inlined_call_operand.hbm [shape: bf16[4,4,128,128], index: 6, kind: output, shape index: {1}]  }
   0x1   :  { %14 = vsyncpa [#allocation4 + $0x1], 0 }
   0x2   :  { %15 = vsyncpa [#allocation6], 0 }
   0x3   :  { %17 = vsyncpa [#allocation6 + $0x1], 0  ;;  %s8785_s21 = smov 0   ;;  %s8787_s22 = smov 0  }
   0x4   :  { %s8789_s23 = smov 0   ;;  %s8791_s24 = smov 0  }
   0x5 LB: > { %s8806_s25 = sadd.s32 4294967295, %s8739_s24   ;;  %s6150_s26 = sadd.s32 4294967294, %s8739_s24   ;;  %s8739_s24 = sphi %s8791_s24, %s12116_s24   ;;  %s8735_s23 = sphi %s8789_s23, %s12115_s23   ;;  %s8731_s22 = sphi %s8787_s22, %s12114_s22   ;;  %s8727_s21 = sphi %s8785_s21, %s12113_s21  }
   0x6   : > { %s8810_s27 = sadd.s32 1, %s8739_s24   ;;  %s140_s28 = sadd.s32 1, %s8735_s23 }
   0x7   : > { %s137_s29 = ssub.s32 %s8739_s24, %s8810_s27  ;;  %p150_p0 = scmp.ne.s32.totalorder %s8735_s23, %s8731_s22 }
   0x8   : > { %p138_p1 = scmp.eq.s32.totalorder %s137_s29, 0  ;;  %p151_p2 = scmp.eq.s32.totalorder %s8806_s25, 1 }
   0x9   : > { %p156_p3 = scmp.ne.s32.totalorder %s8731_s22, %s8727_s21  ;;  %p157_p4 = scmp.eq.s32.totalorder %s6150_s26, 1 }
   0xa   : > { %s8821_s30 = scalar_select %p138_p1, %s8735_s23, %s140_s28  }
   0xb   : > { %p8823_p5 = por %p151_p2, %p150_p0  ;;  %p8827_p6 = por %p157_p4, %p156_p3 }
   0xc   : > { %p6153_p7 = scmp.ge.s32.totalorder %s8739_s24, 1  ;;  %p223_p8 = scmp.lt.s32.totalorder %s8739_s24, 3 }
   0xe   : > { %p224_p9 = pnand %p6153_p7, %p223_p8 }
  0x10   : > { %227 = sbr.rel (%p224_p9) target bundleno = 4783 (0x12af), region = 40 }
  0x15   : > { %v8081_v0 = vld [vmem:[%s11787_s1 + $0xac] ss:$12 sps:$4 sm:$0xff]   ;;  %s6156_s11 = sshll.u32 %s8806_s25, 1  ;;  %v8083_v1 = vld [vmem:[%s11787_s1 + $0xa8] ss:$12 sps:$4 sm:$0xff]   ;;  %v8741_v2 = vmov 0   ;;  %v335_v41 = vlaneseq }
  0x16   : > { %606 = vmatprep.mubr.bf16.mxu0 %v8741_v2  ;;  %p260_p10 = scmp.lt.s32.totalorder %s6156_s11, 3  ;;  %726 = vmatprep.mubr.bf16.mxu1 %v8741_v2  ;;  %v8084_v3 = vld [vmem:[%s11787_s1 + $0x94] ss:$12 sps:$4 sm:$0xff]   ;;  %v8086_v4 = vld [vmem:[%s11787_s1 + $0x90] ss:$12 sps:$4 sm:$0xff]   ;;  %vm1008_vm0 = vcmask 261120  }
  0x17   : > { %574 = vmatprep.subr.bf16.mxu0 %v8081_v0  ;;  %7950 = vmatprep.subr.bf16.mxu1 %v8081_v0  ;;  %v8087_v5 = vld [vmem:[%s11787_s1 + $0x7c] ss:$12 sps:$4 sm:$0xff]   ;;  %v8089_v6 = vld [vmem:[%s11787_s1 + $0x78] ss:$12 sps:$4 sm:$0xff]   ;;  %v8092_v8 = vld [vmem:[%s11787_s1 + $0x60] ss:$12 sps:$4 sm:$0xff]  }
  0x18   : > { %575 = vmatpush1.bf16.msra.mxu0 %v8083_v1  ;;  %s12118_s11 = smov (!%p260_p10, %s6156_s11), 3  ;;  %7958 = vmatpush1.bf16.msra.mxu1 %v8083_v1  ;;  %v8090_v7 = vld [vmem:[%s11787_s1 + $0x64] ss:$12 sps:$4 sm:$0xff]   ;;  %v8093_v9 = vld [vmem:[%s11787_s1 + $0x4c] ss:$12 sps:$4 sm:$0xff]   ;;  %v8951_v42 = vshrl.u32 %v335_v41, 7 }
  0x19   : > { %576 = vmatprep.subr.bf16.mxu0 %v8084_v3  ;;  %7951 = vmatprep.subr.bf16.mxu1 %v8084_v3  ;;  %s6522_s20 = sshll.u32 %s12118_s11, 6  ;;  %v8095_v10 = vld [vmem:[%s11787_s1 + $0x48] ss:$12 sps:$4 sm:$0xff]   ;;  %v8098_v12 = vld [vmem:[%s11787_s1 + $0x30] ss:$12 sps:$4 sm:$0xff]   ;;  %s8743_s26 = smov 64  }
  0x1a   : > { %s8860_s13 = scalar_lea.vmem %s11786_s0, %s6522_s20  ;;  %v8096_v11 = vld [vmem:[%s11787_s1 + $0x34] ss:$12 sps:$4 sm:$0xff]   ;;  %v8099_v13 = vld [vmem:[%s11787_s1 + $0x1c] ss:$12 sps:$4 sm:$0xff]   ;;  %v8101_v14 = vld [vmem:[%s11787_s1 + $0x18] ss:$12 sps:$4 sm:$0xff]  }
  0x1b   : > { %v8102_v15 = vld [vmem:[%s11787_s1 + $0x4] ss:$12 sps:$4 sm:$0xff]   ;;  %v8104_v16 = vld [vmem:[%s11787_s1] ss:$12 sps:$4 sm:$0xff]   ;;  %v8118_v24 = vld [vmem:[%s11787_s1 + $0x68] ss:$12 sps:$4 sm:$0xff]  }
  0x1c   : > { %577 = vmatpush1.bf16.msra.mxu0 %v8086_v4  ;;  %7959 = vmatpush1.bf16.msra.mxu1 %v8086_v4  ;;  %v8113_v17 = vld [vmem:[%s11787_s1 + $0xb0] ss:$12 sps:$4 sm:$0xff]   ;;  %v8105_v18 = vld [vmem:[%s8860_s13] sm:$0xff]   ;;  %v8106_v22 = vld [vmem:[%s8860_s13 + $0x8] sm:$0xff]   ;;  %v337_v43 = vsub.s32 0, %v8951_v42  ;;  %s8742_s20 = smov 96  }
  0x1d   : > { %578 = vmatprep.subr.bf16.mxu0 %v8087_v5  ;;  %7952 = vmatprep.subr.bf16.mxu1 %v8087_v5  ;;  %v8894_v19 = vld [vmem:[%s8860_s13 + $0x60] sm:$0xff]   ;;  %v8907_v23 = vld [vmem:[%s8860_s13 + $0x68] sm:$0xff]   ;;  %v8120_v25 = vld [vmem:[%s11787_s1 + $0x50] ss:$12 sps:$4 sm:$0xff]   ;;  %s8744_s28 = smov 32   ;;  %s9484_s29 = sand.u32 1, %s8731_s22  }
  0x1e   : > { %v8114_v20 = vld [vmem:[%s11787_s1 + $0x98] ss:$12 sps:$4 sm:$0xff]   ;;  %v8117_v21 = vld [vmem:[%s11787_s1 + $0x80] ss:$12 sps:$4 sm:$0xff]   ;;  %v8107_v26 = vld [vmem:[%s8860_s13 + $0x10] sm:$0xff]   ;;  %s6155_s9 = sshll.u32 %s9484_s29, 9 }
  0x1f   : > { %v8119_v27 = vld [vmem:[%s8860_s13 + $0x70] sm:$0xff]   ;;  %v8121_v28 = vld [vmem:[%s11787_s1 + $0x38] ss:$12 sps:$4 sm:$0xff]   ;;  %v8123_v29 = vld [vmem:[%s11787_s1 + $0x20] ss:$12 sps:$4 sm:$0xff]   ;;  %s9502_s10 = scalar_lea.vmem [#allocation5], %s6155_s9 }
  0x20   : > { %579 = vmatpush1.bf16.msra.mxu0 %v8089_v6  ;;  %7960 = vmatpush1.bf16.msra.mxu1 %v8089_v6  ;;  %v8108_v30 = vld [vmem:[%s8860_s13 + $0x18] sm:$0xff]   ;;  %v8124_v32 = vld [vmem:[%s11787_s1 + $0x8] ss:$12 sps:$4 sm:$0xff]   ;;  %v8109_v33 = vld [vmem:[%s8860_s13 + $0x20] sm:$0xff]   ;;  %vm2118_vm1 = vcmask 523520   ;;  %vm2730_vm2 = vcmask 785920  }
  0x21   : > { %580 = vmatprep.subr.bf16.mxu0 %v8090_v7  ;;  %7953 = vmatprep.subr.bf16.mxu1 %v8090_v7  ;;  %v8122_v31 = vld [vmem:[%s8860_s13 + $0x78] sm:$0xff]   ;;  %v8110_v34 = vld [vmem:[%s8860_s13 + $0x28] sm:$0xff]   ;;  %v8111_v35 = vld [vmem:[%s8860_s13 + $0x30] sm:$0xff]   ;;  %vm3342_vm3 = vcmask 1048320   ;;  %s6056_s9 = sshll.u32 %s9502_s10, 4  ;;  %s6025_s15 = scalar_lea.sflag [#allocation6], %s9484_s29  ;;  %s11678_s9 = int_to_ptr.vmem [resolvable:$true] %s6056_s9 }
  0x22   : > { %v8115_v36 = vld [vmem:[%s8860_s13 + $0x38] sm:$0xff]   ;;  %v8125_v37 = vld [vmem:[%s8860_s13 + $0x40] sm:$0xff]   ;;  %v8126_v38 = vld [vmem:[%s8860_s13 + $0x48] sm:$0xff]   ;;  %s8649_s16 = scalar_lea.vmem %s11678_s9, 8192  ;;  %s8745_s17 = smov [#allocation5]  }
  0x23   : > { %v8127_v39 = vld [vmem:[%s8860_s13 + $0x50] sm:$0xff]   ;;  %v8128_v40 = vld [vmem:[%s8860_s13 + $0x58] sm:$0xff]   ;;  %v8957_v44 = vld [vmem:[%s11788_s2] sm:$0x7]  ;;  %p8650_p11 = scmp.ne.s32.totalorder %s11678_s9, %s8649_s16 }
  0x24   : > { %581 = vmatpush1.bf16.msra.mxu0 %v8092_v8  ;;  %7961 = vmatpush1.bf16.msra.mxu1 %v8092_v8  ;;  %v8960_v45 = vrot.slane %v8957_v44, %v337_v43 }
  0x25   : > { %582 = vmatprep.subr.bf16.mxu0 %v8093_v9  ;;  %7954 = vmatprep.subr.bf16.mxu1 %v8093_v9  ;;  %p8651_p12 = pnand %p8650_p11, %p8823_p5 }
  0x27   : > { %p8652_p13 = pneg %p8651_p12 }
  0x28   : > { %583 = vmatpush1.bf16.msra.mxu0 %v8095_v10  ;;  %7962 = vmatpush1.bf16.msra.mxu1 %v8095_v10 }
  0x29   : > { %584 = vmatprep.subr.bf16.mxu0 %v8096_v11  ;;  %7955 = vmatprep.subr.bf16.mxu1 %v8096_v11 }
  0x2c   : > { %585 = vmatpush1.bf16.msra.mxu0 %v8098_v12  ;;  %7963 = vmatpush1.bf16.msra.mxu1 %v8098_v12 }
  0x2d   : > { %586 = vmatprep.subr.bf16.mxu0 %v8099_v13  ;;  %7956 = vmatprep.subr.bf16.mxu1 %v8099_v13 }
  0x30   : > { %587 = vmatpush1.bf16.msra.mxu0 %v8101_v14  ;;  %7964 = vmatpush1.bf16.msra.mxu1 %v8101_v14 }
  0x31   : > { %588 = vmatprep.subr.bf16.mxu0 %v8102_v15  ;;  %7957 = vmatprep.subr.bf16.mxu1 %v8102_v15 }
  0x34   : > { %589 = vmatpush1.bf16.msra.mxu0 %v8104_v16  ;;  %7965 = vmatpush1.bf16.msra.mxu1 %v8104_v16 }
  0x35   : > { %7342 = vmatprep.subr.bf16.mxu1 %v8113_v17 }
  0x37   : > { %607 = vmatmul.mubr.bf16.vlgmr.msra.gmra.mxu0 %v8105_v18  ;;  %727 = vmatmul.mubr.bf16.vlgmr.msra.gmra.mxu1 %v8894_v19 }
  0x38   : > { %616 = vmatprep.mubr.bf16.mxu0 %v8741_v2  ;;  %7343 = vmatpush3.bf16.msra.mxu1 %v8113_v17 }
  0x39   : > { %7344 = vmatprep.subr.bf16.mxu1 %v8114_v20  ;;  %736 = vmatprep.mubr.bf16.mxu1 %v8741_v2 }
  0x3c   : > { %7345 = vmatpush3.bf16.msra.mxu1 %v8114_v20 }
  0x3d   : > { %7346 = vmatprep.subr.bf16.mxu1 %v8117_v21 }
  0x3f   : > { %617 = vmatmul.mubr.bf16.gmra.mxu0 %v8106_v22  ;;  %737 = vmatmul.mubr.bf16.gmra.mxu1 %v8907_v23 }
  0x40   : > { %626 = vmatprep.mubr.bf16.mxu0 %v8741_v2  ;;  %7347 = vmatpush3.bf16.msra.mxu1 %v8117_v21 }
  0x41   : > { %7348 = vmatprep.subr.bf16.mxu1 %v8118_v24  ;;  %746 = vmatprep.mubr.bf16.mxu1 %v8741_v2 }
  0x44   : > { %7349 = vmatpush3.bf16.msra.mxu1 %v8118_v24 }
  0x45   : > { %7350 = vmatprep.subr.bf16.mxu1 %v8120_v25 }
  0x47   : > { %627 = vmatmul.mubr.bf16.gmra.mxu0 %v8107_v26  ;;  %747 = vmatmul.mubr.bf16.gmra.mxu1 %v8119_v27 }
  0x48   : > { %636 = vmatprep.mubr.bf16.mxu0 %v8741_v2  ;;  %7351 = vmatpush3.bf16.msra.mxu1 %v8120_v25 }
  0x49   : > { %7352 = vmatprep.subr.bf16.mxu1 %v8121_v28  ;;  %756 = vmatprep.mubr.bf16.mxu1 %v8741_v2 }
  0x4c   : > { %7353 = vmatpush3.bf16.msra.mxu1 %v8121_v28 }
  0x4d   : > { %7354 = vmatprep.subr.bf16.mxu1 %v8123_v29 }
  0x4f   : > { %637 = vmatmul.mubr.bf16.gmra.mxu0 %v8108_v30  ;;  %757 = vmatmul.mubr.bf16.gmra.mxu1 %v8122_v31 }
  0x50   : > { %646 = vmatprep.mubr.bf16.mxu0 %v8741_v2  ;;  %7355 = vmatpush3.bf16.msra.mxu1 %v8123_v29 }
  0x51   : > { %7356 = vmatprep.subr.bf16.mxu1 %v8124_v32  ;;  %7358 = vmatprep.mubr.bf16.mxu1 %v8105_v18 }
  0x54   : > { %7357 = vmatpush3.bf16.msra.mxu1 %v8124_v32 }
  0x57   : > { %647 = vmatmul.mubr.bf16.gmra.mxu0 %v8109_v33  ;;  %7359 = vmatmul.mubr.bf16.vlgmr.msra.gmra.mxu1 %v8106_v22 }
  0x58   : > { %656 = vmatprep.mubr.bf16.mxu0 %v8741_v2  ;;  %7362 = vmatprep.mubr.bf16.mxu1 %v8107_v26 }
  0x5f   : > { %657 = vmatmul.mubr.bf16.gmra.mxu0 %v8110_v34  ;;  %7363 = vmatmul.mubr.bf16.gmra.mxu1 %v8108_v30 }
  0x60   : > { %666 = vmatprep.mubr.bf16.mxu0 %v8741_v2  ;;  %7366 = vmatprep.mubr.bf16.mxu1 %v8109_v33 }
  0x67   : > { %667 = vmatmul.mubr.bf16.gmra.mxu0 %v8111_v35  ;;  %7367 = vmatmul.mubr.bf16.gmra.mxu1 %v8110_v34 }
  0x68   : > { %676 = vmatprep.mubr.bf16.mxu0 %v8741_v2  ;;  %7370 = vmatprep.mubr.bf16.mxu1 %v8111_v35 }
  0x6f   : > { %677 = vmatmul.mubr.bf16.gmra.mxu0 %v8115_v36  ;;  %7371 = vmatmul.mubr.bf16.gmra.mxu1 %v8115_v36 }
  0x70   : > { %7374 = vmatprep.mubr.bf16.mxu1 %v8125_v37  ;;  %686 = vmatprep.mubr.bf16.mxu0 %v8741_v2 }
  0x77   : > { %7375 = vmatmul.mubr.bf16.gmra.mxu1 %v8126_v38  ;;  %687 = vmatmul.mubr.bf16.gmra.mxu0 %v8125_v37 }
  0x78   : > { %7378 = vmatprep.mubr.bf16.mxu1 %v8127_v39  ;;  %696 = vmatprep.mubr.bf16.mxu0 %v8741_v2 }
  0x7f   : > { %7379 = vmatmul.mubr.bf16.gmra.mxu1 %v8128_v40  ;;  %697 = vmatmul.mubr.bf16.gmra.mxu0 %v8126_v38 }
  0x80   : > { %7382 = vmatprep.mubr.bf16.mxu1 %v8894_v19  ;;  %706 = vmatprep.mubr.bf16.mxu0 %v8741_v2 }
  0x87   : > { %7383 = vmatmul.mubr.bf16.gmra.mxu1 %v8907_v23  ;;  %707 = vmatmul.mubr.bf16.gmra.mxu0 %v8127_v39 }
  0x88   : > { %7386 = vmatprep.mubr.bf16.mxu1 %v8119_v27  ;;  %716 = vmatprep.mubr.bf16.mxu0 %v8741_v2 }
  0x8f   : > { %7387 = vmatmul.mubr.bf16.gmra.mxu1 %v8122_v31  ;;  %717 = vmatmul.mubr.bf16.gmra.mxu0 %v8128_v40 }
  0xf7   : > { %v608_v46 = vpop.f32.mrf.mxu0  ;;  %v728_v47 = vpop.f32.mrf.mxu1 }
  0xf8   : > { %v729_v48 = vadd.f32 %v728_v47, %v8960_v45  ;;  %v609_v51 = vadd.f32 %v608_v46, %v8960_v45 }
  0xf9   : > { %v8963_v49 = vpop.f32.mrf.mxu0  ;;  %v8965_v50 = vpop.f32.mrf.mxu1 }
  0xfa   : > { %11853 = vst [vmem:[#allocation9_spill] sm:$0xff] %v8965_v50  ;;  %v952_v55 = vmul.f32 0.17677669, %v729_v48  ;;  %v928_v59 = vmul.f32 0.17677669, %v609_v51 }
  0xfb   : > { %v612_v52 = vpop.f32.mrf.mxu0  ;;  %v732_v53 = vpop.f32.mrf.mxu1 }
  0xfc   : > { %v613_v54 = vadd.f32 %v612_v52, %v8960_v45  ;;  %v733_v56 = vadd.f32 %v732_v53, %v8960_v45 }
  0xfd   : > { %v8970_v57 = vpop.f32.mrf.mxu0  ;;  %v8972_v58 = vpop.f32.mrf.mxu1 }
  0xfe   : > { %11854 = vst [vmem:[#allocation10_spill] sm:$0xff] %v8972_v58  ;;  %v929_v60 = vmul.f32 0.17677669, %v613_v54  ;;  %v953_v61 = vmul.f32 0.17677669, %v733_v56 }
  0xff   : > { %v618_v62 = vpop.f32.mrf.mxu0  ;;  %v738_v63 = vpop.f32.mrf.mxu1 }
 0x100   : > { %v8974_v0 = vpack.c.bf16 %v929_v60, %v928_v59  ;;  %v8976_v1 = vpack.c.bf16 %v953_v61, %v952_v55  ;;  %v739_v3 = vadd.f32 %v738_v63, %v8960_v45  ;;  %v619_v5 = vadd.f32 %v618_v62, %v8960_v45 }
 0x101   : > { %v8978_v2 = vpop.f32.mrf.mxu0  ;;  %v8981_v4 = vpop.f32.mrf.mxu1  ;;  %v341_v60 = vsub.s32 1, %v8951_v42 }
 0x102   : > { %11855 = vst [vmem:[#allocation11_spill] sm:$0xff] %v8974_v0  ;;  %11856 = vst [vmem:[#allocation12_spill] sm:$0xff] %v8976_v1  ;;  %7406 = vmatprep.mubr.msk.bf16.mxu1 %vm1008_vm0, %v8974_v0  ;;  %v954_v9 = vmul.f32 0.17677669, %v739_v3  ;;  %v930_v13 = vmul.f32 0.17677669, %v619_v5 }
 0x103   : > { %11857 = vst [vmem:[#allocation13_spill] sm:$0xff] %v8981_v4  ;;  %v622_v6 = vpop.f32.mrf.mxu0  ;;  %v742_v7 = vpop.f32.mrf.mxu1  ;;  %v9030_v63 = vrot.slane %v8957_v44, %v341_v60 }
 0x104   : > { %v623_v8 = vadd.f32 %v622_v6, %v8960_v45  ;;  %v743_v10 = vadd.f32 %v742_v7, %v8960_v45 }
 0x105   : > { %v8988_v11 = vpop.f32.mrf.mxu0  ;;  %v8990_v12 = vpop.f32.mrf.mxu1  ;;  %11867 = vst [vmem:[#allocation23_spill] sm:$0xff] %v9030_v63 }
 0x106   : > { %11858 = vst [vmem:[#allocation14_spill] sm:$0xff] %v8990_v12  ;;  %v931_v14 = vmul.f32 0.17677669, %v623_v8  ;;  %v955_v15 = vmul.f32 0.17677669, %v743_v10 }
 0x107   : > { %v8992_v16 = vpop.f32.mrf.mxu0  ;;  %v748_v17 = vpop.f32.mrf.mxu1 }
 0x108   : > { %v8994_v18 = vpack.c.bf16 %v931_v14, %v930_v13  ;;  %v8996_v19 = vpack.c.bf16 %v955_v15, %v954_v9  ;;  %v749_v21 = vadd.f32 %v748_v17, %v8960_v45 }
 0x109   : > { %v630_v20 = vpop.f32.mrf.mxu0  ;;  %v8999_v22 = vpop.f32.mrf.mxu1 }
 0x10a   : > { %11859 = vst [vmem:[#allocation15_spill] sm:$0xff] %v8994_v18  ;;  %11860 = vst [vmem:[#allocation16_spill] sm:$0xff] %v8996_v19  ;;  %v956_v25 = vmul.f32 0.17677669, %v749_v21 }
 0x10b   : > { %11861 = vst [vmem:[#allocation17_spill] sm:$0xff] %v8999_v22  ;;  %v9001_v23 = vpop.f32.mrf.mxu0  ;;  %v752_v24 = vpop.f32.mrf.mxu1 }
 0x10c   : > { %v753_v26 = vadd.f32 %v752_v24, %v8960_v45 }
 0x10d   : > { %v634_v27 = vpop.f32.mrf.mxu0  ;;  %v9004_v28 = vpop.f32.mrf.mxu1 }
 0x10e   : > { %11862 = vst [vmem:[#allocation18_spill] sm:$0xff] %v9004_v28  ;;  %v957_v29 = vmul.f32 0.17677669, %v753_v26  ;;  %v635_v21 = vadd.f32 %v634_v27, %v9030_v63 }
 0x10f   : > { %v638_v30 = vpop.f32.mrf.mxu0  ;;  %v758_v31 = vpop.f32.mrf.mxu1 }
 0x110   : > { %v9006_v32 = vpack.c.bf16 %v957_v29, %v956_v25  ;;  %v759_v34 = vadd.f32 %v758_v31, %v8960_v45  ;;  %v639_v36 = vadd.f32 %v638_v30, %v8960_v45  ;;  %v631_v29 = vadd.f32 %v630_v20, %v9030_v63 }
 0x111   : > { %v9008_v33 = vpop.f32.mrf.mxu0  ;;  %v9011_v35 = vpop.f32.mrf.mxu1  ;;  %v615_v31 = vadd.f32 %v8970_v57, %v9030_v63 }
 0x112   : > { %11863 = vst [vmem:[#allocation19_spill] sm:$0xff] %v9006_v32  ;;  %11864 = vst [vmem:[#allocation20_spill] sm:$0xff] %v9011_v35  ;;  %v958_v40 = vmul.f32 0.17677669, %v759_v34  ;;  %v934_v46 = vmul.f32 0.17677669, %v639_v36  ;;  %v9058_v34 = vpack.c.bf16 %v635_v21, %v631_v29 }
 0x113   : > { %v642_v37 = vpop.f32.mrf.mxu0  ;;  %v762_v38 = vpop.f32.mrf.mxu1 }
 0x114   : > { %v643_v39 = vadd.f32 %v642_v37, %v8960_v45  ;;  %v763_v41 = vadd.f32 %v762_v38, %v8960_v45  ;;  %11869 = vst [vmem:[#allocation25_spill] sm:$0xff] %v9058_v34  ;;  %v611_v37 = vadd.f32 %v8963_v49, %v9030_v63 }
 0x115   : > { %v644_v43 = vpop.f32.mrf.mxu0  ;;  %v9032_v3 = vpop.f32.mrf.mxu1 }
 0x116   : > { %v935_v47 = vmul.f32 0.17677669, %v643_v39  ;;  %v959_v48 = vmul.f32 0.17677669, %v763_v41  ;;  %11868 = vst [vmem:[#allocation24_spill] sm:$0xff] %v9032_v3  ;;  %v9068_v38 = vpack.c.bf16 %v615_v31, %v611_v37  ;;  %v645_v60 = vadd.f32 %v644_v43, %v9030_v63 }
 0x117   : > { %v9016_v51 = vpop.f32.mrf.mxu0  ;;  %v9041_v13 = vpop.f32.mrf.mxu1  ;;  %v625_v43 = vadd.f32 %v8988_v11, %v9030_v63 }
 0x118   : > { %v9018_v52 = vpack.c.bf16 %v935_v47, %v934_v46  ;;  %v9020_v53 = vpack.c.bf16 %v959_v48, %v958_v40  ;;  %11870 = vst [vmem:[#allocation26_spill] sm:$0xff] %v9068_v38 }
 0x119   : > { %v650_v54 = vpop.f32.mrf.mxu0  ;;  %v9049_v25 = vpop.f32.mrf.mxu1 }
 0x11a   : > { %11865 = vst [vmem:[#allocation21_spill] sm:$0xff] %v9018_v52  ;;  %11866 = vst [vmem:[#allocation22_spill] sm:$0xff] %v9020_v53  ;;  %v651_v15 = vadd.f32 %v650_v54, %v9030_v63 }
 0x11b   : > { %v9022_v55 = vpop.f32.mrf.mxu0  ;;  %v9060_v36 = vpop.f32.mrf.mxu1 }
 0x11d   : > { %v654_v56 = vpop.f32.mrf.mxu0  ;;  %v9070_v39 = vpop.f32.mrf.mxu1 }
 0x11e   : > { %v655_v9 = vadd.f32 %v654_v56, %v9030_v63 }
 0x11f   : > { %v9024_v59 = vpop.f32.mrf.mxu0  ;;  %v9080_v48 = vpop.f32.mrf.mxu1 }
 0x120   : > { %v9047_v24 = vpack.c.bf16 %v655_v9, %v651_v15  ;;  %v659_v29 = vadd.f32 %v9024_v59, %v8960_v45 }
 0x121   : > { %v660_v61 = vpop.f32.mrf.mxu0 }
 0x122   : > { %v661_v6 = vadd.f32 %v660_v61, %v9030_v63  ;;  %v9095_v61 = vpop.f32.mrf.mxu1 }
 0x123   : > { %v9027_v62 = vpop.f32.mrf.mxu0 }
 0x125   : > { %v664_v5 = vpop.f32.mrf.mxu0 }
 0x126   : > { %v665_v7 = vadd.f32 %v664_v5, %v9030_v63  ;;  %v633_v5 = vadd.f32 %v9001_v23, %v8960_v45 }
 0x127   : > { %v9036_v8 = vpop.f32.mrf.mxu0 }
 0x128   : > { %v9039_v10 = vpack.c.bf16 %v665_v7, %v661_v6  ;;  %v641_v6 = vadd.f32 %v9008_v33, %v9030_v63  ;;  %v629_v7 = vadd.f32 %v8992_v16, %v8960_v45  ;;  %v933_v23 = vmul.f32 0.17677669, %v633_v5 }
 0x129   : > { %v670_v14 = vpop.f32.mrf.mxu0  ;;  %v621_v33 = vadd.f32 %v8978_v2, %v9030_v63  ;;  %v663_v2 = vadd.f32 %v9027_v62, %v8960_v45 }
 0x12a   : > { %1541 = vrot.lane.b32.xlu1 %v9039_v10, %s8742_s20  ;;  %v671_v49 = vadd.f32 %v670_v14, %v9030_v63  ;;  %v9109_v9 = vpack.c.bf16 %v645_v60, %v641_v6  ;;  %v9111_v14 = vpop.f32.mrf.mxu1  ;;  %v932_v15 = vmul.f32 0.17677669, %v629_v7  ;;  %v1049_v62 = vsel %vm1008_vm0, %v9039_v10, 0 }
 0x12b   : > { %v672_v17 = vpop.f32.mrf.mxu0  ;;  %v9121_v11 = vpack.c.bf16 %v625_v43, %v621_v33  ;;  %v653_v60 = vadd.f32 %v9022_v55, %v8960_v45  ;;  %v649_v6 = vadd.f32 %v9016_v51, %v8960_v45  ;;  %v345_v33 = vsub.s32 2, %v8951_v42 }
 0x12c   : > { %v9125_v21 = vpop.f32.mrf.mxu1  ;;  %v673_v37 = vadd.f32 %v672_v17, %v8960_v45  ;;  %v1043_v55 = vsel %vm1008_vm0, %v9109_v9, 0 }
 0x12d   : > { %v674_v26 = vpop.f32.mrf.mxu0  ;;  %11871 = vst [vmem:[#allocation27_spill] sm:$0xff] %v9121_v11  ;;  %v937_v7 = vmul.f32 0.17677669, %v653_v60  ;;  %v9192_v42 = vrot.slane %v8957_v44, %v345_v33 }
 0x12e   : > { %1539 = vrot.lane.b32.xlu1 %v9047_v24, %s8742_s20  ;;  %v675_v57 = vadd.f32 %v674_v26, %v9030_v63  ;;  %v9127_v26 = vpack.c.bf16 %v933_v23, %v932_v15  ;;  %v9137_v31 = vpop.f32.mrf.mxu1  ;;  %v941_v17 = vmul.f32 0.17677669, %v673_v37  ;;  %v936_v23 = vmul.f32 0.17677669, %v649_v6 }
 0x12f   : > { %v9054_v30 = vpop.f32.mrf.mxu0  ;;  %11876 = vst [vmem:[#allocation32_spill] sm:$0xff] %v9192_v42  ;;  %v829_v60 = vadd.f32 %v9111_v14, %v9192_v42  ;;  %v842_v14 = vadd.f32 %v9137_v31, %v9192_v42 }
 0x130   : > { %v9082_v54 = vpack.c.bf16 %v675_v57, %v671_v49  ;;  %11872 = vst [vmem:[#allocation28_spill] sm:$0xff] %v9127_v26  ;;  %v669_v57 = vadd.f32 %v9036_v8, %v8960_v45  ;;  %v833_v59 = vpop.f32.mrf.mxu1  ;;  %v9181_v51 = vpack.c.bf16 %v937_v7, %v936_v23 }
 0x131   : > { %v680_v27 = vpop.f32.mrf.mxu0 }
 0x132   : > { %1535 = vrot.lane.b32.xlu1 %v9058_v34, %s8742_s20  ;;  %v681_v41 = vadd.f32 %v680_v27, %v9030_v63  ;;  %v1052_v16 = vsel %vm1008_vm0, %v9082_v54, 0  ;;  %v939_v27 = vmul.f32 0.17677669, %v663_v2  ;;  %v7369_v49 = vpop.f32.mrf.mxu1  ;;  %11875 = vst [vmem:[#allocation31_spill] sm:$0xff] %v9181_v51  ;;  %v679_v2 = vadd.f32 %v9054_v30, %v8960_v45 }
 0x133   : > { %v9066_v20 = vpop.f32.mrf.mxu0  ;;  %v845_v7 = vadd.f32 %v7369_v49, %v9192_v42  ;;  %v818_v49 = vadd.f32 %v9095_v61, %v9192_v42 }
 0x134   : > { %v836_v5 = vpop.f32.mrf.mxu1  ;;  %v942_v37 = vmul.f32 0.17677669, %v679_v2  ;;  %v813_v2 = vadd.f32 %v9060_v36, %v9192_v42 }
 0x135   : > { %v684_v40 = vpop.f32.mrf.mxu0  ;;  %v9258_v33 = vpack.c.bf16 %v845_v7, %v842_v14 }
 0x136   : > { %v685_v46 = vadd.f32 %v684_v40, %v9030_v63  ;;  %1531 = vrot.lane.b32.xlu1 %v9068_v38, %s8742_s20  ;;  %v938_v40 = vmul.f32 0.17677669, %v659_v29  ;;  %v7372_v43 = vpop.f32.mrf.mxu1 }
 0x137   : > { %v858_v30 = vadd.f32 %v7372_v43, %v9192_v42  ;;  %v1034_v43 = vsel %vm1008_vm0, %v9068_v38, 0  ;;  %11882 = vst [vmem:[#allocation38_spill] sm:$0xff] %v9258_v33  ;;  %v688_v19 = vpop.f32.mrf.mxu0 }
 0x138   : > { %v9078_v47 = vpack.c.bf16 %v685_v46, %v681_v41  ;;  %v9150_v41 = vpack.c.bf16 %v939_v27, %v938_v40  ;;  %v940_v46 = vmul.f32 0.17677669, %v669_v57  ;;  %v849_v15 = vpop.f32.mrf.mxu1  ;;  %v834_v40 = vadd.f32 %v833_v59, %v9192_v42 }
 0x139   : > { %v837_v57 = vadd.f32 %v836_v5, %v9192_v42  ;;  %v802_v5 = vadd.f32 %v9049_v25, %v9192_v42  ;;  %v689_v1 = vadd.f32 %v688_v19, %v8960_v45 }
 0x13a   : > { %1545 = vrot.lane.b32.xlu0 %v9078_v47, %s8742_s20  ;;  %7966 = vmatprep.subr.msk.bf16.mxu1 %vm1008_vm0, %v9078_v47  ;;  %v1055_v56 = vsel %vm1008_vm0, %v9078_v47, 0  ;;  %11873 = vst [vmem:[#allocation29_spill] sm:$0xff] %v9150_v41  ;;  %v9156_v8 = vpack.c.bf16 %v941_v17, %v940_v46  ;;  %v7373_v27 = vpop.f32.mrf.mxu1  ;;  %v1037_v46 = vsel %vm1008_vm0, %v9121_v11, 0 }
 0x13b   : > { %2165 = vrot.lane.b32.xlu1 %v9078_v47, %s8743_s26  ;;  %7391 = vmatpush3.bf16.xpose.msra.mxu1 %v1055_v56  ;;  %v1046_v56 = vsel %vm1008_vm0, %v9047_v24, 0  ;;  %v861_v44 = vadd.f32 %v7373_v27, %v9192_v42  ;;  %v9224_v59 = vpack.c.bf16 %v837_v57, %v834_v40 }
 0x13c   : > { %7967 = vmatprep.subr.msk.bf16.mxu1 %vm1008_vm0, %v9082_v54  ;;  %11874 = vst [vmem:[#allocation30_spill] sm:$0xff] %v9156_v8  ;;  %v852_v25 = vpop.f32.mrf.mxu1 }
 0x13d   : > { %v9212_v17 = vpack.c.bf16 %v861_v44, %v858_v30  ;;  %11879 = vst [vmem:[#allocation35_spill] sm:$0xff] %v9224_v59  ;;  %v853_v31 = vadd.f32 %v852_v25, %v9192_v42 }
 0x13e   : > { %1543 = vrot.lane.b32.xlu0 %v9082_v54, %s8742_s20  ;;  %v7376_v36 = vpop.f32.mrf.mxu1 }
 0x13f   : > { %2163 = vrot.lane.b32.xlu1 %v9082_v54, %s8743_s26  ;;  %11878 = vst [vmem:[#allocation34_spill] sm:$0xff] %v9212_v17 }
 0x142   : > { %1537 = vrot.lane.b32.xlu0 %v9109_v9, %s8742_s20 }
 0x143   : > { %2159 = vrot.lane.b32.xlu1 %v9047_v24, %s8743_s26  ;;  %7393 = vmatpush3.bf16.xpose.msra.mxu1 %v1052_v16  ;;  %v683_v16 = vadd.f32 %v9066_v20, %v8960_v45  ;;  %v1040_v20 = vsel %vm1008_vm0, %v9058_v34, 0 }
 0x144   : > { %7968 = vmatprep.subr.msk.bf16.mxu1 %vm1008_vm0, %v9039_v10 }
 0x145   : > { %v943_v29 = vmul.f32 0.17677669, %v683_v16 }
 0x146   : > { %1533 = vrot.lane.b32.xlu0 %v9121_v11, %s8742_s20 }
 0x147   : > { %1511 = vrot.lane.b32.xlu1 %v9127_v26, %s8742_s20 }
 0x14a   : > { %1507 = vrot.lane.b32.xlu0 %v8974_v0, %s8742_s20 }
 0x14b   : > { %2155 = vrot.lane.b32.xlu1 %v9058_v34, %s8743_s26  ;;  %7395 = vmatpush3.bf16.xpose.msra.mxu1 %v1049_v62  ;;  %v9204_v62 = vpack.c.bf16 %v943_v29, %v942_v37 }
 0x14c   : > { %7969 = vmatprep.subr.msk.bf16.mxu1 %vm1008_vm0, %v9047_v24 }
 0x14d   : > { %11877 = vst [vmem:[#allocation33_spill] sm:$0xff] %v9204_v62 }
 0x14e   : > { %1509 = vrot.lane.b32.xlu0 %v8994_v18, %s8742_s20 }
 0x14f   : > { %1517 = vrot.lane.b32.xlu1 %v9150_v41, %s8742_s20 }
 0x152   : > { %2161 = vrot.lane.b32.xlu0 %v9039_v10, %s8743_s26 }
 0x153   : > { %1519 = vrot.lane.b32.xlu1 %v9156_v8, %s8742_s20  ;;  %7397 = vmatpush3.bf16.xpose.msra.mxu1 %v1046_v56  ;;  %v826_v56 = vadd.f32 %v9080_v48, %v9192_v42  ;;  %v805_v48 = vadd.f32 %v9070_v39, %v9192_v42  ;;  %v850_v39 = vadd.f32 %v849_v15, %v9192_v42 }
 0x154   : > { %7970 = vmatprep.subr.msk.bf16.mxu1 %vm1008_vm0, %v9109_v9  ;;  %v810_v15 = vadd.f32 %v9041_v13, %v9192_v42 }
 0x155   : > { %v9236_v6 = vpack.c.bf16 %v829_v60, %v826_v56  ;;  %v9247_v23 = vpack.c.bf16 %v805_v48, %v802_v5  ;;  %v9264_v16 = vpack.c.bf16 %v853_v31, %v850_v39 }
 0x156   : > { %2157 = vrot.lane.b32.xlu0 %v9109_v9, %s8743_s26  ;;  %v9282_v13 = vpack.c.bf16 %v813_v2, %v810_v15 }
 0x157   : > { %2151 = vrot.lane.b32.xlu1 %v9068_v38, %s8743_s26  ;;  %11880 = vst [vmem:[#allocation36_spill] sm:$0xff] %v9236_v6  ;;  %11881 = vst [vmem:[#allocation37_spill] sm:$0xff] %v9247_v23 }
 0x158   : > { %11883 = vst [vmem:[#allocation39_spill] sm:$0xff] %v9264_v16  ;;  %11885 = vst [vmem:[#allocation41_spill] sm:$0xff] %v9282_v13 }
 0x15a   : > { %1513 = vrot.lane.b32.xlu0 %v9018_v52, %s8742_s20 }
 0x15b   : > { %2137 = vrot.lane.b32.xlu1 %v8994_v18, %s8743_s26  ;;  %7399 = vmatpush3.bf16.xpose.msra.mxu1 %v1043_v55  ;;  %v821_v55 = vadd.f32 %v9125_v21, %v9192_v42  ;;  %v874_v21 = vadd.f32 %v7376_v36, %v9192_v42 }
 0x15c   : > { %7971 = vmatprep.subr.msk.bf16.mxu1 %vm1008_vm0, %v9058_v34 }
 0x15d   : > { %v9270_v61 = vpack.c.bf16 %v821_v55, %v818_v49 }
 0x15e   : > { %1515 = vrot.lane.b32.xlu0 %v9181_v51, %s8742_s20 }
 0x15f   : > { %2141 = vrot.lane.b32.xlu1 %v9018_v52, %s8743_s26  ;;  %11884 = vst [vmem:[#allocation40_spill] sm:$0xff] %v9270_v61 }
 0x162   : > { %2153 = vrot.lane.b32.xlu0 %v9121_v11, %s8743_s26 }
 0x163   : > { %2145 = vrot.lane.b32.xlu1 %v9150_v41, %s8743_s26  ;;  %7401 = vmatpush3.bf16.xpose.msra.mxu1 %v1040_v20 }
 0x164   : > { %7972 = vmatprep.subr.msk.bf16.mxu1 %vm1008_vm0, %v9121_v11 }
 0x166   : > { %1521 = vrot.lane.b32.xlu0 %v9204_v62, %s8742_s20 }
 0x167   : > { %2149 = vrot.lane.b32.xlu1 %v9204_v62, %s8743_s26 }
 0x16a   : > { %2135 = vrot.lane.b32.xlu0 %v8974_v0, %s8743_s26 }
 0x16b   : > { %1947 = vrot.lane.b32.xlu1 %v9212_v17, %s8742_s20  ;;  %7403 = vmatpush3.bf16.xpose.msra.mxu1 %v1037_v46 }
 0x16c   : > { %7973 = vmatprep.subr.msk.bf16.mxu1 %vm1008_vm0, %v9068_v38 }
 0x16e   : > { %2139 = vrot.lane.b32.xlu0 %v9127_v26, %s8743_s26 }
 0x16f   : > { %1941 = vrot.lane.b32.xlu1 %v9224_v59, %s8742_s20 }
 0x172   : > { %2143 = vrot.lane.b32.xlu0 %v9181_v51, %s8743_s26 }
 0x173   : > { %1939 = vrot.lane.b32.xlu1 %v9236_v6, %s8742_s20  ;;  %7405 = vmatpush3.bf16.xpose.msra.mxu1 %v1034_v43 }
 0x174   : > { %7422 = vmatprep.subr.bf16.mxu1 %v9212_v17 }
 0x176   : > { %2147 = vrot.lane.b32.xlu0 %v9156_v8, %s8743_s26 }
 0x177   : > { %1933 = vrot.lane.b32.xlu1 %v9247_v23, %s8742_s20 }
 0x17a   : > { %1943 = vrot.lane.b32.xlu0 %v9258_v33, %s8742_s20  ;;  %7407 = vmatmul.mubr.msk.bf16.vlgmr.msra.gmra.mxu1 %vm1008_vm0, %v8994_v18 }
 0x17b   : > { %2559 = vrot.lane.b32.xlu1 %v9212_v17, %s8743_s26  ;;  %7410 = vmatprep.mubr.msk.bf16.mxu1 %vm1008_vm0, %v9127_v26 }
 0x17c   : > { %7423 = vmatpush3.bf16.msra.mxu1 %v9212_v17 }
 0x17d   : > { %7424 = vmatprep.subr.bf16.mxu1 %v9264_v16 }
 0x17e   : > { %1937 = vrot.lane.b32.xlu0 %v9270_v61, %s8742_s20 }
 0x17f   : > { %2553 = vrot.lane.b32.xlu1 %v9224_v59, %s8743_s26 }
 0x180   : > { %7425 = vmatpush3.bf16.msra.mxu1 %v9264_v16 }
 0x181   : > { %7426 = vmatprep.subr.bf16.mxu1 %v9258_v33 }
 0x182   : > { %1935 = vrot.lane.b32.xlu0 %v9282_v13, %s8742_s20  ;;  %7411 = vmatmul.mubr.msk.bf16.gmra.mxu1 %vm1008_vm0, %v9018_v52 }
 0x183   : > { %2777 = vrot.lane.b32.xlu1 %v9078_v47, %s8744_s28  ;;  %7414 = vmatprep.mubr.msk.bf16.mxu1 %vm1008_vm0, %v9181_v51  ;;  %v9324_v47 = vpop.f32.mrf.mxu1 }
 0x184   : > { %7427 = vmatpush3.bf16.msra.mxu1 %v9258_v33  ;;  %11886 = vst [vmem:[#allocation42_spill] sm:$0xff] %v9324_v47 }
 0x185   : > { %7428 = vmatprep.subr.bf16.mxu1 %v9224_v59  ;;  %v7377_v29 = vpop.f32.mrf.mxu1 }
 0x186   : > { %2555 = vrot.lane.b32.xlu0 %v9258_v33, %s8743_s26  ;;  %v877_v27 = vadd.f32 %v7377_v29, %v9192_v42 }
 0x187   : > { %v9331_v37 = vpop.f32.mrf.mxu1 }
 0x188   : > { %7429 = vmatpush3.bf16.msra.mxu1 %v9224_v59  ;;  %11887 = vst [vmem:[#allocation43_spill] sm:$0xff] %v9331_v37  ;;  %v9333_v30 = vpack.c.bf16 %v877_v27, %v874_v21 }
 0x189   : > { %7430 = vmatprep.subr.bf16.mxu1 %v9236_v6  ;;  %v7380_v44 = vpop.f32.mrf.mxu1 }
 0x18a   : > { %2551 = vrot.lane.b32.xlu0 %v9236_v6, %s8743_s26  ;;  %7415 = vmatmul.mubr.msk.bf16.gmra.mxu1 %vm1008_vm0, %v9150_v41  ;;  %11888 = vst [vmem:[#allocation44_spill] sm:$0xff] %v9333_v30  ;;  %v890_v46 = vadd.f32 %v7380_v44, %v9192_v42 }
 0x18b   : > { %7418 = vmatprep.mubr.msk.bf16.mxu1 %vm1008_vm0, %v9156_v8  ;;  %v9337_v40 = vpop.f32.mrf.mxu1 }
 0x18c   : > { %7431 = vmatpush3.bf16.msra.mxu1 %v9236_v6  ;;  %11889 = vst [vmem:[#allocation45_spill] sm:$0xff] %v9337_v40 }
 0x18d   : > { %7432 = vmatprep.subr.bf16.mxu1 %v9270_v61  ;;  %v7381_v56 = vpop.f32.mrf.mxu1 }
 0x18e   : > { %2549 = vrot.lane.b32.xlu0 %v9270_v61, %s8743_s26 }
 0x18f   : > { %v9343_v60 = vpop.f32.mrf.mxu1 }
 0x190   : > { %7433 = vmatpush3.bf16.msra.mxu1 %v9270_v61  ;;  %11890 = vst [vmem:[#allocation46_spill] sm:$0xff] %v9343_v60 }
 0x191   : > { %7434 = vmatprep.subr.bf16.mxu1 %v9282_v13  ;;  %v7384_v14 = vpop.f32.mrf.mxu1 }
 0x192   : > { %2547 = vrot.lane.b32.xlu0 %v9282_v13, %s8743_s26  ;;  %7419 = vmatmul.mubr.msk.bf16.gmra.mxu1 %vm1008_vm0, %v9204_v62  ;;  %v906_v25 = vadd.f32 %v7384_v14, %v9192_v42 }
 0x194   : > { %7435 = vmatpush3.bf16.msra.mxu1 %v9282_v13 }
 0x195   : > { %7436 = vmatprep.subr.bf16.mxu1 %v9247_v23 }
 0x196   : > { %2545 = vrot.lane.b32.xlu0 %v9247_v23, %s8743_s26 }
 0x198   : > { %7437 = vmatpush3.bf16.msra.mxu1 %v9247_v23 }
 0x19a   : > { %2775 = vrot.lane.b32.xlu0 %v9082_v54, %s8744_s28  ;;  %v893_v54 = vadd.f32 %v7381_v56, %v9192_v42 }
 0x19c   : > { %v1542_v20 = vpop.permute.xlu1 %1541  ;;  %v9345_v48 = vpack.c.bf16 %v893_v54, %v890_v46 }
 0x19e   : > { %2773 = vrot.lane.b32.xlu0 %v9039_v10, %s8744_s28  ;;  %11891 = vst [vmem:[#allocation47_spill] sm:$0xff] %v9345_v48  ;;  %v9349_v10 = vpop.f32.mrf.mxu1 }
 0x19f   : > { %11892 = vst [vmem:[#allocation48_spill] sm:$0xff] %v9349_v10 }
 0x1a0   : > { %v1540_v57 = vpop.permute.xlu1 %1539  ;;  %v7385_v43 = vpop.f32.mrf.mxu1 }
 0x1a1   : > { %v909_v49 = vadd.f32 %v7385_v43, %v9192_v42 }
 0x1a2   : > { %1945 = vrot.lane.b32.xlu0 %v9264_v16, %s8742_s20  ;;  %v9354_v39 = vpop.f32.mrf.mxu1 }
 0x1a3   : > { %11893 = vst [vmem:[#allocation49_spill] sm:$0xff] %v9354_v39  ;;  %v9361_v36 = vpack.c.bf16 %v909_v49, %v906_v25 }
 0x1a4   : > { %v1536_v5 = vpop.permute.xlu1 %1535  ;;  %v7388_v2 = vpop.f32.mrf.mxu1 }
 0x1a5   : > { %11894 = vst [vmem:[#allocation50_spill] sm:$0xff] %v9361_v36  ;;  %v922_v44 = vadd.f32 %v7388_v2, %v9192_v42  ;;  %v1587_v2 = vsel %vm1008_vm0, %v1542_v20, 0  ;;  %v1578_v32 = vsel %vm1008_vm0, %v1536_v5, 0 }
 0x1a6   : > { %2557 = vrot.lane.b32.xlu0 %v9264_v16, %s8743_s26  ;;  %v9363_v21 = vpop.f32.mrf.mxu1 }
 0x1a7   : > { %11895 = vst [vmem:[#allocation51_spill] sm:$0xff] %v9363_v21 }
 0x1a8   : > { %v9351_v7 = vpop.permute.xlu1 %1531  ;;  %v7389_v46 = vpop.f32.mrf.mxu1 }
 0x1a9   : > { %v925_v54 = vadd.f32 %v7389_v46, %v9192_v42 }
 0x1ab   : > { %v9373_v25 = vpack.c.bf16 %v925_v54, %v922_v44  ;;  %v1584_v44 = vsel %vm1008_vm0, %v1540_v57, 0 }
 0x1ac   : > { %v1546_v31 = vpop.permute.xlu0 %1545 }
 0x1ad   : > { %v9357_v55 = vpop.permute.xlu1 %2165  ;;  %7974 = vmatprep.subr.msk.bf16.mxu0 %vm1008_vm0, %v1546_v31  ;;  %v1593_v15 = vsel %vm1008_vm0, %v1546_v31, 0  ;;  %11896 = vst [vmem:[#allocation52_spill] sm:$0xff] %v9373_v25 }
 0x1ae   : > { %7455 = vmatpush3.bf16.xpose.msra.mxu0 %v1593_v15 }
 0x1b0   : > { %v1544_v29 = vpop.permute.xlu0 %1543 }
 0x1b1   : > { %v9365_v27 = vpop.permute.xlu1 %2163  ;;  %7975 = vmatprep.subr.msk.bf16.mxu0 %vm1008_vm0, %v1544_v29  ;;  %v1590_v43 = vsel %vm1008_vm0, %v1544_v29, 0 }
 0x1b4   : > { %v1538_v56 = vpop.permute.xlu0 %1537 }
 0x1b5   : > { %v9370_v14 = vpop.permute.xlu1 %2159 }
 0x1b6   : > { %7457 = vmatpush3.bf16.xpose.msra.mxu0 %v1590_v43 }
 0x1b7   : > { %7976 = vmatprep.subr.msk.bf16.mxu0 %vm1008_vm0, %v1542_v20 }
 0x1b8   : > { %v1534_v31 = vpop.permute.xlu0 %1533 }
 0x1b9   : > { %v1512_v49 = vpop.permute.xlu1 %1511 }
 0x1bc   : > { %v1508_v15 = vpop.permute.xlu0 %1507 }
 0x1bd   : > { %v9376_v53 = vpop.permute.xlu1 %2155  ;;  %7470 = vmatprep.mubr.msk.bf16.mxu0 %vm1008_vm0, %v1508_v15  ;;  %v1581_v15 = vsel %vm1008_vm0, %v1538_v56, 0 }
 0x1be   : > { %7459 = vmatpush3.bf16.xpose.msra.mxu0 %v1587_v2 }
 0x1bf   : > { %7977 = vmatprep.subr.msk.bf16.mxu0 %vm1008_vm0, %v1540_v57 }
 0x1c1   : > { %v9381_v46 = vpop.permute.xlu1 %1517 }
 0x1c5   : > { %v9383_v29 = vpop.permute.xlu1 %1519 }
 0x1c6   : > { %7461 = vmatpush3.bf16.xpose.msra.mxu0 %v1584_v44  ;;  %v1510_v44 = vpop.permute.xlu0 %1509 }
 0x1c7   : > { %7978 = vmatprep.subr.msk.bf16.mxu0 %vm1008_vm0, %v1538_v56  ;;  %v1575_v56 = vsel %vm1008_vm0, %v1534_v31, 0 }
 0x1c9   : > { %v9387_v54 = vpop.permute.xlu1 %2151 }
 0x1ca   : > { %v2162_v12 = vpop.permute.xlu0 %2161 }
 0x1cd   : > { %v9389_v43 = vpop.permute.xlu1 %2137 }
 0x1ce   : > { %7463 = vmatpush3.bf16.xpose.msra.mxu0 %v1581_v15  ;;  %v9405_v15 = vpop.f32.mrf.mxu0  ;;  %v2158_v3 = vpop.permute.xlu0 %2157 }
 0x1cf   : > { %7979 = vmatprep.subr.msk.bf16.mxu0 %vm1008_vm0, %v1536_v5  ;;  %11897 = vst [vmem:[#allocation53_spill] sm:$0xff] %v9405_v15  ;;  %v944_v5 = vmul.f32 0.17677669, %v689_v1 }
 0x1d1   : > { %v9393_v20 = vpop.permute.xlu1 %2141 }
 0x1d5   : > { %v9395_v2 = vpop.permute.xlu1 %2145 }
 0x1d6   : > { %7465 = vmatpush3.bf16.xpose.msra.mxu0 %v1578_v32  ;;  %v692_v32 = vpop.f32.mrf.mxu0 }
 0x1d7   : > { %7980 = vmatprep.subr.msk.bf16.mxu0 %vm1008_vm0, %v1534_v31  ;;  %v693_v50 = vadd.f32 %v692_v32, %v8960_v45 }
 0x1d8   : > { %v9411_v4 = vpop.f32.mrf.mxu0 }
 0x1d9   : > { %v9399_v57 = vpop.permute.xlu1 %2149  ;;  %11898 = vst [vmem:[#allocation54_spill] sm:$0xff] %v9411_v4  ;;  %v945_v19 = vmul.f32 0.17677669, %v693_v50 }
 0x1da   : > { %v698_v28 = vpop.f32.mrf.mxu0 }
 0x1db   : > { %v9413_v22 = vpack.c.bf16 %v945_v19, %v944_v5  ;;  %v699_v31 = vadd.f32 %v698_v28, %v8960_v45 }
 0x1dc   : > { %v9418_v15 = vpop.f32.mrf.mxu0 }
 0x1dd   : > { %v9402_v58 = vpop.permute.xlu1 %1947  ;;  %11899 = vst [vmem:[#allocation55_spill] sm:$0xff] %v9413_v22  ;;  %11900 = vst [vmem:[#allocation56_spill] sm:$0xff] %v9418_v15  ;;  %v946_v32 = vmul.f32 0.17677669, %v699_v31 }
 0x1de   : > { %7467 = vmatpush3.bf16.xpose.msra.mxu0 %v1575_v56  ;;  %7486 = vmatprep.subr.bf16.mxu1 %v9402_v58  ;;  %v1572_v56 = vsel %vm1008_vm0, %v9351_v7, 0  ;;  %v702_v1 = vpop.f32.mrf.mxu0 }
 0x1df   : > { %7981 = vmatprep.subr.msk.bf16.mxu0 %vm1008_vm0, %v9351_v7  ;;  %v703_v4 = vadd.f32 %v702_v1, %v8960_v45  ;;  %v1514_v7 = vpop.permute.xlu0 %1513 }
 0x1e0   : > { %v9423_v50 = vpop.f32.mrf.mxu0 }
 0x1e1   : > { %11901 = vst [vmem:[#allocation57_spill] sm:$0xff] %v9423_v50  ;;  %v947_v5 = vmul.f32 0.17677669, %v703_v4 }
 0x1e2   : > { %v708_v19 = vpop.f32.mrf.mxu0 }
 0x1e3   : > { %v9425_v22 = vpack.c.bf16 %v947_v5, %v946_v32  ;;  %v709_v28 = vadd.f32 %v708_v19, %v8960_v45  ;;  %v1516_v19 = vpop.permute.xlu0 %1515 }
 0x1e4   : > { %v9431_v15 = vpop.f32.mrf.mxu0 }
 0x1e5   : > { %11902 = vst [vmem:[#allocation58_spill] sm:$0xff] %v9425_v22  ;;  %11903 = vst [vmem:[#allocation59_spill] sm:$0xff] %v9431_v15  ;;  %v948_v31 = vmul.f32 0.17677669, %v709_v28 }
 0x1e6   : > { %7469 = vmatpush3.bf16.xpose.msra.mxu0 %v1572_v56  ;;  %v2213_v56 = vsel %vm1008_vm0, %v9357_v55, 0  ;;  %v712_v4 = vpop.f32.mrf.mxu0 }
 0x1e7   : > { %7982 = vmatprep.subr.msk.bf16.mxu0 %vm1008_vm0, %v9357_v55  ;;  %v713_v1 = vadd.f32 %v712_v4, %v8960_v45 }
 0x1e8   : > { %v9437_v32 = vpop.f32.mrf.mxu0 }
 0x1e9   : > { %11904 = vst [vmem:[#allocation60_spill] sm:$0xff] %v9437_v32  ;;  %v949_v5 = vmul.f32 0.17677669, %v713_v1  ;;  %v9580_v32 = vpop.permute.xlu1 %1941 }
 0x1eb   : > { %v9439_v22 = vpack.c.bf16 %v949_v5, %v948_v31  ;;  %v2154_v31 = vpop.permute.xlu0 %2153 }
 0x1ed   : > { %7471 = vmatmul.mubr.msk.bf16.vlgmr.msra.gmra.mxu0 %vm1008_vm0, %v1510_v44  ;;  %v718_v44 = vpop.f32.mrf.mxu0  ;;  %11905 = vst [vmem:[#allocation61_spill] sm:$0xff] %v9439_v22  ;;  %v9588_v35 = vpop.permute.xlu1 %1939 }
 0x1ee   : > { %7474 = vmatprep.mubr.msk.bf16.mxu0 %vm1008_vm0, %v1512_v49  ;;  %7519 = vmatpush3.bf16.xpose.msra.mxu0 %v2213_v56  ;;  %v719_v55 = vadd.f32 %v718_v44, %v8960_v45  ;;  %v2210_v49 = vsel %vm1008_vm0, %v9365_v27, 0  ;;  %v9481_v44 = vpop.f32.mrf.mxu1 }
 0x1ef   : > { %7983 = vmatprep.subr.msk.bf16.mxu0 %vm1008_vm0, %v9365_v27  ;;  %v9445_v56 = vpop.f32.mrf.mxu0  ;;  %v2207_v27 = vsel %vm1008_vm0, %v2162_v12, 0  ;;  %11908 = vst [vmem:[#allocation64_spill] sm:$0xff] %v9481_v44 }
 0x1f0   : > { %11906 = vst [vmem:[#allocation62_spill] sm:$0xff] %v9445_v56  ;;  %v950_v4 = vmul.f32 0.17677669, %v719_v55 }
 0x1f1   : > { %v722_v28 = vpop.f32.mrf.mxu0  ;;  %v9603_v6 = vpop.permute.xlu1 %1933 }
 0x1f2   : > { %v723_v1 = vadd.f32 %v722_v28, %v8960_v45  ;;  %v2204_v45 = vsel %vm1008_vm0, %v9370_v14, 0 }
 0x1f3   : > { %v9584_v15 = vpop.f32.mrf.mxu0 }
 0x1f4   : > { %v951_v5 = vmul.f32 0.17677669, %v723_v1  ;;  %11914 = vst [vmem:[#allocation70_spill] sm:$0xff] %v9584_v15 }
 0x1f5   : > { %7475 = vmatmul.mubr.msk.bf16.gmra.mxu0 %vm1008_vm0, %v1514_v7  ;;  %v1522_v7 = vpop.permute.xlu0 %1521  ;;  %v9619_v37 = vpop.permute.xlu1 %2559 }
 0x1f6   : > { %7478 = vmatprep.mubr.msk.bf16.mxu0 %vm1008_vm0, %v1516_v19  ;;  %7521 = vmatpush3.bf16.xpose.msra.mxu0 %v2210_v49  ;;  %v9450_v22 = vpack.c.bf16 %v951_v5, %v950_v4 }
 0x1f7   : > { %7984 = vmatprep.subr.msk.bf16.mxu0 %vm1008_vm0, %v2162_v12  ;;  %v2201_v12 = vsel %vm1008_vm0, %v2158_v3, 0 }
 0x1f8   : > { %11907 = vst [vmem:[#allocation63_spill] sm:$0xff] %v9450_v22 }
 0x1f9   : > { %v2136_v19 = vpop.permute.xlu0 %2135  ;;  %v9639_v36 = vpop.permute.xlu1 %2553 }
 0x1fa   : > { %11917 = vst [vmem:[#allocation73_spill] sm:$0xff] %v9639_v36 }
 0x1fd   : > { %7479 = vmatmul.mubr.msk.bf16.gmra.mxu0 %vm1008_vm0, %v9381_v46  ;;  %v2198_v46 = vsel %vm1008_vm0, %v9376_v53, 0 }
 0x1fe   : > { %7482 = vmatprep.mubr.msk.bf16.mxu0 %vm1008_vm0, %v9383_v29  ;;  %7523 = vmatpush3.bf16.xpose.msra.mxu0 %v2207_v27  ;;  %v2140_v29 = vpop.permute.xlu0 %2139 }
 0x1ff   : > { %7985 = vmatprep.subr.msk.bf16.mxu0 %vm1008_vm0, %v9370_v14  ;;  %v2195_v14 = vsel %vm1008_vm0, %v2154_v31, 0 }
 0x205   : > { %7483 = vmatmul.mubr.msk.bf16.gmra.mxu0 %vm1008_vm0, %v1522_v7 }
 0x206   : > { %7525 = vmatpush3.bf16.xpose.msra.mxu0 %v2204_v45  ;;  %7534 = vmatprep.mubr.msk.bf16.mxu0 %vm1008_vm0, %v2136_v19 }
 0x207   : > { %7986 = vmatprep.subr.msk.bf16.mxu0 %vm1008_vm0, %v2158_v3  ;;  %v2192_v3 = vsel %vm1008_vm0, %v9387_v54, 0 }
 0x20e   : > { %7527 = vmatpush3.bf16.xpose.msra.mxu0 %v2201_v12 }
 0x20f   : > { %7987 = vmatprep.subr.msk.bf16.mxu0 %vm1008_vm0, %v9376_v53  ;;  %v2144_v53 = vpop.permute.xlu0 %2143 }
 0x216   : > { %7529 = vmatpush3.bf16.xpose.msra.mxu0 %v2198_v46 }
 0x217   : > { %7988 = vmatprep.subr.msk.bf16.mxu0 %vm1008_vm0, %v2154_v31 }
 0x21e   : > { %7531 = vmatpush3.bf16.xpose.msra.mxu0 %v2195_v14 }
 0x21f   : > { %7989 = vmatprep.subr.msk.bf16.mxu0 %vm1008_vm0, %v9387_v54 }
 0x226   : > { %7533 = vmatpush3.bf16.xpose.msra.mxu0 %v2192_v3 }
 0x22d   : > { %7535 = vmatmul.mubr.msk.bf16.vlgmr.msra.gmra.mxu0 %vm1008_vm0, %v9389_v43  ;;  %v2148_v43 = vpop.permute.xlu0 %2147 }
 0x22e   : > { %7538 = vmatprep.mubr.msk.bf16.mxu0 %vm1008_vm0, %v2140_v29 }
 0x235   : > { %7539 = vmatmul.mubr.msk.bf16.gmra.mxu0 %vm1008_vm0, %v9393_v20 }
 0x236   : > { %7542 = vmatprep.mubr.msk.bf16.mxu0 %vm1008_vm0, %v2144_v53 }
 0x23a   : > { %v9486_v55 = vpop.f32.mrf.mxu1 }
 0x23b   : > { %1238 = vmax.xlane.f32.xlu0 %v9486_v55 }
 0x23c   : > { %v9490_v54 = vpop.f32.mrf.mxu1 }
 0x23d   : > { %7543 = vmatmul.mubr.msk.bf16.gmra.mxu0 %vm1008_vm0, %v9395_v2 }
 0x23e   : > { %v9494_v49 = vpop.f32.mrf.mxu1  ;;  %7546 = vmatprep.mubr.msk.bf16.mxu0 %vm1008_vm0, %v2148_v43 }
 0x23f   : > { %v6663_v20 = vpack.c.bf16 %v9494_v49, %v9486_v55  ;;  %1234 = vmax.xlane.f32.xlu0 %v9490_v54 }
 0x240   : > { %v9500_v28 = vpop.f32.mrf.mxu1 }
 0x241   : > { %6975 = vst [vmem:[%s9502_s10 + $0x8] sm:$0xff] %v6663_v20   ;;  %v6658_v2 = vpack.c.bf16 %v9500_v28, %v9490_v54  ;;  %1236 = vmax.xlane.f32.xlu1 %v9500_v28 }
 0x242   : > { %v9508_v4 = vpop.f32.mrf.mxu1 }
 0x243   : > { %6659 = vst [vmem:[%s9502_s10] sm:$0xff] %v6658_v2   ;;  %1240 = vmax.xlane.f32.xlu0 %v9494_v49 }
 0x244   : > { %v9512_v1 = vpop.f32.mrf.mxu1 }
 0x245   : > { %7547 = vmatmul.mubr.msk.bf16.gmra.mxu0 %vm1008_vm0, %v9399_v57  ;;  %1246 = vmax.xlane.f32.xlu1 %v9508_v4 }
 0x246   : > { %v9517_v31 = vpop.f32.mrf.mxu1 }
 0x247   : > { %v6673_v5 = vpack.c.bf16 %v9517_v31, %v9508_v4  ;;  %1248 = vmax.xlane.f32.xlu0 %v9517_v31 }
 0x248   : > { %v9522_v27 = vpop.f32.mrf.mxu1 }
 0x249   : > { %6977 = vst [vmem:[%s9502_s10 + $0x18] sm:$0xff] %v6673_v5   ;;  %v6668_v7 = vpack.c.bf16 %v9522_v27, %v9512_v1  ;;  %1242 = vmax.xlane.f32.xlu1 %v9512_v1  ;;  %v9566_v5 = vpop.permute.xlu0 %1943 }
 0x24a   : > { %v9528_v57 = vpop.f32.mrf.mxu1 }
 0x24b   : > { %6976 = vst [vmem:[%s9502_s10 + $0x10] sm:$0xff] %v6668_v7   ;;  %1244 = vmax.xlane.f32.xlu0 %v9522_v27 }
 0x24c   : > { %v9532_v19 = vpop.f32.mrf.mxu1 }
 0x24d   : > { %1254 = vmax.xlane.f32.xlu1 %v9528_v57  ;;  %v9568_v7 = vpop.permute.xlu0 %1937 }
 0x24e   : > { %v9535_v45 = vpop.f32.mrf.mxu1 }
 0x24f   : > { %v6683_v12 = vpack.c.bf16 %v9535_v45, %v9528_v57  ;;  %1256 = vmax.xlane.f32.xlu0 %v9535_v45 }
 0x250   : > { %v9540_v46 = vpop.f32.mrf.mxu1 }
 0x251   : > { %6979 = vst [vmem:[%s9502_s10 + $0x28] sm:$0xff] %v6683_v12   ;;  %v6678_v14 = vpack.c.bf16 %v9540_v46, %v9532_v19  ;;  %1250 = vmax.xlane.f32.xlu1 %v9532_v19  ;;  %v9570_v12 = vpop.permute.xlu0 %1935 }
 0x252   : > { %v9546_v3 = vpop.f32.mrf.mxu1 }
 0x253   : > { %6978 = vst [vmem:[%s9502_s10 + $0x20] sm:$0xff] %v6678_v14   ;;  %1252 = vmax.xlane.f32.xlu0 %v9540_v46 }
 0x254   : > { %v9550_v29 = vpop.f32.mrf.mxu1 }
 0x255   : > { %1262 = vmax.xlane.f32.xlu1 %v9546_v3  ;;  %v9572_v14 = vpop.permute.xlu0 %2555 }
 0x256   : > { %v9553_v53 = vpop.f32.mrf.mxu1  ;;  %11909 = vst [vmem:[#allocation65_spill] sm:$0xff] %v9572_v14 }
 0x257   : > { %v6693_v43 = vpack.c.bf16 %v9553_v53, %v9546_v3  ;;  %1264 = vmax.xlane.f32.xlu0 %v9553_v53 }
 0x258   : > { %v9558_v20 = vpop.f32.mrf.mxu1 }
 0x259   : > { %6981 = vst [vmem:[%s9502_s10 + $0x38] sm:$0xff] %v6693_v43   ;;  %v6688_v2 = vpack.c.bf16 %v9558_v20, %v9550_v29  ;;  %1258 = vmax.xlane.f32.xlu1 %v9550_v29  ;;  %v9574_v22 = vpop.permute.xlu0 %2551 }
 0x25a   : > { %11910 = vst [vmem:[#allocation66_spill] sm:$0xff] %v9574_v22 }
 0x25b   : > { %6980 = vst [vmem:[%s9502_s10 + $0x30] sm:$0xff] %v6688_v2   ;;  %1260 = vmax.xlane.f32.xlu0 %v9558_v20 }
 0x25d   : > { %v9576_v50 = vpop.permute.xlu0 %2549 }
 0x25e   : > { %11911 = vst [vmem:[#allocation67_spill] sm:$0xff] %v9576_v50 }
 0x261   : > { %v9578_v43 = vpop.permute.xlu0 %2547 }
 0x262   : > { %11912 = vst [vmem:[#allocation68_spill] sm:$0xff] %v9578_v43 }
 0x265   : > { %v9582_v2 = vpop.permute.xlu0 %2545 }
 0x266   : > { %11913 = vst [vmem:[#allocation69_spill] sm:$0xff] %v9582_v2 }
 0x269   : > { %v9593_v13 = vpop.permute.xlu0 %2775 }
 0x26a   : > { %11915 = vst [vmem:[#allocation71_spill] sm:$0xff] %v9593_v13 }
 0x26d   : > { %v9610_v17 = vpop.permute.xlu0 %2773 }
 0x26e   : > { %11916 = vst [vmem:[#allocation72_spill] sm:$0xff] %v9610_v17  ;;  %v9657_v17 = vpop.permute.xlu1 %2777 }
 0x26f   : > { %11919 = vst [vmem:[#allocation75_spill] sm:$0xff] %v9657_v17 }
 0x2ad   : > { %v9586_v56 = vpop.f32.mrf.mxu0 }
 0x2ae   : > { %1777 = vmax.xlane.f32.xlu1 %v9586_v56 }
 0x2af   : > { %v9591_v63 = vpop.f32.mrf.mxu0 }
 0x2b1   : > { %v9595_v23 = vpop.f32.mrf.mxu0 }
 0x2b2   : > { %v6703_v61 = vpack.c.bf16 %v9595_v23, %v9586_v56  ;;  %1773 = vmax.xlane.f32.xlu1 %v9591_v63  ;;  %1779 = vmax.xlane.f32.xlu0 %v9595_v23 }
 0x2b3   : > { %v9601_v15 = vpop.f32.mrf.mxu0 }
 0x2b4   : > { %6983 = vst [vmem:[%s9502_s10 + $0x48] sm:$0xff] %v6703_v61   ;;  %v6698_v59 = vpack.c.bf16 %v9601_v15, %v9591_v63  ;;  %v9621_v61 = vpop.permute.xlu0 %1945 }
 0x2b5   : > { %v9608_v33 = vpop.f32.mrf.mxu0 }
 0x2b6   : > { %6982 = vst [vmem:[%s9502_s10 + $0x40] sm:$0xff] %v6698_v59   ;;  %1785 = vmax.xlane.f32.xlu1 %v9608_v33  ;;  %1775 = vmax.xlane.f32.xlu0 %v9601_v15 }
 0x2b7   : > { %v9615_v16 = vpop.f32.mrf.mxu0 }
 0x2b8   : > { %v9641_v39 = vpop.permute.xlu0 %2557 }
 0x2b9   : > { %v9617_v30 = vpop.f32.mrf.mxu0  ;;  %11918 = vst [vmem:[#allocation74_spill] sm:$0xff] %v9641_v39 }
 0x2ba   : > { %v6713_v47 = vpack.c.bf16 %v9617_v30, %v9608_v33  ;;  %1781 = vmax.xlane.f32.xlu1 %v9615_v16  ;;  %1787 = vmax.xlane.f32.xlu0 %v9617_v30 }
 0x2bb   : > { %v9627_v59 = vpop.f32.mrf.mxu0 }
 0x2bc   : > { %6985 = vst [vmem:[%s9502_s10 + $0x58] sm:$0xff] %v6713_v47   ;;  %v6708_v48 = vpack.c.bf16 %v9627_v59, %v9615_v16 }
 0x2bd   : > { %v9632_v60 = vpop.f32.mrf.mxu0 }
 0x2be   : > { %6984 = vst [vmem:[%s9502_s10 + $0x50] sm:$0xff] %v6708_v48   ;;  %1793 = vmax.xlane.f32.xlu1 %v9632_v60  ;;  %1783 = vmax.xlane.f32.xlu0 %v9627_v59 }
 0x2bf   : > { %v9637_v40 = vpop.f32.mrf.mxu0 }
 0x2c1   : > { %v9643_v10 = vpop.f32.mrf.mxu0 }
 0x2c2   : > { %v6723_v47 = vpack.c.bf16 %v9643_v10, %v9632_v60  ;;  %1789 = vmax.xlane.f32.xlu1 %v9637_v40  ;;  %1795 = vmax.xlane.f32.xlu0 %v9643_v10 }
 0x2c3   : > { %v9649_v48 = vpop.f32.mrf.mxu0 }
 0x2c4   : > { %6987 = vst [vmem:[%s9502_s10 + $0x68] sm:$0xff] %v6723_v47   ;;  %v6718_v44 = vpack.c.bf16 %v9649_v48, %v9637_v40  ;;  %v1239_v21 = vpop.xlane.xlu0 %1238 }
 0x2c5   : > { %v1268_v42 = vsub.f32 %v9486_v55, %v1239_v21  ;;  %v9655_v25 = vpop.f32.mrf.mxu0 }
 0x2c6   : > { %6986 = vst [vmem:[%s9502_s10 + $0x60] sm:$0xff] %v6718_v44   ;;  %1801 = vmax.xlane.f32.xlu1 %v9655_v25  ;;  %1791 = vmax.xlane.f32.xlu0 %v9649_v48 }
 0x2c7   : > { %v1286_v13 = vmul.f32 1.442695, %v1268_v42  ;;  %v9662_v2 = vpop.f32.mrf.mxu0 }
 0x2c8   : > { %v1235_v47 = vpop.xlane.xlu0 %1234 }
 0x2c9   : > { %8137 = vpow2.f32 %v1286_v13  ;;  %v1266_v62 = vsub.f32 %v9490_v54, %v1235_v47  ;;  %v9665_v43 = vpop.f32.mrf.mxu0 }
 0x2ca   : > { %v6733_v21 = vpack.c.bf16 %v9665_v43, %v9655_v25  ;;  %v1237_v55 = vpop.xlane.xlu1 %1236  ;;  %1797 = vmax.xlane.f32.xlu1 %v9662_v2  ;;  %1803 = vmax.xlane.f32.xlu0 %v9665_v43 }
 0x2cb   : > { %v1282_v44 = vmul.f32 1.442695, %v1266_v62  ;;  %v9671_v17 = vpop.f32.mrf.mxu0  ;;  %v1267_v54 = vsub.f32 %v9500_v28, %v1237_v55 }
 0x2cc   : > { %6989 = vst [vmem:[%s9502_s10 + $0x78] sm:$0xff] %v6733_v21   ;;  %v6728_v42 = vpack.c.bf16 %v9671_v17, %v9662_v2  ;;  %v1241_v13 = vpop.xlane.xlu0 %1240 }
 0x2cd   : > { %8139 = vpow2.f32 %v1282_v44  ;;  %v1269_v47 = vsub.f32 %v9494_v49, %v1241_v13  ;;  %v1284_v52 = vmul.f32 1.442695, %v1267_v54 }
 0x2ce   : > { %6988 = vst [vmem:[%s9502_s10 + $0x70] sm:$0xff] %v6728_v42   ;;  %v1247_v41 = vpop.xlane.xlu1 %1246  ;;  %1799 = vmax.xlane.f32.xlu0 %v9671_v17 }
 0x2cf   : > { %v1288_v50 = vmul.f32 1.442695, %v1269_v47  ;;  %v1272_v8 = vsub.f32 %v9508_v4, %v1247_v41 }
 0x2d0   : > { %v1249_v62 = vpop.xlane.xlu0 %1248 }
 0x2d1   : > { %8141 = vpow2.f32 %v1288_v50  ;;  %v1294_v21 = vmul.f32 1.442695, %v1272_v8  ;;  %v1273_v22 = vsub.f32 %v9517_v31, %v1249_v62 }
 0x2d2   : > { %v1243_v51 = vpop.xlane.xlu1 %1242 }
 0x2d3   : > { %8143 = vpow2.f32 %v1294_v21  ;;  %v1270_v44 = vsub.f32 %v9512_v1, %v1243_v51  ;;  %v1296_v49 = vmul.f32 1.442695, %v1273_v22 }
 0x2d4   : > { %v1245_v28 = vpop.xlane.xlu0 %1244  ;;  %8145 = vpow2.f32 %v1284_v52 }
 0x2d5   : > { %v1290_v55 = vmul.f32 1.442695, %v1270_v44  ;;  %v1271_v42 = vsub.f32 %v9522_v27, %v1245_v28 }
 0x2d6   : > { %v9684_v13 = vpop.eup %8137  ;;  %v1255_v47 = vpop.xlane.xlu1 %1254 }
 0x2d7   : > { %8147 = vpow2.f32 %v1290_v55  ;;  %v1276_v41 = vsub.f32 %v9528_v57, %v1255_v47  ;;  %1318 = vadd.xlane.f32.xlu1 %v9684_v13  ;;  %v1292_v50 = vmul.f32 1.442695, %v1271_v42 }
 0x2d8   : > { %v1257_v8 = vpop.xlane.xlu0 %1256  ;;  %8149 = vpow2.f32 %v1296_v49 }
 0x2d9   : > { %v1302_v4 = vmul.f32 1.442695, %v1276_v41  ;;  %v1277_v51 = vsub.f32 %v9535_v45, %v1257_v8 }
 0x2da   : > { %v9689_v1 = vpop.eup %8139  ;;  %v1251_v22 = vpop.xlane.xlu1 %1250 }
 0x2db   : > { %8151 = vpow2.f32 %v1302_v4  ;;  %v1274_v52 = vsub.f32 %v9532_v19, %v1251_v22  ;;  %1314 = vadd.xlane.f32.xlu1 %v9689_v1  ;;  %v1304_v27 = vmul.f32 1.442695, %v1277_v51 }
 0x2dc   : > { %v1253_v31 = vpop.xlane.xlu0 %1252  ;;  %8153 = vpow2.f32 %v1292_v50 }
 0x2dd   : > { %v1298_v57 = vmul.f32 1.442695, %v1274_v52  ;;  %v1275_v54 = vsub.f32 %v9540_v46, %v1253_v31 }
 0x2de   : > { %v9694_v62 = vpop.eup %8141  ;;  %v1263_v21 = vpop.xlane.xlu1 %1262 }
 0x2df   : > { %8155 = vpow2.f32 %v1298_v57  ;;  %v1280_v45 = vsub.f32 %v9546_v3, %v1263_v21  ;;  %1320 = vadd.xlane.f32.xlu0 %v9694_v62  ;;  %v1300_v19 = vmul.f32 1.442695, %v1275_v54 }
 0x2e0   : > { %v9698_v44 = vpop.eup %8143  ;;  %8157 = vpow2.f32 %v1304_v27  ;;  %v1265_v49 = vpop.xlane.xlu0 %1264 }
 0x2e1   : > { %1326 = vadd.xlane.f32.xlu1 %v9698_v44  ;;  %v9701_v28 = vpop.eup %8145  ;;  %v1310_v55 = vmul.f32 1.442695, %v1280_v45  ;;  %8159 = vpow2.f32 %v1300_v19  ;;  %v1281_v3 = vsub.f32 %v9553_v53, %v1265_v49 }
 0x2e2   : > { %v1259_v42 = vpop.xlane.xlu1 %1258 }
 0x2e3   : > { %1316 = vadd.xlane.f32.xlu0 %v9701_v28  ;;  %8161 = vpow2.f32 %v1310_v55  ;;  %v1278_v41 = vsub.f32 %v9550_v29, %v1259_v42  ;;  %v1312_v50 = vmul.f32 1.442695, %v1281_v3 }
 0x2e4   : > { %v9704_v46 = vpop.eup %8147  ;;  %v1261_v51 = vpop.xlane.xlu0 %1260 }
 0x2e5   : > { %1322 = vadd.xlane.f32.xlu1 %v9704_v46  ;;  %v9708_v47 = vpop.eup %8149  ;;  %v1306_v22 = vmul.f32 1.442695, %v1278_v41  ;;  %8163 = vpow2.f32 %v1312_v50  ;;  %v1279_v52 = vsub.f32 %v9558_v20, %v1261_v51 }
 0x2e7   : > { %1328 = vadd.xlane.f32.xlu0 %v9708_v47  ;;  %8165 = vpow2.f32 %v1306_v22  ;;  %v1308_v57 = vmul.f32 1.442695, %v1279_v52 }
 0x2e8   : > { %v9712_v8 = vpop.eup %8151 }
 0x2e9   : > { %1334 = vadd.xlane.f32.xlu1 %v9712_v8  ;;  %v9715_v4 = vpop.eup %8153  ;;  %8167 = vpow2.f32 %v1308_v57 }
 0x2eb   : > { %1324 = vadd.xlane.f32.xlu0 %v9715_v4 }
 0x2ec   : > { %v9718_v53 = vpop.eup %8155 }
 0x2ed   : > { %v9721_v29 = vpop.f32.mrf.mxu0  ;;  %1330 = vadd.xlane.f32.xlu1 %v9718_v53  ;;  %v9724_v31 = vpop.eup %8157 }
 0x2ee   : > { %v9732_v21 = vpop.eup %8159 }
 0x2ef   : > { %v9726_v27 = vpop.f32.mrf.mxu0  ;;  %1336 = vadd.xlane.f32.xlu0 %v9724_v31 }
 0x2f0   : > { %v9739_v19 = vpop.eup %8161 }
 0x2f1   : > { %v9729_v54 = vpop.f32.mrf.mxu0  ;;  %2397 = vmax.xlane.f32.xlu1 %v9721_v29 }
 0x2f2   : > { %v6743_v20 = vpack.c.bf16 %v9729_v54, %v9721_v29  ;;  %v9754_v41 = vpop.eup %8163 }
 0x2f3   : > { %v9736_v45 = vpop.f32.mrf.mxu0  ;;  %1332 = vadd.xlane.f32.xlu0 %v9732_v21 }
 0x2f4   : > { %6991 = vst [vmem:[%s9502_s10 + $0x88] sm:$0xff] %v6743_v20   ;;  %v6738_v49 = vpack.c.bf16 %v9736_v45, %v9726_v27  ;;  %v9761_v22 = vpop.eup %8165 }
 0x2f5   : > { %v9744_v55 = vpop.f32.mrf.mxu0  ;;  %1342 = vadd.xlane.f32.xlu1 %v9739_v19 }
 0x2f6   : > { %6990 = vst [vmem:[%s9502_s10 + $0x80] sm:$0xff] %v6738_v49   ;;  %v9776_v18 = vpop.eup %8167 }
 0x2f7   : > { %v9748_v42 = vpop.f32.mrf.mxu0  ;;  %2399 = vmax.xlane.f32.xlu0 %v9729_v54 }
 0x2f9   : > { %v9751_v3 = vpop.f32.mrf.mxu0  ;;  %2393 = vmax.xlane.f32.xlu1 %v9726_v27 }
 0x2fa   : > { %v6753_v50 = vpack.c.bf16 %v9751_v3, %v9744_v55 }
 0x2fb   : > { %v9758_v51 = vpop.f32.mrf.mxu0  ;;  %1344 = vadd.xlane.f32.xlu0 %v9754_v41 }
 0x2fc   : > { %11920 = vst [vmem:[#allocation76_spill] sm:$0xff] %v9758_v51  ;;  %6993 = vst [vmem:[%s9502_s10 + $0x98] sm:$0xff] %v6753_v50   ;;  %v6748_v52 = vpack.c.bf16 %v9758_v51, %v9748_v42 }
 0x2fd   : > { %v9766_v57 = vpop.f32.mrf.mxu0  ;;  %1338 = vadd.xlane.f32.xlu1 %v9761_v22 }
 0x2fe   : > { %11921 = vst [vmem:[#allocation77_spill] sm:$0xff] %v9766_v57  ;;  %6992 = vst [vmem:[%s9502_s10 + $0x90] sm:$0xff] %v6748_v52  }
 0x2ff   : > { %v9770_v20 = vpop.f32.mrf.mxu0  ;;  %2395 = vmax.xlane.f32.xlu0 %v9736_v45 }
 0x300   : > { %11922 = vst [vmem:[#allocation78_spill] sm:$0xff] %v9770_v20 }
 0x301   : > { %v9773_v49 = vpop.f32.mrf.mxu0  ;;  %2405 = vmax.xlane.f32.xlu1 %v9744_v55 }
 0x302   : > { %11923 = vst [vmem:[#allocation79_spill] sm:$0xff] %v9773_v49  ;;  %v6763_v50 = vpack.c.bf16 %v9773_v49, %v9766_v57 }
 0x303   : > { %v9780_v36 = vpop.f32.mrf.mxu0  ;;  %1340 = vadd.xlane.f32.xlu0 %v9776_v18 }
 0x304   : > { %11924 = vst [vmem:[#allocation80_spill] sm:$0xff] %v9780_v36  ;;  %6995 = vst [vmem:[%s9502_s10 + $0xa8] sm:$0xff] %v6763_v50   ;;  %v6758_v52 = vpack.c.bf16 %v9780_v36, %v9770_v20 }
 0x305   : > { %v9786_v26 = vpop.f32.mrf.mxu0  ;;  %2401 = vmax.xlane.f32.xlu1 %v9748_v42 }
 0x306   : > { %11925 = vst [vmem:[#allocation81_spill] sm:$0xff] %v9786_v26  ;;  %6994 = vst [vmem:[%s9502_s10 + $0xa0] sm:$0xff] %v6758_v52  }
 0x307   : > { %v9790_v38 = vpop.f32.mrf.mxu0  ;;  %2407 = vmax.xlane.f32.xlu0 %v9751_v3 }
 0x308   : > { %11926 = vst [vmem:[#allocation82_spill] sm:$0xff] %v9790_v38 }
 0x309   : > { %v9793_v14 = vpop.f32.mrf.mxu0  ;;  %2413 = vmax.xlane.f32.xlu1 %v9766_v57 }
 0x30a   : > { %11927 = vst [vmem:[#allocation83_spill] sm:$0xff] %v9793_v14  ;;  %v6773_v0 = vpack.c.bf16 %v9793_v14, %v9786_v26 }
 0x30b   : > { %v9798_v50 = vpop.f32.mrf.mxu0  ;;  %2403 = vmax.xlane.f32.xlu0 %v9758_v51 }
 0x30c   : > { %11928 = vst [vmem:[#allocation84_spill] sm:$0xff] %v9798_v50  ;;  %6997 = vst [vmem:[%s9502_s10 + $0xb8] sm:$0xff] %v6773_v0   ;;  %v6768_v11 = vpack.c.bf16 %v9798_v50, %v9790_v38 }
 0x30d   : > { %2409 = vmax.xlane.f32.xlu1 %v9770_v20 }
 0x30e   : > { %6996 = vst [vmem:[%s9502_s10 + $0xb0] sm:$0xff] %v6768_v11  }
 0x30f   : > { %2415 = vmax.xlane.f32.xlu0 %v9773_v49 }
 0x311   : > { %2421 = vmax.xlane.f32.xlu1 %v9786_v26 }
 0x313   : > { %2411 = vmax.xlane.f32.xlu0 %v9780_v36 }
 0x317   : > { %2417 = vmax.xlane.f32.xlu0 %v9790_v38 }
 0x31b   : > { %2423 = vmax.xlane.f32.xlu0 %v9793_v14 }
 0x31f   : > { %2419 = vmax.xlane.f32.xlu0 %v9798_v50 }
 0x337   : > { %v1778_v52 = vpop.xlane.xlu1 %1777 }
 0x338   : > { %v1807_v0 = vsub.f32 %v9586_v56, %v1778_v52 }
 0x33a   : > { %v1825_v39 = vmul.f32 1.442695, %v1807_v0 }
 0x33b   : > { %v1774_v34 = vpop.xlane.xlu1 %1773  ;;  %v1780_v51 = vpop.xlane.xlu0 %1779 }
 0x33c   : > { %8169 = vpow2.f32 %v1825_v39  ;;  %v1805_v11 = vsub.f32 %v9591_v63, %v1774_v34  ;;  %v1808_v49 = vsub.f32 %v9595_v23, %v1780_v51 }
 0x33e   : > { %v1821_v26 = vmul.f32 1.442695, %v1805_v11  ;;  %v1827_v20 = vmul.f32 1.442695, %v1808_v49 }
 0x33f   : > { %v1786_v36 = vpop.xlane.xlu1 %1785  ;;  %v1776_v57 = vpop.xlane.xlu0 %1775 }
 0x340   : > { %8171 = vpow2.f32 %v1821_v26  ;;  %v1811_v14 = vsub.f32 %v9608_v33, %v1786_v36  ;;  %v1806_v50 = vsub.f32 %v9601_v15, %v1776_v57 }
 0x341   : > { %8173 = vpow2.f32 %v1827_v20 }
 0x342   : > { %v1833_v38 = vmul.f32 1.442695, %v1811_v14  ;;  %v1823_v56 = vmul.f32 1.442695, %v1806_v50 }
 0x343   : > { %v1782_v52 = vpop.xlane.xlu1 %1781  ;;  %v1788_v0 = vpop.xlane.xlu0 %1787 }
 0x344   : > { %8175 = vpow2.f32 %v1833_v38  ;;  %v1809_v39 = vsub.f32 %v9615_v16, %v1782_v52  ;;  %v1812_v63 = vsub.f32 %v9617_v30, %v1788_v0 }
 0x345   : > { %8177 = vpow2.f32 %v1823_v56 }
 0x346   : > { %v1829_v34 = vmul.f32 1.442695, %v1809_v39  ;;  %v1835_v26 = vmul.f32 1.442695, %v1812_v63 }
 0x347   : > { %v1794_v23 = vpop.xlane.xlu1 %1793  ;;  %v1784_v51 = vpop.xlane.xlu0 %1783 }
 0x348   : > { %8179 = vpow2.f32 %v1829_v34  ;;  %v1810_v33 = vsub.f32 %v9627_v59, %v1784_v51  ;;  %v1815_v15 = vsub.f32 %v9632_v60, %v1794_v23 }
 0x349   : > { %v9820_v36 = vpop.eup %8169  ;;  %8181 = vpow2.f32 %v1835_v26 }
 0x34a   : > { %v1831_v14 = vmul.f32 1.442695, %v1810_v33  ;;  %1857 = vadd.xlane.f32.xlu0 %v9820_v36  ;;  %v1841_v20 = vmul.f32 1.442695, %v1815_v15 }
 0x34b   : > { %v1790_v38 = vpop.xlane.xlu1 %1789  ;;  %v1796_v57 = vpop.xlane.xlu0 %1795 }
 0x34c   : > { %v1813_v16 = vsub.f32 %v9637_v40, %v1790_v38  ;;  %8183 = vpow2.f32 %v1831_v14  ;;  %v1816_v49 = vsub.f32 %v9643_v10, %v1796_v57 }
 0x34d   : > { %v9825_v30 = vpop.eup %8171 }
 0x34e   : > { %v1837_v50 = vmul.f32 1.442695, %v1813_v16  ;;  %1853 = vadd.xlane.f32.xlu0 %v9825_v30  ;;  %v9829_v60 = vpop.eup %8173  ;;  %v1843_v40 = vmul.f32 1.442695, %v1816_v49 }
 0x34f   : > { %v1802_v59 = vpop.xlane.xlu1 %1801  ;;  %v1792_v11 = vpop.xlane.xlu0 %1791 }
 0x350   : > { %8185 = vpow2.f32 %v1837_v50  ;;  %v1819_v56 = vsub.f32 %v9655_v25, %v1802_v59  ;;  %v1814_v0 = vsub.f32 %v9649_v48, %v1792_v11 }
 0x351   : > { %v9832_v52 = vpop.eup %8175  ;;  %8187 = vpow2.f32 %v1841_v20 }
 0x352   : > { %v1849_v39 = vmul.f32 1.442695, %v1819_v56  ;;  %1865 = vadd.xlane.f32.xlu1 %v9832_v52  ;;  %1859 = vadd.xlane.f32.xlu0 %v9829_v60  ;;  %v9837_v34 = vpop.eup %8177  ;;  %v1839_v26 = vmul.f32 1.442695, %v1814_v0 }
 0x353   : > { %v1798_v10 = vpop.xlane.xlu1 %1797  ;;  %v1804_v63 = vpop.xlane.xlu0 %1803 }
 0x354   : > { %8189 = vpow2.f32 %v1849_v39  ;;  %v1817_v23 = vsub.f32 %v9662_v2, %v1798_v10  ;;  %v1820_v25 = vsub.f32 %v9665_v43, %v1804_v63 }
 0x355   : > { %v9841_v51 = vpop.eup %8179  ;;  %8191 = vpow2.f32 %v1843_v40 }
 0x356   : > { %v1845_v33 = vmul.f32 1.442695, %v1817_v23  ;;  %1861 = vadd.xlane.f32.xlu1 %v9841_v51  ;;  %1855 = vadd.xlane.f32.xlu0 %v9837_v34  ;;  %v1851_v48 = vmul.f32 1.442695, %v1820_v25  ;;  %v9846_v38 = vpop.eup %8181 }
 0x357   : > { %v1800_v15 = vpop.xlane.xlu0 %1799 }
 0x358   : > { %8193 = vpow2.f32 %v1845_v33  ;;  %v1818_v14 = vsub.f32 %v9671_v17, %v1800_v15 }
 0x359   : > { %8195 = vpow2.f32 %v1839_v26  ;;  %v9848_v2 = vpop.eup %8183 }
 0x35a   : > { %v1847_v43 = vmul.f32 1.442695, %v1818_v14  ;;  %1867 = vadd.xlane.f32.xlu1 %v9846_v38  ;;  %8197 = vpow2.f32 %v1851_v48  ;;  %1863 = vadd.xlane.f32.xlu0 %v9848_v2 }
 0x35c   : > { %8199 = vpow2.f32 %v1847_v43 }
 0x35d   : > { %v9852_v57 = vpop.eup %8185 }
 0x35e   : > { %v9854_v16 = vpop.eup %8187  ;;  %1869 = vadd.xlane.f32.xlu1 %v9852_v57 }
 0x35f   : > { %1873 = vadd.xlane.f32.xlu0 %v9854_v16 }
 0x360   : > { %v1319_v17 = vpop.xlane.xlu1 %1318 }
 0x361   : > { %v9858_v20 = vpop.eup %8189 }
 0x362   : > { %11929 = vst [vmem:[#allocation85_spill] sm:$0xff] %v9858_v20  ;;  %v9860_v49 = vpop.eup %8191  ;;  %1881 = vadd.xlane.f32.xlu1 %v9858_v20 }
 0x363   : > { %1875 = vadd.xlane.f32.xlu0 %v9860_v49 }
 0x364   : > { %v1315_v11 = vpop.xlane.xlu1 %1314 }
 0x365   : > { %v9864_v50 = vpop.eup %8193 }
 0x366   : > { %11930 = vst [vmem:[#allocation86_spill] sm:$0xff] %v9864_v50  ;;  %v9866_v59 = vpop.eup %8195  ;;  %1877 = vadd.xlane.f32.xlu1 %v9864_v50 }
 0x367   : > { %1871 = vadd.xlane.f32.xlu0 %v9866_v59  ;;  %v9870_v56 = vpop.eup %8197 }
 0x368   : > { %11931 = vst [vmem:[#allocation87_spill] sm:$0xff] %v9870_v56  ;;  %v1321_v40 = vpop.xlane.xlu0 %1320 }
 0x369   : > { %v9872_v0 = vpop.eup %8199  ;;  %8201 = vrcp.f32 %v1321_v40 }
 0x36a   : > { %11932 = vst [vmem:[#allocation88_spill] sm:$0xff] %v9872_v0  ;;  %v1327_v39 = vpop.xlane.xlu1 %1326  ;;  %1883 = vadd.xlane.f32.xlu1 %v9870_v56  ;;  %8203 = vrcp.f32 %v1315_v11 }
 0x36b   : > { %1879 = vadd.xlane.f32.xlu0 %v9872_v0  ;;  %8205 = vrcp.f32 %v1319_v17 }
 0x36c   : > { %v1317_v10 = vpop.xlane.xlu0 %1316 }
 0x36d   : > { %8207 = vrcp.f32 %v1317_v10 }
 0x36e   : > { %v1323_v63 = vpop.xlane.xlu1 %1322 }
 0x370   : > { %v1329_v23 = vpop.xlane.xlu0 %1328 }
 0x371   : > { %8209 = vrcp.f32 %v1329_v23 }
 0x372   : > { %v1335_v25 = vpop.xlane.xlu1 %1334  ;;  %8211 = vrcp.f32 %v1323_v63 }
 0x373   : > { %8213 = vrcp.f32 %v1327_v39 }
 0x374   : > { %v1325_v26 = vpop.xlane.xlu0 %1324 }
 0x375   : > { %8215 = vrcp.f32 %v1325_v26 }
 0x376   : > { %v1331_v33 = vpop.xlane.xlu1 %1330  ;;  %v8202_v48 = vpop.eup %8201 }
 0x377   : > { %v8204_v15 = vpop.eup %8203  ;;  %v1365_v17 = vmul.f32 %v8202_v48, %v9694_v62 }
 0x378   : > { %v1337_v14 = vpop.xlane.xlu0 %1336  ;;  %v8206_v43 = vpop.eup %8205  ;;  %v1362_v23 = vmul.f32 %v8204_v15, %v9689_v1 }
 0x379   : > { %8217 = vrcp.f32 %v1337_v14  ;;  %v1364_v26 = vmul.f32 %v8206_v43, %v9684_v13 }
 0x37a   : > { %v8208_v40 = vpop.eup %8207  ;;  %v2398_v11 = vpop.xlane.xlu1 %2397  ;;  %8219 = vrcp.f32 %v1331_v33 }
 0x37b   : > { %v2427_v10 = vsub.f32 %v9721_v29, %v2398_v11  ;;  %v1363_v63 = vmul.f32 %v8208_v40, %v9701_v28  ;;  %8221 = vrcp.f32 %v1335_v25  ;;  %v1379_v50 = vpack.c.bf16 %v1365_v17, %v1364_v26 }
 0x37c   : > { %v1333_v39 = vpop.xlane.xlu0 %1332 }
 0x37d   : > { %v2445_v20 = vmul.f32 1.442695, %v2427_v10  ;;  %8223 = vrcp.f32 %v1333_v39  ;;  %v1378_v56 = vpack.c.bf16 %v1363_v63, %v1362_v23 }
 0x37e   : > { %v1343_v0 = vpop.xlane.xlu1 %1342  ;;  %v8210_v14 = vpop.eup %8209 }
 0x37f   : > { %8225 = vpow2.f32 %v2445_v20  ;;  %7438 = vmatprep.mubr.bf16.mxu1 %v1378_v56  ;;  %v8212_v62 = vpop.eup %8211  ;;  %v1369_v25 = vmul.f32 %v8210_v14, %v9708_v47 }
 0x380   : > { %7439 = vmatmul.mubr.bf16.vlgmr.msra.gmra.mxu1 %v1379_v50  ;;  %v2400_v33 = vpop.xlane.xlu0 %2399  ;;  %v8214_v29 = vpop.eup %8213  ;;  %v1366_v20 = vmul.f32 %v8212_v62, %v9704_v46 }
 0x381   : > { %7487 = vmatpush3.bf16.msra.mxu1 %v9402_v58  ;;  %v2428_v1 = vsub.f32 %v9729_v54, %v2400_v33  ;;  %v1368_v43 = vmul.f32 %v8214_v29, %v9698_v44 }
 0x382   : > { %v8216_v28 = vpop.eup %8215  ;;  %7488 = vmatprep.subr.bf16.mxu1 %v9621_v61  ;;  %v2394_v13 = vpop.xlane.xlu1 %2393 }
 0x383   : > { %v2447_v48 = vmul.f32 1.442695, %v2428_v1  ;;  %v2425_v15 = vsub.f32 %v9726_v27, %v2394_v13  ;;  %v1367_v56 = vmul.f32 %v8216_v28, %v9715_v4  ;;  %v1381_v40 = vpack.c.bf16 %v1369_v25, %v1368_v43 }
 0x384   : > { %v1345_v50 = vpop.xlane.xlu0 %1344 }
 0x385   : > { %8227 = vpow2.f32 %v2447_v48  ;;  %v2441_v58 = vmul.f32 1.442695, %v2425_v15  ;;  %7489 = vmatpush3.bf16.msra.mxu1 %v9621_v61  ;;  %v1380_v54 = vpack.c.bf16 %v1367_v56, %v1366_v20 }
 0x386   : > { %7490 = vmatprep.subr.bf16.mxu1 %v9566_v5  ;;  %v8218_v11 = vpop.eup %8217  ;;  %v1339_v17 = vpop.xlane.xlu1 %1338 }
 0x387   : > { %8229 = vpow2.f32 %v2441_v58  ;;  %7442 = vmatprep.mubr.bf16.mxu1 %v1380_v54  ;;  %v8220_v47 = vpop.eup %8219  ;;  %v1373_v61 = vmul.f32 %v8218_v11, %v9724_v31 }
 0x388   : > { %7443 = vmatmul.mubr.bf16.gmra.mxu1 %v1381_v40  ;;  %v2396_v27 = vpop.xlane.xlu0 %2395  ;;  %v8222_v46 = vpop.eup %8221  ;;  %8231 = vrcp.f32 %v1343_v0  ;;  %v1370_v23 = vmul.f32 %v8220_v47, %v9718_v53  ;;  %v11934_v40 = vld [vmem:[#allocation76_spill] sm:$0xff] }
 0x389   : > { %7491 = vmatpush3.bf16.msra.mxu1 %v9566_v5  ;;  %v2426_v44 = vsub.f32 %v9736_v45, %v2396_v27  ;;  %8233 = vrcp.f32 %v1345_v50  ;;  %v1372_v5 = vmul.f32 %v8222_v46, %v9712_v8  ;;  %v11935_v27 = vld [vmem:[#allocation78_spill] sm:$0xff] }
 0x38a   : > { %v8224_v4 = vpop.eup %8223  ;;  %7492 = vmatprep.subr.bf16.mxu1 %v9580_v32  ;;  %8235 = vrcp.f32 %v1339_v17  ;;  %v2406_v13 = vpop.xlane.xlu1 %2405  ;;  %v11936_v17 = vld [vmem:[#allocation81_spill] sm:$0xff] }
 0x38b   : > { %v2443_v10 = vmul.f32 1.442695, %v2426_v44  ;;  %v1371_v63 = vmul.f32 %v8224_v4, %v9732_v21  ;;  %v1383_v31 = vpack.c.bf16 %v1373_v61, %v1372_v5  ;;  %v2431_v56 = vsub.f32 %v9744_v55, %v2406_v13  ;;  %v11937_v4 = vld [vmem:[#allocation79_spill] sm:$0xff]  ;;  %v11939_v5 = vld [vmem:[#allocation80_spill] sm:$0xff] }
 0x38c   : > { %v9897_v39 = vpop.eup %8225  ;;  %v1341_v26 = vpop.xlane.xlu0 %1340 }
 0x38d   : > { %8237 = vpow2.f32 %v2443_v10  ;;  %7493 = vmatpush3.bf16.msra.mxu1 %v9580_v32  ;;  %2477 = vadd.xlane.f32.xlu0 %v9897_v39  ;;  %v1382_v45 = vpack.c.bf16 %v1371_v63, %v1370_v23  ;;  %v2453_v54 = vmul.f32 1.442695, %v2431_v56  ;;  %v11938_v23 = vld [vmem:[#allocation82_spill] sm:$0xff] }
 0x38e   : > { %8239 = vrcp.f32 %v1341_v26  ;;  %7494 = vmatprep.subr.bf16.mxu1 %v9588_v35  ;;  %v2402_v25 = vpop.xlane.xlu1 %2401 }
 0x38f   : > { %7446 = vmatprep.mubr.bf16.mxu1 %v1382_v45 }
 0x390   : > { %7447 = vmatmul.mubr.bf16.gmra.mxu1 %v1383_v31  ;;  %v2408_v28 = vpop.xlane.xlu0 %2407 }
 0x391   : > { %7495 = vmatpush3.bf16.msra.mxu1 %v9588_v35  ;;  %v2432_v15 = vsub.f32 %v9751_v3, %v2408_v28 }
 0x392   : > { %v9904_v53 = vpop.eup %8227  ;;  %7496 = vmatprep.subr.bf16.mxu1 %v9568_v7 }
 0x393   : > { %2479 = vadd.xlane.f32.xlu0 %v9904_v53  ;;  %v2455_v50 = vmul.f32 1.442695, %v2432_v15 }
 0x394   : > { %v9908_v8 = vpop.eup %8229 }
 0x395   : > { %7497 = vmatpush3.bf16.msra.mxu1 %v9568_v7  ;;  %2473 = vadd.xlane.f32.xlu1 %v9908_v8  ;;  %v8232_v32 = vpop.eup %8231 }
 0x396   : > { %7498 = vmatprep.subr.bf16.mxu1 %v9570_v12  ;;  %v8234_v21 = vpop.eup %8233  ;;  %v1376_v29 = vmul.f32 %v8232_v32, %v9739_v19 }
 0x397   : > { %v8236_v0 = vpop.eup %8235  ;;  %v1377_v62 = vmul.f32 %v8234_v21, %v9754_v41  ;;  %v2404_v41 = vpop.xlane.xlu0 %2403 }
 0x398   : > { %v1374_v7 = vmul.f32 %v8236_v0, %v9761_v22  ;;  %v2430_v11 = vsub.f32 %v11934_v40, %v2404_v41  ;;  %v11940_v0 = vld [vmem:[#allocation83_spill] sm:$0xff] }
 0x399   : > { %7499 = vmatpush3.bf16.msra.mxu1 %v9570_v12  ;;  %v1385_v1 = vpack.c.bf16 %v1377_v62, %v1376_v29 }
 0x39a   : > { %v9914_v35 = vpop.eup %8237  ;;  %7500 = vmatprep.subr.bf16.mxu1 %v9603_v6  ;;  %v2451_v46 = vmul.f32 1.442695, %v2430_v11 }
 0x39b   : > { %v8240_v14 = vpop.eup %8239  ;;  %2475 = vadd.xlane.f32.xlu0 %v9914_v35  ;;  %v2416_v22 = vpop.xlane.xlu0 %2415 }
 0x39c   : > { %v1375_v33 = vmul.f32 %v8240_v14, %v9776_v18  ;;  %v2414_v18 = vpop.xlane.xlu1 %2413  ;;  %v2436_v61 = vsub.f32 %v11937_v4, %v2416_v22 }
 0x39d   : > { %7501 = vmatpush3.bf16.msra.mxu1 %v9603_v6  ;;  %v2429_v6 = vsub.f32 %v9748_v42, %v2402_v25 }
 0x39e   : > { %7550 = vmatprep.subr.bf16.mxu1 %v9619_v37  ;;  %v1384_v12 = vpack.c.bf16 %v1375_v33, %v1374_v7  ;;  %v2463_v26 = vmul.f32 1.442695, %v2436_v61  ;;  %v11941_v7 = vld [vmem:[#allocation84_spill] sm:$0xff] }
 0x39f   : > { %v2412_v19 = vpop.xlane.xlu0 %2411  ;;  %v2449_v48 = vmul.f32 1.442695, %v2429_v6 }
 0x3a0   : > { %7450 = vmatprep.mubr.bf16.mxu1 %v1384_v12  ;;  %v2410_v20 = vpop.xlane.xlu1 %2409  ;;  %v2434_v45 = vsub.f32 %v11939_v5, %v2412_v19 }
 0x3a1   : > { %7451 = vmatmul.mubr.bf16.gmra.mxu1 %v1385_v1  ;;  %8241 = vpow2.f32 %v2449_v48  ;;  %v2433_v42 = vsub.f32 %v11935_v27, %v2410_v20 }
 0x3a2   : > { %8243 = vpow2.f32 %v2455_v50  ;;  %v2459_v62 = vmul.f32 1.442695, %v2434_v45 }
 0x3a3   : > { %v2418_v58 = vpop.xlane.xlu0 %2417  ;;  %8245 = vpow2.f32 %v2453_v54  ;;  %v2457_v55 = vmul.f32 1.442695, %v2433_v42 }
 0x3a4   : > { %v2422_v47 = vpop.xlane.xlu1 %2421  ;;  %v2437_v63 = vsub.f32 %v11938_v23, %v2418_v58 }
 0x3a5   : > { %v2439_v3 = vsub.f32 %v11936_v17, %v2422_v47 }
 0x3a6   : > { %2771 = vrot.lane.b32.xlu1 %v9047_v24, %s8744_s28  ;;  %v11933_v24 = vld [vmem:[#allocation77_spill] sm:$0xff]  ;;  %v2465_v21 = vmul.f32 1.442695, %v2437_v63 }
 0x3a7   : > { %v2435_v43 = vsub.f32 %v11933_v24, %v2414_v18  ;;  %v2424_v44 = vpop.xlane.xlu0 %2423  ;;  %v2469_v10 = vmul.f32 1.442695, %v2439_v3 }
 0x3a8   : > { %v2440_v14 = vsub.f32 %v11940_v0, %v2424_v44 }
 0x3aa   : > { %v2471_v12 = vmul.f32 1.442695, %v2440_v14 }
 0x3ab   : > { %v2420_v32 = vpop.xlane.xlu0 %2419 }
 0x3ac   : > { %v2438_v33 = vsub.f32 %v11941_v7, %v2420_v32  ;;  %v11944_v7 = vld [vmem:[#allocation27_spill] sm:$0xff] }
 0x3ae   : > { %v9938_v31 = vpop.eup %8241  ;;  %v2467_v28 = vmul.f32 1.442695, %v2438_v33 }
 0x3af   : > { %v9943_v29 = vpop.eup %8243 }
 0x3b0   : > { %v9946_v1 = vpop.eup %8245 }
 0x3b1   : > { %2769 = vrot.lane.b32.xlu0 %v9109_v9, %s8744_s28  ;;  %v2461_v9 = vmul.f32 1.442695, %v2435_v43 }
 0x3b3   : > { %8247 = vpow2.f32 %v2461_v9 }
 0x3b4   : > { %8249 = vpow2.f32 %v2451_v46 }
 0x3b5   : > { %8251 = vpow2.f32 %v2457_v55 }
 0x3b6   : > { %8253 = vpow2.f32 %v2469_v10 }
 0x3b7   : > { %8255 = vpow2.f32 %v2463_v26 }
 0x3b8   : > { %8257 = vpow2.f32 %v2465_v21 }
 0x3b9   : > { %8259 = vpow2.f32 %v2459_v62  ;;  %v11943_v62 = vld [vmem:[#allocation74_spill] sm:$0xff] }
 0x3ba   : > { %8261 = vpow2.f32 %v2471_v12  ;;  %v11947_v12 = vld [vmem:[#allocation26_spill] sm:$0xff] }
 0x3bb   : > { %8263 = vpow2.f32 %v2467_v28 }
 0x3c0   : > { %v9949_v13 = vpop.eup %8247 }
 0x3c1   : > { %v9952_v41 = vpop.eup %8249 }
 0x3c2   : > { %v9955_v22 = vpop.eup %8251 }
 0x3c3   : > { %v9958_v18 = vpop.eup %8253 }
 0x3c4   : > { %v9961_v19 = vpop.eup %8255 }
 0x3c5   : > { %v9964_v48 = vpop.eup %8257 }
 0x3c6   : > { %v9967_v56 = vpop.eup %8259 }
 0x3c7   : > { %v9970_v50 = vpop.eup %8261 }
 0x3c8   : > { %v9973_v58 = vpop.eup %8263 }
 0x3ca   : > { %2481 = vadd.xlane.f32.xlu1 %v9938_v31 }
 0x3ce   : > { %2487 = vadd.xlane.f32.xlu1 %v9943_v29 }
 0x3d0   : > { %2485 = vadd.xlane.f32.xlu0 %v9946_v1 }
 0x3d2   : > { %2493 = vadd.xlane.f32.xlu1 %v9949_v13 }
 0x3d3   : > { %v1858_v25 = vpop.xlane.xlu0 %1857 }
 0x3d4   : > { %2483 = vadd.xlane.f32.xlu0 %v9952_v41 }
 0x3d6   : > { %2489 = vadd.xlane.f32.xlu1 %v9955_v22 }
 0x3d7   : > { %v1854_v6 = vpop.xlane.xlu0 %1853 }
 0x3d8   : > { %2501 = vadd.xlane.f32.xlu0 %v9958_v18 }
 0x3da   : > { %2495 = vadd.xlane.f32.xlu1 %v9961_v19 }
 0x3db   : > { %v1866_v15 = vpop.xlane.xlu1 %1865  ;;  %v1860_v20 = vpop.xlane.xlu0 %1859 }
 0x3dc   : > { %2497 = vadd.xlane.f32.xlu0 %v9964_v48  ;;  %8265 = vrcp.f32 %v1860_v20 }
 0x3dd   : > { %8267 = vrcp.f32 %v1854_v6  ;;  %v11948_v6 = vld [vmem:[#allocation28_spill] sm:$0xff] }
 0x3de   : > { %2491 = vadd.xlane.f32.xlu1 %v9967_v56  ;;  %8269 = vrcp.f32 %v1858_v25 }
 0x3df   : > { %v1862_v24 = vpop.xlane.xlu1 %1861  ;;  %v1856_v43 = vpop.xlane.xlu0 %1855 }
 0x3e0   : > { %2503 = vadd.xlane.f32.xlu0 %v9970_v50  ;;  %8271 = vrcp.f32 %v1856_v43 }
 0x3e1   : > { %8273 = vrcp.f32 %v1862_v24  ;;  %v11949_v24 = vld [vmem:[#allocation73_spill] sm:$0xff] }
 0x3e2   : > { %2499 = vadd.xlane.f32.xlu1 %v9973_v58 }
 0x3e3   : > { %v1868_v54 = vpop.xlane.xlu1 %1867  ;;  %v1864_v40 = vpop.xlane.xlu0 %1863 }
 0x3e4   : > { %8275 = vrcp.f32 %v1864_v40 }
 0x3e5   : > { %8277 = vrcp.f32 %v1868_v54  ;;  %v11951_v54 = vld [vmem:[#allocation31_spill] sm:$0xff] }
 0x3e6   : > { %8279 = vrcp.f32 %v1866_v15 }
 0x3e7   : > { %v1870_v11 = vpop.xlane.xlu1 %1869 }
 0x3e8   : > { %v1874_v47 = vpop.xlane.xlu0 %1873 }
 0x3e9   : > { %v8266_v9 = vpop.eup %8265 }
 0x3ea   : > { %v8268_v42 = vpop.eup %8267  ;;  %v1904_v44 = vmul.f32 %v8266_v9, %v9829_v60  ;;  %v11942_v60 = vld [vmem:[#allocation25_spill] sm:$0xff] }
 0x3eb   : > { %v1882_v27 = vpop.xlane.xlu1 %1881  ;;  %v8270_v17 = vpop.eup %8269  ;;  %v1901_v4 = vmul.f32 %v8268_v42, %v9825_v30 }
 0x3ec   : > { %v1876_v46 = vpop.xlane.xlu0 %1875  ;;  %v1903_v63 = vmul.f32 %v8270_v17, %v9820_v36  ;;  %v11953_v17 = vld [vmem:[#allocation21_spill] sm:$0xff] }
 0x3ed   : > { %v8272_v3 = vpop.eup %8271  ;;  %8281 = vrcp.f32 %v1876_v46  ;;  %v11952_v46 = vld [vmem:[#allocation66_spill] sm:$0xff] }
 0x3ee   : > { %8283 = vrcp.f32 %v1870_v11  ;;  %v1902_v61 = vmul.f32 %v8272_v3, %v9837_v34  ;;  %v8274_v10 = vpop.eup %8273  ;;  %v1918_v45 = vpack.c.bf16 %v1904_v44, %v1903_v63  ;;  %v11954_v44 = vld [vmem:[#allocation30_spill] sm:$0xff]  ;;  %v11959_v63 = vld [vmem:[#allocation87_spill] sm:$0xff] }
 0x3ef   : > { %v1878_v55 = vpop.xlane.xlu1 %1877  ;;  %8285 = vrcp.f32 %v1874_v47  ;;  %v1905_v30 = vmul.f32 %v8274_v10, %v9841_v51  ;;  %v11945_v51 = vld [vmem:[#allocation11_spill] sm:$0xff] }
 0x3f0   : > { %v1872_v23 = vpop.xlane.xlu0 %1871  ;;  %v1917_v26 = vpack.c.bf16 %v1902_v61, %v1901_v4  ;;  %v11957_v10 = vld [vmem:[#allocation67_spill] sm:$0xff] }
 0x3f1   : > { %8287 = vrcp.f32 %v1872_v23  ;;  %v8276_v5 = vpop.eup %8275  ;;  %v11958_v23 = vld [vmem:[#allocation29_spill] sm:$0xff] }
 0x3f2   : > { %v8278_v32 = vpop.eup %8277  ;;  %8289 = vrcp.f32 %v1878_v55  ;;  %7502 = vmatprep.mubr.bf16.mxu1 %v1917_v26  ;;  %v1906_v34 = vmul.f32 %v8276_v5, %v9848_v2  ;;  %v11956_v55 = vld [vmem:[#allocation88_spill] sm:$0xff]  ;;  %v11960_v5 = vld [vmem:[#allocation85_spill] sm:$0xff] }
 0x3f3   : > { %v1884_v21 = vpop.xlane.xlu1 %1883  ;;  %2767 = vrot.lane.b32.xlu1 %v11942_v60, %s8744_s28  ;;  %7503 = vmatmul.mubr.bf16.vlgmr.msra.gmra.mxu1 %v1918_v45  ;;  %v8280_v14 = vpop.eup %8279  ;;  %v1908_v33 = vmul.f32 %v8278_v32, %v9846_v38  ;;  %v11961_v32 = vld [vmem:[#allocation68_spill] sm:$0xff] }
 0x3f4   : > { %v1880_v0 = vpop.xlane.xlu0 %1879  ;;  %7551 = vmatpush3.bf16.msra.mxu1 %v9619_v37  ;;  %v1919_v36 = vpack.c.bf16 %v1906_v34, %v1905_v30  ;;  %v1907_v2 = vmul.f32 %v8280_v14, %v9832_v52  ;;  %v11946_v37 = vld [vmem:[#allocation65_spill] sm:$0xff]  ;;  %v11950_v52 = vld [vmem:[#allocation15_spill] sm:$0xff] }
 0x3f5   : > { %8291 = vrcp.f32 %v1880_v0  ;;  %7552 = vmatprep.subr.bf16.mxu1 %v11943_v62  ;;  %v11963_v30 = vld [vmem:[#allocation69_spill] sm:$0xff]  ;;  %v11964_v34 = vld [vmem:[#allocation75_spill] sm:$0xff] }
 0x3f6   : > { %8293 = vrcp.f32 %v1884_v21  ;;  %2765 = vrot.lane.b32.xlu0 %v11944_v7, %s8744_s28  ;;  %7506 = vmatprep.mubr.bf16.mxu1 %v1919_v36  ;;  %v1920_v28 = vpack.c.bf16 %v1908_v33, %v1907_v2  ;;  %v11962_v21 = vld [vmem:[#allocation33_spill] sm:$0xff] }
 0x3f7   : > { %2747 = vrot.lane.b32.xlu1 %v11945_v51, %s8744_s28  ;;  %8295 = vrcp.f32 %v1882_v27 }
 0x3f8   : > { %7553 = vmatpush3.bf16.msra.mxu1 %v11943_v62 }
 0x3f9   : > { %7554 = vmatprep.subr.bf16.mxu1 %v11946_v37 }
 0x3fa   : > { %2763 = vrot.lane.b32.xlu0 %v11947_v12, %s8744_s28  ;;  %v8282_v25 = vpop.eup %8281 }
 0x3fb   : > { %2751 = vrot.lane.b32.xlu1 %v11948_v6, %s8744_s28  ;;  %v8284_v38 = vpop.eup %8283  ;;  %7507 = vmatmul.mubr.bf16.gmra.mxu1 %v1920_v28  ;;  %v1912_v43 = vmul.f32 %v8282_v25, %v9860_v49 }
 0x3fc   : > { %v8286_v15 = vpop.eup %8285  ;;  %7555 = vmatpush3.bf16.msra.mxu1 %v11946_v37  ;;  %v1909_v40 = vmul.f32 %v8284_v38, %v9852_v57  ;;  %v11955_v57 = vld [vmem:[#allocation86_spill] sm:$0xff] }
 0x3fd   : > { %7556 = vmatprep.subr.bf16.mxu1 %v11949_v24  ;;  %v1911_v9 = vmul.f32 %v8286_v15, %v9854_v16  ;;  %v2825_v15 = vsel %vm1008_vm0, %v11964_v34, 0 }
 0x3fe   : > { %v8288_v20 = vpop.eup %8287  ;;  %2749 = vrot.lane.b32.xlu0 %v11950_v52, %s8744_s28 }
 0x3ff   : > { %2755 = vrot.lane.b32.xlu1 %v11951_v54, %s8744_s28  ;;  %v1910_v11 = vmul.f32 %v8288_v20, %v9866_v59  ;;  %v8290_v47 = vpop.eup %8289  ;;  %v1922_v49 = vpack.c.bf16 %v1912_v43, %v1911_v9  ;;  %v11965_v20 = vld [vmem:[#allocation71_spill] sm:$0xff] }
 0x400   : > { %7557 = vmatpush3.bf16.msra.mxu1 %v11949_v24  ;;  %v1913_v59 = vmul.f32 %v8290_v47, %v11955_v57 }
 0x401   : > { %v1921_v27 = vpack.c.bf16 %v1910_v11, %v1909_v40  ;;  %7558 = vmatprep.subr.bf16.mxu1 %v11952_v46 }
 0x402   : > { %v8292_v42 = vpop.eup %8291  ;;  %2753 = vrot.lane.b32.xlu0 %v11953_v17, %s8744_s28 }
 0x403   : > { %v8294_v3 = vpop.eup %8293  ;;  %7510 = vmatprep.mubr.bf16.mxu1 %v1921_v27  ;;  %2759 = vrot.lane.b32.xlu1 %v11954_v44, %s8744_s28  ;;  %v1914_v4 = vmul.f32 %v8292_v42, %v11956_v55 }
 0x404   : > { %7511 = vmatmul.mubr.bf16.gmra.mxu1 %v1922_v49  ;;  %v8296_v16 = vpop.eup %8295  ;;  %v1916_v26 = vmul.f32 %v8294_v3, %v11959_v63 }
 0x405   : > { %7559 = vmatpush3.bf16.msra.mxu1 %v11952_v46  ;;  %v1923_v61 = vpack.c.bf16 %v1914_v4, %v1913_v59  ;;  %v1915_v45 = vmul.f32 %v8296_v16, %v11960_v5 }
 0x406   : > { %7560 = vmatprep.subr.bf16.mxu1 %v11957_v10  ;;  %2757 = vrot.lane.b32.xlu0 %v11958_v23, %s8744_s28 }
 0x407   : > { %7514 = vmatprep.mubr.bf16.mxu1 %v1923_v61  ;;  %v1924_v60 = vpack.c.bf16 %v1916_v26, %v1915_v45 }
 0x409   : > { %7561 = vmatpush3.bf16.msra.mxu1 %v11957_v10 }
 0x40a   : > { %7562 = vmatprep.subr.bf16.mxu1 %v11961_v32  ;;  %2761 = vrot.lane.b32.xlu0 %v11962_v21, %s8744_s28 }
 0x40c   : > { %7515 = vmatmul.mubr.bf16.gmra.mxu1 %v1924_v60 }
 0x40d   : > { %7563 = vmatpush3.bf16.msra.mxu1 %v11961_v32 }
 0x40e   : > { %7564 = vmatprep.subr.bf16.mxu1 %v11963_v30 }
 0x411   : > { %7565 = vmatpush3.bf16.msra.mxu1 %v11963_v30 }
 0x412   : > { %7990 = vmatprep.subr.msk.bf16.mxu1 %vm1008_vm0, %v11964_v34 }
 0x416   : > { %v2478_v0 = vpop.xlane.xlu0 %2477 }
 0x41c   : > { %v2480_v14 = vpop.xlane.xlu0 %2479 }
 0x41d   : > { %8297 = vrcp.f32 %v2480_v14 }
 0x41e   : > { %v2474_v36 = vpop.xlane.xlu1 %2473 }
 0x41f   : > { %8299 = vrcp.f32 %v2474_v36 }
 0x420   : > { %8301 = vrcp.f32 %v2478_v0 }
 0x422   : > { %v2772_v40 = vpop.permute.xlu1 %2771 }
 0x423   : > { %v2816_v42 = vsel %vm1008_vm0, %v2772_v40, 0 }
 0x424   : > { %v2476_v62 = vpop.xlane.xlu0 %2475 }
 0x425   : > { %8303 = vrcp.f32 %v2476_v62 }
 0x428   : > { %v2770_v46 = vpop.permute.xlu0 %2769 }
 0x429   : > { %v2813_v59 = vsel %vm1008_vm0, %v2770_v46, 0 }
 0x42a   : > { %v8298_v7 = vpop.eup %8297 }
 0x42b   : > { %v2524_v37 = vmul.f32 %v8298_v7, %v9904_v53  ;;  %v2822_v53 = vsel %vm1008_vm0, %v11965_v20, 0 }
 0x42c   : > { %v8300_v33 = vpop.eup %8299 }
 0x42d   : > { %v8302_v51 = vpop.eup %8301  ;;  %v2521_v12 = vmul.f32 %v8300_v33, %v9908_v8  ;;  %v11966_v8 = vld [vmem:[#allocation72_spill] sm:$0xff] }
 0x42e   : > { %v2523_v25 = vmul.f32 %v8302_v51, %v9897_v39  ;;  %v2819_v54 = vsel %vm1008_vm0, %v11966_v8, 0 }
 0x430   : > { %v2538_v38 = vpack.c.bf16 %v2524_v37, %v2523_v25 }
 0x432   : > { %v8304_v2 = vpop.eup %8303 }
 0x433   : > { %v2522_v28 = vmul.f32 %v8304_v2, %v9914_v35 }
 0x435   : > { %v2537_v6 = vpack.c.bf16 %v2522_v28, %v2521_v12 }
 0x437   : > { %7566 = vmatprep.mubr.bf16.mxu1 %v2537_v6 }
 0x438   : > { %7567 = vmatmul.mubr.bf16.vlgmr.msra.gmra.mxu1 %v2538_v38 }
 0x439   : > { %7583 = vmatpush3.bf16.xpose.msra.mxu1 %v2825_v15 }
 0x43a   : > { %7991 = vmatprep.subr.msk.bf16.mxu1 %vm1008_vm0, %v11965_v20 }
 0x440   : > { %v7440_v24 = vpop.f32.mrf.mxu1 }
 0x441   : > { %1485 = vst.msk [vmem:[#allocation2 + $0x10] sm:$0xff] %vm1008_vm0, %v7440_v24  ;;  %7585 = vmatpush3.bf16.xpose.msra.mxu1 %v2822_v53 }
 0x442   : > { %7992 = vmatprep.subr.msk.bf16.mxu1 %vm1008_vm0, %v11966_v8  ;;  %v1420_v39 = vpop.f32.mrf.mxu1 }
 0x443   : > { %1483 = vst.msk [vmem:[#allocation2] sm:$0xff] %vm1008_vm0, %v1420_v39 }
 0x444   : > { %v7441_v35 = vpop.f32.mrf.mxu1 }
 0x445   : > { %1486 = vst.msk [vmem:[#allocation2 + $0x18] sm:$0xff] %vm1008_vm0, %v7441_v35 }
 0x446   : > { %v1423_v52 = vpop.f32.mrf.mxu1 }
 0x447   : > { %1484 = vst.msk [vmem:[#allocation2 + $0x8] sm:$0xff] %vm1008_vm0, %v1423_v52 }
 0x448   : > { %v7444_v43 = vpop.f32.mrf.mxu1 }
 0x449   : > { %1489 = vst.msk [vmem:[#allocation2 + $0x30] sm:$0xff] %vm1008_vm0, %v7444_v43  ;;  %7587 = vmatpush3.bf16.xpose.msra.mxu1 %v2819_v54 }
 0x44a   : > { %7993 = vmatprep.subr.msk.bf16.mxu1 %vm1008_vm0, %v2772_v40  ;;  %v1436_v11 = vpop.f32.mrf.mxu1 }
 0x44b   : > { %1487 = vst.msk [vmem:[#allocation2 + $0x20] sm:$0xff] %vm1008_vm0, %v1436_v11 }
 0x44c   : > { %v7445_v47 = vpop.f32.mrf.mxu1 }
 0x44d   : > { %1490 = vst.msk [vmem:[#allocation2 + $0x38] sm:$0xff] %vm1008_vm0, %v7445_v47 }
 0x44e   : > { %v1439_v9 = vpop.f32.mrf.mxu1 }
 0x44f   : > { %1488 = vst.msk [vmem:[#allocation2 + $0x28] sm:$0xff] %vm1008_vm0, %v1439_v9 }
 0x450   : > { %v7448_v27 = vpop.f32.mrf.mxu1 }
 0x451   : > { %1493 = vst.msk [vmem:[#allocation2 + $0x50] sm:$0xff] %vm1008_vm0, %v7448_v27  ;;  %7589 = vmatpush3.bf16.xpose.msra.mxu1 %v2816_v42  ;;  %v11967_v27 = vld [vmem:[#allocation52_spill] sm:$0xff] }
 0x452   : > { %7994 = vmatprep.subr.msk.bf16.mxu1 %vm1008_vm0, %v2770_v46  ;;  %v1452_v17 = vpop.f32.mrf.mxu1  ;;  %v11970_v46 = vld [vmem:[#allocation64_spill] sm:$0xff] }
 0x453   : > { %1491 = vst.msk [vmem:[#allocation2 + $0x40] sm:$0xff] %vm1008_vm0, %v1452_v17  ;;  %v2482_v49 = vpop.xlane.xlu1 %2481 }
 0x454   : > { %v7449_v3 = vpop.f32.mrf.mxu1 }
 0x455   : > { %1494 = vst.msk [vmem:[#allocation2 + $0x58] sm:$0xff] %vm1008_vm0, %v7449_v3  ;;  %v11971_v3 = vld [vmem:[#allocation48_spill] sm:$0xff] }
 0x456   : > { %v1455_v44 = vpop.f32.mrf.mxu1 }
 0x457   : > { %1492 = vst.msk [vmem:[#allocation2 + $0x48] sm:$0xff] %vm1008_vm0, %v1455_v44  ;;  %v2488_v57 = vpop.xlane.xlu1 %2487 }
 0x459   : > { %7591 = vmatpush3.bf16.xpose.msra.mxu1 %v2813_v59  ;;  %v2486_v55 = vpop.xlane.xlu0 %2485 }
 0x45a   : > { %8305 = vrcp.f32 %v2486_v55  ;;  %v11973_v55 = vld [vmem:[#allocation50_spill] sm:$0xff] }
 0x45b   : > { %v2494_v4 = vpop.xlane.xlu1 %2493  ;;  %8307 = vrcp.f32 %v2482_v49 }
 0x45c   : > { %8309 = vrcp.f32 %v2488_v57  ;;  %v11972_v57 = vld [vmem:[#allocation49_spill] sm:$0xff] }
 0x45d   : > { %v2484_v16 = vpop.xlane.xlu0 %2483 }
 0x45e   : > { %8311 = vrcp.f32 %v2484_v16 }
 0x45f   : > { %v2490_v61 = vpop.xlane.xlu1 %2489 }
 0x461   : > { %v7452_v10 = vpop.f32.mrf.mxu1  ;;  %v2502_v23 = vpop.xlane.xlu0 %2501 }
 0x462   : > { %1497 = vst.msk [vmem:[#allocation2 + $0x70] sm:$0xff] %vm1008_vm0, %v7452_v10  ;;  %v11974_v10 = vld [vmem:[#allocation45_spill] sm:$0xff] }
 0x463   : > { %v1468_v63 = vpop.f32.mrf.mxu1  ;;  %v2496_v26 = vpop.xlane.xlu1 %2495 }
 0x464   : > { %1495 = vst.msk [vmem:[#allocation2 + $0x60] sm:$0xff] %vm1008_vm0, %v1468_v63  ;;  %8313 = vrcp.f32 %v2496_v26  ;;  %v11975_v63 = vld [vmem:[#allocation46_spill] sm:$0xff] }
 0x465   : > { %v7453_v5 = vpop.f32.mrf.mxu1  ;;  %v2498_v45 = vpop.xlane.xlu0 %2497  ;;  %8315 = vrcp.f32 %v2490_v61 }
 0x466   : > { %1498 = vst.msk [vmem:[#allocation2 + $0x78] sm:$0xff] %vm1008_vm0, %v7453_v5  ;;  %8317 = vrcp.f32 %v2494_v4  ;;  %v11976_v5 = vld [vmem:[#allocation47_spill] sm:$0xff] }
 0x467   : > { %v1471_v32 = vpop.f32.mrf.mxu1  ;;  %v2492_v21 = vpop.xlane.xlu1 %2491 }
 0x468   : > { %v8306_v60 = vpop.eup %8305  ;;  %1496 = vst.msk [vmem:[#allocation2 + $0x68] sm:$0xff] %vm1008_vm0, %v1471_v32  ;;  %8319 = vrcp.f32 %v2492_v21 }
 0x469   : > { %v8308_v30 = vpop.eup %8307  ;;  %8321 = vrcp.f32 %v2498_v45  ;;  %v2504_v0 = vpop.xlane.xlu0 %2503  ;;  %v2527_v62 = vmul.f32 %v8306_v60, %v9946_v1  ;;  %v11977_v60 = vld [vmem:[#allocation42_spill] sm:$0xff] }
 0x46a   : > { %v8310_v34 = vpop.eup %8309  ;;  %v2525_v7 = vmul.f32 %v8308_v30, %v9938_v31 }
 0x46b   : > { %v8312_v14 = vpop.eup %8311  ;;  %v2500_v36 = vpop.xlane.xlu1 %2499  ;;  %v2528_v51 = vmul.f32 %v8310_v34, %v9943_v29  ;;  %v11978_v34 = vld [vmem:[#allocation43_spill] sm:$0xff] }
 0x46c   : > { %8323 = vrcp.f32 %v2500_v36  ;;  %v2526_v33 = vmul.f32 %v8312_v14, %v9952_v41  ;;  %v11979_v14 = vld [vmem:[#allocation44_spill] sm:$0xff] }
 0x46d   : > { %8325 = vrcp.f32 %v2504_v0  ;;  %v2540_v12 = vpack.c.bf16 %v2528_v51, %v2527_v62  ;;  %v2766_v1 = vpop.permute.xlu0 %2765 }
 0x46e   : > { %v2539_v2 = vpack.c.bf16 %v2526_v33, %v2525_v7  ;;  %8327 = vrcp.f32 %v2502_v23  ;;  %v2807_v39 = vsel %vm1008_vm0, %v2766_v1, 0 }
 0x46f   : > { %v2768_v37 = vpop.permute.xlu1 %2767 }
 0x470   : > { %7570 = vmatprep.mubr.bf16.mxu1 %v2539_v2  ;;  %7995 = vmatprep.subr.msk.bf16.mxu1 %vm1008_vm0, %v2768_v37  ;;  %v2810_v28 = vsel %vm1008_vm0, %v2768_v37, 0 }
 0x471   : > { %7571 = vmatmul.mubr.bf16.gmra.mxu1 %v2540_v12  ;;  %v8314_v25 = vpop.eup %8313  ;;  %v2764_v43 = vpop.permute.xlu0 %2763 }
 0x472   : > { %7593 = vmatpush3.bf16.xpose.msra.mxu1 %v2810_v28  ;;  %v8316_v6 = vpop.eup %8315  ;;  %v2532_v29 = vmul.f32 %v8314_v25, %v9961_v19  ;;  %v2804_v11 = vsel %vm1008_vm0, %v2764_v43, 0 }
 0x473   : > { %7996 = vmatprep.subr.msk.bf16.mxu1 %vm1008_vm0, %v2766_v1  ;;  %v8318_v31 = vpop.eup %8317  ;;  %v2529_v38 = vmul.f32 %v8316_v6, %v9955_v22  ;;  %v2748_v9 = vpop.permute.xlu1 %2747 }
 0x474   : > { %v2531_v24 = vmul.f32 %v8318_v31, %v9949_v13 }
 0x475   : > { %v8320_v41 = vpop.eup %8319 }
 0x476   : > { %v2530_v15 = vmul.f32 %v8320_v41, %v9967_v56  ;;  %v8322_v20 = vpop.eup %8321  ;;  %v2542_v35 = vpack.c.bf16 %v2532_v29, %v2531_v24 }
 0x477   : > { %v2533_v54 = vmul.f32 %v8322_v20, %v9964_v48  ;;  %v11968_v48 = vld [vmem:[#allocation32_spill] sm:$0xff] }
 0x478   : > { %v2541_v53 = vpack.c.bf16 %v2530_v15, %v2529_v38  ;;  %v917_v17 = vadd.f32 %v11970_v46, %v11968_v48  ;;  %v898_v44 = vadd.f32 %v11971_v3, %v11968_v48  ;;  %v901_v59 = vadd.f32 %v11972_v57, %v11968_v48 }
 0x479   : > { %v8324_v8 = vpop.eup %8323  ;;  %v882_v23 = vadd.f32 %v11974_v10, %v11968_v48  ;;  %v885_v26 = vadd.f32 %v11975_v63, %v11968_v48  ;;  %v866_v30 = vadd.f32 %v11977_v60, %v11968_v48  ;;  %v869_v0 = vadd.f32 %v11978_v34, %v11968_v48 }
 0x47a   : > { %v8326_v52 = vpop.eup %8325  ;;  %7595 = vmatpush3.bf16.xpose.msra.mxu1 %v2807_v39  ;;  %7574 = vmatprep.mubr.bf16.mxu1 %v2541_v53  ;;  %v2534_v19 = vmul.f32 %v8324_v8, %v9973_v58  ;;  %v11969_v58 = vld [vmem:[#allocation51_spill] sm:$0xff]  ;;  %v10101_v16 = vpack.c.bf16 %v901_v59, %v898_v44 }
 0x47b   : > { %7997 = vmatprep.subr.msk.bf16.mxu1 %vm1008_vm0, %v2764_v43  ;;  %7575 = vmatmul.mubr.bf16.gmra.mxu1 %v2542_v35  ;;  %v8328_v22 = vpop.eup %8327  ;;  %v2536_v13 = vmul.f32 %v8326_v52, %v9970_v50  ;;  %v914_v42 = vadd.f32 %v11969_v58, %v11968_v48  ;;  %v2750_v50 = vpop.permute.xlu0 %2749  ;;  %v10113_v32 = vpack.c.bf16 %v885_v26, %v882_v23 }
 0x47c   : > { %v2543_v56 = vpack.c.bf16 %v2534_v19, %v2533_v54  ;;  %v2535_v40 = vmul.f32 %v8328_v22, %v9958_v18  ;;  %v2752_v18 = vpop.permute.xlu1 %2751  ;;  %v10125_v62 = vpack.c.bf16 %v869_v0, %v866_v30 }
 0x47d   : > { %v10089_v49 = vpack.c.bf16 %v917_v17, %v914_v42 }
 0x47e   : > { %7578 = vmatprep.mubr.bf16.mxu1 %v2543_v56  ;;  %v2544_v47 = vpack.c.bf16 %v2536_v13, %v2535_v40 }
 0x47f   : > { %v2754_v4 = vpop.permute.xlu0 %2753 }
 0x480   : > { %v2756_v61 = vpop.permute.xlu1 %2755 }
 0x482   : > { %7597 = vmatpush3.bf16.xpose.msra.mxu1 %v2804_v11 }
 0x483   : > { %7678 = vmatprep.subr.bf16.mxu1 %v11967_v27  ;;  %7579 = vmatmul.mubr.bf16.gmra.mxu1 %v2544_v47  ;;  %v2758_v45 = vpop.permute.xlu0 %2757 }
 0x484   : > { %7598 = vmatprep.mubr.msk.bf16.mxu1 %vm1008_vm0, %v2748_v9  ;;  %v2760_v21 = vpop.permute.xlu1 %2759 }
 0x487   : > { %v2762_v36 = vpop.permute.xlu0 %2761 }
 0x48b   : > { %7599 = vmatmul.mubr.msk.bf16.vlgmr.msra.gmra.mxu1 %vm1008_vm0, %v2750_v50 }
 0x48c   : > { %7679 = vmatpush3.bf16.msra.mxu1 %v11967_v27  ;;  %7602 = vmatprep.mubr.msk.bf16.mxu1 %vm1008_vm0, %v2752_v18 }
 0x48d   : > { %7680 = vmatprep.subr.bf16.mxu1 %v10089_v49 }
 0x490   : > { %7681 = vmatpush3.bf16.msra.mxu1 %v10089_v49 }
 0x491   : > { %7682 = vmatprep.subr.bf16.mxu1 %v11973_v55 }
 0x493   : > { %7603 = vmatmul.mubr.msk.bf16.gmra.mxu1 %vm1008_vm0, %v2754_v4 }
 0x494   : > { %7683 = vmatpush3.bf16.msra.mxu1 %v11973_v55  ;;  %7606 = vmatprep.mubr.msk.bf16.mxu1 %vm1008_vm0, %v2756_v61 }
 0x495   : > { %7684 = vmatprep.subr.bf16.mxu1 %v10101_v16 }
 0x498   : > { %7685 = vmatpush3.bf16.msra.mxu1 %v10101_v16 }
 0x499   : > { %7686 = vmatprep.subr.bf16.mxu1 %v11976_v5 }
 0x49b   : > { %7607 = vmatmul.mubr.msk.bf16.gmra.mxu1 %vm1008_vm0, %v2758_v45 }
 0x49c   : > { %7687 = vmatpush3.bf16.msra.mxu1 %v11976_v5  ;;  %7610 = vmatprep.mubr.msk.bf16.mxu1 %vm1008_vm0, %v2760_v21  ;;  %v12008_v21 = vld [vmem:[#allocation39_spill] sm:$0xff] }
 0x49d   : > { %7688 = vmatprep.subr.bf16.mxu1 %v10113_v32 }
 0x4a0   : > { %7689 = vmatpush3.bf16.msra.mxu1 %v10113_v32 }
 0x4a1   : > { %7690 = vmatprep.subr.bf16.mxu1 %v11979_v14 }
 0x4a3   : > { %7611 = vmatmul.mubr.msk.bf16.gmra.mxu1 %vm1008_vm0, %v2762_v36  ;;  %v12009_v36 = vld [vmem:[#allocation34_spill] sm:$0xff] }
 0x4a4   : > { %7691 = vmatpush3.bf16.msra.mxu1 %v11979_v14 }
 0x4a5   : > { %7692 = vmatprep.subr.bf16.mxu1 %v10125_v62 }
 0x4a8   : > { %7693 = vmatpush3.bf16.msra.mxu1 %v10125_v62 }
 0x4b3   : > { %v10131_v7 = vpop.f32.mrf.mxu1 }
 0x4b5   : > { %v10133_v33 = vpop.f32.mrf.mxu1 }
 0x4b6   : > { %11980 = vst [vmem:[#allocation77_spill] sm:$0xff] %v10133_v33 }
 0x4b7   : > { %v10135_v51 = vpop.f32.mrf.mxu1 }
 0x4b8   : > { %11981 = vst [vmem:[#allocation76_spill] sm:$0xff] %v10135_v51 }
 0x4b9   : > { %v10137_v2 = vpop.f32.mrf.mxu1 }
 0x4bb   : > { %v10139_v37 = vpop.f32.mrf.mxu1 }
 0x4bc   : > { %11982 = vst [vmem:[#allocation78_spill] sm:$0xff] %v10139_v37 }
 0x4bd   : > { %v10141_v12 = vpop.f32.mrf.mxu1 }
 0x4be   : > { %11983 = vst [vmem:[#allocation81_spill] sm:$0xff] %v10141_v12 }
 0x4bf   : > { %v10143_v28 = vpop.f32.mrf.mxu1 }
 0x4c0   : > { %11984 = vst [vmem:[#allocation79_spill] sm:$0xff] %v10143_v28 }
 0x4c1   : > { %v10145_v25 = vpop.f32.mrf.mxu1 }
 0x4c2   : > { %11985 = vst [vmem:[#allocation82_spill] sm:$0xff] %v10145_v25 }
 0x4c4   : > { %v10147_v1 = vpop.f32.mrf.mxu1 }
 0x4c5   : > { %11986 = vst [vmem:[#allocation80_spill] sm:$0xff] %v10147_v1 }
 0x4c6   : > { %v10149_v6 = vpop.f32.mrf.mxu1 }
 0x4c7   : > { %11987 = vst [vmem:[#allocation83_spill] sm:$0xff] %v10149_v6 }
 0x4c8   : > { %v10151_v31 = vpop.f32.mrf.mxu1 }
 0x4c9   : > { %11988 = vst [vmem:[#allocation84_spill] sm:$0xff] %v10151_v31 }
 0x4ca   : > { %v10153_v41 = vpop.f32.mrf.mxu1 }
 0x4cb   : > { %11989 = vst [vmem:[#allocation25_spill] sm:$0xff] %v10153_v41 }
 0x4cc   : > { %v10155_v29 = vpop.f32.mrf.mxu1 }
 0x4cd   : > { %11990 = vst [vmem:[#allocation74_spill] sm:$0xff] %v10155_v29 }
 0x4ce   : > { %v10157_v38 = vpop.f32.mrf.mxu1 }
 0x4cf   : > { %11991 = vst [vmem:[#allocation27_spill] sm:$0xff] %v10157_v38 }
 0x4d0   : > { %v10159_v15 = vpop.f32.mrf.mxu1 }
 0x4d1   : > { %11992 = vst [vmem:[#allocation11_spill] sm:$0xff] %v10159_v15 }
 0x4d2   : > { %v10161_v20 = vpop.f32.mrf.mxu1 }
 0x4d3   : > { %11993 = vst [vmem:[#allocation65_spill] sm:$0xff] %v10161_v20 }
 0x4f8   : > { %v10163_v24 = vpop.f32.mrf.mxu1 }
 0x4fa   : > { %v10165_v53 = vpop.f32.mrf.mxu1 }
 0x4fc   : > { %v10167_v8 = vpop.f32.mrf.mxu1 }
 0x4fd   : > { %11994 = vst [vmem:[#allocation26_spill] sm:$0xff] %v10167_v8 }
 0x4fe   : > { %v10169_v39 = vpop.f32.mrf.mxu1 }
 0x4ff   : > { %11995 = vst [vmem:[#allocation28_spill] sm:$0xff] %v10169_v39 }
 0x531   : > { %v10171_v35 = vpop.f32.mrf.mxu1 }
 0x532   : > { %11996 = vst [vmem:[#allocation73_spill] sm:$0xff] %v10171_v35 }
 0x533   : > { %v10173_v52 = vpop.f32.mrf.mxu1 }
 0x534   : > { %11997 = vst [vmem:[#allocation15_spill] sm:$0xff] %v10173_v52 }
 0x535   : > { %v10175_v43 = vpop.f32.mrf.mxu1 }
 0x536   : > { %11998 = vst [vmem:[#allocation31_spill] sm:$0xff] %v10175_v43 }
 0x537   : > { %v10177_v54 = vpop.f32.mrf.mxu1 }
 0x538   : > { %11999 = vst [vmem:[#allocation66_spill] sm:$0xff] %v10177_v54 }
 0x53b   : > { %v10179_v19 = vpop.f32.mrf.mxu1 }
 0x53c   : > { %12000 = vst [vmem:[#allocation21_spill] sm:$0xff] %v10179_v19 }
 0x53d   : > { %v10181_v22 = vpop.f32.mrf.mxu1 }
 0x53e   : > { %12001 = vst [vmem:[#allocation30_spill] sm:$0xff] %v10181_v22 }
 0x53f   : > { %v10183_v56 = vpop.f32.mrf.mxu1 }
 0x540   : > { %12002 = vst [vmem:[#allocation86_spill] sm:$0xff] %v10183_v56 }
 0x541   : > { %v10185_v13 = vpop.f32.mrf.mxu1 }
 0x542   : > { %12003 = vst [vmem:[#allocation88_spill] sm:$0xff] %v10185_v13 }
 0x543   : > { %v10187_v40 = vpop.f32.mrf.mxu1 }
 0x544   : > { %12004 = vst [vmem:[#allocation67_spill] sm:$0xff] %v10187_v40 }
 0x545   : > { %v10189_v11 = vpop.f32.mrf.mxu1 }
 0x546   : > { %12005 = vst [vmem:[#allocation29_spill] sm:$0xff] %v10189_v11 }
 0x547   : > { %v10191_v47 = vpop.f32.mrf.mxu1 }
 0x548   : > { %12006 = vst [vmem:[#allocation87_spill] sm:$0xff] %v10191_v47 }
 0x549   : > { %v10193_v9 = vpop.f32.mrf.mxu1 }
 0x54a   : > { %12007 = vst [vmem:[#allocation85_spill] sm:$0xff] %v10193_v9 }
 0x54b   : > { %v7600_v48 = vpop.f32.mrf.mxu1 }
 0x54c   : > { %3009 = vmax.xlane.f32.xlu0 %v7600_v48 }
 0x54d   : > { %v2861_v58 = vpop.f32.mrf.mxu1 }
 0x54e   : > { %3005 = vmax.xlane.f32.xlu1 %v2861_v58 }
 0x54f   : > { %v7601_v42 = vpop.f32.mrf.mxu1 }
 0x550   : > { %v6783_v46 = vpack.c.bf16 %v7601_v42, %v7600_v48 }
 0x551   : > { %v10195_v17 = vpop.f32.mrf.mxu1 }
 0x552   : > { %6999 = vst [vmem:[%s9502_s10 + $0xc8] sm:$0xff] %v6783_v46   ;;  %v6778_v50 = vpack.c.bf16 %v10195_v17, %v2861_v58  ;;  %3011 = vmax.xlane.f32.xlu1 %v7601_v42  ;;  %3007 = vmax.xlane.f32.xlu0 %v10195_v17 }
 0x553   : > { %v10200_v18 = vpop.f32.mrf.mxu1 }
 0x554   : > { %6998 = vst [vmem:[%s9502_s10 + $0xc0] sm:$0xff] %v6778_v50  }
 0x555   : > { %v10203_v3 = vpop.f32.mrf.mxu1 }
 0x557   : > { %v10205_v44 = vpop.f32.mrf.mxu1 }
 0x558   : > { %v6793_v57 = vpack.c.bf16 %v10205_v44, %v10200_v18 }
 0x559   : > { %v10209_v59 = vpop.f32.mrf.mxu1 }
 0x55a   : > { %7001 = vst [vmem:[%s9502_s10 + $0xd8] sm:$0xff] %v6793_v57   ;;  %v6788_v4 = vpack.c.bf16 %v10209_v59, %v10203_v3  ;;  %v12010_v57 = vld [vmem:[#allocation38_spill] sm:$0xff] }
 0x55b   : > { %v10214_v61 = vpop.f32.mrf.mxu1 }
 0x55c   : > { %7000 = vst [vmem:[%s9502_s10 + $0xd0] sm:$0xff] %v6788_v4   ;;  %v12011_v4 = vld [vmem:[#allocation35_spill] sm:$0xff] }
 0x55d   : > { %v10217_v10 = vpop.f32.mrf.mxu1 }
 0x55f   : > { %v10219_v23 = vpop.f32.mrf.mxu1 }
 0x560   : > { %v6803_v63 = vpack.c.bf16 %v10219_v23, %v10214_v61 }
 0x561   : > { %v10223_v26 = vpop.f32.mrf.mxu1 }
 0x562   : > { %7003 = vst [vmem:[%s9502_s10 + $0xe8] sm:$0xff] %v6803_v63   ;;  %v6798_v45 = vpack.c.bf16 %v10223_v26, %v10217_v10  ;;  %v12012_v63 = vld [vmem:[#allocation36_spill] sm:$0xff] }
 0x563   : > { %3169 = vrot.lane.b32.xlu1 %v12008_v21, %s8744_s28  ;;  %v10230_v60 = vpop.f32.mrf.mxu1  ;;  %v12014_v21 = vld [vmem:[#allocation37_spill] sm:$0xff] }
 0x564   : > { %7002 = vst [vmem:[%s9502_s10 + $0xe0] sm:$0xff] %v6798_v45   ;;  %v12013_v45 = vld [vmem:[#allocation40_spill] sm:$0xff] }
 0x565   : > { %v10233_v30 = vpop.f32.mrf.mxu1 }
 0x567   : > { %v10235_v34 = vpop.f32.mrf.mxu1 }
 0x568   : > { %v6813_v0 = vpack.c.bf16 %v10235_v34, %v10230_v60  ;;  %3171 = vrot.lane.b32.xlu0 %v12009_v36, %s8744_s28 }
 0x569   : > { %v10241_v46 = vpop.f32.mrf.mxu1 }
 0x56a   : > { %7005 = vst [vmem:[%s9502_s10 + $0xf8] sm:$0xff] %v6813_v0   ;;  %v6808_v50 = vpack.c.bf16 %v10241_v46, %v10233_v30 }
 0x56c   : > { %7004 = vst [vmem:[%s9502_s10 + $0xf0] sm:$0xff] %v6808_v50  }
 0x587   : > { %3017 = vmax.xlane.f32.xlu0 %v10200_v18  ;;  %3019 = vmax.xlane.f32.xlu1 %v10205_v44 }
 0x58b   : > { %3013 = vmax.xlane.f32.xlu0 %v10203_v3  ;;  %3015 = vmax.xlane.f32.xlu1 %v10209_v59 }
 0x58f   : > { %3025 = vmax.xlane.f32.xlu0 %v10214_v61  ;;  %3027 = vmax.xlane.f32.xlu1 %v10219_v23 }
 0x593   : > { %3021 = vmax.xlane.f32.xlu0 %v10217_v10  ;;  %3023 = vmax.xlane.f32.xlu1 %v10223_v26 }
 0x597   : > { %3033 = vmax.xlane.f32.xlu0 %v10230_v60  ;;  %3035 = vmax.xlane.f32.xlu1 %v10235_v34 }
 0x59b   : > { %3029 = vmax.xlane.f32.xlu0 %v10233_v30  ;;  %3031 = vmax.xlane.f32.xlu1 %v10241_v46 }
 0x5b1   : > { %3167 = vrot.lane.b32.xlu0 %v12010_v57, %s8744_s28 }
 0x5b5   : > { %3165 = vrot.lane.b32.xlu0 %v12011_v4, %s8744_s28 }
 0x5b9   : > { %3163 = vrot.lane.b32.xlu0 %v12012_v63, %s8744_s28 }
 0x5bd   : > { %3161 = vrot.lane.b32.xlu0 %v12013_v45, %s8744_s28 }
 0x5c1   : > { %3157 = vrot.lane.b32.xlu0 %v12014_v21, %s8744_s28 }
 0x5d5   : > { %v3010_v0 = vpop.xlane.xlu0 %3009 }
 0x5d6   : > { %v3039_v36 = vsub.f32 %v7600_v48, %v3010_v0 }
 0x5d7   : > { %v3006_v50 = vpop.xlane.xlu1 %3005 }
 0x5d8   : > { %v3057_v47 = vmul.f32 1.442695, %v3039_v36  ;;  %v3037_v9 = vsub.f32 %v2861_v58, %v3006_v50 }
 0x5da   : > { %8329 = vpow2.f32 %v3057_v47  ;;  %v3053_v15 = vmul.f32 1.442695, %v3037_v9 }
 0x5db   : > { %v3012_v57 = vpop.xlane.xlu1 %3011  ;;  %v3008_v20 = vpop.xlane.xlu0 %3007 }
 0x5dc   : > { %v3040_v56 = vsub.f32 %v7601_v42, %v3012_v57  ;;  %8331 = vpow2.f32 %v3053_v15  ;;  %v3038_v63 = vsub.f32 %v10195_v17, %v3008_v20 }
 0x5de   : > { %v3059_v4 = vmul.f32 1.442695, %v3040_v56  ;;  %v3055_v21 = vmul.f32 1.442695, %v3038_v63  ;;  %v12015_v56 = vld [vmem:[#allocation41_spill] sm:$0xff] }
 0x5df   : > { %v3172_v13 = vpop.permute.xlu0 %3171  ;;  %v3170_v45 = vpop.permute.xlu1 %3169 }
 0x5e0   : > { %7614 = vmatprep.subr.bf16.mxu0 %v3172_v13  ;;  %8333 = vpow2.f32 %v3059_v4 }
 0x5e1   : > { %7615 = vmatpush3.bf16.msra.mxu0 %v3172_v13  ;;  %8335 = vpow2.f32 %v3055_v21 }
 0x5e2   : > { %7616 = vmatprep.subr.bf16.mxu0 %v3170_v45 }
 0x5e5   : > { %7617 = vmatpush3.bf16.msra.mxu0 %v3170_v45 }
 0x5e7   : > { %v10270_v48 = vpop.eup %8329 }
 0x5e8   : > { %3089 = vadd.xlane.f32.xlu1 %v10270_v48 }
 0x5e9   : > { %v10273_v47 = vpop.eup %8331 }
 0x5ec   : > { %3085 = vadd.xlane.f32.xlu1 %v10273_v47 }
 0x5ed   : > { %v10276_v15 = vpop.eup %8333 }
 0x5ee   : > { %v10279_v20 = vpop.eup %8335 }
 0x5f0   : > { %3091 = vadd.xlane.f32.xlu1 %v10276_v15 }
 0x5f4   : > { %3087 = vadd.xlane.f32.xlu1 %v10279_v20 }
 0x605   : > { %3159 = vrot.lane.b32.xlu1 %v12015_v56, %s8744_s28 }
 0x610   : > { %v3020_v13 = vpop.xlane.xlu1 %3019  ;;  %v3018_v9 = vpop.xlane.xlu0 %3017 }
 0x611   : > { %v3043_v17 = vsub.f32 %v10200_v18, %v3018_v9  ;;  %v3044_v50 = vsub.f32 %v10205_v44, %v3020_v13 }
 0x613   : > { %v3065_v21 = vmul.f32 1.442695, %v3043_v17  ;;  %v3067_v31 = vmul.f32 1.442695, %v3044_v50 }
 0x614   : > { %v3016_v58 = vpop.xlane.xlu1 %3015  ;;  %v3014_v42 = vpop.xlane.xlu0 %3013 }
 0x615   : > { %v3042_v0 = vsub.f32 %v10209_v59, %v3016_v58  ;;  %v3041_v36 = vsub.f32 %v10203_v3, %v3014_v42 }
 0x617   : > { %v3063_v57 = vmul.f32 1.442695, %v3042_v0  ;;  %v3061_v4 = vmul.f32 1.442695, %v3041_v36 }
 0x618   : > { %v3028_v63 = vpop.xlane.xlu1 %3027  ;;  %v3026_v45 = vpop.xlane.xlu0 %3025 }
 0x619   : > { %8337 = vpow2.f32 %v3063_v57  ;;  %v3047_v59 = vsub.f32 %v10214_v61, %v3026_v45  ;;  %v3048_v3 = vsub.f32 %v10219_v23, %v3028_v63 }
 0x61a   : > { %8339 = vpow2.f32 %v3061_v4 }
 0x61b   : > { %8341 = vpow2.f32 %v3065_v21  ;;  %v3073_v42 = vmul.f32 1.442695, %v3047_v59  ;;  %v3075_v17 = vmul.f32 1.442695, %v3048_v3 }
 0x61c   : > { %v3024_v56 = vpop.xlane.xlu1 %3023  ;;  %v3022_v41 = vpop.xlane.xlu0 %3021  ;;  %8343 = vpow2.f32 %v3067_v31 }
 0x61d   : > { %v3046_v43 = vsub.f32 %v10223_v26, %v3024_v56  ;;  %v3045_v18 = vsub.f32 %v10217_v10, %v3022_v41 }
 0x61f   : > { %v3071_v44 = vmul.f32 1.442695, %v3046_v43  ;;  %v3069_v13 = vmul.f32 1.442695, %v3045_v18 }
 0x620   : > { %v3036_v9 = vpop.xlane.xlu1 %3035  ;;  %v3034_v58 = vpop.xlane.xlu0 %3033 }
 0x621   : > { %8345 = vpow2.f32 %v3069_v13  ;;  %v3051_v31 = vsub.f32 %v10230_v60, %v3034_v58  ;;  %v3052_v43 = vsub.f32 %v10235_v34, %v3036_v9  ;;  %v12016_v58 = vld [vmem:[#allocation23_spill] sm:$0xff] }
 0x622   : > { %8347 = vpow2.f32 %v3071_v44 }
 0x623   : > { %8349 = vpow2.f32 %v3073_v42  ;;  %v3083_v4 = vmul.f32 1.442695, %v3052_v43  ;;  %v12017_v42 = vld [vmem:[#allocation20_spill] sm:$0xff] }
 0x624   : > { %v3032_v0 = vpop.xlane.xlu1 %3031  ;;  %v3030_v36 = vpop.xlane.xlu0 %3029  ;;  %8351 = vpow2.f32 %v3075_v17  ;;  %v761_v17 = vadd.f32 %v12017_v42, %v12016_v58 }
 0x625   : > { %v3050_v50 = vsub.f32 %v10241_v46, %v3032_v0  ;;  %v3049_v26 = vsub.f32 %v10233_v30, %v3030_v36  ;;  %v3081_v30 = vmul.f32 1.442695, %v3051_v31  ;;  %v12018_v0 = vld [vmem:[#allocation24_spill] sm:$0xff] }
 0x626   : > { %v10294_v41 = vpop.eup %8337  ;;  %v765_v36 = vadd.f32 %v12018_v0, %v12016_v58  ;;  %v12019_v0 = vld [vmem:[#allocation17_spill] sm:$0xff] }
 0x627   : > { %v3079_v61 = vmul.f32 1.442695, %v3050_v50  ;;  %v3077_v10 = vmul.f32 1.442695, %v3049_v26  ;;  %3095 = vadd.xlane.f32.xlu0 %v10294_v41  ;;  %v10299_v23 = vpop.eup %8339 }
 0x628   : > { %v3168_v57 = vpop.permute.xlu0 %3167  ;;  %v10302_v46 = vpop.eup %8341  ;;  %v10336_v50 = vpack.c.bf16 %v765_v36, %v761_v17  ;;  %v751_v36 = vadd.f32 %v12019_v0, %v12016_v58 }
 0x629   : > { %3093 = vadd.xlane.f32.xlu1 %v10299_v23  ;;  %7618 = vmatprep.subr.bf16.mxu0 %v3168_v57  ;;  %8353 = vpow2.f32 %v3077_v10  ;;  %v10305_v60 = vpop.eup %8343 }
 0x62a   : > { %7619 = vmatpush3.bf16.msra.mxu0 %v3168_v57  ;;  %8355 = vpow2.f32 %v3079_v61 }
 0x62b   : > { %3097 = vadd.xlane.f32.xlu0 %v10302_v46  ;;  %8357 = vpow2.f32 %v3081_v30 }
 0x62c   : > { %v3166_v34 = vpop.permute.xlu0 %3165  ;;  %8359 = vpow2.f32 %v3083_v4 }
 0x62d   : > { %3099 = vadd.xlane.f32.xlu1 %v10305_v60  ;;  %7620 = vmatprep.subr.bf16.mxu0 %v3166_v34 }
 0x62e   : > { %7621 = vmatpush3.bf16.msra.mxu0 %v3166_v34  ;;  %v10308_v63 = vpop.eup %8345 }
 0x62f   : > { %v10310_v45 = vpop.eup %8347  ;;  %3101 = vadd.xlane.f32.xlu0 %v10308_v63 }
 0x630   : > { %v3164_v21 = vpop.permute.xlu0 %3163  ;;  %v10314_v56 = vpop.eup %8349 }
 0x631   : > { %3103 = vadd.xlane.f32.xlu1 %v10310_v45  ;;  %7622 = vmatprep.subr.bf16.mxu0 %v3164_v21  ;;  %v10316_v18 = vpop.eup %8351 }
 0x632   : > { %7623 = vmatpush3.bf16.msra.mxu0 %v3164_v21 }
 0x633   : > { %3105 = vadd.xlane.f32.xlu0 %v10314_v56 }
 0x634   : > { %v3162_v59 = vpop.permute.xlu0 %3161 }
 0x635   : > { %3107 = vadd.xlane.f32.xlu1 %v10316_v18  ;;  %7624 = vmatprep.subr.bf16.mxu0 %v3162_v59 }
 0x636   : > { %7625 = vmatpush3.bf16.msra.mxu0 %v3162_v59  ;;  %v10320_v3 = vpop.eup %8353 }
 0x637   : > { %v10322_v44 = vpop.eup %8355  ;;  %3109 = vadd.xlane.f32.xlu0 %v10320_v3 }
 0x638   : > { %v10326_v13 = vpop.eup %8357  ;;  %v3158_v57 = vpop.permute.xlu0 %3157 }
 0x639   : > { %3111 = vadd.xlane.f32.xlu1 %v10322_v44  ;;  %v10328_v9 = vpop.eup %8359 }
 0x63b   : > { %3113 = vadd.xlane.f32.xlu0 %v10326_v13 }
 0x63d   : > { %3115 = vadd.xlane.f32.xlu1 %v10328_v9 }
 0x651   : > { %3896 = vrot.lane.b32.xlu0 %v10336_v50, %s8742_s20 }
 0x671   : > { %v3090_v26 = vpop.xlane.xlu1 %3089 }
 0x675   : > { %v3086_v31 = vpop.xlane.xlu1 %3085 }
 0x679   : > { %v3092_v43 = vpop.xlane.xlu1 %3091 }
 0x67a   : > { %8361 = vrcp.f32 %v3092_v43 }
 0x67b   : > { %8363 = vrcp.f32 %v3086_v31 }
 0x67c   : > { %8365 = vrcp.f32 %v3090_v26  ;;  %v12020_v26 = vld [vmem:[#allocation18_spill] sm:$0xff] }
 0x67d   : > { %v3088_v61 = vpop.xlane.xlu1 %3087  ;;  %v755_v31 = vadd.f32 %v12020_v26, %v12016_v58  ;;  %v12025_v26 = vld [vmem:[#allocation62_spill] sm:$0xff] }
 0x67e   : > { %8367 = vrcp.f32 %v3088_v61 }
 0x681   : > { %v3160_v10 = vpop.permute.xlu1 %3159 }
 0x682   : > { %7626 = vmatprep.subr.bf16.mxu0 %v3160_v10 }
 0x683   : > { %7627 = vmatpush3.bf16.msra.mxu0 %v3160_v10 }
 0x684   : > { %7628 = vmatprep.subr.bf16.mxu0 %v3158_v57 }
 0x687   : > { %7629 = vmatpush3.bf16.msra.mxu0 %v3158_v57  ;;  %v8362_v30 = vpop.eup %8361  ;;  %v10350_v57 = vpack.c.bf16 %v755_v31, %v751_v36  ;;  %v721_v31 = vadd.f32 %v12025_v26, %v12016_v58 }
 0x688   : > { %7998 = vmatprep.subr.msk.bf16.mxu0 %vm1008_vm0, %v10336_v50  ;;  %v8364_v4 = vpop.eup %8363  ;;  %v3136_v59 = vmul.f32 %v8362_v30, %v10276_v15  ;;  %v3405_v15 = vsel %vm1008_vm0, %v10336_v50, 0  ;;  %v12022_v30 = vld [vmem:[#allocation14_spill] sm:$0xff] }
 0x689   : > { %v8366_v34 = vpop.eup %8365  ;;  %v3133_v42 = vmul.f32 %v8364_v4, %v10273_v47  ;;  %v12021_v47 = vld [vmem:[#allocation13_spill] sm:$0xff]  ;;  %v745_v4 = vadd.f32 %v12022_v30, %v12016_v58  ;;  %v12028_v30 = vld [vmem:[#allocation60_spill] sm:$0xff] }
 0x68a   : > { %v3135_v43 = vmul.f32 %v8366_v34, %v10270_v48  ;;  %v3402_v34 = vsel %vm1008_vm0, %v10350_v57, 0 }
 0x68b   : > { %v8368_v21 = vpop.eup %8367 }
 0x68c   : > { %v3134_v17 = vmul.f32 %v8368_v21, %v10279_v20  ;;  %v3150_v10 = vpack.c.bf16 %v3136_v59, %v3135_v43  ;;  %v741_v20 = vadd.f32 %v12021_v47, %v12016_v58  ;;  %v12023_v21 = vld [vmem:[#allocation9_spill] sm:$0xff]  ;;  %v12026_v43 = vld [vmem:[#allocation70_spill] sm:$0xff]  ;;  %v12027_v47 = vld [vmem:[#allocation59_spill] sm:$0xff] }
 0x68d   : > { %v731_v59 = vadd.f32 %v12023_v21, %v12016_v58 }
 0x68e   : > { %v3149_v61 = vpack.c.bf16 %v3134_v17, %v3133_v42  ;;  %v10360_v48 = vpack.c.bf16 %v745_v4, %v741_v20  ;;  %v12024_v42 = vld [vmem:[#allocation10_spill] sm:$0xff]  ;;  %v711_v20 = vadd.f32 %v12027_v47, %v12016_v58  ;;  %v715_v4 = vadd.f32 %v12028_v30, %v12016_v58 }
 0x68f   : > { %v735_v17 = vadd.f32 %v12024_v42, %v12016_v58 }
 0x690   : > { %7630 = vmatprep.mubr.bf16.mxu0 %v3149_v61  ;;  %v3399_v36 = vsel %vm1008_vm0, %v10360_v48, 0  ;;  %v725_v61 = vadd.f32 %v12026_v43, %v12016_v58  ;;  %v10390_v21 = vpack.c.bf16 %v715_v4, %v711_v20  ;;  %v12031_v4 = vld [vmem:[#allocation53_spill] sm:$0xff] }
 0x691   : > { %7631 = vmatmul.mubr.bf16.vlgmr.msra.gmra.mxu0 %v3150_v10  ;;  %v10370_v0 = vpack.c.bf16 %v735_v17, %v731_v59 }
 0x692   : > { %7647 = vmatpush3.bf16.xpose.msra.mxu0 %v3405_v15  ;;  %v10380_v10 = vpack.c.bf16 %v725_v61, %v721_v31  ;;  %v12030_v31 = vld [vmem:[#allocation57_spill] sm:$0xff]  ;;  %v3390_v20 = vsel %vm1008_vm0, %v10390_v21, 0 }
 0x693   : > { %7999 = vmatprep.subr.msk.bf16.mxu0 %vm1008_vm0, %v10350_v57  ;;  %v3396_v15 = vsel %vm1008_vm0, %v10370_v0, 0  ;;  %v705_v43 = vadd.f32 %v12030_v31, %v12016_v58 }
 0x694   : > { %v3393_v59 = vsel %vm1008_vm0, %v10380_v10, 0 }
 0x69a   : > { %7649 = vmatpush3.bf16.xpose.msra.mxu0 %v3402_v34 }
 0x69b   : > { %8000 = vmatprep.subr.msk.bf16.mxu0 %vm1008_vm0, %v10360_v48 }
 0x6a2   : > { %7651 = vmatpush3.bf16.xpose.msra.mxu0 %v3399_v36  ;;  %v12029_v36 = vld [vmem:[#allocation56_spill] sm:$0xff] }
 0x6a3   : > { %8001 = vmatprep.subr.msk.bf16.mxu0 %vm1008_vm0, %v10370_v0  ;;  %v701_v26 = vadd.f32 %v12029_v36, %v12016_v58 }
 0x6aa   : > { %7653 = vmatpush3.bf16.xpose.msra.mxu0 %v3396_v15  ;;  %v10400_v15 = vpack.c.bf16 %v705_v43, %v701_v26 }
 0x6ab   : > { %8002 = vmatprep.subr.msk.bf16.mxu0 %vm1008_vm0, %v10380_v10 }
 0x6b0   : > { %v3096_v34 = vpop.xlane.xlu0 %3095 }
 0x6b1   : > { %8369 = vrcp.f32 %v3096_v34  ;;  %v691_v34 = vadd.f32 %v12031_v4, %v12016_v58 }
 0x6b2   : > { %7655 = vmatpush3.bf16.xpose.msra.mxu0 %v3393_v59  ;;  %v3094_v42 = vpop.xlane.xlu1 %3093  ;;  %v12032_v59 = vld [vmem:[#allocation54_spill] sm:$0xff] }
 0x6b3   : > { %8371 = vrcp.f32 %v3094_v42  ;;  %8003 = vmatprep.subr.msk.bf16.mxu0 %vm1008_vm0, %v10390_v21  ;;  %v695_v42 = vadd.f32 %v12032_v59, %v12016_v58 }
 0x6b4   : > { %v3098_v17 = vpop.xlane.xlu0 %3097 }
 0x6b5   : > { %8373 = vrcp.f32 %v3098_v17  ;;  %v10410_v43 = vpack.c.bf16 %v695_v42, %v691_v34 }
 0x6b6   : > { %v3100_v61 = vpop.xlane.xlu1 %3099 }
 0x6b7   : > { %8375 = vrcp.f32 %v3100_v61 }
 0x6b8   : > { %v3102_v47 = vpop.xlane.xlu0 %3101 }
 0x6b9   : > { %8377 = vrcp.f32 %v3102_v47  ;;  %v3387_v47 = vsel %vm1008_vm0, %v10400_v15, 0 }
 0x6ba   : > { %7657 = vmatpush3.bf16.xpose.msra.mxu0 %v3390_v20  ;;  %v3104_v30 = vpop.xlane.xlu1 %3103 }
 0x6bb   : > { %8379 = vrcp.f32 %v3104_v30  ;;  %8004 = vmatprep.subr.msk.bf16.mxu0 %vm1008_vm0, %v10400_v15 }
 0x6bc   : > { %v3106_v17 = vpop.xlane.xlu0 %3105 }
 0x6bd   : > { %8381 = vrcp.f32 %v3106_v17 }
 0x6be   : > { %v8370_v36 = vpop.eup %8369  ;;  %v3108_v26 = vpop.xlane.xlu1 %3107 }
 0x6bf   : > { %8383 = vrcp.f32 %v3108_v26  ;;  %v3138_v30 = vmul.f32 %v8370_v36, %v10294_v41 }
 0x6c0   : > { %v8372_v31 = vpop.eup %8371  ;;  %v3110_v61 = vpop.xlane.xlu0 %3109 }
 0x6c1   : > { %v3137_v20 = vmul.f32 %v8372_v31, %v10299_v23  ;;  %8385 = vrcp.f32 %v3110_v61 }
 0x6c2   : > { %v8374_v4 = vpop.eup %8373  ;;  %7659 = vmatpush3.bf16.xpose.msra.mxu0 %v3387_v47  ;;  %v3112_v58 = vpop.xlane.xlu1 %3111  ;;  %v3384_v47 = vsel %vm1008_vm0, %v10410_v43, 0 }
 0x6c3   : > { %8387 = vrcp.f32 %v3112_v58  ;;  %8005 = vmatprep.subr.msk.bf16.mxu0 %vm1008_vm0, %v10410_v43  ;;  %v3151_v59 = vpack.c.bf16 %v3138_v30, %v3137_v20  ;;  %v3139_v42 = vmul.f32 %v8374_v4, %v10302_v46 }
 0x6c4   : > { %v8376_v17 = vpop.eup %8375  ;;  %v3114_v34 = vpop.xlane.xlu0 %3113 }
 0x6c5   : > { %7634 = vmatprep.mubr.bf16.mxu0 %v3151_v59  ;;  %v3140_v26 = vmul.f32 %v8376_v17, %v10305_v60  ;;  %8389 = vrcp.f32 %v3114_v34 }
 0x6c6   : > { %v3116_v23 = vpop.xlane.xlu1 %3115  ;;  %v8378_v31 = vpop.eup %8377 }
 0x6c7   : > { %8391 = vrcp.f32 %v3116_v23  ;;  %v3152_v41 = vpack.c.bf16 %v3140_v26, %v3139_v42  ;;  %v3141_v20 = vmul.f32 %v8378_v31, %v10308_v63 }
 0x6c8   : > { %v8380_v36 = vpop.eup %8379  ;;  %v10420_v61 = vpop.permute.xlu0 %3896 }
 0x6c9   : > { %7635 = vmatmul.mubr.bf16.gmra.mxu0 %v3152_v41  ;;  %v3142_v30 = vmul.f32 %v8380_v36, %v10310_v45  ;;  %8006 = vmatprep.subr.msk.bf16.mxu1 %vm1008_vm0, %v10420_v61 }
 0x6ca   : > { %7661 = vmatpush3.bf16.xpose.msra.mxu0 %v3384_v47  ;;  %v8382_v46 = vpop.eup %8381 }
 0x6cb   : > { %v3153_v60 = vpack.c.bf16 %v3142_v30, %v3141_v20  ;;  %v3143_v58 = vmul.f32 %v8382_v46, %v10314_v56  ;;  %v12033_v56 = vld [vmem:[#allocation55_spill] sm:$0xff]  ;;  %v12035_v20 = vld [vmem:[#allocation61_spill] sm:$0xff]  ;;  %v12040_v30 = vld [vmem:[#allocation22_spill] sm:$0xff] }
 0x6cc   : > { %v8384_v4 = vpop.eup %8383 }
 0x6cd   : > { %7638 = vmatprep.mubr.bf16.mxu0 %v3153_v60  ;;  %v3144_v59 = vmul.f32 %v8384_v4, %v10316_v18  ;;  %v12034_v18 = vld [vmem:[#allocation58_spill] sm:$0xff] }
 0x6ce   : > { %v8386_v17 = vpop.eup %8385 }
 0x6cf   : > { %v3154_v34 = vpack.c.bf16 %v3144_v59, %v3143_v58  ;;  %v3145_v63 = vmul.f32 %v8386_v17, %v10320_v3  ;;  %v12036_v3 = vld [vmem:[#allocation63_spill] sm:$0xff] }
 0x6d0   : > { %v8388_v42 = vpop.eup %8387 }
 0x6d1   : > { %7639 = vmatmul.mubr.bf16.gmra.mxu0 %v3154_v34  ;;  %v3146_v45 = vmul.f32 %v8388_v42, %v10322_v44  ;;  %v12037_v44 = vld [vmem:[#allocation12_spill] sm:$0xff] }
 0x6d2   : > { %v8390_v26 = vpop.eup %8389 }
 0x6d3   : > { %v3155_v23 = vpack.c.bf16 %v3146_v45, %v3145_v63  ;;  %v3147_v41 = vmul.f32 %v8390_v26, %v10326_v13  ;;  %v12038_v13 = vld [vmem:[#allocation16_spill] sm:$0xff] }
 0x6d4   : > { %v8392_v31 = vpop.eup %8391 }
 0x6d5   : > { %7642 = vmatprep.mubr.bf16.mxu0 %v3155_v23  ;;  %v3148_v36 = vmul.f32 %v8392_v31, %v10328_v9  ;;  %v12039_v9 = vld [vmem:[#allocation19_spill] sm:$0xff] }
 0x6d7   : > { %v3156_v47 = vpack.c.bf16 %v3148_v36, %v3147_v41 }
 0x6d9   : > { %7643 = vmatmul.mubr.bf16.gmra.mxu0 %v3156_v47 }
 0x6da   : > { %7662 = vmatprep.mubr.msk.bf16.mxu0 %vm1008_vm0, %v12033_v56 }
 0x6e1   : > { %7663 = vmatmul.mubr.msk.bf16.vlgmr.msra.gmra.mxu0 %vm1008_vm0, %v12034_v18 }
 0x6e2   : > { %7666 = vmatprep.mubr.msk.bf16.mxu0 %vm1008_vm0, %v12035_v20 }
 0x6e9   : > { %7667 = vmatmul.mubr.msk.bf16.gmra.mxu0 %vm1008_vm0, %v12036_v3 }
 0x6ea   : > { %7670 = vmatprep.mubr.msk.bf16.mxu0 %vm1008_vm0, %v12037_v44 }
 0x6f1   : > { %7671 = vmatmul.mubr.msk.bf16.gmra.mxu0 %vm1008_vm0, %v12038_v13 }
 0x6f2   : > { %7674 = vmatprep.mubr.msk.bf16.mxu0 %vm1008_vm0, %v12039_v9 }
 0x6f9   : > { %7675 = vmatmul.mubr.msk.bf16.gmra.mxu0 %vm1008_vm0, %v12040_v30 }
 0x751   : > { %v10450_v46 = vpop.f32.mrf.mxu0 }
 0x752   : > { %12041 = vst [vmem:[#allocation68_spill] sm:$0xff] %v10450_v46 }
 0x753   : > { %v10452_v60 = vpop.f32.mrf.mxu0 }
 0x755   : > { %v10454_v4 = vpop.f32.mrf.mxu0 }
 0x756   : > { %12042 = vst [vmem:[#allocation33_spill] sm:$0xff] %v10454_v4 }
 0x757   : > { %v10456_v58 = vpop.f32.mrf.mxu0 }
 0x758   : > { %12043 = vst [vmem:[#allocation69_spill] sm:$0xff] %v10456_v58 }
 0x789   : > { %v10458_v59 = vpop.f32.mrf.mxu0 }
 0x78a   : > { %12044 = vst [vmem:[#allocation75_spill] sm:$0xff] %v10458_v59 }
 0x78b   : > { %v10460_v17 = vpop.f32.mrf.mxu0 }
 0x78c   : > { %12045 = vst [vmem:[#allocation71_spill] sm:$0xff] %v10460_v17 }
 0x78d   : > { %v10462_v34 = vpop.f32.mrf.mxu0 }
 0x78e   : > { %12046 = vst [vmem:[#allocation72_spill] sm:$0xff] %v10462_v34 }
 0x78f   : > { %v10464_v42 = vpop.f32.mrf.mxu0 }
 0x790   : > { %12047 = vst [vmem:[#allocation52_spill] sm:$0xff] %v10464_v42 }
 0x791   : > { %v10466_v63 = vpop.f32.mrf.mxu0 }
 0x792   : > { %12048 = vst [vmem:[#allocation32_spill] sm:$0xff] %v10466_v63 }
 0x793   : > { %v10468_v45 = vpop.f32.mrf.mxu0 }
 0x794   : > { %12049 = vst [vmem:[#allocation51_spill] sm:$0xff] %v10468_v45 }
 0x795   : > { %v10470_v26 = vpop.f32.mrf.mxu0 }
 0x796   : > { %12050 = vst [vmem:[#allocation64_spill] sm:$0xff] %v10470_v26 }
 0x797   : > { %v10472_v23 = vpop.f32.mrf.mxu0 }
 0x798   : > { %12051 = vst [vmem:[#allocation48_spill] sm:$0xff] %v10472_v23 }
 0x799   : > { %v10474_v31 = vpop.f32.mrf.mxu0 }
 0x79a   : > { %12052 = vst [vmem:[#allocation49_spill] sm:$0xff] %v10474_v31 }
 0x79b   : > { %v10476_v41 = vpop.f32.mrf.mxu0 }
 0x79c   : > { %12053 = vst [vmem:[#allocation50_spill] sm:$0xff] %v10476_v41 }
 0x79d   : > { %v10478_v36 = vpop.f32.mrf.mxu0 }
 0x79e   : > { %12054 = vst [vmem:[#allocation45_spill] sm:$0xff] %v10478_v36 }
 0x79f   : > { %v10480_v47 = vpop.f32.mrf.mxu0 }
 0x7a0   : > { %12055 = vst [vmem:[#allocation46_spill] sm:$0xff] %v10480_v47 }
 0x7a1   : > { %v7664_v34 = vpop.f32.mrf.mxu0 }
 0x7a2   : > { %3589 = vmax.xlane.f32.xlu0 %v7664_v34 }
 0x7a3   : > { %v3441_v42 = vpop.f32.mrf.mxu0 }
 0x7a5   : > { %v7665_v54 = vpop.f32.mrf.mxu0 }
 0x7a6   : > { %v6823_v40 = vpack.c.bf16 %v7665_v54, %v7664_v34  ;;  %3585 = vmax.xlane.f32.xlu0 %v3441_v42  ;;  %3591 = vmax.xlane.f32.xlu1 %v7665_v54 }
 0x7a7   : > { %v3444_v26 = vpop.f32.mrf.mxu0 }
 0x7a8   : > { %7007 = vst [vmem:[%s9502_s10 + $0x108] sm:$0xff] %v6823_v40   ;;  %v6818_v23 = vpack.c.bf16 %v3444_v26, %v3441_v42 }
 0x7a9   : > { %v10483_v28 = vpop.f32.mrf.mxu0 }
 0x7aa   : > { %7006 = vst [vmem:[%s9502_s10 + $0x100] sm:$0xff] %v6818_v23   ;;  %3587 = vmax.xlane.f32.xlu1 %v3444_v26  ;;  %3597 = vmax.xlane.f32.xlu0 %v10483_v28 }
 0x7ab   : > { %v10487_v36 = vpop.f32.mrf.mxu0 }
 0x7ad   : > { %v10489_v47 = vpop.f32.mrf.mxu0 }
 0x7ae   : > { %v6833_v31 = vpack.c.bf16 %v10489_v47, %v10483_v28  ;;  %3593 = vmax.xlane.f32.xlu0 %v10487_v36 }
 0x7af   : > { %v10494_v41 = vpop.f32.mrf.mxu0 }
 0x7b0   : > { %7009 = vst [vmem:[%s9502_s10 + $0x118] sm:$0xff] %v6833_v31   ;;  %v6828_v40 = vpack.c.bf16 %v10494_v41, %v10487_v36 }
 0x7b1   : > { %v10499_v23 = vpop.f32.mrf.mxu0 }
 0x7b2   : > { %7008 = vst [vmem:[%s9502_s10 + $0x110] sm:$0xff] %v6828_v40   ;;  %3605 = vmax.xlane.f32.xlu0 %v10499_v23 }
 0x7b3   : > { %v10503_v11 = vpop.f32.mrf.mxu0 }
 0x7b5   : > { %v10505_v25 = vpop.f32.mrf.mxu0 }
 0x7b6   : > { %v6843_v29 = vpack.c.bf16 %v10505_v25, %v10499_v23  ;;  %3601 = vmax.xlane.f32.xlu0 %v10503_v11 }
 0x7b7   : > { %v10510_v31 = vpop.f32.mrf.mxu0 }
 0x7b8   : > { %7011 = vst [vmem:[%s9502_s10 + $0x128] sm:$0xff] %v6843_v29   ;;  %v6838_v4 = vpack.c.bf16 %v10510_v31, %v10503_v11 }
 0x7b9   : > { %v10515_v40 = vpop.f32.mrf.mxu0 }
 0x7ba   : > { %7010 = vst [vmem:[%s9502_s10 + $0x120] sm:$0xff] %v6838_v4   ;;  %3613 = vmax.xlane.f32.xlu0 %v10515_v40 }
 0x7bb   : > { %3894 = vrot.lane.b32.xlu1 %v10350_v57, %s8742_s20  ;;  %v10521_v38 = vpop.f32.mrf.mxu0 }
 0x7bd   : > { %v10523_v58 = vpop.f32.mrf.mxu0 }
 0x7be   : > { %v6853_v63 = vpack.c.bf16 %v10523_v58, %v10515_v40  ;;  %3609 = vmax.xlane.f32.xlu0 %v10521_v38 }
 0x7bf   : > { %v10528_v29 = vpop.f32.mrf.mxu0 }
 0x7c0   : > { %7013 = vst [vmem:[%s9502_s10 + $0x138] sm:$0xff] %v6853_v63   ;;  %v6848_v4 = vpack.c.bf16 %v10528_v29, %v10521_v38 }
 0x7c2   : > { %7012 = vst [vmem:[%s9502_s10 + $0x130] sm:$0xff] %v6848_v4  }
 0x7d4   : > { %3892 = vrot.lane.b32.xlu0 %v10360_v48, %s8742_s20 }
 0x7df   : > { %3599 = vmax.xlane.f32.xlu1 %v10489_v47 }
 0x7e3   : > { %3595 = vmax.xlane.f32.xlu1 %v10494_v41 }
 0x7e7   : > { %3607 = vmax.xlane.f32.xlu1 %v10505_v25 }
 0x7eb   : > { %3603 = vmax.xlane.f32.xlu1 %v10510_v31 }
 0x7ef   : > { %3615 = vmax.xlane.f32.xlu1 %v10523_v58 }
 0x7f3   : > { %3611 = vmax.xlane.f32.xlu1 %v10528_v29 }
 0x82b   : > { %v3590_v63 = vpop.xlane.xlu0 %3589 }
 0x82c   : > { %v3619_v8 = vsub.f32 %v7664_v34, %v3590_v63 }
 0x82e   : > { %v3637_v45 = vmul.f32 1.442695, %v3619_v8 }
 0x82f   : > { %v3592_v39 = vpop.xlane.xlu1 %3591  ;;  %v3586_v4 = vpop.xlane.xlu0 %3585 }
 0x830   : > { %8393 = vpow2.f32 %v3637_v45  ;;  %v3620_v19 = vsub.f32 %v7665_v54, %v3592_v39  ;;  %v3617_v51 = vsub.f32 %v3441_v42, %v3586_v4 }
 0x832   : > { %v3639_v22 = vmul.f32 1.442695, %v3620_v19  ;;  %v3633_v33 = vmul.f32 1.442695, %v3617_v51 }
 0x833   : > { %v3588_v1 = vpop.xlane.xlu1 %3587  ;;  %v3598_v51 = vpop.xlane.xlu0 %3597 }
 0x834   : > { %8395 = vpow2.f32 %v3639_v22  ;;  %v3618_v6 = vsub.f32 %v3444_v26, %v3588_v1 }
 0x835   : > { %8397 = vpow2.f32 %v3633_v33 }
 0x836   : > { %v3635_v59 = vmul.f32 1.442695, %v3618_v6  ;;  %v3623_v6 = vsub.f32 %v10483_v28, %v3598_v51 }
 0x837   : > { %v3594_v33 = vpop.xlane.xlu0 %3593  ;;  %v10559_v19 = vpop.permute.xlu1 %3894 }
 0x838   : > { %8399 = vpow2.f32 %v3635_v59  ;;  %v3621_v22 = vsub.f32 %v10487_v36, %v3594_v33  ;;  %v3645_v59 = vmul.f32 1.442695, %v3623_v6 }
 0x83a   : > { %v3641_v45 = vmul.f32 1.442695, %v3621_v22  ;;  %8401 = vpow2.f32 %v3645_v59 }
 0x83b   : > { %v3606_v1 = vpop.xlane.xlu0 %3605 }
 0x83c   : > { %v3627_v63 = vsub.f32 %v10499_v23, %v3606_v1  ;;  %8403 = vpow2.f32 %v3641_v45 }
 0x83d   : > { %v10542_v17 = vpop.eup %8393 }
 0x83e   : > { %3669 = vadd.xlane.f32.xlu0 %v10542_v17  ;;  %v3653_v46 = vmul.f32 1.442695, %v3627_v63 }
 0x83f   : > { %v3602_v54 = vpop.xlane.xlu0 %3601 }
 0x840   : > { %v3625_v36 = vsub.f32 %v10503_v11, %v3602_v54 }
 0x841   : > { %v10545_v35 = vpop.eup %8395 }
 0x842   : > { %v10547_v8 = vpop.eup %8397  ;;  %3671 = vadd.xlane.f32.xlu1 %v10545_v35  ;;  %v3649_v23 = vmul.f32 1.442695, %v3625_v36 }
 0x843   : > { %3665 = vadd.xlane.f32.xlu0 %v10547_v8  ;;  %v3614_v34 = vpop.xlane.xlu0 %3613 }
 0x844   : > { %v3631_v37 = vsub.f32 %v10515_v40, %v3614_v34 }
 0x845   : > { %v10551_v39 = vpop.eup %8399 }
 0x846   : > { %3667 = vadd.xlane.f32.xlu1 %v10551_v39  ;;  %v3661_v6 = vmul.f32 1.442695, %v3631_v37 }
 0x847   : > { %v3610_v51 = vpop.xlane.xlu0 %3609  ;;  %v10569_v59 = vpop.eup %8401 }
 0x84b   : > { %v3893_v36 = vpop.permute.xlu0 %3892 }
 0x857   : > { %3890 = vrot.lane.b32.xlu1 %v10370_v0, %s8742_s20 }
 0x859   : > { %3888 = vrot.lane.b32.xlu0 %v10380_v10, %s8742_s20 }
 0x868   : > { %v3600_v42 = vpop.xlane.xlu1 %3599 }
 0x869   : > { %v3624_v26 = vsub.f32 %v10489_v47, %v3600_v42  ;;  %v3629_v47 = vsub.f32 %v10521_v38, %v3610_v51 }
 0x86b   : > { %v3647_v4 = vmul.f32 1.442695, %v3624_v26  ;;  %v3657_v40 = vmul.f32 1.442695, %v3629_v47 }
 0x86c   : > { %v3596_v52 = vpop.xlane.xlu1 %3595 }
 0x86d   : > { %v3622_v28 = vsub.f32 %v10494_v41, %v3596_v52  ;;  %8405 = vpow2.f32 %v3647_v4 }
 0x86f   : > { %v3643_v12 = vmul.f32 1.442695, %v3622_v28 }
 0x870   : > { %v3608_v33 = vpop.xlane.xlu1 %3607 }
 0x871   : > { %8407 = vpow2.f32 %v3643_v12  ;;  %v3628_v1 = vsub.f32 %v10505_v25, %v3608_v33  ;;  %v10574_v12 = vpop.eup %8403 }
 0x872   : > { %8409 = vpow2.f32 %v3653_v46 }
 0x873   : > { %8411 = vpow2.f32 %v3661_v6  ;;  %v3655_v52 = vmul.f32 1.442695, %v3628_v1 }
 0x874   : > { %v3604_v22 = vpop.xlane.xlu1 %3603  ;;  %8413 = vpow2.f32 %v3649_v23 }
 0x875   : > { %8415 = vpow2.f32 %v3657_v40  ;;  %v3626_v37 = vsub.f32 %v10510_v31, %v3604_v22 }
 0x876   : > { %8417 = vpow2.f32 %v3655_v52 }
 0x877   : > { %v3651_v54 = vmul.f32 1.442695, %v3626_v37 }
 0x878   : > { %3677 = vadd.xlane.f32.xlu0 %v10569_v59  ;;  %v3616_v11 = vpop.xlane.xlu1 %3615 }
 0x879   : > { %v3632_v38 = vsub.f32 %v10523_v58, %v3616_v11 }
 0x87a   : > { %v10577_v41 = vpop.eup %8405 }
 0x87b   : > { %v3663_v46 = vmul.f32 1.442695, %v3632_v38  ;;  %3673 = vadd.xlane.f32.xlu1 %v10574_v12 }
 0x87c   : > { %v3612_v25 = vpop.xlane.xlu1 %3611 }
 0x87d   : > { %8419 = vpow2.f32 %v3663_v46  ;;  %v3630_v34 = vsub.f32 %v10528_v29, %v3612_v25 }
 0x87e   : > { %v10580_v42 = vpop.eup %8407  ;;  %8421 = vpow2.f32 %v3651_v54 }
 0x87f   : > { %3675 = vadd.xlane.f32.xlu0 %v10580_v42  ;;  %3679 = vadd.xlane.f32.xlu1 %v10577_v41  ;;  %v10584_v58 = vpop.eup %8409  ;;  %v3659_v31 = vmul.f32 1.442695, %v3630_v34  ;;  %v3944_v34 = vsel %vm1008_vm0, %v10420_v61, 0 }
 0x880   : > { %v10586_v45 = vpop.eup %8411 }
 0x881   : > { %v10590_v26 = vpop.eup %8413  ;;  %8423 = vpow2.f32 %v3659_v31 }
 0x882   : > { %v10592_v29 = vpop.eup %8415 }
 0x883   : > { %3685 = vadd.xlane.f32.xlu1 %v10584_v58  ;;  %3693 = vadd.xlane.f32.xlu0 %v10586_v45  ;;  %v10596_v63 = vpop.eup %8417 }
 0x887   : > { %3681 = vadd.xlane.f32.xlu1 %v10590_v26  ;;  %3689 = vadd.xlane.f32.xlu0 %v10592_v29 }
 0x88a   : > { %v10598_v4 = vpop.eup %8419 }
 0x88b   : > { %3687 = vadd.xlane.f32.xlu1 %v10596_v63  ;;  %3695 = vadd.xlane.f32.xlu0 %v10598_v4  ;;  %v10602_v28 = vpop.eup %8421 }
 0x88e   : > { %v10605_v51 = vpop.eup %8423 }
 0x88f   : > { %3683 = vadd.xlane.f32.xlu1 %v10602_v28 }
 0x893   : > { %3691 = vadd.xlane.f32.xlu1 %v10605_v51 }
 0x8a1   : > { %3884 = vrot.lane.b32.xlu0 %v10400_v15, %s8742_s20 }
 0x8a4   : > { %3886 = vrot.lane.b32.xlu1 %v10390_v21, %s8742_s20 }
 0x8a5   : > { %3882 = vrot.lane.b32.xlu0 %v10410_v43, %s8742_s20 }
 0x8a8   : > { %3858 = vrot.lane.b32.xlu1 %v12033_v56, %s8742_s20 }
 0x8a9   : > { %3860 = vrot.lane.b32.xlu0 %v12034_v18, %s8742_s20 }
 0x8ac   : > { %3862 = vrot.lane.b32.xlu1 %v12035_v20, %s8742_s20 }
 0x8ad   : > { %3864 = vrot.lane.b32.xlu0 %v12036_v3, %s8742_s20 }
 0x8b0   : > { %3866 = vrot.lane.b32.xlu1 %v12037_v44, %s8742_s20 }
 0x8b1   : > { %3868 = vrot.lane.b32.xlu0 %v12038_v13, %s8742_s20 }
 0x8b4   : > { %3870 = vrot.lane.b32.xlu1 %v12039_v9, %s8742_s20 }
 0x8b5   : > { %3872 = vrot.lane.b32.xlu0 %v12040_v30, %s8742_s20 }
 0x8b8   : > { %4296 = vrot.lane.b32.xlu1 %v10089_v49, %s8742_s20 }
 0x8b9   : > { %4298 = vrot.lane.b32.xlu0 %v11967_v27, %s8742_s20 }
 0x8bd   : > { %4294 = vrot.lane.b32.xlu0 %v11973_v55, %s8742_s20 }
 0x8c1   : > { %4292 = vrot.lane.b32.xlu0 %v10101_v16, %s8742_s20 }
 0x8c5   : > { %4290 = vrot.lane.b32.xlu0 %v11976_v5, %s8742_s20 }
 0x8c7   : > { %v3670_v33 = vpop.xlane.xlu0 %3669 }
 0x8cb   : > { %v3672_v6 = vpop.xlane.xlu1 %3671 }
 0x8cc   : > { %v3666_v47 = vpop.xlane.xlu0 %3665  ;;  %8425 = vrcp.f32 %v3672_v6 }
 0x8cd   : > { %8427 = vrcp.f32 %v3666_v47 }
 0x8ce   : > { %8429 = vrcp.f32 %v3670_v33 }
 0x8cf   : > { %v3668_v23 = vpop.xlane.xlu1 %3667 }
 0x8d0   : > { %8431 = vrcp.f32 %v3668_v23  ;;  %v3889_v31 = vpop.permute.xlu0 %3888 }
 0x8d1   : > { %v3932_v61 = vsel %vm1008_vm0, %v3889_v31, 0 }
 0x8d9   : > { %v8426_v1 = vpop.eup %8425 }
 0x8da   : > { %v8428_v22 = vpop.eup %8427  ;;  %v3716_v11 = vmul.f32 %v8426_v1, %v10545_v35  ;;  %v3941_v35 = vsel %vm1008_vm0, %v10559_v19, 0 }
 0x8db   : > { %v8430_v40 = vpop.eup %8429  ;;  %v3713_v37 = vmul.f32 %v8428_v22, %v10547_v8  ;;  %v3938_v8 = vsel %vm1008_vm0, %v3893_v36, 0 }
 0x8dc   : > { %v3715_v46 = vmul.f32 %v8430_v40, %v10542_v17  ;;  %v3891_v17 = vpop.permute.xlu1 %3890 }
 0x8dd   : > { %v8432_v52 = vpop.eup %8431 }
 0x8de   : > { %v3714_v38 = vmul.f32 %v8432_v52, %v10551_v39  ;;  %v3730_v54 = vpack.c.bf16 %v3716_v11, %v3715_v46  ;;  %v3935_v39 = vsel %vm1008_vm0, %v3891_v17, 0 }
 0x8e0   : > { %v3729_v25 = vpack.c.bf16 %v3714_v38, %v3713_v37 }
 0x8e2   : > { %7694 = vmatprep.mubr.bf16.mxu1 %v3729_v25 }
 0x8e3   : > { %7695 = vmatmul.mubr.bf16.vlgmr.msra.gmra.mxu1 %v3730_v54 }
 0x8e4   : > { %7711 = vmatpush3.bf16.xpose.msra.mxu1 %v3944_v34 }
 0x8e5   : > { %8007 = vmatprep.subr.msk.bf16.mxu1 %vm1008_vm0, %v10559_v19 }
 0x8ec   : > { %7713 = vmatpush3.bf16.xpose.msra.mxu1 %v3941_v35 }
 0x8ed   : > { %8008 = vmatprep.subr.msk.bf16.mxu1 %vm1008_vm0, %v3893_v36 }
 0x8f4   : > { %7715 = vmatpush3.bf16.xpose.msra.mxu1 %v3938_v8 }
 0x8f5   : > { %8009 = vmatprep.subr.msk.bf16.mxu1 %vm1008_vm0, %v3891_v17 }
 0x8fc   : > { %7717 = vmatpush3.bf16.xpose.msra.mxu1 %v3935_v39 }
 0x8fd   : > { %8010 = vmatprep.subr.msk.bf16.mxu1 %vm1008_vm0, %v3889_v31 }
 0x901   : > { %v3678_v33 = vpop.xlane.xlu0 %3677 }
 0x902   : > { %8433 = vrcp.f32 %v3678_v33 }
 0x904   : > { %7719 = vmatpush3.bf16.xpose.msra.mxu1 %v3932_v61  ;;  %v3674_v19 = vpop.xlane.xlu1 %3673 }
 0x905   : > { %8435 = vrcp.f32 %v3674_v19 }
 0x908   : > { %v3680_v6 = vpop.xlane.xlu1 %3679  ;;  %v3676_v47 = vpop.xlane.xlu0 %3675 }
 0x909   : > { %8437 = vrcp.f32 %v3680_v6 }
 0x90a   : > { %8439 = vrcp.f32 %v3676_v47 }
 0x90c   : > { %v3686_v36 = vpop.xlane.xlu1 %3685  ;;  %v3694_v23 = vpop.xlane.xlu0 %3693 }
 0x90f   : > { %v8434_v40 = vpop.eup %8433 }
 0x910   : > { %v3682_v1 = vpop.xlane.xlu1 %3681  ;;  %v3690_v22 = vpop.xlane.xlu0 %3689  ;;  %v3719_v25 = vmul.f32 %v8434_v40, %v10569_v59 }
 0x912   : > { %v8436_v37 = vpop.eup %8435 }
 0x913   : > { %v3717_v8 = vmul.f32 %v8436_v37, %v10574_v12 }
 0x914   : > { %v3688_v52 = vpop.xlane.xlu1 %3687  ;;  %v3696_v11 = vpop.xlane.xlu0 %3695 }
 0x915   : > { %8441 = vrcp.f32 %v3688_v52 }
 0x916   : > { %v8438_v38 = vpop.eup %8437  ;;  %8443 = vrcp.f32 %v3682_v1 }
 0x917   : > { %v8440_v46 = vpop.eup %8439  ;;  %v3720_v54 = vmul.f32 %v8438_v38, %v10577_v41  ;;  %8445 = vrcp.f32 %v3686_v36 }
 0x918   : > { %v3684_v34 = vpop.xlane.xlu1 %3683  ;;  %v3885_v35 = vpop.permute.xlu0 %3884  ;;  %v3718_v17 = vmul.f32 %v8440_v46, %v10580_v42 }
 0x919   : > { %8447 = vrcp.f32 %v3684_v34  ;;  %v3732_v39 = vpack.c.bf16 %v3720_v54, %v3719_v25  ;;  %v3926_v46 = vsel %vm1008_vm0, %v3885_v35, 0 }
 0x91a   : > { %v3731_v31 = vpack.c.bf16 %v3718_v17, %v3717_v8  ;;  %8449 = vrcp.f32 %v3690_v22 }
 0x91c   : > { %7698 = vmatprep.mubr.bf16.mxu1 %v3731_v31  ;;  %v3692_v61 = vpop.xlane.xlu1 %3691  ;;  %v3883_v33 = vpop.permute.xlu0 %3882 }
 0x91d   : > { %8451 = vrcp.f32 %v3692_v61  ;;  %7699 = vmatmul.mubr.bf16.gmra.mxu1 %v3732_v39 }
 0x91e   : > { %8453 = vrcp.f32 %v3696_v11 }
 0x91f   : > { %8455 = vrcp.f32 %v3694_v23 }
 0x920   : > { %v3887_v59 = vpop.permute.xlu1 %3886  ;;  %v3861_v41 = vpop.permute.xlu0 %3860 }
 0x921   : > { %8011 = vmatprep.subr.msk.bf16.mxu1 %vm1008_vm0, %v3887_v59  ;;  %v3929_v19 = vsel %vm1008_vm0, %v3887_v59, 0 }
 0x922   : > { %7721 = vmatpush3.bf16.xpose.msra.mxu1 %v3929_v19  ;;  %v8442_v12 = vpop.eup %8441  ;;  %v3923_v19 = vsel %vm1008_vm0, %v3883_v33, 0 }
 0x923   : > { %8012 = vmatprep.subr.msk.bf16.mxu1 %vm1008_vm0, %v3885_v35  ;;  %v8444_v42 = vpop.eup %8443  ;;  %v3724_v22 = vmul.f32 %v8442_v12, %v10596_v63 }
 0x924   : > { %v3859_v6 = vpop.permute.xlu1 %3858  ;;  %v3865_v47 = vpop.permute.xlu0 %3864  ;;  %v3721_v40 = vmul.f32 %v8444_v42, %v10590_v26 }
 0x925   : > { %v8446_v36 = vpop.eup %8445 }
 0x926   : > { %v8448_v1 = vpop.eup %8447  ;;  %v3723_v38 = vmul.f32 %v8446_v36, %v10584_v58 }
 0x927   : > { %v3722_v23 = vmul.f32 %v8448_v1, %v10602_v28  ;;  %v8450_v52 = vpop.eup %8449 }
 0x928   : > { %v3863_v11 = vpop.permute.xlu1 %3862  ;;  %v3869_v37 = vpop.permute.xlu0 %3868  ;;  %v3734_v34 = vpack.c.bf16 %v3724_v22, %v3723_v38  ;;  %v3725_v63 = vmul.f32 %v8450_v52, %v10592_v29 }
 0x929   : > { %v3733_v25 = vpack.c.bf16 %v3722_v23, %v3721_v40 }
 0x92a   : > { %v8452_v54 = vpop.eup %8451  ;;  %7723 = vmatpush3.bf16.xpose.msra.mxu1 %v3926_v46 }
 0x92b   : > { %v8454_v8 = vpop.eup %8453  ;;  %7702 = vmatprep.mubr.bf16.mxu1 %v3733_v25  ;;  %8013 = vmatprep.subr.msk.bf16.mxu1 %vm1008_vm0, %v3883_v33  ;;  %v3726_v26 = vmul.f32 %v8452_v54, %v10605_v51 }
 0x92c   : > { %v3867_v28 = vpop.permute.xlu1 %3866  ;;  %7703 = vmatmul.mubr.bf16.gmra.mxu1 %v3734_v34  ;;  %v3873_v17 = vpop.permute.xlu0 %3872  ;;  %v3728_v58 = vmul.f32 %v8454_v8, %v10598_v4 }
 0x92d   : > { %v8456_v39 = vpop.eup %8455  ;;  %v3735_v31 = vpack.c.bf16 %v3726_v26, %v3725_v63 }
 0x92e   : > { %v3727_v59 = vmul.f32 %v8456_v39, %v10586_v45 }
 0x92f   : > { %7706 = vmatprep.mubr.bf16.mxu1 %v3735_v31 }
 0x930   : > { %v3871_v35 = vpop.permute.xlu1 %3870  ;;  %v4299_v61 = vpop.permute.xlu0 %4298  ;;  %v3736_v29 = vpack.c.bf16 %v3728_v58, %v3727_v59 }
 0x931   : > { %7742 = vmatprep.subr.bf16.mxu0 %v4299_v61 }
 0x932   : > { %7725 = vmatpush3.bf16.xpose.msra.mxu1 %v3923_v19  ;;  %7743 = vmatpush3.bf16.msra.mxu0 %v4299_v61 }
 0x934   : > { %v4297_v12 = vpop.permute.xlu1 %4296  ;;  %7707 = vmatmul.mubr.bf16.gmra.mxu1 %v3736_v29  ;;  %v4295_v51 = vpop.permute.xlu0 %4294 }
 0x935   : > { %7726 = vmatprep.mubr.msk.bf16.mxu1 %vm1008_vm0, %v3859_v6  ;;  %7744 = vmatprep.subr.bf16.mxu0 %v4297_v12 }
 0x936   : > { %7745 = vmatpush3.bf16.msra.mxu0 %v4297_v12 }
 0x937   : > { %7746 = vmatprep.subr.bf16.mxu0 %v4295_v51 }
 0x938   : > { %v4293_v4 = vpop.permute.xlu0 %4292 }
 0x93a   : > { %7747 = vmatpush3.bf16.msra.mxu0 %v4295_v51 }
 0x93b   : > { %7748 = vmatprep.subr.bf16.mxu0 %v4293_v4 }
 0x93c   : > { %7727 = vmatmul.mubr.msk.bf16.vlgmr.msra.gmra.mxu1 %vm1008_vm0, %v3861_v41  ;;  %v4291_v45 = vpop.permute.xlu0 %4290 }
 0x93d   : > { %7730 = vmatprep.mubr.msk.bf16.mxu1 %vm1008_vm0, %v3863_v11 }
 0x93e   : > { %7749 = vmatpush3.bf16.msra.mxu0 %v4293_v4 }
 0x93f   : > { %7750 = vmatprep.subr.bf16.mxu0 %v4291_v45 }
 0x942   : > { %7751 = vmatpush3.bf16.msra.mxu0 %v4291_v45 }
 0x944   : > { %7731 = vmatmul.mubr.msk.bf16.gmra.mxu1 %vm1008_vm0, %v3865_v47 }
 0x945   : > { %7734 = vmatprep.mubr.msk.bf16.mxu1 %vm1008_vm0, %v3867_v28 }
 0x94c   : > { %7735 = vmatmul.mubr.msk.bf16.gmra.mxu1 %vm1008_vm0, %v3869_v37 }
 0x94d   : > { %7738 = vmatprep.mubr.msk.bf16.mxu1 %vm1008_vm0, %v3871_v35 }
 0x954   : > { %7739 = vmatmul.mubr.msk.bf16.gmra.mxu1 %vm1008_vm0, %v3873_v17 }
 0x9a3   : > { %v7696_v33 = vpop.f32.mrf.mxu1 }
 0x9a4   : > { %3836 = vst.msk [vmem:[#allocation2 + $0x90] sm:$0xff] %vm1008_vm0, %v7696_v33 }
 0x9a5   : > { %v3771_v41 = vpop.f32.mrf.mxu1 }
 0x9a6   : > { %3834 = vst.msk [vmem:[#allocation2 + $0x80] sm:$0xff] %vm1008_vm0, %v3771_v41 }
 0x9a7   : > { %v7697_v42 = vpop.f32.mrf.mxu1 }
 0x9a8   : > { %3837 = vst.msk [vmem:[#allocation2 + $0x98] sm:$0xff] %vm1008_vm0, %v7697_v42 }
 0x9a9   : > { %v3774_v6 = vpop.f32.mrf.mxu1 }
 0x9aa   : > { %3835 = vst.msk [vmem:[#allocation2 + $0x88] sm:$0xff] %vm1008_vm0, %v3774_v6 }
 0x9dd   : > { %v7700_v47 = vpop.f32.mrf.mxu1 }
 0x9de   : > { %3840 = vst.msk [vmem:[#allocation2 + $0xb0] sm:$0xff] %vm1008_vm0, %v7700_v47 }
 0x9df   : > { %v3787_v36 = vpop.f32.mrf.mxu1 }
 0x9e0   : > { %3838 = vst.msk [vmem:[#allocation2 + $0xa0] sm:$0xff] %vm1008_vm0, %v3787_v36 }
 0x9e1   : > { %v7701_v1 = vpop.f32.mrf.mxu1 }
 0x9e2   : > { %3841 = vst.msk [vmem:[#allocation2 + $0xb8] sm:$0xff] %vm1008_vm0, %v7701_v1 }
 0x9e3   : > { %v3790_v22 = vpop.f32.mrf.mxu1 }
 0x9e4   : > { %3839 = vst.msk [vmem:[#allocation2 + $0xa8] sm:$0xff] %vm1008_vm0, %v3790_v22 }
 0x9ec   : > { %v7704_v40 = vpop.f32.mrf.mxu1 }
 0x9ed   : > { %3844 = vst.msk [vmem:[#allocation2 + $0xd0] sm:$0xff] %vm1008_vm0, %v7704_v40 }
 0x9ee   : > { %v3803_v23 = vpop.f32.mrf.mxu1 }
 0x9ef   : > { %3842 = vst.msk [vmem:[#allocation2 + $0xc0] sm:$0xff] %vm1008_vm0, %v3803_v23 }
 0x9f0   : > { %v7705_v52 = vpop.f32.mrf.mxu1 }
 0x9f1   : > { %3845 = vst.msk [vmem:[#allocation2 + $0xd8] sm:$0xff] %vm1008_vm0, %v7705_v52 }
 0x9f2   : > { %v3806_v11 = vpop.f32.mrf.mxu1 }
 0x9f3   : > { %3843 = vst.msk [vmem:[#allocation2 + $0xc8] sm:$0xff] %vm1008_vm0, %v3806_v11 }
 0x9f4   : > { %v7708_v37 = vpop.f32.mrf.mxu1 }
 0x9f5   : > { %3848 = vst.msk [vmem:[#allocation2 + $0xf0] sm:$0xff] %vm1008_vm0, %v7708_v37 }
 0x9f6   : > { %v3819_v38 = vpop.f32.mrf.mxu1 }
 0x9f7   : > { %3846 = vst.msk [vmem:[#allocation2 + $0xe0] sm:$0xff] %vm1008_vm0, %v3819_v38 }
 0x9f8   : > { %v7709_v46 = vpop.f32.mrf.mxu1 }
 0x9f9   : > { %3849 = vst.msk [vmem:[#allocation2 + $0xf8] sm:$0xff] %vm1008_vm0, %v7709_v46 }
 0x9fa   : > { %v3822_v25 = vpop.f32.mrf.mxu1 }
 0x9fb   : > { %3847 = vst.msk [vmem:[#allocation2 + $0xe8] sm:$0xff] %vm1008_vm0, %v3822_v25 }
 0x9fc   : > { %v7728_v54 = vpop.f32.mrf.mxu1 }
 0x9fd   : > { %4128 = vmax.xlane.f32.xlu0 %v7728_v54 }
 0x9fe   : > { %v3980_v34 = vpop.f32.mrf.mxu1 }
 0x9ff   : > { %4124 = vmax.xlane.f32.xlu1 %v3980_v34 }
 0xa00   : > { %v7729_v8 = vpop.f32.mrf.mxu1 }
 0xa01   : > { %v6863_v63 = vpack.c.bf16 %v7729_v8, %v7728_v54 }
 0xa02   : > { %v10698_v26 = vpop.f32.mrf.mxu1 }
 0xa03   : > { %7015 = vst [vmem:[%s9502_s10 + $0x148] sm:$0xff] %v6863_v63   ;;  %v6858_v28 = vpack.c.bf16 %v10698_v26, %v3980_v34  ;;  %4130 = vmax.xlane.f32.xlu1 %v7729_v8  ;;  %4126 = vmax.xlane.f32.xlu0 %v10698_v26 }
 0xa04   : > { %v10703_v17 = vpop.f32.mrf.mxu1 }
 0xa05   : > { %7014 = vst [vmem:[%s9502_s10 + $0x140] sm:$0xff] %v6858_v28  }
 0xa06   : > { %v10706_v39 = vpop.f32.mrf.mxu1 }
 0xa08   : > { %v10708_v31 = vpop.f32.mrf.mxu1 }
 0xa09   : > { %v6873_v58 = vpack.c.bf16 %v10708_v31, %v10703_v17 }
 0xa0a   : > { %v10712_v35 = vpop.f32.mrf.mxu1 }
 0xa0b   : > { %7017 = vst [vmem:[%s9502_s10 + $0x158] sm:$0xff] %v6873_v58   ;;  %v6868_v61 = vpack.c.bf16 %v10712_v35, %v10706_v39 }
 0xa0c   : > { %v10717_v59 = vpop.f32.mrf.mxu1 }
 0xa0d   : > { %7016 = vst [vmem:[%s9502_s10 + $0x150] sm:$0xff] %v6868_v61  }
 0xa0e   : > { %v10720_v19 = vpop.f32.mrf.mxu1 }
 0xa10   : > { %v10722_v29 = vpop.f32.mrf.mxu1 }
 0xa11   : > { %v6883_v12 = vpack.c.bf16 %v10722_v29, %v10717_v59 }
 0xa12   : > { %v10726_v51 = vpop.f32.mrf.mxu1 }
 0xa13   : > { %7019 = vst [vmem:[%s9502_s10 + $0x168] sm:$0xff] %v6883_v12   ;;  %v6878_v4 = vpack.c.bf16 %v10726_v51, %v10720_v19 }
 0xa14   : > { %4286 = vrot.lane.b32.xlu1 %v11979_v14, %s8742_s20  ;;  %v10733_v45 = vpop.f32.mrf.mxu1 }
 0xa15   : > { %7018 = vst [vmem:[%s9502_s10 + $0x160] sm:$0xff] %v6878_v4  }
 0xa16   : > { %v10736_v33 = vpop.f32.mrf.mxu1 }
 0xa18   : > { %v10738_v41 = vpop.f32.mrf.mxu1 }
 0xa19   : > { %v6893_v42 = vpack.c.bf16 %v10738_v41, %v10733_v45  ;;  %4288 = vrot.lane.b32.xlu0 %v10113_v32, %s8742_s20 }
 0xa1a   : > { %v10744_v6 = vpop.f32.mrf.mxu1 }
 0xa1b   : > { %7021 = vst [vmem:[%s9502_s10 + $0x178] sm:$0xff] %v6893_v42   ;;  %v6888_v47 = vpack.c.bf16 %v10744_v6, %v10736_v33 }
 0xa1d   : > { %7020 = vst [vmem:[%s9502_s10 + $0x170] sm:$0xff] %v6888_v47  }
 0xa38   : > { %4136 = vmax.xlane.f32.xlu0 %v10703_v17  ;;  %4138 = vmax.xlane.f32.xlu1 %v10708_v31 }
 0xa3c   : > { %4132 = vmax.xlane.f32.xlu0 %v10706_v39  ;;  %4134 = vmax.xlane.f32.xlu1 %v10712_v35 }
 0xa40   : > { %4144 = vmax.xlane.f32.xlu0 %v10717_v59  ;;  %4146 = vmax.xlane.f32.xlu1 %v10722_v29 }
 0xa44   : > { %4140 = vmax.xlane.f32.xlu0 %v10720_v19  ;;  %4142 = vmax.xlane.f32.xlu1 %v10726_v51 }
 0xa48   : > { %4152 = vmax.xlane.f32.xlu0 %v10733_v45 }
 0xa4c   : > { %4148 = vmax.xlane.f32.xlu0 %v10736_v33 }
 0xa55   : > { %4515 = vrot.lane.b32.xlu1 %v10336_v50, %s8743_s26 }
 0xa62   : > { %4284 = vrot.lane.b32.xlu0 %v10125_v62, %s8742_s20 }
 0xa66   : > { %4513 = vrot.lane.b32.xlu0 %v10350_v57, %s8743_s26 }
 0xa6a   : > { %4511 = vrot.lane.b32.xlu0 %v10360_v48, %s8743_s26 }
 0xa6e   : > { %4507 = vrot.lane.b32.xlu0 %v10380_v10, %s8743_s26 }
 0xa79   : > { %4154 = vmax.xlane.f32.xlu1 %v10738_v41 }
 0xa7d   : > { %4150 = vmax.xlane.f32.xlu1 %v10744_v6 }
 0xa86   : > { %v4129_v36 = vpop.xlane.xlu0 %4128 }
 0xa87   : > { %v4158_v1 = vsub.f32 %v7728_v54, %v4129_v36 }
 0xa88   : > { %v4125_v22 = vpop.xlane.xlu1 %4124 }
 0xa89   : > { %v4176_v40 = vmul.f32 1.442695, %v4158_v1  ;;  %v4156_v23 = vsub.f32 %v3980_v34, %v4125_v22 }
 0xa8b   : > { %8457 = vpow2.f32 %v4176_v40  ;;  %v4172_v52 = vmul.f32 1.442695, %v4156_v23 }
 0xa8c   : > { %v4131_v11 = vpop.xlane.xlu1 %4130  ;;  %v4127_v37 = vpop.xlane.xlu0 %4126 }
 0xa8d   : > { %v4159_v38 = vsub.f32 %v7729_v8, %v4131_v11  ;;  %8459 = vpow2.f32 %v4172_v52  ;;  %v4157_v25 = vsub.f32 %v10698_v26, %v4127_v37 }
 0xa8f   : > { %v4178_v46 = vmul.f32 1.442695, %v4159_v38  ;;  %v4174_v58 = vmul.f32 1.442695, %v4157_v25 }
 0xa90   : > { %v4289_v63 = vpop.permute.xlu0 %4288  ;;  %v4287_v28 = vpop.permute.xlu1 %4286 }
 0xa91   : > { %7752 = vmatprep.subr.bf16.mxu0 %v4289_v63  ;;  %8461 = vpow2.f32 %v4178_v46 }
 0xa92   : > { %7753 = vmatpush3.bf16.msra.mxu0 %v4289_v63  ;;  %8463 = vpow2.f32 %v4174_v58 }
 0xa93   : > { %7754 = vmatprep.subr.bf16.mxu0 %v4287_v28 }
 0xa96   : > { %7755 = vmatpush3.bf16.msra.mxu0 %v4287_v28 }
 0xa98   : > { %v10773_v54 = vpop.eup %8457 }
 0xa99   : > { %4208 = vadd.xlane.f32.xlu1 %v10773_v54 }
 0xa9a   : > { %v10776_v34 = vpop.eup %8459 }
 0xa9d   : > { %4204 = vadd.xlane.f32.xlu1 %v10776_v34 }
 0xa9e   : > { %v10779_v8 = vpop.eup %8461 }
 0xa9f   : > { %v10782_v26 = vpop.eup %8463 }
 0xaa1   : > { %4210 = vadd.xlane.f32.xlu1 %v10779_v8 }
 0xaa5   : > { %4206 = vadd.xlane.f32.xlu1 %v10782_v26 }
 0xab6   : > { %4509 = vrot.lane.b32.xlu1 %v10370_v0, %s8743_s26 }
 0xac1   : > { %v4139_v61 = vpop.xlane.xlu1 %4138  ;;  %v4137_v12 = vpop.xlane.xlu0 %4136 }
 0xac2   : > { %v4162_v4 = vsub.f32 %v10703_v17, %v4137_v12  ;;  %v4163_v40 = vsub.f32 %v10708_v31, %v4139_v61 }
 0xac4   : > { %v4184_v42 = vmul.f32 1.442695, %v4162_v4  ;;  %v4186_v37 = vmul.f32 1.442695, %v4163_v40 }
 0xac5   : > { %v4135_v47 = vpop.xlane.xlu1 %4134  ;;  %v4133_v36 = vpop.xlane.xlu0 %4132 }
 0xac6   : > { %v4161_v1 = vsub.f32 %v10712_v35, %v4135_v47  ;;  %v4160_v22 = vsub.f32 %v10706_v39, %v4133_v36  ;;  %8465 = vpow2.f32 %v4184_v42 }
 0xac8   : > { %v4182_v23 = vmul.f32 1.442695, %v4161_v1  ;;  %v4180_v52 = vmul.f32 1.442695, %v4160_v22 }
 0xac9   : > { %v4145_v11 = vpop.xlane.xlu0 %4144  ;;  %v4147_v17 = vpop.xlane.xlu1 %4146 }
 0xaca   : > { %8467 = vpow2.f32 %v4182_v23  ;;  %v4166_v38 = vsub.f32 %v10717_v59, %v4145_v11  ;;  %v4167_v31 = vsub.f32 %v10722_v29, %v4147_v17 }
 0xacb   : > { %8469 = vpow2.f32 %v4180_v52 }
 0xacc   : > { %8471 = vpow2.f32 %v4186_v37  ;;  %v4192_v25 = vmul.f32 1.442695, %v4166_v38 }
 0xacd   : > { %v4141_v46 = vpop.xlane.xlu0 %4140  ;;  %v4143_v12 = vpop.xlane.xlu1 %4142 }
 0xace   : > { %v4164_v63 = vsub.f32 %v10720_v19, %v4141_v46  ;;  %8473 = vpow2.f32 %v4192_v25  ;;  %v4194_v19 = vmul.f32 1.442695, %v4167_v31  ;;  %v4165_v47 = vsub.f32 %v10726_v51, %v4143_v12 }
 0xad0   : > { %v4188_v58 = vmul.f32 1.442695, %v4164_v63 }
 0xad1   : > { %v4153_v35 = vpop.xlane.xlu0 %4152  ;;  %v10806_v1 = vpop.permute.xlu1 %4515 }
 0xad2   : > { %v4170_v39 = vsub.f32 %v10733_v45, %v4153_v35 }
 0xad3   : > { %v10794_v28 = vpop.eup %8465 }
 0xad4   : > { %v4200_v61 = vmul.f32 1.442695, %v4170_v39  ;;  %4216 = vadd.xlane.f32.xlu0 %v10794_v28 }
 0xad5   : > { %v4149_v59 = vpop.xlane.xlu0 %4148 }
 0xad6   : > { %8475 = vpow2.f32 %v4200_v61  ;;  %v4168_v4 = vsub.f32 %v10736_v33, %v4149_v59  ;;  %v4190_v33 = vmul.f32 1.442695, %v4165_v47 }
 0xad7   : > { %v10799_v42 = vpop.eup %8467  ;;  %8477 = vpow2.f32 %v4188_v58 }
 0xad8   : > { %v4196_v45 = vmul.f32 1.442695, %v4168_v4  ;;  %v10802_v36 = vpop.eup %8469  ;;  %4214 = vadd.xlane.f32.xlu0 %v10799_v42 }
 0xad9   : > { %v4285_v29 = vpop.permute.xlu0 %4284  ;;  %v10810_v51 = vpop.eup %8471 }
 0xada   : > { %8479 = vpow2.f32 %v4196_v45  ;;  %4212 = vadd.xlane.f32.xlu1 %v10802_v36  ;;  %7756 = vmatprep.subr.bf16.mxu0 %v4285_v29 }
 0xadb   : > { %7757 = vmatpush3.bf16.msra.mxu0 %v4285_v29  ;;  %8481 = vpow2.f32 %v4194_v19  ;;  %v10813_v22 = vpop.eup %8473 }
 0xadc   : > { %8014 = vmatprep.subr.msk.bf16.mxu0 %vm1008_vm0, %v10806_v1  ;;  %8483 = vpow2.f32 %v4190_v33 }
 0xade   : > { %4218 = vadd.xlane.f32.xlu1 %v10810_v51 }
 0xae2   : > { %4224 = vadd.xlane.f32.xlu1 %v10813_v22 }
 0xae3   : > { %v10816_v40 = vpop.eup %8475 }
 0xae4   : > { %4232 = vadd.xlane.f32.xlu0 %v10816_v40  ;;  %v10819_v23 = vpop.eup %8477 }
 0xae6   : > { %4220 = vadd.xlane.f32.xlu1 %v10819_v23 }
 0xae7   : > { %v10822_v52 = vpop.eup %8479 }
 0xae8   : > { %4228 = vadd.xlane.f32.xlu0 %v10822_v52  ;;  %v10825_v11 = vpop.eup %8481 }
 0xae9   : > { %v10828_v37 = vpop.eup %8483 }
 0xaea   : > { %4226 = vadd.xlane.f32.xlu1 %v10825_v11 }
 0xaee   : > { %4222 = vadd.xlane.f32.xlu1 %v10828_v37 }
 0xb02   : > { %v4155_v38 = vpop.xlane.xlu1 %4154 }
 0xb03   : > { %v4171_v46 = vsub.f32 %v10738_v41, %v4155_v38 }
 0xb05   : > { %v4202_v17 = vmul.f32 1.442695, %v4171_v46 }
 0xb06   : > { %v4151_v25 = vpop.xlane.xlu1 %4150 }
 0xb07   : > { %8485 = vpow2.f32 %v4202_v17  ;;  %v4169_v63 = vsub.f32 %v10744_v6, %v4151_v25  ;;  %v4563_v17 = vsel %vm1008_vm0, %v10806_v1, 0 }
 0xb09   : > { %v4198_v35 = vmul.f32 1.442695, %v4169_v63 }
 0xb0b   : > { %8487 = vpow2.f32 %v4198_v35 }
 0xb14   : > { %v10833_v39 = vpop.eup %8485 }
 0xb15   : > { %4234 = vadd.xlane.f32.xlu0 %v10833_v39 }
 0xb18   : > { %v10836_v31 = vpop.eup %8487 }
 0xb19   : > { %4230 = vadd.xlane.f32.xlu1 %v10836_v31 }
 0xb22   : > { %v4209_v58 = vpop.xlane.xlu1 %4208 }
 0xb26   : > { %v4205_v61 = vpop.xlane.xlu1 %4204 }
 0xb2a   : > { %v4211_v12 = vpop.xlane.xlu1 %4210  ;;  %4505 = vrot.lane.b32.xlu1 %v10390_v21, %s8743_s26 }
 0xb2b   : > { %4503 = vrot.lane.b32.xlu0 %v10400_v15, %s8743_s26  ;;  %8489 = vrcp.f32 %v4211_v12 }
 0xb2c   : > { %8491 = vrcp.f32 %v4205_v61 }
 0xb2d   : > { %8493 = vrcp.f32 %v4209_v58 }
 0xb2e   : > { %v4207_v41 = vpop.xlane.xlu1 %4206  ;;  %4485 = vrot.lane.b32.xlu1 %v12033_v56, %s8743_s26 }
 0xb2f   : > { %8495 = vrcp.f32 %v4207_v41  ;;  %4501 = vrot.lane.b32.xlu0 %v10410_v43, %s8743_s26 }
 0xb32   : > { %4489 = vrot.lane.b32.xlu1 %v12035_v20, %s8743_s26  ;;  %v4510_v1 = vpop.permute.xlu1 %4509 }
 0xb33   : > { %4487 = vrot.lane.b32.xlu0 %v12034_v18, %s8743_s26  ;;  %v4554_v63 = vsel %vm1008_vm0, %v4510_v1, 0 }
 0xb36   : > { %4493 = vrot.lane.b32.xlu1 %v12037_v44, %s8743_s26 }
 0xb37   : > { %4491 = vrot.lane.b32.xlu0 %v12036_v3, %s8743_s26 }
 0xb38   : > { %v8490_v6 = vpop.eup %8489 }
 0xb39   : > { %v8492_v59 = vpop.eup %8491  ;;  %v4255_v47 = vmul.f32 %v8490_v6, %v10779_v8  ;;  %v4514_v8 = vpop.permute.xlu0 %4513 }
 0xb3a   : > { %4497 = vrot.lane.b32.xlu1 %v12039_v9, %s8743_s26  ;;  %v8494_v4 = vpop.eup %8493  ;;  %v4252_v45 = vmul.f32 %v8492_v59, %v10776_v34 }
 0xb3b   : > { %4495 = vrot.lane.b32.xlu0 %v12038_v13, %s8743_s26  ;;  %v4254_v33 = vmul.f32 %v8494_v4, %v10773_v54  ;;  %v4560_v54 = vsel %vm1008_vm0, %v4514_v8, 0 }
 0xb3c   : > { %v8496_v19 = vpop.eup %8495 }
 0xb3d   : > { %v4253_v29 = vmul.f32 %v8496_v19, %v10782_v26  ;;  %v4269_v46 = vpack.c.bf16 %v4255_v47, %v4254_v33  ;;  %v4512_v34 = vpop.permute.xlu0 %4511 }
 0xb3e   : > { %4907 = vrot.lane.b32.xlu1 %v10089_v49, %s8743_s26  ;;  %v4557_v26 = vsel %vm1008_vm0, %v4512_v34, 0 }
 0xb3f   : > { %4499 = vrot.lane.b32.xlu0 %v12040_v30, %s8743_s26  ;;  %v4268_v38 = vpack.c.bf16 %v4253_v29, %v4252_v45 }
 0xb41   : > { %7758 = vmatprep.mubr.bf16.mxu0 %v4268_v38  ;;  %v4508_v25 = vpop.permute.xlu0 %4507 }
 0xb42   : > { %7759 = vmatmul.mubr.bf16.vlgmr.msra.gmra.mxu0 %v4269_v46  ;;  %v4551_v61 = vsel %vm1008_vm0, %v4508_v25, 0 }
 0xb43   : > { %7775 = vmatpush3.bf16.xpose.msra.mxu0 %v4563_v17  ;;  %4909 = vrot.lane.b32.xlu0 %v11967_v27, %s8743_s26 }
 0xb44   : > { %8015 = vmatprep.subr.msk.bf16.mxu0 %vm1008_vm0, %v4514_v8 }
 0xb47   : > { %4905 = vrot.lane.b32.xlu0 %v11973_v55, %s8743_s26 }
 0xb4b   : > { %7777 = vmatpush3.bf16.xpose.msra.mxu0 %v4560_v54  ;;  %4903 = vrot.lane.b32.xlu0 %v10101_v16, %s8743_s26 }
 0xb4c   : > { %8016 = vmatprep.subr.msk.bf16.mxu0 %vm1008_vm0, %v4512_v34 }
 0xb4f   : > { %4901 = vrot.lane.b32.xlu0 %v11976_v5, %s8743_s26 }
 0xb53   : > { %7779 = vmatpush3.bf16.xpose.msra.mxu0 %v4557_v26 }
 0xb54   : > { %8017 = vmatprep.subr.msk.bf16.mxu0 %vm1008_vm0, %v4510_v1 }
 0xb5b   : > { %7781 = vmatpush3.bf16.xpose.msra.mxu0 %v4554_v63 }
 0xb5c   : > { %8018 = vmatprep.subr.msk.bf16.mxu0 %vm1008_vm0, %v4508_v25 }
 0xb5d   : > { %v4217_v35 = vpop.xlane.xlu0 %4216 }
 0xb61   : > { %v4215_v58 = vpop.xlane.xlu0 %4214 }
 0xb62   : > { %8497 = vrcp.f32 %v4215_v58 }
 0xb63   : > { %7783 = vmatpush3.bf16.xpose.msra.mxu0 %v4551_v61  ;;  %v4213_v12 = vpop.xlane.xlu1 %4212 }
 0xb64   : > { %8499 = vrcp.f32 %v4213_v12 }
 0xb65   : > { %8501 = vrcp.f32 %v4217_v35 }
 0xb67   : > { %v4219_v41 = vpop.xlane.xlu1 %4218 }
 0xb68   : > { %8503 = vrcp.f32 %v4219_v41 }
 0xb6b   : > { %v4225_v6 = vpop.xlane.xlu1 %4224 }
 0xb6f   : > { %v4221_v59 = vpop.xlane.xlu1 %4220  ;;  %v8498_v4 = vpop.eup %8497 }
 0xb70   : > { %v4257_v45 = vmul.f32 %v8498_v4, %v10799_v42 }
 0xb71   : > { %v8500_v19 = vpop.eup %8499 }
 0xb72   : > { %v4256_v47 = vmul.f32 %v8500_v19, %v10802_v36  ;;  %v8502_v29 = vpop.eup %8501 }
 0xb73   : > { %v4227_v33 = vpop.xlane.xlu1 %4226  ;;  %v4258_v17 = vmul.f32 %v8502_v29, %v10794_v28 }
 0xb74   : > { %v4270_v38 = vpack.c.bf16 %v4257_v45, %v4256_v47  ;;  %8505 = vrcp.f32 %v4227_v33 }
 0xb75   : > { %v8504_v46 = vpop.eup %8503  ;;  %8507 = vrcp.f32 %v4221_v59 }
 0xb76   : > { %7762 = vmatprep.mubr.bf16.mxu0 %v4270_v38  ;;  %v4259_v8 = vmul.f32 %v8504_v46, %v10810_v51  ;;  %8509 = vrcp.f32 %v4225_v6  ;;  %v4233_v51 = vpop.xlane.xlu0 %4232 }
 0xb77   : > { %v4223_v54 = vpop.xlane.xlu1 %4222 }
 0xb78   : > { %8511 = vrcp.f32 %v4223_v54  ;;  %v4271_v34 = vpack.c.bf16 %v4259_v8, %v4258_v17 }
 0xb7a   : > { %7763 = vmatmul.mubr.bf16.gmra.mxu0 %v4271_v34  ;;  %v4229_v12 = vpop.xlane.xlu0 %4228 }
 0xb81   : > { %v8506_v26 = vpop.eup %8505 }
 0xb82   : > { %v8508_v36 = vpop.eup %8507  ;;  %v4263_v25 = vmul.f32 %v8506_v26, %v10825_v11 }
 0xb83   : > { %v8510_v1 = vpop.eup %8509  ;;  %v4260_v63 = vmul.f32 %v8508_v36, %v10819_v23 }
 0xb84   : > { %v4262_v58 = vmul.f32 %v8510_v1, %v10813_v22 }
 0xb85   : > { %v8512_v42 = vpop.eup %8511 }
 0xb86   : > { %v4261_v35 = vmul.f32 %v8512_v42, %v10828_v37  ;;  %v4273_v61 = vpack.c.bf16 %v4263_v25, %v4262_v58 }
 0xb88   : > { %v4272_v28 = vpack.c.bf16 %v4261_v35, %v4260_v63 }
 0xb8a   : > { %7766 = vmatprep.mubr.bf16.mxu0 %v4272_v28 }
 0xb8b   : > { %7767 = vmatmul.mubr.bf16.gmra.mxu0 %v4273_v61 }
 0xb9e   : > { %v4235_v41 = vpop.xlane.xlu0 %4234 }
 0xb9f   : > { %8513 = vrcp.f32 %v4235_v41 }
 0xba0   : > { %8515 = vrcp.f32 %v4229_v12 }
 0xba1   : > { %8517 = vrcp.f32 %v4233_v51 }
 0xba2   : > { %v4231_v6 = vpop.xlane.xlu1 %4230  ;;  %v4504_v59 = vpop.permute.xlu0 %4503 }
 0xba3   : > { %8519 = vrcp.f32 %v4231_v6  ;;  %v4545_v38 = vsel %vm1008_vm0, %v4504_v59, 0 }
 0xba6   : > { %v4506_v11 = vpop.permute.xlu1 %4505  ;;  %v4502_v4 = vpop.permute.xlu0 %4501 }
 0xba7   : > { %8019 = vmatprep.subr.msk.bf16.mxu0 %vm1008_vm0, %v4506_v11  ;;  %v4548_v23 = vsel %vm1008_vm0, %v4506_v11, 0 }
 0xba8   : > { %7785 = vmatpush3.bf16.xpose.msra.mxu0 %v4548_v23 }
 0xba9   : > { %8020 = vmatprep.subr.msk.bf16.mxu0 %vm1008_vm0, %v4504_v59 }
 0xbaa   : > { %v4486_v22 = vpop.permute.xlu1 %4485  ;;  %v4488_v37 = vpop.permute.xlu0 %4487 }
 0xbac   : > { %v8514_v19 = vpop.eup %8513 }
 0xbad   : > { %v8516_v47 = vpop.eup %8515  ;;  %v4267_v17 = vmul.f32 %v8514_v19, %v10833_v39  ;;  %v4542_v39 = vsel %vm1008_vm0, %v4502_v4, 0 }
 0xbae   : > { %v4490_v45 = vpop.permute.xlu1 %4489  ;;  %v4492_v29 = vpop.permute.xlu0 %4491  ;;  %v4264_v8 = vmul.f32 %v8516_v47, %v10822_v52 }
 0xbaf   : > { %v8518_v33 = vpop.eup %8517 }
 0xbb0   : > { %v8520_v46 = vpop.eup %8519  ;;  %7787 = vmatpush3.bf16.xpose.msra.mxu0 %v4545_v38  ;;  %v4266_v36 = vmul.f32 %v8518_v33, %v10816_v40 }
 0xbb1   : > { %8021 = vmatprep.subr.msk.bf16.mxu0 %vm1008_vm0, %v4502_v4  ;;  %v4265_v54 = vmul.f32 %v8520_v46, %v10836_v31 }
 0xbb2   : > { %v4494_v34 = vpop.permute.xlu1 %4493  ;;  %v4496_v26 = vpop.permute.xlu0 %4495  ;;  %v4275_v42 = vpack.c.bf16 %v4267_v17, %v4266_v36 }
 0xbb3   : > { %v4274_v1 = vpack.c.bf16 %v4265_v54, %v4264_v8 }
 0xbb5   : > { %7770 = vmatprep.mubr.bf16.mxu0 %v4274_v1 }
 0xbb6   : > { %v4498_v25 = vpop.permute.xlu1 %4497  ;;  %7771 = vmatmul.mubr.bf16.gmra.mxu0 %v4275_v42  ;;  %v4500_v63 = vpop.permute.xlu0 %4499 }
 0xbb7   : > { %7790 = vmatprep.mubr.msk.bf16.mxu0 %vm1008_vm0, %v4486_v22 }
 0xbb8   : > { %7789 = vmatpush3.bf16.xpose.msra.mxu0 %v4542_v39 }
 0xbba   : > { %v4910_v35 = vpop.permute.xlu0 %4909  ;;  %v4908_v52 = vpop.permute.xlu1 %4907 }
 0xbbb   : > { %7806 = vmatprep.subr.bf16.mxu1 %v4910_v35 }
 0xbbc   : > { %7807 = vmatpush3.bf16.msra.mxu1 %v4910_v35 }
 0xbbd   : > { %7808 = vmatprep.subr.bf16.mxu1 %v4908_v52 }
 0xbbe   : > { %v4906_v31 = vpop.permute.xlu0 %4905 }
 0xbbf   : > { %7791 = vmatmul.mubr.msk.bf16.vlgmr.msra.gmra.mxu0 %vm1008_vm0, %v4488_v37 }
 0xbc0   : > { %7794 = vmatprep.mubr.msk.bf16.mxu0 %vm1008_vm0, %v4490_v45  ;;  %7809 = vmatpush3.bf16.msra.mxu1 %v4908_v52 }
 0xbc1   : > { %7810 = vmatprep.subr.bf16.mxu1 %v4906_v31 }
 0xbc2   : > { %v4904_v40 = vpop.permute.xlu0 %4903 }
 0xbc4   : > { %7811 = vmatpush3.bf16.msra.mxu1 %v4906_v31 }
 0xbc5   : > { %7812 = vmatprep.subr.bf16.mxu1 %v4904_v40 }
 0xbc6   : > { %v4902_v58 = vpop.permute.xlu0 %4901 }
 0xbc7   : > { %7795 = vmatmul.mubr.msk.bf16.gmra.mxu0 %vm1008_vm0, %v4492_v29 }
 0xbc8   : > { %7798 = vmatprep.mubr.msk.bf16.mxu0 %vm1008_vm0, %v4494_v34  ;;  %7813 = vmatpush3.bf16.msra.mxu1 %v4904_v40 }
 0xbc9   : > { %7814 = vmatprep.subr.bf16.mxu1 %v4902_v58 }
 0xbcc   : > { %7815 = vmatpush3.bf16.msra.mxu1 %v4902_v58 }
 0xbcf   : > { %7799 = vmatmul.mubr.msk.bf16.gmra.mxu0 %vm1008_vm0, %v4496_v26 }
 0xbd0   : > { %7802 = vmatprep.mubr.msk.bf16.mxu0 %vm1008_vm0, %v4498_v25 }
 0xbd7   : > { %7803 = vmatmul.mubr.msk.bf16.gmra.mxu0 %vm1008_vm0, %v4500_v63 }
 0xc02   : > { %v10911_v28 = vpop.f32.mrf.mxu0 }
 0xc04   : > { %v10913_v61 = vpop.f32.mrf.mxu0 }
 0xc06   : > { %v10915_v51 = vpop.f32.mrf.mxu0 }
 0xc07   : > { %12056 = vst [vmem:[#allocation47_spill] sm:$0xff] %v10915_v51 }
 0xc08   : > { %v10917_v12 = vpop.f32.mrf.mxu0 }
 0xc3a   : > { %v10919_v41 = vpop.f32.mrf.mxu0 }
 0xc3c   : > { %v10921_v6 = vpop.f32.mrf.mxu0 }
 0xc3e   : > { %v10923_v59 = vpop.f32.mrf.mxu0 }
 0xc3f   : > { %12057 = vst [vmem:[#allocation42_spill] sm:$0xff] %v10923_v59 }
 0xc40   : > { %v10925_v11 = vpop.f32.mrf.mxu0 }
 0xc41   : > { %12058 = vst [vmem:[#allocation43_spill] sm:$0xff] %v10925_v11 }
 0xc4b   : > { %v10927_v4 = vpop.f32.mrf.mxu0 }
 0xc4d   : > { %v10929_v23 = vpop.f32.mrf.mxu0 }
 0xc4f   : > { %v10931_v22 = vpop.f32.mrf.mxu0 }
 0xc50   : > { %12059 = vst [vmem:[#allocation44_spill] sm:$0xff] %v10931_v22 }
 0xc51   : > { %v10933_v37 = vpop.f32.mrf.mxu0 }
 0xc52   : > { %12060 = vst [vmem:[#allocation39_spill] sm:$0xff] %v10933_v37 }
 0xc76   : > { %v10935_v19 = vpop.f32.mrf.mxu0 }
 0xc78   : > { %v10937_v47 = vpop.f32.mrf.mxu0 }
 0xc7a   : > { %v10939_v45 = vpop.f32.mrf.mxu0 }
 0xc7b   : > { %12061 = vst [vmem:[#allocation34_spill] sm:$0xff] %v10939_v45 }
 0xc7c   : > { %v10941_v29 = vpop.f32.mrf.mxu0 }
 0xc7d   : > { %12062 = vst [vmem:[#allocation38_spill] sm:$0xff] %v10941_v29 }
 0xc7f   : > { %v7792_v33 = vpop.f32.mrf.mxu0 }
 0xc80   : > { %4747 = vmax.xlane.f32.xlu0 %v7792_v33 }
 0xc81   : > { %v4599_v38 = vpop.f32.mrf.mxu0 }
 0xc82   : > { %4743 = vmax.xlane.f32.xlu1 %v4599_v38 }
 0xc83   : > { %v7793_v46 = vpop.f32.mrf.mxu0 }
 0xc84   : > { %v6903_v17 = vpack.c.bf16 %v7793_v46, %v7792_v33 }
 0xc85   : > { %v10943_v8 = vpop.f32.mrf.mxu0 }
 0xc86   : > { %7023 = vst [vmem:[%s9502_s10 + $0x188] sm:$0xff] %v6903_v17   ;;  %v6898_v54 = vpack.c.bf16 %v10943_v8, %v4599_v38  ;;  %4749 = vmax.xlane.f32.xlu1 %v7793_v46  ;;  %4745 = vmax.xlane.f32.xlu0 %v10943_v8 }
 0xc87   : > { %v10948_v34 = vpop.f32.mrf.mxu0 }
 0xc88   : > { %7022 = vst [vmem:[%s9502_s10 + $0x180] sm:$0xff] %v6898_v54  }
 0xc89   : > { %v10951_v26 = vpop.f32.mrf.mxu0 }
 0xc8b   : > { %v10953_v36 = vpop.f32.mrf.mxu0 }
 0xc8c   : > { %v6913_v1 = vpack.c.bf16 %v10953_v36, %v10948_v34 }
 0xc8d   : > { %v10957_v42 = vpop.f32.mrf.mxu0 }
 0xc8e   : > { %7025 = vst [vmem:[%s9502_s10 + $0x198] sm:$0xff] %v6913_v1   ;;  %v6908_v25 = vpack.c.bf16 %v10957_v42, %v10951_v26 }
 0xc8f   : > { %v10962_v63 = vpop.f32.mrf.mxu0 }
 0xc90   : > { %7024 = vst [vmem:[%s9502_s10 + $0x190] sm:$0xff] %v6908_v25  }
 0xc91   : > { %v10965_v39 = vpop.f32.mrf.mxu0 }
 0xc93   : > { %v10967_v35 = vpop.f32.mrf.mxu0 }
 0xc94   : > { %v6923_v52 = vpack.c.bf16 %v10967_v35, %v10962_v63 }
 0xc95   : > { %v10971_v31 = vpop.f32.mrf.mxu0 }
 0xc96   : > { %7027 = vst [vmem:[%s9502_s10 + $0x1a8] sm:$0xff] %v6923_v52   ;;  %v6918_v40 = vpack.c.bf16 %v10971_v31, %v10965_v39 }
 0xc97   : > { %4897 = vrot.lane.b32.xlu1 %v11979_v14, %s8743_s26  ;;  %v10978_v58 = vpop.f32.mrf.mxu0 }
 0xc98   : > { %7026 = vst [vmem:[%s9502_s10 + $0x1a0] sm:$0xff] %v6918_v40  }
 0xc99   : > { %v10981_v17 = vpop.f32.mrf.mxu0 }
 0xc9b   : > { %v10983_v54 = vpop.f32.mrf.mxu0 }
 0xc9c   : > { %v6933_v1 = vpack.c.bf16 %v10983_v54, %v10978_v58  ;;  %4899 = vrot.lane.b32.xlu0 %v10113_v32, %s8743_s26 }
 0xc9d   : > { %v10989_v25 = vpop.f32.mrf.mxu0 }
 0xc9e   : > { %7029 = vst [vmem:[%s9502_s10 + $0x1b8] sm:$0xff] %v6933_v1   ;;  %v6928_v52 = vpack.c.bf16 %v10989_v25, %v10981_v17 }
 0xca0   : > { %7028 = vst [vmem:[%s9502_s10 + $0x1b0] sm:$0xff] %v6928_v52  }
 0xcbb   : > { %4755 = vmax.xlane.f32.xlu0 %v10948_v34  ;;  %4757 = vmax.xlane.f32.xlu1 %v10953_v36 }
 0xcbf   : > { %4751 = vmax.xlane.f32.xlu0 %v10951_v26  ;;  %4753 = vmax.xlane.f32.xlu1 %v10957_v42 }
 0xcc3   : > { %4763 = vmax.xlane.f32.xlu0 %v10962_v63  ;;  %4765 = vmax.xlane.f32.xlu1 %v10967_v35 }
 0xcc7   : > { %4759 = vmax.xlane.f32.xlu0 %v10965_v39  ;;  %4761 = vmax.xlane.f32.xlu1 %v10971_v31 }
 0xccb   : > { %4771 = vmax.xlane.f32.xlu0 %v10978_v58 }
 0xccf   : > { %4767 = vmax.xlane.f32.xlu0 %v10981_v17 }
 0xcd8   : > { %5126 = vrot.lane.b32.xlu1 %v10336_v50, %s8744_s28 }
 0xce5   : > { %4895 = vrot.lane.b32.xlu0 %v10125_v62, %s8743_s26 }
 0xce9   : > { %5124 = vrot.lane.b32.xlu0 %v10350_v57, %s8744_s28 }
 0xced   : > { %5122 = vrot.lane.b32.xlu0 %v10360_v48, %s8744_s28 }
 0xcf1   : > { %5118 = vrot.lane.b32.xlu0 %v10380_v10, %s8744_s28 }
 0xcfc   : > { %4773 = vmax.xlane.f32.xlu1 %v10983_v54 }
 0xd00   : > { %4769 = vmax.xlane.f32.xlu1 %v10989_v25 }
 0xd09   : > { %v4748_v40 = vpop.xlane.xlu0 %4747 }
 0xd0a   : > { %v4777_v1 = vsub.f32 %v7792_v33, %v4748_v40 }
 0xd0b   : > { %v4744_v52 = vpop.xlane.xlu1 %4743 }
 0xd0c   : > { %v4795_v50 = vmul.f32 1.442695, %v4777_v1  ;;  %v4775_v45 = vsub.f32 %v4599_v38, %v4744_v52 }
 0xd0e   : > { %8521 = vpow2.f32 %v4795_v50  ;;  %v4791_v29 = vmul.f32 1.442695, %v4775_v45 }
 0xd0f   : > { %v4750_v22 = vpop.xlane.xlu1 %4749  ;;  %v4746_v37 = vpop.xlane.xlu0 %4745 }
 0xd10   : > { %v4778_v57 = vsub.f32 %v7793_v46, %v4750_v22  ;;  %8523 = vpow2.f32 %v4791_v29  ;;  %v4776_v48 = vsub.f32 %v10943_v8, %v4746_v37 }
 0xd12   : > { %v4797_v59 = vmul.f32 1.442695, %v4778_v57  ;;  %v4793_v51 = vmul.f32 1.442695, %v4776_v48 }
 0xd13   : > { %v4900_v11 = vpop.permute.xlu0 %4899  ;;  %v4898_v10 = vpop.permute.xlu1 %4897 }
 0xd14   : > { %7816 = vmatprep.subr.bf16.mxu1 %v4900_v11  ;;  %8525 = vpow2.f32 %v4797_v59 }
 0xd15   : > { %7817 = vmatpush3.bf16.msra.mxu1 %v4900_v11  ;;  %8527 = vpow2.f32 %v4793_v51 }
 0xd16   : > { %7818 = vmatprep.subr.bf16.mxu1 %v4898_v10 }
 0xd19   : > { %7819 = vmatpush3.bf16.msra.mxu1 %v4898_v10 }
 0xd1b   : > { %v11018_v33 = vpop.eup %8521 }
 0xd1c   : > { %4827 = vadd.xlane.f32.xlu1 %v11018_v33 }
 0xd1d   : > { %v11021_v45 = vpop.eup %8523 }
 0xd20   : > { %4823 = vadd.xlane.f32.xlu1 %v11021_v45 }
 0xd21   : > { %v11024_v22 = vpop.eup %8525 }
 0xd22   : > { %v11027_v37 = vpop.eup %8527 }
 0xd24   : > { %4829 = vadd.xlane.f32.xlu1 %v11024_v22 }
 0xd28   : > { %4825 = vadd.xlane.f32.xlu1 %v11027_v37 }
 0xd39   : > { %5120 = vrot.lane.b32.xlu1 %v10370_v0, %s8744_s28 }
 0xd44   : > { %v4758_v51 = vpop.xlane.xlu1 %4757  ;;  %v4756_v59 = vpop.xlane.xlu0 %4755 }
 0xd45   : > { %v4781_v11 = vsub.f32 %v10948_v34, %v4756_v59  ;;  %v4782_v1 = vsub.f32 %v10953_v36, %v4758_v51 }
 0xd47   : > { %v4803_v29 = vmul.f32 1.442695, %v4781_v11  ;;  %v4805_v48 = vmul.f32 1.442695, %v4782_v1 }
 0xd48   : > { %v4754_v38 = vpop.xlane.xlu1 %4753  ;;  %v4752_v46 = vpop.xlane.xlu0 %4751 }
 0xd49   : > { %v4780_v8 = vsub.f32 %v10957_v42, %v4754_v38  ;;  %v4779_v40 = vsub.f32 %v10951_v26, %v4752_v46  ;;  %8529 = vpow2.f32 %v4803_v29 }
 0xd4b   : > { %v4801_v52 = vmul.f32 1.442695, %v4780_v8  ;;  %v4799_v50 = vmul.f32 1.442695, %v4779_v40 }
 0xd4c   : > { %v4764_v57 = vpop.xlane.xlu0 %4763  ;;  %v4766_v34 = vpop.xlane.xlu1 %4765 }
 0xd4d   : > { %8531 = vpow2.f32 %v4801_v52  ;;  %v4785_v0 = vsub.f32 %v10962_v63, %v4764_v57  ;;  %v4786_v36 = vsub.f32 %v10967_v35, %v4766_v34 }
 0xd4e   : > { %8533 = vpow2.f32 %v4799_v50 }
 0xd4f   : > { %8535 = vpow2.f32 %v4805_v48  ;;  %v4811_v59 = vmul.f32 1.442695, %v4785_v0 }
 0xd50   : > { %v4760_v10 = vpop.xlane.xlu0 %4759  ;;  %v4762_v46 = vpop.xlane.xlu1 %4761 }
 0xd51   : > { %v4783_v11 = vsub.f32 %v10965_v39, %v4760_v10  ;;  %8537 = vpow2.f32 %v4811_v59  ;;  %v4813_v39 = vmul.f32 1.442695, %v4786_v36  ;;  %v4784_v1 = vsub.f32 %v10971_v31, %v4762_v46 }
 0xd53   : > { %v4807_v51 = vmul.f32 1.442695, %v4783_v11 }
 0xd54   : > { %v4772_v42 = vpop.xlane.xlu0 %4771  ;;  %v11051_v50 = vpop.permute.xlu1 %5126 }
 0xd55   : > { %v4789_v26 = vsub.f32 %v10978_v58, %v4772_v42 }
 0xd56   : > { %v11039_v29 = vpop.eup %8529 }
 0xd57   : > { %v4819_v38 = vmul.f32 1.442695, %v4789_v26  ;;  %4835 = vadd.xlane.f32.xlu0 %v11039_v29 }
 0xd58   : > { %v4768_v63 = vpop.xlane.xlu0 %4767 }
 0xd59   : > { %8539 = vpow2.f32 %v4819_v38  ;;  %v4787_v8 = vsub.f32 %v10981_v17, %v4768_v63  ;;  %v4809_v17 = vmul.f32 1.442695, %v4784_v1 }
 0xd5a   : > { %v11044_v40 = vpop.eup %8531  ;;  %8541 = vpow2.f32 %v4807_v51 }
 0xd5b   : > { %v4815_v58 = vmul.f32 1.442695, %v4787_v8  ;;  %v11047_v52 = vpop.eup %8533  ;;  %4833 = vadd.xlane.f32.xlu0 %v11044_v40 }
 0xd5c   : > { %v4896_v35 = vpop.permute.xlu0 %4895  ;;  %v11055_v31 = vpop.eup %8535 }
 0xd5d   : > { %8543 = vpow2.f32 %v4815_v58  ;;  %4831 = vadd.xlane.f32.xlu1 %v11047_v52  ;;  %7820 = vmatprep.subr.bf16.mxu1 %v4896_v35 }
 0xd5e   : > { %7821 = vmatpush3.bf16.msra.mxu1 %v4896_v35  ;;  %8545 = vpow2.f32 %v4813_v39  ;;  %v11058_v57 = vpop.eup %8537 }
 0xd5f   : > { %8022 = vmatprep.subr.msk.bf16.mxu1 %vm1008_vm0, %v11051_v50  ;;  %8547 = vpow2.f32 %v4809_v17 }
 0xd61   : > { %4837 = vadd.xlane.f32.xlu1 %v11055_v31 }
 0xd65   : > { %4843 = vadd.xlane.f32.xlu1 %v11058_v57 }
 0xd66   : > { %v11061_v48 = vpop.eup %8539 }
 0xd67   : > { %4851 = vadd.xlane.f32.xlu0 %v11061_v48  ;;  %v11064_v0 = vpop.eup %8541 }
 0xd69   : > { %4839 = vadd.xlane.f32.xlu1 %v11064_v0 }
 0xd6a   : > { %v11067_v10 = vpop.eup %8543 }
 0xd6b   : > { %4847 = vadd.xlane.f32.xlu0 %v11067_v10  ;;  %v11070_v34 = vpop.eup %8545 }
 0xd6c   : > { %v11073_v59 = vpop.eup %8547 }
 0xd6d   : > { %4845 = vadd.xlane.f32.xlu1 %v11070_v34 }
 0xd71   : > { %4841 = vadd.xlane.f32.xlu1 %v11073_v59 }
 0xd85   : > { %v4774_v11 = vpop.xlane.xlu1 %4773 }
 0xd86   : > { %v4790_v42 = vsub.f32 %v10983_v54, %v4774_v11 }
 0xd88   : > { %v4821_v26 = vmul.f32 1.442695, %v4790_v42 }
 0xd89   : > { %v4770_v36 = vpop.xlane.xlu1 %4769 }
 0xd8a   : > { %8549 = vpow2.f32 %v4821_v26  ;;  %v4788_v51 = vsub.f32 %v10989_v25, %v4770_v36 }
 0xd8c   : > { %v4817_v38 = vmul.f32 1.442695, %v4788_v51 }
 0xd8e   : > { %8551 = vpow2.f32 %v4817_v38 }
 0xd97   : > { %v11078_v46 = vpop.eup %8549 }
 0xd98   : > { %4853 = vadd.xlane.f32.xlu0 %v11078_v46 }
 0xd9b   : > { %v11081_v63 = vpop.eup %8551 }
 0xd9c   : > { %4849 = vadd.xlane.f32.xlu1 %v11081_v63 }
 0xda5   : > { %v4828_v8 = vpop.xlane.xlu1 %4827 }
 0xda9   : > { %v4824_v39 = vpop.xlane.xlu1 %4823 }
 0xdad   : > { %v4830_v1 = vpop.xlane.xlu1 %4829  ;;  %5116 = vrot.lane.b32.xlu1 %v10390_v21, %s8744_s28 }
 0xdae   : > { %5114 = vrot.lane.b32.xlu0 %v10400_v15, %s8744_s28  ;;  %8553 = vrcp.f32 %v4830_v1 }
 0xdaf   : > { %8555 = vrcp.f32 %v4824_v39 }
 0xdb0   : > { %8557 = vrcp.f32 %v4828_v8 }
 0xdb1   : > { %v4826_v54 = vpop.xlane.xlu1 %4825  ;;  %5096 = vrot.lane.b32.xlu1 %v12033_v56, %s8744_s28 }
 0xdb2   : > { %8559 = vrcp.f32 %v4826_v54  ;;  %5112 = vrot.lane.b32.xlu0 %v10410_v43, %s8744_s28 }
 0xdb5   : > { %5100 = vrot.lane.b32.xlu1 %v12035_v20, %s8744_s28 }
 0xdb6   : > { %5098 = vrot.lane.b32.xlu0 %v12034_v18, %s8744_s28 }
 0xdb9   : > { %5104 = vrot.lane.b32.xlu1 %v12037_v44, %s8744_s28 }
 0xdba   : > { %5102 = vrot.lane.b32.xlu0 %v12036_v3, %s8744_s28 }
 0xdbb   : > { %v8554_v21 = vpop.eup %8553 }
 0xdbc   : > { %v8556_v15 = vpop.eup %8555  ;;  %v4874_v20 = vmul.f32 %v8554_v21, %v11024_v22  ;;  %v5125_v22 = vpop.permute.xlu0 %5124 }
 0xdbd   : > { %5108 = vrot.lane.b32.xlu1 %v12039_v9, %s8744_s28  ;;  %v8558_v56 = vpop.eup %8557  ;;  %v4871_v18 = vmul.f32 %v8556_v15, %v11021_v45  ;;  %v5121_v45 = vpop.permute.xlu1 %5120 }
 0xdbe   : > { %5106 = vrot.lane.b32.xlu0 %v12038_v13, %s8744_s28  ;;  %v4873_v44 = vmul.f32 %v8558_v56, %v11018_v33  ;;  %v5174_v13 = vsel %vm1008_vm0, %v11051_v50, 0  ;;  %v5171_v33 = vsel %vm1008_vm0, %v5125_v22, 0  ;;  %v5165_v58 = vsel %vm1008_vm0, %v5121_v45, 0 }
 0xdbf   : > { %v8560_v43 = vpop.eup %8559 }
 0xdc0   : > { %v4872_v25 = vmul.f32 %v8560_v43, %v11027_v37  ;;  %v4888_v9 = vpack.c.bf16 %v4874_v20, %v4873_v44 }
 0xdc1   : > { %5518 = vrot.lane.b32.xlu1 %v10089_v49, %s8744_s28  ;;  %v5123_v49 = vpop.permute.xlu0 %5122 }
 0xdc2   : > { %5110 = vrot.lane.b32.xlu0 %v12040_v30, %s8744_s28  ;;  %v4887_v3 = vpack.c.bf16 %v4872_v25, %v4871_v18  ;;  %v5168_v30 = vsel %vm1008_vm0, %v5123_v49, 0 }
 0xdc4   : > { %7822 = vmatprep.mubr.bf16.mxu1 %v4887_v3 }
 0xdc5   : > { %7823 = vmatmul.mubr.bf16.vlgmr.msra.gmra.mxu1 %v4888_v9  ;;  %v5119_v37 = vpop.permute.xlu0 %5118 }
 0xdc6   : > { %7839 = vmatpush3.bf16.xpose.msra.mxu1 %v5174_v13  ;;  %5520 = vrot.lane.b32.xlu0 %v11967_v27, %s8744_s28  ;;  %v5162_v50 = vsel %vm1008_vm0, %v5119_v37, 0 }
 0xdc7   : > { %8023 = vmatprep.subr.msk.bf16.mxu1 %vm1008_vm0, %v5125_v22 }
 0xdce   : > { %7841 = vmatpush3.bf16.xpose.msra.mxu1 %v5171_v33 }
 0xdcf   : > { %8024 = vmatprep.subr.msk.bf16.mxu1 %vm1008_vm0, %v5123_v49 }
 0xdd6   : > { %7843 = vmatpush3.bf16.xpose.msra.mxu1 %v5168_v30 }
 0xdd7   : > { %8025 = vmatprep.subr.msk.bf16.mxu1 %vm1008_vm0, %v5121_v45 }
 0xdde   : > { %7845 = vmatpush3.bf16.xpose.msra.mxu1 %v5165_v58 }
 0xddf   : > { %8026 = vmatprep.subr.msk.bf16.mxu1 %vm1008_vm0, %v5119_v37 }
 0xde0   : > { %v4836_v27 = vpop.xlane.xlu0 %4835 }
 0xde4   : > { %v4834_v35 = vpop.xlane.xlu0 %4833 }
 0xde5   : > { %8561 = vrcp.f32 %v4834_v35 }
 0xde6   : > { %7847 = vmatpush3.bf16.xpose.msra.mxu1 %v5162_v50  ;;  %v4832_v17 = vpop.xlane.xlu1 %4831 }
 0xde7   : > { %8563 = vrcp.f32 %v4832_v17 }
 0xde8   : > { %8565 = vrcp.f32 %v4836_v27 }
 0xdea   : > { %v4838_v11 = vpop.xlane.xlu1 %4837 }
 0xdeb   : > { %8567 = vrcp.f32 %v4838_v11 }
 0xdee   : > { %v4844_v42 = vpop.xlane.xlu1 %4843 }
 0xdf2   : > { %v4840_v26 = vpop.xlane.xlu1 %4839  ;;  %v8562_v36 = vpop.eup %8561 }
 0xdf3   : > { %v4876_v8 = vmul.f32 %v8562_v36, %v11044_v40 }
 0xdf4   : > { %v8564_v51 = vpop.eup %8563 }
 0xdf5   : > { %v4875_v38 = vmul.f32 %v8564_v51, %v11047_v52  ;;  %v8566_v39 = vpop.eup %8565 }
 0xdf6   : > { %v4846_v1 = vpop.xlane.xlu1 %4845  ;;  %v4877_v15 = vmul.f32 %v8566_v39, %v11039_v29 }
 0xdf7   : > { %v4889_v54 = vpack.c.bf16 %v4876_v8, %v4875_v38  ;;  %8569 = vrcp.f32 %v4846_v1 }
 0xdf8   : > { %v8568_v21 = vpop.eup %8567  ;;  %8571 = vrcp.f32 %v4840_v26 }
 0xdf9   : > { %7826 = vmatprep.mubr.bf16.mxu1 %v4889_v54  ;;  %v4878_v56 = vmul.f32 %v8568_v21, %v11055_v31  ;;  %8573 = vrcp.f32 %v4844_v42  ;;  %v4852_v31 = vpop.xlane.xlu0 %4851 }
 0xdfa   : > { %v4842_v43 = vpop.xlane.xlu1 %4841 }
 0xdfb   : > { %8575 = vrcp.f32 %v4842_v43  ;;  %v4890_v20 = vpack.c.bf16 %v4878_v56, %v4877_v15 }
 0xdfd   : > { %7827 = vmatmul.mubr.bf16.gmra.mxu1 %v4890_v20  ;;  %v4848_v33 = vpop.xlane.xlu0 %4847 }
 0xe04   : > { %v8570_v18 = vpop.eup %8569 }
 0xe05   : > { %v8572_v52 = vpop.eup %8571  ;;  %v4882_v44 = vmul.f32 %v8570_v18, %v11070_v34 }
 0xe06   : > { %v8574_v25 = vpop.eup %8573  ;;  %v4879_v3 = vmul.f32 %v8572_v52, %v11064_v0 }
 0xe07   : > { %v4881_v13 = vmul.f32 %v8574_v25, %v11058_v57 }
 0xe08   : > { %v8576_v40 = vpop.eup %8575 }
 0xe09   : > { %v4880_v9 = vmul.f32 %v8576_v40, %v11073_v59  ;;  %v4892_v22 = vpack.c.bf16 %v4882_v44, %v4881_v13 }
 0xe0b   : > { %v4891_v29 = vpack.c.bf16 %v4880_v9, %v4879_v3 }
 0xe0d   : > { %7830 = vmatprep.mubr.bf16.mxu1 %v4891_v29 }
 0xe0e   : > { %7831 = vmatmul.mubr.bf16.gmra.mxu1 %v4892_v22 }
 0xe21   : > { %v4854_v49 = vpop.xlane.xlu0 %4853 }
 0xe22   : > { %8577 = vrcp.f32 %v4854_v49 }
 0xe23   : > { %8579 = vrcp.f32 %v4848_v33 }
 0xe24   : > { %8581 = vrcp.f32 %v4852_v31 }
 0xe25   : > { %v4850_v30 = vpop.xlane.xlu1 %4849  ;;  %v5115_v45 = vpop.permute.xlu0 %5114 }
 0xe26   : > { %8583 = vrcp.f32 %v4850_v30  ;;  %v5156_v11 = vsel %vm1008_vm0, %v5115_v45, 0 }
 0xe29   : > { %v5117_v34 = vpop.permute.xlu1 %5116  ;;  %v5113_v37 = vpop.permute.xlu0 %5112 }
 0xe2a   : > { %8027 = vmatprep.subr.msk.bf16.mxu1 %vm1008_vm0, %v5117_v34  ;;  %v5159_v0 = vsel %vm1008_vm0, %v5117_v34, 0 }
 0xe2b   : > { %7849 = vmatpush3.bf16.xpose.msra.mxu1 %v5159_v0 }
 0xe2c   : > { %8028 = vmatprep.subr.msk.bf16.mxu1 %vm1008_vm0, %v5115_v45 }
 0xe2d   : > { %v5097_v57 = vpop.permute.xlu1 %5096  ;;  %v5099_v59 = vpop.permute.xlu0 %5098 }
 0xe2f   : > { %v8578_v58 = vpop.eup %8577 }
 0xe30   : > { %v8580_v27 = vpop.eup %8579  ;;  %v4886_v26 = vmul.f32 %v8578_v58, %v11078_v46  ;;  %v5153_v46 = vsel %vm1008_vm0, %v5113_v37, 0 }
 0xe31   : > { %v5101_v35 = vpop.permute.xlu1 %5100  ;;  %v5103_v50 = vpop.permute.xlu0 %5102  ;;  %v4883_v36 = vmul.f32 %v8580_v27, %v11067_v10 }
 0xe32   : > { %v8582_v17 = vpop.eup %8581 }
 0xe33   : > { %v8584_v42 = vpop.eup %8583  ;;  %7851 = vmatpush3.bf16.xpose.msra.mxu1 %v5156_v11  ;;  %v4885_v39 = vmul.f32 %v8582_v17, %v11061_v48 }
 0xe34   : > { %8029 = vmatprep.subr.msk.bf16.mxu1 %vm1008_vm0, %v5113_v37  ;;  %v4884_v51 = vmul.f32 %v8584_v42, %v11081_v63 }
 0xe35   : > { %v5105_v38 = vpop.permute.xlu1 %5104  ;;  %v5107_v8 = vpop.permute.xlu0 %5106  ;;  %v4894_v54 = vpack.c.bf16 %v4886_v26, %v4885_v39 }
 0xe36   : > { %v4893_v1 = vpack.c.bf16 %v4884_v51, %v4883_v36 }
 0xe38   : > { %7834 = vmatprep.mubr.bf16.mxu1 %v4893_v1 }
 0xe39   : > { %v5109_v21 = vpop.permute.xlu1 %5108  ;;  %7835 = vmatmul.mubr.bf16.gmra.mxu1 %v4894_v54  ;;  %v5111_v15 = vpop.permute.xlu0 %5110 }
 0xe3a   : > { %7854 = vmatprep.mubr.msk.bf16.mxu1 %vm1008_vm0, %v5097_v57 }
 0xe3b   : > { %7853 = vmatpush3.bf16.xpose.msra.mxu1 %v5153_v46 }
 0xe3d   : > { %v5521_v56 = vpop.permute.xlu0 %5520  ;;  %v5519_v10 = vpop.permute.xlu1 %5518 }
 0xe3e   : > { %7870 = vmatprep.subr.bf16.mxu0 %v5521_v56 }
 0xe3f   : > { %7871 = vmatpush3.bf16.msra.mxu0 %v5521_v56 }
 0xe40   : > { %7872 = vmatprep.subr.bf16.mxu0 %v5519_v10 }
 0xe42   : > { %7855 = vmatmul.mubr.msk.bf16.vlgmr.msra.gmra.mxu1 %vm1008_vm0, %v5099_v59 }
 0xe43   : > { %7858 = vmatprep.mubr.msk.bf16.mxu1 %vm1008_vm0, %v5101_v35  ;;  %7873 = vmatpush3.bf16.msra.mxu0 %v5519_v10 }
 0xe4a   : > { %7859 = vmatmul.mubr.msk.bf16.gmra.mxu1 %vm1008_vm0, %v5103_v50 }
 0xe4b   : > { %7862 = vmatprep.mubr.msk.bf16.mxu1 %vm1008_vm0, %v5105_v38 }
 0xe52   : > { %7863 = vmatmul.mubr.msk.bf16.gmra.mxu1 %vm1008_vm0, %v5107_v8 }
 0xe53   : > { %7866 = vmatprep.mubr.msk.bf16.mxu1 %vm1008_vm0, %v5109_v21 }
 0xe5a   : > { %7867 = vmatmul.mubr.msk.bf16.gmra.mxu1 %vm1008_vm0, %v5111_v15 }
 0xe85   : > { %v11150_v48 = vpop.f32.mrf.mxu1 }
 0xe87   : > { %v11152_v63 = vpop.f32.mrf.mxu1 }
 0xe89   : > { %v11154_v43 = vpop.f32.mrf.mxu1 }
 0xe8b   : > { %v11156_v20 = vpop.f32.mrf.mxu1 }
 0xebd   : > { %v11158_v18 = vpop.f32.mrf.mxu1 }
 0xebf   : > { %v11160_v52 = vpop.f32.mrf.mxu1 }
 0xec1   : > { %v11162_v25 = vpop.f32.mrf.mxu1 }
 0xec3   : > { %v11164_v40 = vpop.f32.mrf.mxu1 }
 0xece   : > { %v11166_v44 = vpop.f32.mrf.mxu1 }
 0xed0   : > { %v11168_v3 = vpop.f32.mrf.mxu1 }
 0xed2   : > { %v11170_v9 = vpop.f32.mrf.mxu1 }
 0xed4   : > { %v11172_v13 = vpop.f32.mrf.mxu1 }
 0xef9   : > { %v11174_v29 = vpop.f32.mrf.mxu1 }
 0xefb   : > { %v11176_v22 = vpop.f32.mrf.mxu1 }
 0xefd   : > { %v11178_v31 = vpop.f32.mrf.mxu1 }
 0xeff   : > { %v11180_v33 = vpop.f32.mrf.mxu1 }
 0xf02   : > { %v7856_v49 = vpop.f32.mrf.mxu1 }
 0xf03   : > { %5358 = vmax.xlane.f32.xlu0 %v7856_v49 }
 0xf04   : > { %v5210_v30 = vpop.f32.mrf.mxu1 }
 0xf05   : > { %5354 = vmax.xlane.f32.xlu1 %v5210_v30 }
 0xf06   : > { %v7857_v45 = vpop.f32.mrf.mxu1 }
 0xf07   : > { %v6943_v34 = vpack.c.bf16 %v7857_v45, %v7856_v49 }
 0xf08   : > { %v11182_v37 = vpop.f32.mrf.mxu1 }
 0xf09   : > { %7031 = vst [vmem:[%s9502_s10 + $0x1c8] sm:$0xff] %v6943_v34   ;;  %v6938_v0 = vpack.c.bf16 %v11182_v37, %v5210_v30  ;;  %5360 = vmax.xlane.f32.xlu1 %v7857_v45  ;;  %5356 = vmax.xlane.f32.xlu0 %v11182_v37 }
 0xf0a   : > { %v7860_v57 = vpop.f32.mrf.mxu1 }
 0xf0b   : > { %7030 = vst [vmem:[%s9502_s10 + $0x1c0] sm:$0xff] %v6938_v0  }
 0xf0c   : > { %v11188_v59 = vpop.f32.mrf.mxu1 }
 0xf0d   : > { %5366 = vmax.xlane.f32.xlu0 %v7860_v57 }
 0xf0e   : > { %v11190_v58 = vpop.f32.mrf.mxu1 }
 0xf0f   : > { %v6953_v27 = vpack.c.bf16 %v11190_v58, %v7860_v57  ;;  %5368 = vmax.xlane.f32.xlu1 %v11190_v58 }
 0xf10   : > { %v11194_v35 = vpop.f32.mrf.mxu1 }
 0xf11   : > { %7033 = vst [vmem:[%s9502_s10 + $0x1d8] sm:$0xff] %v6953_v27   ;;  %v6948_v50 = vpack.c.bf16 %v11194_v35, %v11188_v59  ;;  %5362 = vmax.xlane.f32.xlu0 %v11188_v59 }
 0xf12   : > { %v11200_v17 = vpop.f32.mrf.mxu1 }
 0xf13   : > { %7032 = vst [vmem:[%s9502_s10 + $0x1d0] sm:$0xff] %v6948_v50   ;;  %5364 = vmax.xlane.f32.xlu1 %v11194_v35 }
 0xf14   : > { %v11204_v11 = vpop.f32.mrf.mxu1 }
 0xf15   : > { %5374 = vmax.xlane.f32.xlu0 %v11200_v17 }
 0xf16   : > { %v11207_v42 = vpop.f32.mrf.mxu1 }
 0xf17   : > { %v6963_v26 = vpack.c.bf16 %v11207_v42, %v11200_v17  ;;  %5376 = vmax.xlane.f32.xlu1 %v11207_v42 }
 0xf18   : > { %v11212_v36 = vpop.f32.mrf.mxu1 }
 0xf19   : > { %7035 = vst [vmem:[%s9502_s10 + $0x1e8] sm:$0xff] %v6963_v26   ;;  %v6958_v51 = vpack.c.bf16 %v11212_v36, %v11204_v11  ;;  %5370 = vmax.xlane.f32.xlu0 %v11204_v11 }
 0xf1a   : > { %v11218_v38 = vpop.f32.mrf.mxu1 }
 0xf1b   : > { %7034 = vst [vmem:[%s9502_s10 + $0x1e0] sm:$0xff] %v6958_v51   ;;  %5372 = vmax.xlane.f32.xlu1 %v11212_v36 }
 0xf1c   : > { %v11222_v8 = vpop.f32.mrf.mxu1 }
 0xf1d   : > { %5382 = vmax.xlane.f32.xlu0 %v11218_v38 }
 0xf1e   : > { %v11225_v39 = vpop.f32.mrf.mxu1 }
 0xf1f   : > { %v6973_v1 = vpack.c.bf16 %v11225_v39, %v11218_v38 }
 0xf20   : > { %v11229_v54 = vpop.f32.mrf.mxu1 }
 0xf21   : > { %7037 = vst [vmem:[%s9502_s10 + $0x1f8] sm:$0xff] %v6973_v1   ;;  %v6968_v21 = vpack.c.bf16 %v11229_v54, %v11222_v8  ;;  %5378 = vmax.xlane.f32.xlu0 %v11222_v8 }
 0xf23   : > { %7036 = vst [vmem:[%s9502_s10 + $0x1f0] sm:$0xff] %v6968_v21  }
 0xf2c   : > { %5512 = vrot.lane.b32.xlu1 %v11976_v5, %s8744_s28 }
 0xf37   : > { %5516 = vrot.lane.b32.xlu0 %v11973_v55, %s8744_s28 }
 0xf3b   : > { %5514 = vrot.lane.b32.xlu0 %v10101_v16, %s8744_s28 }
 0xf3f   : > { %5508 = vrot.lane.b32.xlu0 %v11979_v14, %s8744_s28 }
 0xf50   : > { %5384 = vmax.xlane.f32.xlu1 %v11225_v39 }
 0xf54   : > { %5380 = vmax.xlane.f32.xlu1 %v11229_v54 }
 0xf65   : > { %5510 = vrot.lane.b32.xlu1 %v10113_v32, %s8744_s28 }
 0xf8c   : > { %v5359_v15 = vpop.xlane.xlu0 %5358 }
 0xf8d   : > { %v5388_v46 = vsub.f32 %v7856_v49, %v5359_v15 }
 0xf8e   : > { %v5355_v56 = vpop.xlane.xlu1 %5354 }
 0xf8f   : > { %v5406_v5 = vmul.f32 1.442695, %v5388_v46  ;;  %v5386_v10 = vsub.f32 %v5210_v30, %v5355_v56 }
 0xf91   : > { %8585 = vpow2.f32 %v5406_v5  ;;  %v5402_v55 = vmul.f32 1.442695, %v5386_v10 }
 0xf92   : > { %v5361_v34 = vpop.xlane.xlu1 %5360  ;;  %v5357_v0 = vpop.xlane.xlu0 %5356 }
 0xf93   : > { %v5389_v16 = vsub.f32 %v7857_v45, %v5361_v34  ;;  %8587 = vpow2.f32 %v5402_v55  ;;  %v5387_v14 = vsub.f32 %v11182_v37, %v5357_v0 }
 0xf95   : > { %v5408_v27 = vmul.f32 1.442695, %v5389_v16  ;;  %v5404_v1 = vmul.f32 1.442695, %v5387_v14 }
 0xf96   : > { %v5367_v50 = vpop.xlane.xlu0 %5366 }
 0xf97   : > { %v5392_v26 = vsub.f32 %v7860_v57, %v5367_v50  ;;  %8589 = vpow2.f32 %v5408_v27 }
 0xf98   : > { %v5369_v51 = vpop.xlane.xlu1 %5368 }
 0xf99   : > { %v5414_v32 = vmul.f32 1.442695, %v5392_v26  ;;  %v5393_v49 = vsub.f32 %v11190_v58, %v5369_v51 }
 0xf9a   : > { %v5363_v21 = vpop.xlane.xlu0 %5362 }
 0xf9b   : > { %8591 = vpow2.f32 %v5414_v32  ;;  %v5390_v30 = vsub.f32 %v11188_v59, %v5363_v21  ;;  %v5416_v5 = vmul.f32 1.442695, %v5393_v49 }
 0xf9c   : > { %v5365_v15 = vpop.xlane.xlu1 %5364  ;;  %8593 = vpow2.f32 %v5404_v1 }
 0xf9d   : > { %v5410_v46 = vmul.f32 1.442695, %v5390_v30  ;;  %v5391_v45 = vsub.f32 %v11194_v35, %v5365_v15 }
 0xf9e   : > { %v11252_v56 = vpop.eup %8585  ;;  %v5375_v37 = vpop.xlane.xlu0 %5374 }
 0xf9f   : > { %8595 = vpow2.f32 %v5410_v46  ;;  %v5412_v57 = vmul.f32 1.442695, %v5391_v45  ;;  %v5396_v10 = vsub.f32 %v11200_v17, %v5375_v37  ;;  %5438 = vadd.xlane.f32.xlu1 %v11252_v56 }
 0xfa0   : > { %v5377_v55 = vpop.xlane.xlu1 %5376  ;;  %v11256_v58 = vpop.eup %8587 }
 0xfa1   : > { %8597 = vpow2.f32 %v5412_v57  ;;  %v5422_v34 = vmul.f32 1.442695, %v5396_v10  ;;  %v5397_v17 = vsub.f32 %v11207_v42, %v5377_v55 }
 0xfa2   : > { %v5371_v59 = vpop.xlane.xlu0 %5370  ;;  %8599 = vpow2.f32 %v5416_v5 }
 0xfa3   : > { %v5394_v0 = vsub.f32 %v11204_v11, %v5371_v59  ;;  %5434 = vadd.xlane.f32.xlu1 %v11256_v58  ;;  %8601 = vpow2.f32 %v5422_v34  ;;  %v5424_v21 = vmul.f32 1.442695, %v5397_v17 }
 0xfa4   : > { %v5373_v35 = vpop.xlane.xlu1 %5372  ;;  %v11261_v27 = vpop.eup %8589 }
 0xfa5   : > { %v5395_v16 = vsub.f32 %v11212_v36, %v5373_v35  ;;  %v5418_v50 = vmul.f32 1.442695, %v5394_v0 }
 0xfa6   : > { %v5383_v14 = vpop.xlane.xlu0 %5382 }
 0xfa7   : > { %v5420_v26 = vmul.f32 1.442695, %v5395_v16  ;;  %v5400_v51 = vsub.f32 %v11218_v38, %v5383_v14  ;;  %5440 = vadd.xlane.f32.xlu1 %v11261_v27 }
 0xfa8   : > { %v11266_v1 = vpop.eup %8591  ;;  %v5513_v37 = vpop.permute.xlu1 %5512 }
 0xfa9   : > { %8603 = vpow2.f32 %v5420_v26  ;;  %v5430_v11 = vmul.f32 1.442695, %v5400_v51  ;;  %5446 = vadd.xlane.f32.xlu0 %v11266_v1  ;;  %v11269_v32 = vpop.eup %8593  ;;  %v12068_v26 = vld [vmem:[#allocation71_spill] sm:$0xff] }
 0xfaa   : > { %v5379_v36 = vpop.xlane.xlu0 %5378  ;;  %8605 = vpow2.f32 %v5418_v50  ;;  %v12067_v50 = vld [vmem:[#allocation73_spill] sm:$0xff]  ;;  %v12069_v51 = vld [vmem:[#allocation75_spill] sm:$0xff] }
 0xfab   : > { %v5398_v42 = vsub.f32 %v11222_v8, %v5379_v36  ;;  %5436 = vadd.xlane.f32.xlu1 %v11269_v32  ;;  %8607 = vpow2.f32 %v5430_v11  ;;  %v12070_v11 = vld [vmem:[#allocation83_spill] sm:$0xff]  ;;  %v12071_v36 = vld [vmem:[#allocation80_spill] sm:$0xff] }
 0xfac   : > { %v11273_v49 = vpop.eup %8595  ;;  %8609 = vpow2.f32 %v5424_v21  ;;  %v12072_v21 = vld [vmem:[#allocation77_spill] sm:$0xff] }
 0xfad   : > { %v5426_v38 = vmul.f32 1.442695, %v5398_v42  ;;  %5442 = vadd.xlane.f32.xlu0 %v11273_v49  ;;  %v12073_v42 = vld [vmem:[#allocation30_spill] sm:$0xff] }
 0xfae   : > { %v11276_v30 = vpop.eup %8597  ;;  %v5517_v15 = vpop.permute.xlu0 %5516 }
 0xfaf   : > { %5444 = vadd.xlane.f32.xlu1 %v11276_v30  ;;  %7874 = vmatprep.subr.bf16.mxu0 %v5517_v15  ;;  %v11279_v46 = vpop.eup %8599  ;;  %8611 = vpow2.f32 %v5426_v38  ;;  %v12074_v38 = vld [vmem:[#allocation76_spill] sm:$0xff] }
 0xfb0   : > { %7875 = vmatpush3.bf16.msra.mxu0 %v5517_v15  ;;  %v11282_v45 = vpop.eup %8601  ;;  %v12075_v15 = vld [vmem:[#allocation21_spill] sm:$0xff] }
 0xfb1   : > { %5448 = vadd.xlane.f32.xlu0 %v11279_v46 }
 0xfb2   : > { %v5515_v8 = vpop.permute.xlu0 %5514 }
 0xfb3   : > { %7876 = vmatprep.subr.bf16.mxu0 %v5515_v8 }
 0xfb4   : > { %7877 = vmatpush3.bf16.msra.mxu0 %v5515_v8  ;;  %v12076_v8 = vld [vmem:[#allocation28_spill] sm:$0xff] }
 0xfb5   : > { %5454 = vadd.xlane.f32.xlu0 %v11282_v45  ;;  %7878 = vmatprep.subr.bf16.mxu0 %v5513_v37 }
 0xfb6   : > { %v11285_v5 = vpop.eup %8603 }
 0xfb7   : > { %5452 = vadd.xlane.f32.xlu1 %v11285_v5  ;;  %v11288_v57 = vpop.eup %8605 }
 0xfb8   : > { %7879 = vmatpush3.bf16.msra.mxu0 %v5513_v37  ;;  %v11291_v10 = vpop.eup %8607  ;;  %v12077_v37 = vld [vmem:[#allocation51_spill] sm:$0xff] }
 0xfb9   : > { %5450 = vadd.xlane.f32.xlu0 %v11288_v57  ;;  %v11294_v55 = vpop.eup %8609 }
 0xfbb   : > { %5462 = vadd.xlane.f32.xlu1 %v11291_v10 }
 0xfbc   : > { %v11297_v59 = vpop.eup %8611 }
 0xfbd   : > { %5456 = vadd.xlane.f32.xlu0 %v11294_v55 }
 0xfbf   : > { %5458 = vadd.xlane.f32.xlu1 %v11297_v59 }
 0xfd0   : > { %5506 = vrot.lane.b32.xlu1 %v10125_v62, %s8744_s28 }
 0xfd4   : > { %2072 = vrot.lane.b32.xlu1 %v10137_v2, %s8744_s28  ;;  %v5509_v2 = vpop.permute.xlu0 %5508 }
 0xfd8   : > { %2074 = vrot.lane.b32.xlu1 %v10131_v7, %s8744_s28  ;;  %v12063_v7 = vld [vmem:[#allocation68_spill] sm:$0xff] }
 0xfd9   : > { %v5385_v34 = vpop.xlane.xlu1 %5384 }
 0xfda   : > { %v5401_v35 = vsub.f32 %v11225_v39, %v5385_v34  ;;  %v12078_v34 = vld [vmem:[#allocation26_spill] sm:$0xff] }
 0xfdc   : > { %2682 = vrot.lane.b32.xlu1 %v10165_v53, %s8743_s26  ;;  %v5432_v14 = vmul.f32 1.442695, %v5401_v35  ;;  %v12064_v53 = vld [vmem:[#allocation81_spill] sm:$0xff] }
 0xfdd   : > { %v5381_v0 = vpop.xlane.xlu1 %5380  ;;  %v12080_v35 = vld [vmem:[#allocation69_spill] sm:$0xff] }
 0xfde   : > { %v5399_v16 = vsub.f32 %v11229_v54, %v5381_v0  ;;  %v12079_v0 = vld [vmem:[#allocation32_spill] sm:$0xff] }
 0xfe0   : > { %v5428_v17 = vmul.f32 1.442695, %v5399_v16  ;;  %2686 = vrot.lane.b32.xlu1 %v10163_v24, %s8743_s26  ;;  %v12065_v24 = vld [vmem:[#allocation78_spill] sm:$0xff]  ;;  %v12081_v16 = vld [vmem:[#allocation27_spill] sm:$0xff] }
 0xfe1   : > { %v5511_v62 = vpop.permute.xlu1 %5510 }
 0xfe2   : > { %8613 = vpow2.f32 %v5428_v17  ;;  %7880 = vmatprep.subr.bf16.mxu0 %v5511_v62  ;;  %v12082_v17 = vld [vmem:[#allocation33_spill] sm:$0xff] }
 0xfe3   : > { %7881 = vmatpush3.bf16.msra.mxu0 %v5511_v62  ;;  %8615 = vpow2.f32 %v5432_v14  ;;  %v12083_v62 = vld [vmem:[#allocation74_spill] sm:$0xff] }
 0xfe4   : > { %3294 = vrot.lane.b32.xlu1 %v10452_v60, %s8742_s20  ;;  %7882 = vmatprep.subr.bf16.mxu0 %v5509_v2  ;;  %v12066_v60 = vld [vmem:[#allocation15_spill] sm:$0xff]  ;;  %v12084_v14 = vld [vmem:[#allocation82_spill] sm:$0xff] }
 0xfe7   : > { %7883 = vmatpush3.bf16.msra.mxu0 %v5509_v2  ;;  %v12085_v2 = vld [vmem:[#allocation29_spill] sm:$0xff] }
 0xfe8   : > { %3298 = vrot.lane.b32.xlu1 %v12063_v7, %s8742_s20  ;;  %v12086_v7 = vld [vmem:[#allocation79_spill] sm:$0xff] }
 0xfec   : > { %2078 = vrot.lane.b32.xlu1 %v12064_v53, %s8744_s28 }
 0xfef   : > { %v11318_v39 = vpop.eup %8613 }
 0xff0   : > { %5460 = vadd.xlane.f32.xlu0 %v11318_v39  ;;  %2082 = vrot.lane.b32.xlu1 %v12065_v24, %s8744_s28  ;;  %v11323_v54 = vpop.eup %8615  ;;  %v12087_v24 = vld [vmem:[#allocation67_spill] sm:$0xff] }
 0xff4   : > { %5464 = vadd.xlane.f32.xlu0 %v11323_v54  ;;  %2690 = vrot.lane.b32.xlu1 %v12066_v60, %s8743_s26  ;;  %v12088_v60 = vld [vmem:[#allocation66_spill] sm:$0xff] }
 0xff8   : > { %2694 = vrot.lane.b32.xlu1 %v12067_v50, %s8743_s26 }
 0xffc   : > { %3302 = vrot.lane.b32.xlu1 %v12068_v26, %s8742_s20  ;;  %v12089_v26 = vld [vmem:[#allocation50_spill] sm:$0xff] }
0x1000   : > { %3306 = vrot.lane.b32.xlu1 %v12069_v51, %s8742_s20  ;;  %v12090_v51 = vld [vmem:[#allocation31_spill] sm:$0xff] }
0x1004   : > { %2086 = vrot.lane.b32.xlu1 %v12070_v11, %s8744_s28 }
0x1008   : > { %2090 = vrot.lane.b32.xlu1 %v12071_v36, %s8744_s28  ;;  %v12091_v36 = vld [vmem:[#allocation49_spill] sm:$0xff] }
0x100a   : > { %2070 = vrot.lane.b32.xlu0 %v12072_v21, %s8744_s28  ;;  %v12092_v21 = vld [vmem:[#allocation52_spill] sm:$0xff] }
0x100c   : > { %2698 = vrot.lane.b32.xlu1 %v12073_v42, %s8743_s26 }
0x100e   : > { %2076 = vrot.lane.b32.xlu0 %v12074_v38, %s8744_s28 }
0x1010   : > { %2702 = vrot.lane.b32.xlu1 %v12075_v15, %s8743_s26  ;;  %v12093_v15 = vld [vmem:[#allocation72_spill] sm:$0xff] }
0x1012   : > { %2684 = vrot.lane.b32.xlu0 %v12076_v8, %s8743_s26 }
0x1014   : > { %3310 = vrot.lane.b32.xlu1 %v12077_v37, %s8742_s20 }
0x1016   : > { %2688 = vrot.lane.b32.xlu0 %v12078_v34, %s8743_s26  ;;  %v12094_v34 = vld [vmem:[#allocation25_spill] sm:$0xff] }
0x1018   : > { %3314 = vrot.lane.b32.xlu1 %v12079_v0, %s8742_s20 }
0x101a   : > { %3296 = vrot.lane.b32.xlu0 %v12080_v35, %s8742_s20 }
0x101c   : > { %2094 = vrot.lane.b32.xlu1 %v12081_v16, %s8744_s28 }
0x101e   : > { %3300 = vrot.lane.b32.xlu0 %v12082_v17, %s8742_s20 }
0x1020   : > { %2098 = vrot.lane.b32.xlu1 %v12083_v62, %s8744_s28  ;;  %v12096_v62 = vld [vmem:[#allocation88_spill] sm:$0xff] }
0x1022   : > { %2080 = vrot.lane.b32.xlu0 %v12084_v14, %s8744_s28 }
0x1024   : > { %2706 = vrot.lane.b32.xlu1 %v12085_v2, %s8743_s26 }
0x1026   : > { %2084 = vrot.lane.b32.xlu0 %v12086_v7, %s8744_s28 }
0x1028   : > { %v5439_v53 = vpop.xlane.xlu1 %5438  ;;  %2710 = vrot.lane.b32.xlu1 %v12087_v24, %s8743_s26 }
0x102a   : > { %2692 = vrot.lane.b32.xlu0 %v12088_v60, %s8743_s26 }
0x102c   : > { %v5435_v50 = vpop.xlane.xlu1 %5434  ;;  %3318 = vrot.lane.b32.xlu1 %v12089_v26, %s8742_s20  ;;  %v12098_v26 = vld [vmem:[#allocation48_spill] sm:$0xff] }
0x102d   : > { %8617 = vrcp.f32 %v5435_v50 }
0x102e   : > { %2696 = vrot.lane.b32.xlu0 %v12090_v51, %s8743_s26 }
0x1030   : > { %v5441_v11 = vpop.xlane.xlu1 %5440  ;;  %3322 = vrot.lane.b32.xlu1 %v12091_v36, %s8742_s20 }
0x1032   : > { %3304 = vrot.lane.b32.xlu0 %v12092_v21, %s8742_s20  ;;  %v5447_v42 = vpop.xlane.xlu0 %5446 }
0x1034   : > { %v5437_v38 = vpop.xlane.xlu1 %5436  ;;  %4421 = vrot.lane.b32.xlu1 %v10913_v61, %s8744_s28  ;;  %v12095_v61 = vld [vmem:[#allocation84_spill] sm:$0xff] }
0x1035   : > { %8619 = vrcp.f32 %v5437_v38 }
0x1036   : > { %3308 = vrot.lane.b32.xlu0 %v12093_v15, %s8742_s20  ;;  %v5443_v8 = vpop.xlane.xlu0 %5442  ;;  %8621 = vrcp.f32 %v5441_v11  ;;  %v8129_v11 = vld [vmem:[%s11789_s3 + $0x38] sm:$0xff]  }
0x1038   : > { %4425 = vrot.lane.b32.xlu1 %v10911_v28, %s8744_s28  ;;  %v5445_v37 = vpop.xlane.xlu1 %5444 }
0x1039   : > { %8623 = vrcp.f32 %v5445_v37 }
0x103a   : > { %2088 = vrot.lane.b32.xlu0 %v12094_v34, %s8744_s28  ;;  %v5449_v0 = vpop.xlane.xlu0 %5448  ;;  %8625 = vrcp.f32 %v5439_v53  ;;  %v8618_v16 = vpop.eup %8617  ;;  %v12100_v34 = vld [vmem:[#allocation65_spill] sm:$0xff] }
0x103b   : > { %8627 = vrcp.f32 %v5443_v8  ;;  %v5482_v2 = vmul.f32 %v8618_v16, %v11256_v58 }
0x103c   : > { %5032 = vrot.lane.b32.xlu1 %v11152_v63, %s8743_s26  ;;  %8629 = vrcp.f32 %v5449_v0 }
0x103e   : > { %2092 = vrot.lane.b32.xlu0 %v12095_v61, %s8744_s28  ;;  %v5455_v35 = vpop.xlane.xlu0 %5454 }
0x1040   : > { %v5453_v17 = vpop.xlane.xlu1 %5452  ;;  %5036 = vrot.lane.b32.xlu1 %v11150_v48, %s8743_s26  ;;  %v12097_v48 = vld [vmem:[#allocation86_spill] sm:$0xff] }
0x1042   : > { %v8620_v28 = vpop.eup %8619  ;;  %2700 = vrot.lane.b32.xlu0 %v12096_v62, %s8743_s26  ;;  %v5451_v14 = vpop.xlane.xlu0 %5450 }
0x1043   : > { %v5483_v63 = vmul.f32 %v8620_v28, %v11269_v32  ;;  %8631 = vrcp.f32 %v5451_v14  ;;  %v8622_v24 = vpop.eup %8621  ;;  %v8132_v14 = vld [vmem:[%s11789_s3 + $0x20] sm:$0xff]  }
0x1044   : > { %v11398_v7 = vpop.xlane.xlu1 %5462  ;;  %4429 = vrot.lane.b32.xlu1 %v10921_v6, %s8744_s28  ;;  %8633 = vrcp.f32 %v5447_v42  ;;  %v5485_v51 = vmul.f32 %v8622_v24, %v11261_v27  ;;  %v12099_v42 = vld [vmem:[#allocation64_spill] sm:$0xff] }
0x1045   : > { %v5498_v53 = vpack.c.bf16 %v5483_v63, %v5482_v2  ;;  %8635 = vrcp.f32 %v5453_v17  ;;  %v12101_v17 = vld [vmem:[#allocation11_spill] sm:$0xff]  ;;  %v12102_v2 = vld [vmem:[#allocation85_spill] sm:$0xff]  ;;  %v8133_v63 = vld [vmem:[%s11789_s3 + $0x18] sm:$0xff]  }
0x1046   : > { %2704 = vrot.lane.b32.xlu0 %v12097_v48, %s8743_s26  ;;  %v5457_v60 = vpop.xlane.xlu0 %5456  ;;  %v8624_v32 = vpop.eup %8623  ;;  %v12103_v48 = vld [vmem:[#allocation87_spill] sm:$0xff] }
0x1047   : > { %7886 = vmatprep.mubr.bf16.mxu0 %v5498_v53  ;;  %v8626_v50 = vpop.eup %8625  ;;  %8637 = vrcp.f32 %v5457_v60  ;;  %v12104_v60 = vld [vmem:[#allocation46_spill] sm:$0xff] }
0x1048   : > { %4433 = vrot.lane.b32.xlu1 %v10919_v41, %s8744_s28  ;;  %v11406_v58 = vpop.xlane.xlu1 %5458  ;;  %v8628_v6 = vpop.eup %8627  ;;  %v5487_v41 = vmul.f32 %v8624_v32, %v11276_v30  ;;  %v5484_v21 = vmul.f32 %v8626_v50, %v11252_v56  ;;  %8639 = vrcp.f32 %v5455_v35  ;;  %v8130_v56 = vld [vmem:[%s11789_s3 + $0x30] sm:$0xff]   ;;  %v8131_v35 = vld [vmem:[%s11789_s3 + $0x28] sm:$0xff]   ;;  %v12105_v32 = vld [vmem:[#allocation45_spill] sm:$0xff] }
0x1049   : > { %v5486_v27 = vmul.f32 %v8628_v6, %v11273_v49  ;;  %v8630_v15 = vpop.eup %8629  ;;  %8641 = vrcp.f32 %v11406_v58 }
0x104a   : > { %3312 = vrot.lane.b32.xlu0 %v12098_v26, %s8742_s20  ;;  %v5499_v38 = vpack.c.bf16 %v5485_v51, %v5484_v21  ;;  %v5489_v0 = vmul.f32 %v8630_v15, %v11279_v46 }
0x104b   : > { %v5500_v8 = vpack.c.bf16 %v5487_v41, %v5486_v27  ;;  %v12108_v41 = vld [vmem:[#allocation42_spill] sm:$0xff] }
0x104c   : > { %5040 = vrot.lane.b32.xlu1 %v11160_v52, %s8743_s26  ;;  %v5507_v36 = vpop.permute.xlu1 %5506 }
0x104d   : > { %7884 = vmatprep.subr.bf16.mxu0 %v5507_v36 }
0x104e   : > { %3316 = vrot.lane.b32.xlu0 %v12099_v42, %s8742_s20  ;;  %7885 = vmatpush3.bf16.msra.mxu0 %v5507_v36 }
0x104f   : > { %7902 = vmatprep.subr.bf16.mxu0 %v8129_v11 }
0x1050   : > { %5044 = vrot.lane.b32.xlu1 %v11158_v18, %s8743_s26  ;;  %v2073_v52 = vpop.permute.xlu1 %2072  ;;  %v8632_v30 = vpop.eup %8631 }
0x1051   : > { %2120 = vst.msk [vmem:[#allocation2 + $0x8] sm:$0xff] %vm2118_vm1, %v2073_v52  ;;  %7887 = vmatmul.mubr.bf16.vlgmr.msra.gmra.mxu0 %v5499_v38  ;;  %v8634_v37 = vpop.eup %8633  ;;  %v5490_v61 = vmul.f32 %v8632_v30, %v11288_v57 }
0x1052   : > { %2096 = vrot.lane.b32.xlu0 %v12100_v34, %s8744_s28  ;;  %7890 = vmatprep.mubr.bf16.mxu0 %v5500_v8  ;;  %v8636_v49 = vpop.eup %8635  ;;  %v5488_v16 = vmul.f32 %v8634_v37, %v11266_v1 }
0x1053   : > { %7903 = vmatpush3.bf16.msra.mxu0 %v8129_v11  ;;  %v5491_v46 = vmul.f32 %v8636_v49, %v11285_v5  ;;  %v12107_v11 = vld [vmem:[#allocation43_spill] sm:$0xff] }
0x1054   : > { %4437 = vrot.lane.b32.xlu1 %v10929_v23, %s8744_s28  ;;  %v2075_v18 = vpop.permute.xlu1 %2074  ;;  %7904 = vmatprep.subr.bf16.mxu0 %v8130_v56  ;;  %v5501_v28 = vpack.c.bf16 %v5489_v0, %v5488_v16  ;;  %v8638_v23 = vpop.eup %8637 }
0x1055   : > { %2121 = vst.msk [vmem:[#allocation2 + $0x10] sm:$0xff] %vm2118_vm1, %v2075_v18  ;;  %v5502_v62 = vpack.c.bf16 %v5491_v46, %v5490_v61  ;;  %v8640_v1 = vpop.eup %8639  ;;  %v5493_v5 = vmul.f32 %v8638_v23, %v11294_v55 }
0x1056   : > { %2100 = vrot.lane.b32.xlu0 %v12101_v17, %s8744_s28  ;;  %v5492_v53 = vmul.f32 %v8640_v1, %v11282_v45  ;;  %v8642_v21 = vpop.eup %8641 }
0x1057   : > { %7905 = vmatpush3.bf16.msra.mxu0 %v8130_v56  ;;  %v5494_v15 = vmul.f32 %v8642_v21, %v11297_v59  ;;  %v12109_v56 = vld [vmem:[#allocation39_spill] sm:$0xff] }
0x1058   : > { %4441 = vrot.lane.b32.xlu1 %v10927_v4, %s8744_s28  ;;  %v11443_v57 = vpop.permute.xlu1 %2682  ;;  %7906 = vmatprep.subr.bf16.mxu0 %v8131_v35  ;;  %v5503_v24 = vpack.c.bf16 %v5493_v5, %v5492_v53 }
0x1059   : > { %7891 = vmatmul.mubr.bf16.gmra.mxu0 %v5501_v28  ;;  %v12111_v28 = vld [vmem:[#allocation38_spill] sm:$0xff] }
0x105a   : > { %2708 = vrot.lane.b32.xlu0 %v12102_v2, %s8743_s26  ;;  %7894 = vmatprep.mubr.bf16.mxu0 %v5502_v62 }
0x105b   : > { %7907 = vmatpush3.bf16.msra.mxu0 %v8131_v35 }
0x105c   : > { %5048 = vrot.lane.b32.xlu1 %v11168_v3, %s8743_s26  ;;  %v2687_v4 = vpop.permute.xlu1 %2686  ;;  %7908 = vmatprep.subr.bf16.mxu0 %v8132_v14  ;;  %v8134_v3 = vld [vmem:[%s11789_s3 + $0x10] sm:$0xff]  }
0x105d   : > { %2733 = vst.msk [vmem:[#allocation2 + $0x10] sm:$0xff] %vm2730_vm2, %v2687_v4 }
0x105e   : > { %2712 = vrot.lane.b32.xlu0 %v12103_v48, %s8743_s26 }
0x105f   : > { %7909 = vmatpush3.bf16.msra.mxu0 %v8132_v14 }
0x1060   : > { %5052 = vrot.lane.b32.xlu1 %v11166_v44, %s8743_s26  ;;  %v3295_v55 = vpop.permute.xlu1 %3294  ;;  %7910 = vmatprep.subr.bf16.mxu0 %v8133_v63  ;;  %v8135_v44 = vld [vmem:[%s11789_s3 + $0x8] sm:$0xff]  }
0x1061   : > { %7895 = vmatmul.mubr.bf16.gmra.mxu0 %v5503_v24 }
0x1062   : > { %3320 = vrot.lane.b32.xlu0 %v12104_v60, %s8742_s20 }
0x1063   : > { %7911 = vmatpush3.bf16.msra.mxu0 %v8133_v63 }
0x1064   : > { %4445 = vrot.lane.b32.xlu1 %v10937_v47, %s8744_s28  ;;  %v3299_v45 = vpop.permute.xlu1 %3298  ;;  %7912 = vmatprep.subr.bf16.mxu0 %v8134_v3  ;;  %v8136_v47 = vld [vmem:[%s11789_s3] sm:$0xff]  }
0x1065   : > { %3345 = vst.msk [vmem:[#allocation2 + $0x10] sm:$0xff] %vm3342_vm3, %v3299_v45 }
0x1066   : > { %3324 = vrot.lane.b32.xlu0 %v12105_v32, %s8742_s20 }
0x1067   : > { %7913 = vmatpush3.bf16.msra.mxu0 %v8134_v3 }
0x1068   : > { %4449 = vrot.lane.b32.xlu1 %v10935_v19, %s8744_s28  ;;  %v2079_v50 = vpop.permute.xlu1 %2078  ;;  %7914 = vmatprep.subr.bf16.mxu0 %v8135_v44  ;;  %v12106_v19 = vld [vmem:[#allocation47_spill] sm:$0xff] }
0x1069   : > { %2123 = vst.msk [vmem:[#allocation2 + $0x20] sm:$0xff] %vm2118_vm1, %v2079_v50 }
0x106a   : > { %4423 = vrot.lane.b32.xlu0 %v10917_v12, %s8744_s28 }
0x106b   : > { %7915 = vmatpush3.bf16.msra.mxu0 %v8135_v44 }
0x106c   : > { %5056 = vrot.lane.b32.xlu1 %v11176_v22, %s8743_s26  ;;  %v2083_v26 = vpop.permute.xlu1 %2082  ;;  %7916 = vmatprep.subr.bf16.mxu0 %v8136_v47  ;;  %v5709_v62 = vld [vmem:[#allocation2 + $0x10] sm:$0xff] }
0x106d   : > { %2125 = vst.msk [vmem:[#allocation2 + $0x30] sm:$0xff] %vm2118_vm1, %v2083_v26 }
0x106e   : > { %4427 = vrot.lane.b32.xlu0 %v12106_v19, %s8744_s28 }
0x106f   : > { %7917 = vmatpush3.bf16.msra.mxu0 %v8136_v47 }
0x1070   : > { %v2691_v6 = vpop.permute.xlu1 %2690 }
0x1071   : > { %2735 = vst.msk [vmem:[#allocation2 + $0x20] sm:$0xff] %vm2730_vm2, %v2691_v6 }
0x1072   : > { %5034 = vrot.lane.b32.xlu0 %v11156_v20, %s8743_s26 }
0x1074   : > { %v2695_v51 = vpop.permute.xlu1 %2694 }
0x1075   : > { %2737 = vst.msk [vmem:[#allocation2 + $0x30] sm:$0xff] %vm2730_vm2, %v2695_v51 }
0x1076   : > { %5038 = vrot.lane.b32.xlu0 %v11154_v43, %s8743_s26 }
0x1078   : > { %v3303_v12 = vpop.permute.xlu1 %3302 }
0x1079   : > { %3347 = vst.msk [vmem:[#allocation2 + $0x20] sm:$0xff] %vm3342_vm3, %v3303_v12  ;;  %v5461_v22 = vpop.xlane.xlu0 %5460 }
0x107a   : > { %8643 = vrcp.f32 %v5461_v22  ;;  %4431 = vrot.lane.b32.xlu0 %v12107_v11, %s8744_s28 }
0x107b   : > { %8645 = vrcp.f32 %v11398_v7 }
0x107c   : > { %v3307_v36 = vpop.permute.xlu1 %3306 }
0x107d   : > { %3349 = vst.msk [vmem:[#allocation2 + $0x30] sm:$0xff] %vm3342_vm3, %v3307_v36  ;;  %v5465_v20 = vpop.xlane.xlu0 %5464 }
0x107e   : > { %8647 = vrcp.f32 %v5465_v20  ;;  %4435 = vrot.lane.b32.xlu0 %v12108_v41, %s8744_s28 }
0x1080   : > { %v2087_v43 = vpop.permute.xlu1 %2086  ;;  %v5711_v60 = vld [vmem:[#allocation2 + $0x20] sm:$0xff] }
0x1081   : > { %2127 = vst.msk [vmem:[#allocation2 + $0x40] sm:$0xff] %vm2118_vm1, %v2087_v43  ;;  %v2071_v58 = vpop.permute.xlu0 %2070 }
0x1082   : > { %2119 = vst.msk [vmem:[#allocation2] sm:$0xff] %vm2118_vm1, %v2071_v58  ;;  %5042 = vrot.lane.b32.xlu0 %v11164_v40, %s8743_s26 }
0x1083   : > { %2731 = vst.msk [vmem:[#allocation2] sm:$0xff] %vm2730_vm2, %v11443_v57 }
0x1084   : > { %3343 = vst.msk [vmem:[#allocation2] sm:$0xff] %vm3342_vm3, %v3295_v55  ;;  %v2091_v7 = vpop.permute.xlu1 %2090  ;;  %v5713_v47 = vld [vmem:[#allocation2 + $0x30] sm:$0xff] }
0x1085   : > { %2129 = vst.msk [vmem:[#allocation2 + $0x50] sm:$0xff] %vm2118_vm1, %v2091_v7  ;;  %v2077_v42 = vpop.permute.xlu0 %2076 }
0x1086   : > { %2122 = vst.msk [vmem:[#allocation2 + $0x18] sm:$0xff] %vm2118_vm1, %v2077_v42  ;;  %5046 = vrot.lane.b32.xlu0 %v11162_v25, %s8743_s26 }
0x1087   : > { %v8644_v27 = vpop.eup %8643 }
0x1088   : > { %v2699_v38 = vpop.permute.xlu1 %2698  ;;  %v5495_v40 = vmul.f32 %v8644_v27, %v11318_v39  ;;  %v8646_v52 = vpop.eup %8645  ;;  %v12110_v39 = vld [vmem:[#allocation44_spill] sm:$0xff] }
0x1089   : > { %2739 = vst.msk [vmem:[#allocation2 + $0x40] sm:$0xff] %vm2730_vm2, %v2699_v38  ;;  %v2685_v8 = vpop.permute.xlu0 %2684  ;;  %v5496_v25 = vmul.f32 %v8646_v52, %v11291_v10 }
0x108a   : > { %2732 = vst.msk [vmem:[#allocation2 + $0x8] sm:$0xff] %vm2730_vm2, %v2685_v8  ;;  %4439 = vrot.lane.b32.xlu0 %v12109_v56, %s8744_s28  ;;  %v5504_v30 = vpack.c.bf16 %v5495_v40, %v5494_v15 }
0x108b   : > { %v8648_v37 = vpop.eup %8647  ;;  %v5707_v17 = vld [vmem:[#allocation2] sm:$0xff] }
0x108c   : > { %v2703_v34 = vpop.permute.xlu1 %2702  ;;  %7898 = vmatprep.mubr.bf16.mxu0 %v5504_v30  ;;  %v5497_v49 = vmul.f32 %v8648_v37, %v11323_v54 }
0x108d   : > { %2741 = vst.msk [vmem:[#allocation2 + $0x50] sm:$0xff] %vm2730_vm2, %v2703_v34  ;;  %v2689_v59 = vpop.permute.xlu0 %2688 }
0x108e   : > { %2734 = vst.msk [vmem:[#allocation2 + $0x18] sm:$0xff] %vm2730_vm2, %v2689_v59  ;;  %4443 = vrot.lane.b32.xlu0 %v12110_v39, %s8744_s28  ;;  %v5505_v0 = vpack.c.bf16 %v5497_v49, %v5496_v25 }
0x1090   : > { %v3311_v18 = vpop.permute.xlu1 %3310  ;;  %7899 = vmatmul.mubr.bf16.gmra.mxu0 %v5505_v0 }
0x1091   : > { %3351 = vst.msk [vmem:[#allocation2 + $0x40] sm:$0xff] %vm3342_vm3, %v3311_v18  ;;  %v3297_v61 = vpop.permute.xlu0 %3296 }
0x1092   : > { %3344 = vst.msk [vmem:[#allocation2 + $0x8] sm:$0xff] %vm3342_vm3, %v3297_v61  ;;  %5050 = vrot.lane.b32.xlu0 %v11172_v13, %s8743_s26 }
0x1094   : > { %v3315_v10 = vpop.permute.xlu1 %3314 }
0x1095   : > { %3353 = vst.msk [vmem:[#allocation2 + $0x50] sm:$0xff] %vm3342_vm3, %v3315_v10  ;;  %v3301_v54 = vpop.permute.xlu0 %3300 }
0x1096   : > { %3346 = vst.msk [vmem:[#allocation2 + $0x18] sm:$0xff] %vm3342_vm3, %v3301_v54  ;;  %5054 = vrot.lane.b32.xlu0 %v11170_v9, %s8743_s26  ;;  %v12112_v9 = vld [vmem:[#allocation34_spill] sm:$0xff] }
0x1098   : > { %v2095_v35 = vpop.permute.xlu1 %2094  ;;  %v5715_v7 = vld [vmem:[#allocation2 + $0x40] sm:$0xff] }
0x1099   : > { %2131 = vst.msk [vmem:[#allocation2 + $0x60] sm:$0xff] %vm2118_vm1, %v2095_v35  ;;  %v2081_v16 = vpop.permute.xlu0 %2080  ;;  %v5708_v46 = vld [vmem:[#allocation2 + $0x8] sm:$0xff] }
0x109a   : > { %2124 = vst.msk [vmem:[#allocation2 + $0x28] sm:$0xff] %vm2118_vm1, %v2081_v16  ;;  %4447 = vrot.lane.b32.xlu0 %v12111_v28, %s8744_s28  ;;  %v5739_v13 = vpack.c.bf16 %v5708_v46, %v5707_v17 }
0x109c   : > { %v2099_v23 = vpop.permute.xlu1 %2098  ;;  %7918 = vmatprep.mubr.bf16.mxu0 %v5739_v13  ;;  %v5717_v15 = vld [vmem:[#allocation2 + $0x50] sm:$0xff] }
0x109d   : > { %2133 = vst.msk [vmem:[#allocation2 + $0x70] sm:$0xff] %vm2118_vm1, %v2099_v23  ;;  %v2085_v57 = vpop.permute.xlu0 %2084  ;;  %v5710_v14 = vld [vmem:[#allocation2 + $0x18] sm:$0xff] }
0x109e   : > { %2126 = vst.msk [vmem:[#allocation2 + $0x38] sm:$0xff] %vm2118_vm1, %v2085_v57  ;;  %4451 = vrot.lane.b32.xlu0 %v12112_v9, %s8744_s28  ;;  %v5740_v1 = vpack.c.bf16 %v5710_v14, %v5709_v62  ;;  %s6154_s28 = sshll.u32 %s9484_s29, 8 }
0x109f   : > { %s11620_s19 = scalar_lea.vmem [#allocation3], %s6154_s28  ;;  %s8653_s28 = sshll.u32 %s8745_s17, 4  ;;  %s8654_s28 = int_to_ptr.vmem [resolvable:$false] %s8653_s28 }
0x10a0   : > { %v2707_v2 = vpop.permute.xlu1 %2706  ;;  %7919 = vmatmul.mubr.bf16.vlgmr.msra.gmra.mxu0 %v5740_v1  ;;  %s8655_s10 = scalar_lea.vmem %s8654_s28, 16384  ;;  %p8656_p0 = scmp.lt.s32.totalorder %s11678_s9, %s8654_s28 }
0x10a1   : > { %2743 = vst.msk [vmem:[#allocation2 + $0x60] sm:$0xff] %vm2730_vm2, %v2707_v2  ;;  %v2693_v5 = vpop.permute.xlu0 %2692  ;;  %p8657_p1 = scmp.lt.s32.totalorder %s8655_s10, %s8649_s16 }
0x10a2   : > { %2736 = vst.msk [vmem:[#allocation2 + $0x28] sm:$0xff] %vm2730_vm2, %v2693_v5  ;;  %5058 = vrot.lane.b32.xlu0 %v11180_v33, %s8743_s26 }
0x10a3   : > { %p8658_p2 = por %p8657_p1, %p8656_p0 }
0x10a4   : > { %v2711_v4 = vpop.permute.xlu1 %2710 }
0x10a5   : > { %2745 = vst.msk [vmem:[#allocation2 + $0x70] sm:$0xff] %vm2730_vm2, %v2711_v4  ;;  %v2697_v63 = vpop.permute.xlu0 %2696  ;;  %p8659_p3 = pnand %p8658_p2, %p8652_p13 }
0x10a6   : > { %2738 = vst.msk [vmem:[#allocation2 + $0x38] sm:$0xff] %vm2730_vm2, %v2697_v63 }
0x10a8   : > { %v3319_v53 = vpop.permute.xlu1 %3318 }
0x10a9   : > { %3355 = vst.msk [vmem:[#allocation2 + $0x60] sm:$0xff] %vm3342_vm3, %v3319_v53  ;;  %v3305_v48 = vpop.permute.xlu0 %3304 }
0x10aa   : > { %3348 = vst.msk [vmem:[#allocation2 + $0x28] sm:$0xff] %vm3342_vm3, %v3305_v48 }
0x10ac   : > { %v3323_v24 = vpop.permute.xlu1 %3322 }
0x10ad   : > { %3357 = vst.msk [vmem:[#allocation2 + $0x70] sm:$0xff] %vm3342_vm3, %v3323_v24  ;;  %v3309_v55 = vpop.permute.xlu0 %3308 }
0x10ae   : > { %3350 = vst.msk [vmem:[#allocation2 + $0x38] sm:$0xff] %vm3342_vm3, %v3309_v55 }
0x10b0   : > { %v4422_v3 = vpop.permute.xlu1 %4421  ;;  %v5719_v18 = vld [vmem:[#allocation2 + $0x60] sm:$0xff] }
0x10b1   : > { %4469 = vst.msk [vmem:[#allocation2 + $0x80] sm:$0xff] %vm2118_vm1, %v4422_v3  ;;  %v2089_v33 = vpop.permute.xlu0 %2088  ;;  %v5712_v45 = vld [vmem:[#allocation2 + $0x28] sm:$0xff] }
0x10b2   : > { %2128 = vst.msk [vmem:[#allocation2 + $0x48] sm:$0xff] %vm2118_vm1, %v2089_v33  ;;  %v5741_v44 = vpack.c.bf16 %v5712_v45, %v5711_v60 }
0x10b4   : > { %v4426_v32 = vpop.permute.xlu1 %4425  ;;  %7922 = vmatprep.mubr.bf16.mxu0 %v5741_v44  ;;  %v5721_v16 = vld [vmem:[#allocation2 + $0x70] sm:$0xff] }
0x10b5   : > { %4471 = vst.msk [vmem:[#allocation2 + $0x90] sm:$0xff] %vm2118_vm1, %v4426_v32  ;;  %v2093_v50 = vpop.permute.xlu0 %2092  ;;  %v5714_v26 = vld [vmem:[#allocation2 + $0x38] sm:$0xff] }
0x10b6   : > { %2130 = vst.msk [vmem:[#allocation2 + $0x58] sm:$0xff] %vm2118_vm1, %v2093_v50  ;;  %v5742_v19 = vpack.c.bf16 %v5714_v26, %v5713_v47 }
0x10b8   : > { %v5033_v6 = vpop.permute.xlu1 %5032  ;;  %7923 = vmatmul.mubr.bf16.gmra.mxu0 %v5742_v19 }
0x10b9   : > { %5080 = vst.msk [vmem:[#allocation2 + $0x80] sm:$0xff] %vm2730_vm2, %v5033_v6  ;;  %v2701_v51 = vpop.permute.xlu0 %2700 }
0x10ba   : > { %2740 = vst.msk [vmem:[#allocation2 + $0x48] sm:$0xff] %vm2730_vm2, %v2701_v51 }
0x10bc   : > { %v5037_v12 = vpop.permute.xlu1 %5036 }
0x10bd   : > { %5082 = vst.msk [vmem:[#allocation2 + $0x90] sm:$0xff] %vm2730_vm2, %v5037_v12  ;;  %v2705_v22 = vpop.permute.xlu0 %2704 }
0x10be   : > { %2742 = vst.msk [vmem:[#allocation2 + $0x58] sm:$0xff] %vm2730_vm2, %v2705_v22 }
0x10c0   : > { %v4430_v11 = vpop.permute.xlu1 %4429 }
0x10c1   : > { %4473 = vst.msk [vmem:[#allocation2 + $0xa0] sm:$0xff] %vm2118_vm1, %v4430_v11  ;;  %v3313_v36 = vpop.permute.xlu0 %3312 }
0x10c2   : > { %3352 = vst.msk [vmem:[#allocation2 + $0x48] sm:$0xff] %vm3342_vm3, %v3313_v36 }
0x10c4   : > { %v4434_v20 = vpop.permute.xlu1 %4433 }
0x10c5   : > { %4475 = vst.msk [vmem:[#allocation2 + $0xb0] sm:$0xff] %vm2118_vm1, %v4434_v20  ;;  %v3317_v41 = vpop.permute.xlu0 %3316 }
0x10c6   : > { %3354 = vst.msk [vmem:[#allocation2 + $0x58] sm:$0xff] %vm3342_vm3, %v3317_v41 }
0x10c8   : > { %v5041_v43 = vpop.permute.xlu1 %5040 }
0x10c9   : > { %5084 = vst.msk [vmem:[#allocation2 + $0xa0] sm:$0xff] %vm2730_vm2, %v5041_v43  ;;  %v2097_v58 = vpop.permute.xlu0 %2096  ;;  %v5716_v21 = vld [vmem:[#allocation2 + $0x48] sm:$0xff] }
0x10ca   : > { %2132 = vst.msk [vmem:[#allocation2 + $0x68] sm:$0xff] %vm2118_vm1, %v2097_v58  ;;  %v5743_v42 = vpack.c.bf16 %v5716_v21, %v5715_v7 }
0x10cc   : > { %v5045_v27 = vpop.permute.xlu1 %5044  ;;  %7926 = vmatprep.mubr.bf16.mxu0 %v5743_v42 }
0x10cd   : > { %5086 = vst.msk [vmem:[#allocation2 + $0xb0] sm:$0xff] %vm2730_vm2, %v5045_v27  ;;  %v2101_v38 = vpop.permute.xlu0 %2100  ;;  %v5718_v40 = vld [vmem:[#allocation2 + $0x58] sm:$0xff] }
0x10ce   : > { %2134 = vst.msk [vmem:[#allocation2 + $0x78] sm:$0xff] %vm2118_vm1, %v2101_v38  ;;  %v5744_v52 = vpack.c.bf16 %v5718_v40, %v5717_v15 }
0x10d0   : > { %v4438_v8 = vpop.permute.xlu1 %4437  ;;  %7927 = vmatmul.mubr.bf16.gmra.mxu0 %v5744_v52 }
0x10d1   : > { %4477 = vst.msk [vmem:[#allocation2 + $0xc0] sm:$0xff] %vm2118_vm1, %v4438_v8  ;;  %v2709_v56 = vpop.permute.xlu0 %2708 }
0x10d2   : > { %2744 = vst.msk [vmem:[#allocation2 + $0x68] sm:$0xff] %vm2730_vm2, %v2709_v56 }
0x10d4   : > { %v4442_v30 = vpop.permute.xlu1 %4441 }
0x10d5   : > { %4479 = vst.msk [vmem:[#allocation2 + $0xd0] sm:$0xff] %vm2118_vm1, %v4442_v30  ;;  %v2713_v37 = vpop.permute.xlu0 %2712 }
0x10d6   : > { %2746 = vst.msk [vmem:[#allocation2 + $0x78] sm:$0xff] %vm2730_vm2, %v2713_v37 }
0x10d8   : > { %v5049_v34 = vpop.permute.xlu1 %5048 }
0x10d9   : > { %5088 = vst.msk [vmem:[#allocation2 + $0xc0] sm:$0xff] %vm2730_vm2, %v5049_v34  ;;  %v3321_v25 = vpop.permute.xlu0 %3320 }
0x10da   : > { %3356 = vst.msk [vmem:[#allocation2 + $0x68] sm:$0xff] %vm3342_vm3, %v3321_v25 }
0x10dc   : > { %v5053_v49 = vpop.permute.xlu1 %5052 }
0x10dd   : > { %5090 = vst.msk [vmem:[#allocation2 + $0xd0] sm:$0xff] %vm2730_vm2, %v5053_v49  ;;  %v3325_v59 = vpop.permute.xlu0 %3324 }
0x10de   : > { %3358 = vst.msk [vmem:[#allocation2 + $0x78] sm:$0xff] %vm3342_vm3, %v3325_v59 }
0x10e0   : > { %v4446_v39 = vpop.permute.xlu1 %4445 }
0x10e1   : > { %4481 = vst.msk [vmem:[#allocation2 + $0xe0] sm:$0xff] %vm2118_vm1, %v4446_v39  ;;  %v4424_v0 = vpop.permute.xlu0 %4423  ;;  %v5720_v61 = vld [vmem:[#allocation2 + $0x68] sm:$0xff] }
0x10e2   : > { %4470 = vst.msk [vmem:[#allocation2 + $0x88] sm:$0xff] %vm2118_vm1, %v4424_v0  ;;  %v5745_v10 = vpack.c.bf16 %v5720_v61, %v5719_v18 }
0x10e4   : > { %v4450_v54 = vpop.permute.xlu1 %4449  ;;  %7930 = vmatprep.mubr.bf16.mxu0 %v5745_v10 }
0x10e5   : > { %4483 = vst.msk [vmem:[#allocation2 + $0xf0] sm:$0xff] %vm2118_vm1, %v4450_v54  ;;  %v4428_v35 = vpop.permute.xlu0 %4427  ;;  %v5722_v17 = vld [vmem:[#allocation2 + $0x78] sm:$0xff] }
0x10e6   : > { %4472 = vst.msk [vmem:[#allocation2 + $0x98] sm:$0xff] %vm2118_vm1, %v4428_v35  ;;  %v5746_v46 = vpack.c.bf16 %v5722_v17, %v5721_v16 }
0x10e8   : > { %v5057_v28 = vpop.permute.xlu1 %5056  ;;  %7931 = vmatmul.mubr.bf16.gmra.mxu0 %v5746_v46 }
0x10e9   : > { %5092 = vst.msk [vmem:[#allocation2 + $0xe0] sm:$0xff] %vm2730_vm2, %v5057_v28  ;;  %v5035_v13 = vpop.permute.xlu0 %5034 }
0x10ea   : > { %5081 = vst.msk [vmem:[#allocation2 + $0x88] sm:$0xff] %vm2730_vm2, %v5035_v13 }
0x10ed   : > { %v5039_v23 = vpop.permute.xlu0 %5038 }
0x10ee   : > { %5083 = vst.msk [vmem:[#allocation2 + $0x98] sm:$0xff] %vm2730_vm2, %v5039_v23 }
0x10f1   : > { %v4432_v57 = vpop.permute.xlu0 %4431 }
0x10f2   : > { %4474 = vst.msk [vmem:[#allocation2 + $0xa8] sm:$0xff] %vm2118_vm1, %v4432_v57 }
0x10f5   : > { %v4436_v62 = vpop.permute.xlu0 %4435 }
0x10f6   : > { %4476 = vst.msk [vmem:[#allocation2 + $0xb8] sm:$0xff] %vm2118_vm1, %v4436_v62 }
0x10f9   : > { %v5043_v14 = vpop.permute.xlu0 %5042 }
0x10fa   : > { %5085 = vst.msk [vmem:[#allocation2 + $0xa8] sm:$0xff] %vm2730_vm2, %v5043_v14 }
0x10fd   : > { %v5047_v9 = vpop.permute.xlu0 %5046 }
0x10fe   : > { %5087 = vst.msk [vmem:[#allocation2 + $0xb8] sm:$0xff] %vm2730_vm2, %v5047_v9 }
0x1101   : > { %v4440_v1 = vpop.permute.xlu0 %4439 }
0x1102   : > { %4478 = vst.msk [vmem:[#allocation2 + $0xc8] sm:$0xff] %vm2118_vm1, %v4440_v1 }
0x1105   : > { %v4444_v2 = vpop.permute.xlu0 %4443 }
0x1106   : > { %4480 = vst.msk [vmem:[#allocation2 + $0xd8] sm:$0xff] %vm2118_vm1, %v4444_v2 }
0x1109   : > { %v5051_v5 = vpop.permute.xlu0 %5050 }
0x110a   : > { %5089 = vst.msk [vmem:[#allocation2 + $0xc8] sm:$0xff] %vm2730_vm2, %v5051_v5 }
0x110d   : > { %v5055_v4 = vpop.permute.xlu0 %5054 }
0x110e   : > { %5091 = vst.msk [vmem:[#allocation2 + $0xd8] sm:$0xff] %vm2730_vm2, %v5055_v4 }
0x1111   : > { %v7888_v63 = vpop.f32.mrf.mxu0  ;;  %v4448_v53 = vpop.permute.xlu0 %4447 }
0x1112   : > { %4482 = vst.msk [vmem:[#allocation2 + $0xe8] sm:$0xff] %vm2118_vm1, %v4448_v53  ;;  %5647 = vrot.lane.b32.xlu1 %v7888_v63, %s8742_s20 }
0x1113   : > { %v5564_v48 = vpop.f32.mrf.mxu0 }
0x1115   : > { %v7889_v24 = vpop.f32.mrf.mxu0  ;;  %v4452_v55 = vpop.permute.xlu0 %4451 }
0x1116   : > { %4484 = vst.msk [vmem:[#allocation2 + $0xf8] sm:$0xff] %vm2118_vm1, %v4452_v55  ;;  %5643 = vrot.lane.b32.xlu1 %v5564_v48, %s8742_s20  ;;  %5649 = vrot.lane.b32.xlu0 %v7889_v24, %s8742_s20 }
0x1117   : > { %v5567_v3 = vpop.f32.mrf.mxu0 }
0x1119   : > { %v7892_v33 = vpop.f32.mrf.mxu0  ;;  %v5059_v60 = vpop.permute.xlu0 %5058 }
0x111a   : > { %5093 = vst.msk [vmem:[#allocation2 + $0xe8] sm:$0xff] %vm2730_vm2, %v5059_v60  ;;  %5645 = vrot.lane.b32.xlu0 %v5567_v3, %s8742_s20  ;;  %5655 = vrot.lane.b32.xlu1 %v7892_v33, %s8742_s20 }
0x111b   : > { %v5580_v45 = vpop.f32.mrf.mxu0 }
0x111d   : > { %v7893_v44 = vpop.f32.mrf.mxu0 }
0x111e   : > { %5651 = vrot.lane.b32.xlu1 %v5580_v45, %s8742_s20  ;;  %5657 = vrot.lane.b32.xlu0 %v7893_v44, %s8742_s20 }
0x111f   : > { %v5583_v32 = vpop.f32.mrf.mxu0 }
0x1121   : > { %v7896_v50 = vpop.f32.mrf.mxu0 }
0x1122   : > { %5653 = vrot.lane.b32.xlu0 %v5583_v32, %s8742_s20  ;;  %5663 = vrot.lane.b32.xlu1 %v7896_v50, %s8742_s20 }
0x1123   : > { %v5596_v47 = vpop.f32.mrf.mxu0 }
0x1125   : > { %v7897_v26 = vpop.f32.mrf.mxu0 }
0x1126   : > { %5659 = vrot.lane.b32.xlu1 %v5596_v47, %s8742_s20  ;;  %5665 = vrot.lane.b32.xlu0 %v7897_v26, %s8742_s20 }
0x1127   : > { %v5599_v19 = vpop.f32.mrf.mxu0 }
0x112a   : > { %5060 = vrot.lane.b32.xlu1 %v11174_v29, %s8743_s26  ;;  %5661 = vrot.lane.b32.xlu0 %v5599_v19, %s8742_s20  ;;  %v11617_v29 = vld [vmem:[%s11790_s4] ss:$0 sm:$0xff] }
0x112e   : > { %5062 = vrot.lane.b32.xlu0 %v11178_v31, %s8743_s26 }
0x1150   : > { %v7900_v6 = vpop.f32.mrf.mxu0 }
0x1152   : > { %v5612_v51 = vpop.f32.mrf.mxu0 }
0x1153   : > { %5667 = vrot.lane.b32.xlu1 %v5612_v51, %s8742_s20 }
0x1154   : > { %v7901_v12 = vpop.f32.mrf.mxu0 }
0x1156   : > { %v5615_v22 = vpop.f32.mrf.mxu0 }
0x1157   : > { %5671 = vrot.lane.b32.xlu1 %v7900_v6, %s8742_s20  ;;  %5669 = vrot.lane.b32.xlu0 %v5615_v22, %s8742_s20 }
0x115b   : > { %5673 = vrot.lane.b32.xlu0 %v7901_v12, %s8742_s20  ;;  %s6654_s20 = sshll.u32 %s8806_s25, 13 }
0x115c   : > { %s11676_s11 = scalar_lea.hbm %s11792_s6, %s6654_s20 }
0x1160   : > { %v7920_v11 = vpop.f32.mrf.mxu0 }
0x1161   : > { %v5869_v31 = vadd.f32 %v7920_v11, %v11617_v29 }
0x1162   : > { %v5860_v36 = vpop.f32.mrf.mxu0 }
0x1163   : > { %5989 = vst [vmem:[%s11620_s19 + $0x10] sm:$0xff] %v5869_v31  ;;  %v5861_v20 = vadd.f32 %v11617_v29, %v5860_v36 }
0x1164   : > { %v7921_v41 = vpop.f32.mrf.mxu0 }
0x1165   : > { %5987 = vst [vmem:[%s11620_s19] sm:$0xff] %v5861_v20  ;;  %v5872_v43 = vadd.f32 %v7921_v41, %v11617_v29 }
0x1166   : > { %v5863_v58 = vpop.f32.mrf.mxu0 }
0x1167   : > { %5990 = vst [vmem:[%s11620_s19 + $0x18] sm:$0xff] %v5872_v43  ;;  %v5864_v7 = vadd.f32 %v11617_v29, %v5863_v58 }
0x1169   : > { %5988 = vst [vmem:[%s11620_s19 + $0x8] sm:$0xff] %v5864_v7 }
0x1178   : > { %v7924_v21 = vpop.f32.mrf.mxu0 }
0x1179   : > { %v5885_v42 = vadd.f32 %v7924_v21, %v11617_v29 }
0x117a   : > { %v5876_v27 = vpop.f32.mrf.mxu0 }
0x117b   : > { %5993 = vst [vmem:[%s11620_s19 + $0x30] sm:$0xff] %v5885_v42  ;;  %v5877_v38 = vadd.f32 %v11617_v29, %v5876_v27 }
0x117c   : > { %v7925_v15 = vpop.f32.mrf.mxu0 }
0x117d   : > { %5991 = vst [vmem:[%s11620_s19 + $0x20] sm:$0xff] %v5877_v38  ;;  %v5888_v40 = vadd.f32 %v7925_v15, %v11617_v29 }
0x117e   : > { %v5879_v52 = vpop.f32.mrf.mxu0 }
0x117f   : > { %5994 = vst [vmem:[%s11620_s19 + $0x38] sm:$0xff] %v5888_v40  ;;  %v5880_v8 = vadd.f32 %v11617_v29, %v5879_v52 }
0x1181   : > { %5992 = vst [vmem:[%s11620_s19 + $0x28] sm:$0xff] %v5880_v8 }
0x1184   : > { %v5648_v56 = vpop.permute.xlu1 %5647 }
0x1185   : > { %5693 = vst.msk [vmem:[#allocation2 + $0x90] sm:$0xff] %vm3342_vm3, %v5648_v56 }
0x1188   : > { %v5644_v30 = vpop.permute.xlu1 %5643  ;;  %v5650_v37 = vpop.permute.xlu0 %5649 }
0x1189   : > { %5691 = vst.msk [vmem:[#allocation2 + $0x80] sm:$0xff] %vm3342_vm3, %v5644_v30  ;;  %5694 = vst.msk [vmem:[#allocation2 + $0x98] sm:$0xff] %vm3342_vm3, %v5650_v37 }
0x118c   : > { %v5656_v34 = vpop.permute.xlu1 %5655  ;;  %v5646_v25 = vpop.permute.xlu0 %5645  ;;  %v5725_v23 = vld [vmem:[#allocation2 + $0x90] sm:$0xff] }
0x118d   : > { %5697 = vst.msk [vmem:[#allocation2 + $0xb0] sm:$0xff] %vm3342_vm3, %v5656_v34  ;;  %5692 = vst.msk [vmem:[#allocation2 + $0x88] sm:$0xff] %vm3342_vm3, %v5646_v25 }
0x1190   : > { %v5652_v49 = vpop.permute.xlu1 %5651  ;;  %v7928_v59 = vpop.f32.mrf.mxu0  ;;  %v5726_v10 = vld [vmem:[#allocation2 + $0x98] sm:$0xff]  ;;  %v5723_v16 = vld [vmem:[#allocation2 + $0x80] sm:$0xff] }
0x1191   : > { %5695 = vst.msk [vmem:[#allocation2 + $0xa0] sm:$0xff] %vm3342_vm3, %v5652_v49  ;;  %v5901_v39 = vadd.f32 %v7928_v59, %v11617_v29  ;;  %v5658_v0 = vpop.permute.xlu0 %5657  ;;  %v5748_v62 = vpack.c.bf16 %v5726_v10, %v5725_v23 }
0x1192   : > { %5698 = vst.msk [vmem:[#allocation2 + $0xb8] sm:$0xff] %vm3342_vm3, %v5658_v0  ;;  %v5892_v18 = vpop.f32.mrf.mxu0 }
0x1193   : > { %5997 = vst [vmem:[%s11620_s19 + $0x50] sm:$0xff] %v5901_v39  ;;  %v5893_v61 = vadd.f32 %v11617_v29, %v5892_v18 }
0x1194   : > { %v5664_v54 = vpop.permute.xlu1 %5663  ;;  %v7929_v35 = vpop.f32.mrf.mxu0  ;;  %v5724_v17 = vld [vmem:[#allocation2 + $0x88] sm:$0xff]  ;;  %v5729_v24 = vld [vmem:[#allocation2 + $0xb0] sm:$0xff] }
0x1195   : > { %5995 = vst [vmem:[%s11620_s19 + $0x40] sm:$0xff] %v5893_v61  ;;  %5701 = vst.msk [vmem:[#allocation2 + $0xd0] sm:$0xff] %vm3342_vm3, %v5664_v54  ;;  %v5904_v46 = vadd.f32 %v7929_v35, %v11617_v29  ;;  %v5654_v28 = vpop.permute.xlu0 %5653  ;;  %v5747_v13 = vpack.c.bf16 %v5724_v17, %v5723_v16 }
0x1196   : > { %5696 = vst.msk [vmem:[#allocation2 + $0xa8] sm:$0xff] %vm3342_vm3, %v5654_v28  ;;  %v5895_v57 = vpop.f32.mrf.mxu0 }
0x1197   : > { %5998 = vst [vmem:[%s11620_s19 + $0x58] sm:$0xff] %v5904_v46  ;;  %v5896_v14 = vadd.f32 %v11617_v29, %v5895_v57  ;;  %7934 = vmatprep.mubr.bf16.mxu0 %v5747_v13 }
0x1198   : > { %v5660_v9 = vpop.permute.xlu1 %5659  ;;  %7935 = vmatmul.mubr.bf16.gmra.mxu0 %v5748_v62  ;;  %v5727_v63 = vld [vmem:[#allocation2 + $0xa0] sm:$0xff] }
0x1199   : > { %5996 = vst [vmem:[%s11620_s19 + $0x48] sm:$0xff] %v5896_v14  ;;  %5699 = vst.msk [vmem:[#allocation2 + $0xc0] sm:$0xff] %vm3342_vm3, %v5660_v9  ;;  %v5666_v1 = vpop.permute.xlu0 %5665  ;;  %v5730_v5 = vld [vmem:[#allocation2 + $0xb8] sm:$0xff] }
0x119a   : > { %5702 = vst.msk [vmem:[#allocation2 + $0xd8] sm:$0xff] %vm3342_vm3, %v5666_v1  ;;  %v5750_v55 = vpack.c.bf16 %v5730_v5, %v5729_v24 }
0x119c   : > { %v5061_v2 = vpop.permute.xlu1 %5060  ;;  %v5733_v32 = vld [vmem:[#allocation2 + $0xd0] sm:$0xff] }
0x119d   : > { %5094 = vst.msk [vmem:[#allocation2 + $0xf0] sm:$0xff] %vm2730_vm2, %v5061_v2  ;;  %v5662_v4 = vpop.permute.xlu0 %5661  ;;  %v5728_v53 = vld [vmem:[#allocation2 + $0xa8] sm:$0xff] }
0x119e   : > { %5700 = vst.msk [vmem:[#allocation2 + $0xc8] sm:$0xff] %vm3342_vm3, %v5662_v4  ;;  %v5749_v48 = vpack.c.bf16 %v5728_v53, %v5727_v63 }
0x11a0   : > { %7938 = vmatprep.mubr.bf16.mxu0 %v5749_v48  ;;  %v5731_v60 = vld [vmem:[#allocation2 + $0xc0] sm:$0xff] }
0x11a1   : > { %7939 = vmatmul.mubr.bf16.gmra.mxu0 %v5750_v55  ;;  %v5063_v3 = vpop.permute.xlu0 %5062  ;;  %v5734_v33 = vld [vmem:[#allocation2 + $0xd8] sm:$0xff] }
0x11a2   : > { %5095 = vst.msk [vmem:[#allocation2 + $0xf8] sm:$0xff] %vm2730_vm2, %v5063_v3  ;;  %v5752_v50 = vpack.c.bf16 %v5734_v33, %v5733_v32 }
0x11a5   : > { %v5732_v45 = vld [vmem:[#allocation2 + $0xc8] sm:$0xff] }
0x11a6   : > { %v5751_v44 = vpack.c.bf16 %v5732_v45, %v5731_v60 }
0x11a8   : > { %7942 = vmatprep.mubr.bf16.mxu0 %v5751_v44  ;;  %v7932_v47 = vpop.f32.mrf.mxu0 }
0x11a9   : > { %v5917_v26 = vadd.f32 %v7932_v47, %v11617_v29  ;;  %7943 = vmatmul.mubr.bf16.gmra.mxu0 %v5752_v50 }
0x11aa   : > { %v5908_v19 = vpop.f32.mrf.mxu0 }
0x11ab   : > { %6001 = vst [vmem:[%s11620_s19 + $0x70] sm:$0xff] %v5917_v26  ;;  %v5909_v6 = vadd.f32 %v11617_v29, %v5908_v19 }
0x11ac   : > { %v7933_v51 = vpop.f32.mrf.mxu0 }
0x11ad   : > { %5999 = vst [vmem:[%s11620_s19 + $0x60] sm:$0xff] %v5909_v6  ;;  %v5920_v12 = vadd.f32 %v7933_v51, %v11617_v29 }
0x11ae   : > { %v5911_v22 = vpop.f32.mrf.mxu0 }
0x11af   : > { %6002 = vst [vmem:[%s11620_s19 + $0x78] sm:$0xff] %v5920_v12  ;;  %v5912_v11 = vadd.f32 %v11617_v29, %v5911_v22 }
0x11b1   : > { %6000 = vst [vmem:[%s11620_s19 + $0x68] sm:$0xff] %v5912_v11 }
0x11c5   : > { %v5668_v31 = vpop.permute.xlu1 %5667 }
0x11c6   : > { %5703 = vst.msk [vmem:[#allocation2 + $0xe0] sm:$0xff] %vm3342_vm3, %v5668_v31 }
0x11c9   : > { %v5672_v36 = vpop.permute.xlu1 %5671  ;;  %v5670_v20 = vpop.permute.xlu0 %5669 }
0x11ca   : > { %5705 = vst.msk [vmem:[#allocation2 + $0xf0] sm:$0xff] %vm3342_vm3, %v5672_v36  ;;  %5704 = vst.msk [vmem:[#allocation2 + $0xe8] sm:$0xff] %vm3342_vm3, %v5670_v20 }
0x11cd   : > { %v5674_v41 = vpop.permute.xlu0 %5673  ;;  %v5735_v43 = vld [vmem:[#allocation2 + $0xe0] sm:$0xff] }
0x11ce   : > { %5706 = vst.msk [vmem:[#allocation2 + $0xf8] sm:$0xff] %vm3342_vm3, %v5674_v41 }
0x11d1   : > { %v5736_v58 = vld [vmem:[#allocation2 + $0xe8] sm:$0xff]  ;;  %v5737_v21 = vld [vmem:[#allocation2 + $0xf0] sm:$0xff] }
0x11d2   : > { %v5753_v7 = vpack.c.bf16 %v5736_v58, %v5735_v43 }
0x11d4   : > { %7946 = vmatprep.mubr.bf16.mxu0 %v5753_v7 }
0x11d5   : > { %v5738_v42 = vld [vmem:[#allocation2 + $0xf8] sm:$0xff] }
0x11d6   : > { %v5754_v27 = vpack.c.bf16 %v5738_v42, %v5737_v21 }
0x11d8   : > { %7947 = vmatmul.mubr.bf16.gmra.mxu0 %v5754_v27 }
0x11d9   : > { %8662 = shalt.err (!%p8659_p3)
}
0x11da   : > { %s8663_s18 = scalar_lea.hbm %s11676_s11, 8192  ;;  %s8667_s12 = scalar_lea.hbm %s11792_s6, 16384 }
0x11db   : > { %p8664_p4 = scmp.ne.s32.totalorder %s11676_s11, %s8663_s18  ;;  %p8668_p9 = scmp.lt.s32.totalorder %s11676_s11, %s11792_s6 }
0x11dc   : > { %p8669_p10 = scmp.lt.s32.totalorder %s8667_s12, %s8663_s18 }
0x11dd   : > { %p8665_p7 = pnand %p8664_p4, %p8823_p5 }
0x11de   : > { %p8670_p11 = por %p8669_p10, %p8668_p9 }
0x11df   : > { %p8666_p8 = pneg %p8665_p7 }
0x11e1   : > { %p8671_p12 = pnand %p8670_p11, %p8666_p8 }
0x11e3   : > { %8674 = shalt.err (!%p8671_p12)
}
0x11e4   : > { %s8746_s16 = smov 4   ;;  %s8747_s18 = smov [#allocation3]  }
0x11e5   : > { %8031 = dma.vmem_to_hbm [thread:$0]  (%p8823_p5), %s11678_s9, 8192, %s11676_s11, %s6025_s15, %s8743_s26, %s8743_s26, %s8746_s16  }
0x11e6   : > { %s6652_s26 = sshll.u32 %s8806_s25, 12  ;;  %s6039_s9 = sshll.u32 %s11620_s19, 4  ;;  %s11741_s9 = int_to_ptr.vmem [resolvable:$true] %s6039_s9 }
0x11e7   : > { %s11739_s28 = scalar_lea.hbm %s11791_s5, %s6652_s26  ;;  %s6020_s25 = scalar_lea.sflag [#allocation4], %s9484_s29 }
0x11e8   : > { %s8675_s10 = scalar_lea.vmem %s11741_s9, 4096  ;;  %s8679_s13 = sshll.u32 %s8747_s18, 4  ;;  %s8680_s13 = int_to_ptr.vmem [resolvable:$false] %s8679_s13 }
0x11e9   : > { %p8676_p13 = scmp.ne.s32.totalorder %s11741_s9, %s8675_s10  ;;  %s8681_s20 = scalar_lea.vmem %s8680_s13, 8192 }
0x11ea   : > { %p8682_p2 = scmp.lt.s32.totalorder %s11741_s9, %s8680_s13  ;;  %p8683_p3 = scmp.lt.s32.totalorder %s8681_s20, %s8675_s10 }
0x11eb   : > { %p8677_p0 = pnand %p8676_p13, %p8823_p5 }
0x11ec   : > { %p8684_p4 = por %p8683_p3, %p8682_p2 }
0x11ed   : > { %p8678_p1 = pneg %p8677_p0 }
0x11ef   : > { %p8685_p7 = pnand %p8684_p4, %p8678_p1 }
0x1258   : > { %v7936_v38 = vpop.f32.mrf.mxu0 }
0x1259   : > { %v5933_v15 = vadd.f32 %v7936_v38, %v11617_v29 }
0x125a   : > { %v5924_v40 = vpop.f32.mrf.mxu0 }
0x125b   : > { %6005 = vst [vmem:[%s11620_s19 + $0x90] sm:$0xff] %v5933_v15  ;;  %v5925_v52 = vadd.f32 %v11617_v29, %v5924_v40 }
0x125c   : > { %v7937_v8 = vpop.f32.mrf.mxu0 }
0x125d   : > { %6003 = vst [vmem:[%s11620_s19 + $0x80] sm:$0xff] %v5925_v52  ;;  %v5936_v56 = vadd.f32 %v7937_v8, %v11617_v29 }
0x125e   : > { %v5927_v30 = vpop.f32.mrf.mxu0 }
0x125f   : > { %6006 = vst [vmem:[%s11620_s19 + $0x98] sm:$0xff] %v5936_v56  ;;  %v5928_v37 = vadd.f32 %v11617_v29, %v5927_v30 }
0x1261   : > { %6004 = vst [vmem:[%s11620_s19 + $0x88] sm:$0xff] %v5928_v37  ;;  %v7940_v34 = vpop.f32.mrf.mxu0 }
0x1262   : > { %v5949_v25 = vadd.f32 %v7940_v34, %v11617_v29 }
0x1263   : > { %v5940_v49 = vpop.f32.mrf.mxu0 }
0x1264   : > { %6009 = vst [vmem:[%s11620_s19 + $0xb0] sm:$0xff] %v5949_v25  ;;  %v5941_v59 = vadd.f32 %v11617_v29, %v5940_v49 }
0x1265   : > { %v7941_v39 = vpop.f32.mrf.mxu0 }
0x1266   : > { %6007 = vst [vmem:[%s11620_s19 + $0xa0] sm:$0xff] %v5941_v59  ;;  %v5952_v0 = vadd.f32 %v7941_v39, %v11617_v29 }
0x1267   : > { %v5943_v18 = vpop.f32.mrf.mxu0 }
0x1268   : > { %6010 = vst [vmem:[%s11620_s19 + $0xb8] sm:$0xff] %v5952_v0  ;;  %v5944_v61 = vadd.f32 %v11617_v29, %v5943_v18 }
0x1269   : > { %v7944_v10 = vpop.f32.mrf.mxu0 }
0x126a   : > { %6008 = vst [vmem:[%s11620_s19 + $0xa8] sm:$0xff] %v5944_v61  ;;  %v5965_v54 = vadd.f32 %v7944_v10, %v11617_v29 }
0x126b   : > { %v5956_v35 = vpop.f32.mrf.mxu0 }
0x126c   : > { %6013 = vst [vmem:[%s11620_s19 + $0xd0] sm:$0xff] %v5965_v54  ;;  %v5957_v16 = vadd.f32 %v11617_v29, %v5956_v35 }
0x126d   : > { %v7945_v17 = vpop.f32.mrf.mxu0 }
0x126e   : > { %6011 = vst [vmem:[%s11620_s19 + $0xc0] sm:$0xff] %v5957_v16  ;;  %v5968_v46 = vadd.f32 %v7945_v17, %v11617_v29 }
0x126f   : > { %v5959_v28 = vpop.f32.mrf.mxu0 }
0x1270   : > { %6014 = vst [vmem:[%s11620_s19 + $0xd8] sm:$0xff] %v5968_v46  ;;  %v5960_v13 = vadd.f32 %v11617_v29, %v5959_v28 }
0x1272   : > { %6012 = vst [vmem:[%s11620_s19 + $0xc8] sm:$0xff] %v5960_v13 }
0x1298   : > { %v7948_v23 = vpop.f32.mrf.mxu0 }
0x1299   : > { %v5981_v57 = vadd.f32 %v7948_v23, %v11617_v29 }
0x129a   : > { %v5972_v62 = vpop.f32.mrf.mxu0 }
0x129b   : > { %6017 = vst [vmem:[%s11620_s19 + $0xf0] sm:$0xff] %v5981_v57  ;;  %v5973_v14 = vadd.f32 %v11617_v29, %v5972_v62 }
0x129c   : > { %v7949_v9 = vpop.f32.mrf.mxu0 }
0x129d   : > { %6015 = vst [vmem:[%s11620_s19 + $0xe0] sm:$0xff] %v5973_v14  ;;  %v5984_v1 = vadd.f32 %v7949_v9, %v11617_v29 }
0x129e   : > { %v5975_v2 = vpop.f32.mrf.mxu0 }
0x129f   : > { %6018 = vst [vmem:[%s11620_s19 + $0xf8] sm:$0xff] %v5984_v1  ;;  %v5976_v5 = vadd.f32 %v11617_v29, %v5975_v2 }
0x12a1   : > { %6016 = vst [vmem:[%s11620_s19 + $0xe8] sm:$0xff] %v5976_v5 }
0x12a2   : > { %8688 = shalt.err (!%p8685_p7)
}
0x12a3   : > { %s8689_s19 = scalar_lea.hbm %s11739_s28, 4096  ;;  %s8693_s17 = scalar_lea.hbm %s11791_s5, 8192 }
0x12a4   : > { %p8690_p8 = scmp.ne.s32.totalorder %s11739_s28, %s8689_s19  ;;  %p8694_p11 = scmp.lt.s32.totalorder %s11739_s28, %s11791_s5 }
0x12a5   : > { %p8695_p12 = scmp.lt.s32.totalorder %s8693_s17, %s8689_s19 }
0x12a6   : > { %p8691_p9 = pnand %p8690_p8, %p8823_p5 }
0x12a7   : > { %p8696_p13 = por %p8695_p12, %p8694_p11 }
0x12a8   : > { %p8692_p10 = pneg %p8691_p9 }
0x12aa   : > { %p8697_p0 = pnand %p8696_p13, %p8692_p10 }
0x12ac   : > { %8700 = shalt.err (!%p8697_p0)
}
0x12ad   : > { %s8748_s11 = smov 128   ;;  %s8749_s15 = smov 8  }
0x12ae   : > { %8030 = dma.vmem_to_hbm [thread:$0]  (%p8823_p5), %s11741_s9, 4096, %s11739_s28, %s6020_s25, %s8748_s11, %s8748_s11, %s8749_s15  }
0x12af PF: > { %p8041_p1 = scmp.ge.s32.totalorder %s8739_s24, 2  ;;  %s6071_s10 = sand.u32 1, %s8727_s21  }
0x12b0   : > { %s6072_s18 = scalar_lea.sflag [#allocation4], %s6071_s10 }
0x12b1   : > { %p8035_p2 = pnand %p8041_p1, %p8827_p6 }
0x12b3   : > { %p8036_p3 = pneg %p8035_p2 }
0x12b5   : > { %8718 = dma.done.wait (%p8036_p3), %s6072_s18, 4096  }
0x12b6   : > { %8720 = vsyncadd (%p8036_p3), %s6072_s18, 4294963200  ;;  %s6081_s13 = scalar_lea.sflag [#allocation6], %s6071_s10 }
0x12b7   : > { %8722 = dma.done.wait (%p8036_p3), %s6081_s13, 8192  }
0x12b8   : > { %8724 = vsyncadd (%p8036_p3), %s6081_s13, 4294959104  ;;  %p20_p5 = scmp.ge.s32.totalorder %s8810_s27, 4   ;;  %s12113_s21 = smov %s8731_s22 }
0x12b9   : > { %s12114_s22 = smov %s8735_s23  ;;  %s12115_s23 = smov %s8821_s30 }
0x12ba   : > { %s12116_s24 = smov %s8810_s27  ;;  %22 = sbr.rel (!%p20_p5) target bundleno = 5 (0x5), region = 99 }
0x12bf   :  { %6086 = vsyncpa [#allocation4], 1 }
0x12c0   :  { %6088 = vsyncpa [#allocation4 + $0x1], 1 }
0x12c1   :  { %6089 = vsyncpa [#allocation6], 1 }
0x12c2   :  { %6091 = vsyncpa [#allocation6 + $0x1], 1 }

</bundles_post_ra>
